<compile_context>
chip_gen: v7x
topology: tpu7x:2x2x1
jax: 0.10.0
libtpu: 0.0.40
codegen_flags: <defaults>
</compile_context>

<pallas_src>
import collections
import functools

import jax
import jax.numpy as jnp
from jax.experimental import pallas as pl
from jax.experimental.pallas import tpu as pltpu

_EPS = 1e-5                      # PyTorch BatchNorm2d default
_VMEM_LIMIT_BYTES = 32 * 1024 * 1024


def _round_up(x, m):
    return ((x + m - 1) // m) * m


@functools.lru_cache(maxsize=None)
def _tm_max():
    """Lazy (trace-time) per-generation max M-tile for the multi-tile path."""
    try:
        vmem = pltpu.get_tpu_info().vmem_capacity_bytes
    except Exception:
        return 2048
    # v7x-class parts (64 MiB VMEM): 1024 still fits the worst layer
    # (k_pad=1728, cpad=192) comfortably; v5e/v6e (128 MiB): 2048.
    return 1024 if vmem <= 64 * 1024 * 1024 else 2048


# ----------------------------- Pallas kernels ------------------------------ #

def _fused_conv_bn_relu_kernel(p_ref, w_ref, gamma_ref, beta_ref, o_ref, *,
                               m_true):
    """Single-tile fused Conv(matmul) + batch-stat BN + ReLU.

    p_ref    : (Mp, Kp)   bf16 im2col patches (rows >= m_true are zero pad)
    w_ref    : (Kp, Cp)   bf16 weights (Cout zero-padded to Cp)
    gamma/beta: (1, Cp)   f32
    o_ref    : (m_true, cout) bf16 final activation (sliced in-kernel)
    """
    y = jnp.dot(p_ref[...], w_ref[...], preferred_element_type=jnp.float32)
    inv_m = 1.0 / m_true                              # padded rows are zeros
    mean = jnp.sum(y, axis=0, keepdims=True) * inv_m
    var = jnp.maximum(
        jnp.sum(y * y, axis=0, keepdims=True) * inv_m - mean * mean, 0.0)
    scale = gamma_ref[...] * jax.lax.rsqrt(var + _EPS)
    shift = beta_ref[...] - mean * scale
    out = jnp.maximum(y * scale + shift, 0.0)
    o_ref[...] = out[:o_ref.shape[0], :o_ref.shape[1]].astype(o_ref.dtype)


def _matmul_stats_kernel(p_ref, w_ref, y_ref, stats_ref):
    """Fallback pass 1 (one M-tile): y = P @ W + per-tile BN partial stats."""
    y = jnp.dot(p_ref[...], w_ref[...], preferred_element_type=jnp.float32)
    y_ref[...] = y
    s = jnp.sum(y, axis=0, keepdims=True)
    sq = jnp.sum(y * y, axis=0, keepdims=True)
    rid = jax.lax.broadcasted_iota(jnp.int32, stats_ref.shape, 0)
    stats_ref[...] = jnp.where(rid == 0, s, jnp.where(rid == 1, sq, 0.0))


def _bn_relu_kernel(y_ref, scale_ref, shift_ref, o_ref):
    """Fallback pass 2: out = max(y*scale + shift, 0), Cout sliced in-kernel."""
    out = jnp.maximum(y_ref[...] * scale_ref[...] + shift_ref[...], 0.0)
    o_ref[...] = out[:, :o_ref.shape[1]].astype(o_ref.dtype)


# ------------------------------ JAX wrappers ------------------------------- #

def _im2col(x, kh, kw, stride, ph, pw):
    """x: (N, H, W, C) -> patches (N*OH*OW, KH*KW*C), channels fastest."""
    n, h, w, c = x.shape
    xp = jnp.pad(x, ((0, 0), (ph, ph), (pw, pw), (0, 0)))
    oh = (h + 2 * ph - kh) // stride + 1
    ow = (w + 2 * pw - kw) // stride + 1
    cols = []
    for i in range(kh):
        for j in range(kw):
            cols.append(
                xp[:, i:i + stride * (oh - 1) + 1:stride,
                      j:j + stride * (ow - 1) + 1:stride, :])
    patches = jnp.concatenate(cols, axis=-1).reshape(n * oh * ow, kh * kw * c)
    return patches, (n, oh, ow)


def conv_bn_relu(x, arrs, meta):
    """NHWC (bf16) -> Conv2d (no bias) + batch-stat BN + ReLU -> NHWC bf16."""
    xb = x.astype(jnp.bfloat16)        # no-op when previous layer emitted bf16
    if meta.kh == 1 and meta.kw == 1 and meta.stride == 1 \
            and meta.ph == 0 and meta.pw == 0:
        n, h, w, c = xb.shape
        patches, (n, oh, ow) = xb.reshape(n * h * w, c), (n, h, w)
    else:
        # TODO(synk): in-kernel tap-loop im2col to avoid this HBM expansion.
        patches, (n, oh, ow) = _im2col(xb, meta.kh, meta.kw, meta.stride,
                                       meta.ph, meta.pw)
    m = n * oh * ow
    if meta.k_pad > meta.k:                            # K -> multiple of 16
        patches = jnp.pad(patches, ((0, 0), (0, meta.k_pad - meta.k)))
    cpad = meta.cout_pad
    tm_max = _tm_max()

    if m <= tm_max:
        # ---- Fully fused single-call path: matmul + BN stats + BN + ReLU ---
        m_pad = _round_up(m, 16)                       # bf16 sublane packing
        if m_pad > m:                                  # zero rows -> y rows 0
            patches = jnp.pad(patches, ((0, m_pad - m), (0, 0)))
        out = pl.pallas_call(
            functools.partial(_fused_conv_bn_relu_kernel, m_true=m),
            out_shape=jax.ShapeDtypeStruct((m, meta.cout), jnp.bfloat16),
            compiler_params=pltpu.CompilerParams(
                vmem_limit_bytes=_VMEM_LIMIT_BYTES),
        )(patches, arrs["wm"], arrs["gamma"], arrs["beta"])
        return out.reshape(n, oh, ow, meta.cout)

    # ---- Multi-tile fallback (large M): gridded matmul+stats, then BN+ReLU --
    tm = tm_max
    m_pad = _round_up(m, tm)
    if m_pad > m:
        patches = jnp.pad(patches, ((0, m_pad - m), (0, 0)))
    nt = m_pad // tm

    y, stats = pl.pallas_call(
        _matmul_stats_kernel,
        grid=(nt,),
        in_specs=[pl.BlockSpec((tm, meta.k_pad), lambda i: (i, 0)),
                  pl.BlockSpec((meta.k_pad, cpad), lambda i: (0, 0),
                               pipeline_mode=pl.Buffered(1))],
        out_specs=(pl.BlockSpec((tm, cpad), lambda i: (i, 0)),
                   pl.BlockSpec((8, cpad), lambda i: (i, 0))),
        out_shape=(jax.ShapeDtypeStruct((m_pad, cpad), jnp.float32),
                   jax.ShapeDtypeStruct((nt * 8, cpad), jnp.float32)),
        compiler_params=pltpu.CompilerParams(
            dimension_semantics=("parallel",),
            vmem_limit_bytes=_VMEM_LIMIT_BYTES),
    )(patches, arrs["wm"])

    stats = stats.reshape(nt, 8, cpad)
    mean = jnp.sum(stats[:, 0, :], axis=0) / m          # padded rows are zero
    var = jnp.maximum(jnp.sum(stats[:, 1, :], axis=0) / m - mean * mean, 0.0)
    scale = (arrs["gamma"][0] * jax.lax.rsqrt(var + _EPS)).reshape(1, cpad)
    shift = (arrs["beta"][0] - mean * scale[0]).reshape(1, cpad)

    out = pl.pallas_call(
        _bn_relu_kernel,
        grid=(nt,),
        in_specs=[pl.BlockSpec((tm, cpad), lambda i: (i, 0)),
                  pl.BlockSpec((1, cpad), lambda i: (0, 0)),
                  pl.BlockSpec((1, cpad), lambda i: (0, 0))],
        out_specs=pl.BlockSpec((tm, meta.cout), lambda i: (i, 0)),
        out_shape=jax.ShapeDtypeStruct((m_pad, meta.cout), jnp.bfloat16),
        compiler_params=pltpu.CompilerParams(
            dimension_semantics=("parallel",),
            vmem_limit_bytes=_VMEM_LIMIT_BYTES),
    )(y, scale, shift)

    return out[:m].reshape(n, oh, ow, meta.cout)


def maxpool3x3s2(x):
    """MaxPool2d(kernel_size=3, stride=2), floor mode, NHWC.

    Left to XLA as a fused tree of strided-view maxima (avoids the 9x stacked
    HBM copy and the fixed pallas_call overhead at these small shapes)."""
    n, h, w, c = x.shape
    oh = (h - 3) // 2 + 1
    ow = (w - 3) // 2 + 1
    out = None
    for i in range(3):
        for j in range(3):
            v = x[:, i:i + 2 * (oh - 1) + 1:2, j:j + 2 * (ow - 1) + 1:2, :]
            out = v if out is None else jnp.maximum(out, v)
    return out


# ------------------------------- Parameters -------------------------------- #

Meta = collections.namedtuple(
    "Meta", "cin cout kh kw stride ph pw k k_pad cout_pad")


def _make_meta(cin, cout, kh, kw, stride, ph, pw):
    k = kh * kw * cin
    return Meta(cin, cout, kh, kw, stride, ph, pw,
                k, _round_up(k, 16), max(128, _round_up(cout, 64)))


# name: (cin, cout, kh, kw, stride, pad_h, pad_w)  — mirrors the PyTorch Stem
_SPECS = {
    "conv1":       (3,   32, 3, 3, 2, 0, 0),
    "conv2":       (32,  32, 3, 3, 1, 0, 0),
    "conv3":       (32,  64, 3, 3, 1, 1, 1),
    "branch1_2":   (64,  96, 3, 3, 2, 0, 0),
    "branch2_1_1": (160, 64, 1, 1, 1, 0, 0),
    "branch2_1_2": (64,  96, 3, 3, 1, 0, 0),
    "branch2_2_1": (160, 64, 1, 1, 1, 0, 0),
    "branch2_2_2": (64,  64, 7, 1, 1, 3, 0),
    "branch2_2_3": (64,  64, 1, 7, 1, 0, 3),
    "branch2_2_4": (64,  96, 3, 3, 1, 0, 0),
    "branch3_1":   (192, 192, 3, 3, 2, 0, 0),
}

META = {name: _make_meta(*spec) for name, spec in _SPECS.items()
        if name not in ("branch2_1_1", "branch2_2_1")}
# branch2_1_1 + branch2_2_1 fused: same input (out4, 160ch), combined Cout=128.
META["branch2_x_1"] = _make_meta(160, 128, 1, 1, 1, 0, 0)


def _prep_layer(w, gamma, beta, meta):
    """One-time weight layout: (Cout,Cin,KH,KW) -> (K_pad, Cout_pad) bf16."""
    cout, cin, kh, kw = w.shape
    k = kh * kw * cin
    wm = jnp.transpose(w, (2, 3, 1, 0)).reshape(k, cout)   # ((kh,kw),cin) rows
    wm = jnp.pad(wm, ((0, meta.k_pad - k), (0, meta.cout_pad - cout)))
    return {"wm": wm.astype(jnp.bfloat16),
            "gamma": jnp.pad(gamma, (0, meta.cout_pad - cout)
                             ).reshape(1, meta.cout_pad).astype(jnp.float32),
            "beta": jnp.pad(beta, (0, meta.cout_pad - cout)
                            ).reshape(1, meta.cout_pad).astype(jnp.float32)}


def init_stem_params(key):
    keys = jax.random.split(key, len(_SPECS))
    raw = {}
    for k, (name, (cin, cout, kh, kw, *_)) in zip(keys, _SPECS.items()):
        # Conv bias intentionally omitted: exactly cancelled by batch-stat BN.
        w = jax.random.normal(k, (cout, cin, kh, kw), jnp.float32) * 0.1
        raw[name] = (w, jnp.ones((cout,), jnp.float32),
                     jnp.zeros((cout,), jnp.float32))
    params = {}
    for name, meta in META.items():
        if name == "branch2_x_1":
            w1, g1, b1 = raw["branch2_1_1"]
            w2, g2, b2 = raw["branch2_2_1"]
            w = jnp.concatenate([w1, w2], axis=0)
            g = jnp.concatenate([g1, g2])
            b = jnp.concatenate([b1, b2])
        else:
            w, g, b = raw[name]
        params[name] = _prep_layer(w, g, b, meta)
    return params


# ------------------------------ Stem forward ------------------------------- #

def stem_forward(x_nchw, params):
    x = jnp.transpose(x_nchw, (0, 2, 3, 1)).astype(jnp.bfloat16)     # -> NHWC

    out1 = conv_bn_relu(x,    params["conv1"], META["conv1"])
    out2 = conv_bn_relu(out1, params["conv2"], META["conv2"])
    out3 = conv_bn_relu(out2, params["conv3"], META["conv3"])

    out4_1 = maxpool3x3s2(out3)
    out4_2 = conv_bn_relu(out3, params["branch1_2"], META["branch1_2"])
    out4 = jnp.concatenate([out4_1, out4_2], axis=-1)                # C = 160

    # Fused 1x1 convs (branch2_1_1 | branch2_2_1): read out4 once, Cout=128.
    b2 = conv_bn_relu(out4, params["branch2_x_1"], META["branch2_x_1"])
    b21, b22 = b2[..., :64], b2[..., 64:]

    out5_1 = conv_bn_relu(b21, params["branch2_1_2"], META["branch2_1_2"])
    t = conv_bn_relu(b22, params["branch2_2_2"], META["branch2_2_2"])
    t = conv_bn_relu(t,   params["branch2_2_3"], META["branch2_2_3"])
    out5_2 = conv_bn_relu(t, params["branch2_2_4"], META["branch2_2_4"])
    out5 = jnp.concatenate([out5_1, out5_2], axis=-1)                # C = 192

    out6_1 = conv_bn_relu(out5, params["branch3_1"], META["branch3_1"])
    out6_2 = maxpool3x3s2(out5)
    out = jnp.concatenate([out6_1, out6_2], axis=-1)                 # C = 384
    return jnp.transpose(out, (0, 3, 1, 2)).astype(jnp.float32)      # -> NCHW


# ----------------------------------- Main ----------------------------------- #

if __name__ == "__main__":
    key = jax.random.PRNGKey(0)
    k_param, k_input = jax.random.split(key)

    params = init_stem_params(k_param)
    # Small input consistent with the module (3 input channels, spatial big
    # enough to survive the three stride-2 stages with no padding).
    x = jax.random.normal(k_input, (2, 3, 35, 35), jnp.float32)      # NCHW

    out = jax.jit(stem_forward)(x, params)
    out = jax.block_until_ready(out)

    assert out.shape == (2, 384, 2, 2), out.shape
    assert bool(jnp.all(jnp.isfinite(out)))
    print("KERNEL_OK")
</pallas_src>

<mosaic_0001>
module attributes {stable_mosaic.version = 11 : i64} {
  func.func @_fused_conv_bn_relu_kernel(%arg0: memref<592x32xbf16, #tpu.memory_space<vmem>>, %arg1: memref<32x128xbf16, #tpu.memory_space<vmem>>, %arg2: memref<1x128xf32, #tpu.memory_space<vmem>>, %arg3: memref<1x128xf32, #tpu.memory_space<vmem>>, %arg4: memref<578x32xbf16, #tpu.memory_space<vmem>>) attributes {dimension_semantics = [], scalar_prefetch = 0 : i64, scratch_operands = 0 : i64, tpu.core_type = #tpu.core_type<tc>} {
    %c0 = arith.constant 0 : index
    %c0_0 = arith.constant 0 : index
    %0 = vector.load %arg0[%c0, %c0_0] : memref<592x32xbf16, #tpu.memory_space<vmem>>, vector<592x32xbf16>
    %c0_1 = arith.constant 0 : index
    %c0_2 = arith.constant 0 : index
    %1 = vector.load %arg1[%c0_1, %c0_2] : memref<32x128xbf16, #tpu.memory_space<vmem>>, vector<32x128xbf16>
    %cst = arith.constant dense<0.000000e+00> : vector<592x128xf32>
    %2 = tpu.matmul %0, %1, %cst {dimension_numbers = #tpu.dot_dimension_numbers<[1], [0], [0], [1], [0, 0, 1, 1], [], []>} : vector<592x32xbf16>, vector<32x128xbf16>, vector<592x128xf32> -> vector<592x128xf32>
    %cst_3 = arith.constant dense<0.000000e+00> : vector<128xf32>
    %3 = vector.multi_reduction <add>, %2, %cst_3 [0] : vector<592x128xf32> to vector<128xf32>
    %4 = vector.shape_cast %3 : vector<128xf32> to vector<1x128xf32>
    %cst_4 = arith.constant 0.00173010386 : f32
    %5 = vector.broadcast %cst_4 : f32 to vector<1x128xf32>
    %6 = arith.mulf %4, %5 : vector<1x128xf32>
    %7 = arith.mulf %2, %2 : vector<592x128xf32>
    %cst_5 = arith.constant dense<0.000000e+00> : vector<128xf32>
    %8 = vector.multi_reduction <add>, %7, %cst_5 [0] : vector<592x128xf32> to vector<128xf32>
    %9 = vector.shape_cast %8 : vector<128xf32> to vector<1x128xf32>
    %cst_6 = arith.constant 0.00173010386 : f32
    %10 = vector.broadcast %cst_6 : f32 to vector<1x128xf32>
    %11 = arith.mulf %9, %10 : vector<1x128xf32>
    %12 = arith.mulf %6, %6 : vector<1x128xf32>
    %13 = arith.subf %11, %12 : vector<1x128xf32>
    %cst_7 = arith.constant 0.000000e+00 : f32
    %14 = vector.broadcast %cst_7 : f32 to vector<1x128xf32>
    %15 = arith.maximumf %13, %14 : vector<1x128xf32>
    %c0_8 = arith.constant 0 : index
    %c0_9 = arith.constant 0 : index
    %16 = vector.load %arg2[%c0_8, %c0_9] : memref<1x128xf32, #tpu.memory_space<vmem>>, vector<1x128xf32>
    %cst_10 = arith.constant 9.99999974E-6 : f32
    %17 = vector.broadcast %cst_10 : f32 to vector<1x128xf32>
    %18 = arith.addf %15, %17 : vector<1x128xf32>
    %19 = math.rsqrt %18 : vector<1x128xf32>
    %20 = arith.mulf %16, %19 : vector<1x128xf32>
    %c0_11 = arith.constant 0 : index
    %c0_12 = arith.constant 0 : index
    %21 = vector.load %arg3[%c0_11, %c0_12] : memref<1x128xf32, #tpu.memory_space<vmem>>, vector<1x128xf32>
    %22 = arith.mulf %6, %20 : vector<1x128xf32>
    %23 = arith.subf %21, %22 : vector<1x128xf32>
    %24 = vector.broadcast %20 : vector<1x128xf32> to vector<592x128xf32>
    %25 = arith.mulf %2, %24 : vector<592x128xf32>
    %26 = vector.broadcast %23 : vector<1x128xf32> to vector<592x128xf32>
    %27 = arith.addf %25, %26 : vector<592x128xf32>
    %cst_13 = arith.constant 0.000000e+00 : f32
    %28 = vector.broadcast %cst_13 : f32 to vector<592x128xf32>
    %29 = arith.maximumf %27, %28 : vector<592x128xf32>
    %30 = vector.extract_strided_slice %29 {offsets = [0, 0], sizes = [578, 32], strides = [1, 1]} : vector<592x128xf32> to vector<578x32xf32>
    %31 = arith.truncf %30 : vector<578x32xf32> to vector<578x32xbf16>
    %c0_14 = arith.constant 0 : index
    %c0_15 = arith.constant 0 : index
    %32 = vector.load %arg4[%c0_14, %c0_15] : memref<578x32xbf16, #tpu.memory_space<vmem>>, vector<578x32xbf16>
    tpu.vector_store %arg4[%c0_14, %c0_15], %31 {strides = array<i32>} : memref<578x32xbf16, #tpu.memory_space<vmem>>, vector<578x32xbf16>,
    return
  }
}

module attributes {stable_mosaic.version = 11 : i64} {
  func.func @_fused_conv_bn_relu_kernel(%arg0: memref<464x288xbf16, #tpu.memory_space<vmem>>, %arg1: memref<288x128xbf16, #tpu.memory_space<vmem>>, %arg2: memref<1x128xf32, #tpu.memory_space<vmem>>, %arg3: memref<1x128xf32, #tpu.memory_space<vmem>>, %arg4: memref<450x32xbf16, #tpu.memory_space<vmem>>) attributes {dimension_semantics = [], scalar_prefetch = 0 : i64, scratch_operands = 0 : i64, tpu.core_type = #tpu.core_type<tc>} {
    %c0 = arith.constant 0 : index
    %c0_0 = arith.constant 0 : index
    %0 = vector.load %arg0[%c0, %c0_0] : memref<464x288xbf16, #tpu.memory_space<vmem>>, vector<464x288xbf16>
    %c0_1 = arith.constant 0 : index
    %c0_2 = arith.constant 0 : index
    %1 = vector.load %arg1[%c0_1, %c0_2] : memref<288x128xbf16, #tpu.memory_space<vmem>>, vector<288x128xbf16>
    %cst = arith.constant dense<0.000000e+00> : vector<464x128xf32>
    %2 = tpu.matmul %0, %1, %cst {dimension_numbers = #tpu.dot_dimension_numbers<[1], [0], [0], [1], [0, 0, 1, 1], [], []>} : vector<464x288xbf16>, vector<288x128xbf16>, vector<464x128xf32> -> vector<464x128xf32>
    %cst_3 = arith.constant dense<0.000000e+00> : vector<128xf32>
    %3 = vector.multi_reduction <add>, %2, %cst_3 [0] : vector<464x128xf32> to vector<128xf32>
    %4 = vector.shape_cast %3 : vector<128xf32> to vector<1x128xf32>
    %cst_4 = arith.constant 0.00222222228 : f32
    %5 = vector.broadcast %cst_4 : f32 to vector<1x128xf32>
    %6 = arith.mulf %4, %5 : vector<1x128xf32>
    %7 = arith.mulf %2, %2 : vector<464x128xf32>
    %cst_5 = arith.constant dense<0.000000e+00> : vector<128xf32>
    %8 = vector.multi_reduction <add>, %7, %cst_5 [0] : vector<464x128xf32> to vector<128xf32>
    %9 = vector.shape_cast %8 : vector<128xf32> to vector<1x128xf32>
    %cst_6 = arith.constant 0.00222222228 : f32
    %10 = vector.broadcast %cst_6 : f32 to vector<1x128xf32>
    %11 = arith.mulf %9, %10 : vector<1x128xf32>
    %12 = arith.mulf %6, %6 : vector<1x128xf32>
    %13 = arith.subf %11, %12 : vector<1x128xf32>
    %cst_7 = arith.constant 0.000000e+00 : f32
    %14 = vector.broadcast %cst_7 : f32 to vector<1x128xf32>
    %15 = arith.maximumf %13, %14 : vector<1x128xf32>
    %c0_8 = arith.constant 0 : index
    %c0_9 = arith.constant 0 : index
    %16 = vector.load %arg2[%c0_8, %c0_9] : memref<1x128xf32, #tpu.memory_space<vmem>>, vector<1x128xf32>
    %cst_10 = arith.constant 9.99999974E-6 : f32
    %17 = vector.broadcast %cst_10 : f32 to vector<1x128xf32>
    %18 = arith.addf %15, %17 : vector<1x128xf32>
    %19 = math.rsqrt %18 : vector<1x128xf32>
    %20 = arith.mulf %16, %19 : vector<1x128xf32>
    %c0_11 = arith.constant 0 : index
    %c0_12 = arith.constant 0 : index
    %21 = vector.load %arg3[%c0_11, %c0_12] : memref<1x128xf32, #tpu.memory_space<vmem>>, vector<1x128xf32>
    %22 = arith.mulf %6, %20 : vector<1x128xf32>
    %23 = arith.subf %21, %22 : vector<1x128xf32>
    %24 = vector.broadcast %20 : vector<1x128xf32> to vector<464x128xf32>
    %25 = arith.mulf %2, %24 : vector<464x128xf32>
    %26 = vector.broadcast %23 : vector<1x128xf32> to vector<464x128xf32>
    %27 = arith.addf %25, %26 : vector<464x128xf32>
    %cst_13 = arith.constant 0.000000e+00 : f32
    %28 = vector.broadcast %cst_13 : f32 to vector<464x128xf32>
    %29 = arith.maximumf %27, %28 : vector<464x128xf32>
    %30 = vector.extract_strided_slice %29 {offsets = [0, 0], sizes = [450, 32], strides = [1, 1]} : vector<464x128xf32> to vector<450x32xf32>
    %31 = arith.truncf %30 : vector<450x32xf32> to vector<450x32xbf16>
    %c0_14 = arith.constant 0 : index
    %c0_15 = arith.constant 0 : index
    %32 = vector.load %arg4[%c0_14, %c0_15] : memref<450x32xbf16, #tpu.memory_space<vmem>>, vector<450x32xbf16>
    tpu.vector_store %arg4[%c0_14, %c0_15], %31 {strides = array<i32>} : memref<450x32xbf16, #tpu.memory_space<vmem>>, vector<450x32xbf16>,
    return
  }
}

module attributes {stable_mosaic.version = 11 : i64} {
  func.func @_fused_conv_bn_relu_kernel(%arg0: memref<464x288xbf16, #tpu.memory_space<vmem>>, %arg1: memref<288x128xbf16, #tpu.memory_space<vmem>>, %arg2: memref<1x128xf32, #tpu.memory_space<vmem>>, %arg3: memref<1x128xf32, #tpu.memory_space<vmem>>, %arg4: memref<450x64xbf16, #tpu.memory_space<vmem>>) attributes {dimension_semantics = [], scalar_prefetch = 0 : i64, scratch_operands = 0 : i64, tpu.core_type = #tpu.core_type<tc>} {
    %c0 = arith.constant 0 : index
    %c0_0 = arith.constant 0 : index
    %0 = vector.load %arg0[%c0, %c0_0] : memref<464x288xbf16, #tpu.memory_space<vmem>>, vector<464x288xbf16>
    %c0_1 = arith.constant 0 : index
    %c0_2 = arith.constant 0 : index
    %1 = vector.load %arg1[%c0_1, %c0_2] : memref<288x128xbf16, #tpu.memory_space<vmem>>, vector<288x128xbf16>
    %cst = arith.constant dense<0.000000e+00> : vector<464x128xf32>
    %2 = tpu.matmul %0, %1, %cst {dimension_numbers = #tpu.dot_dimension_numbers<[1], [0], [0], [1], [0, 0, 1, 1], [], []>} : vector<464x288xbf16>, vector<288x128xbf16>, vector<464x128xf32> -> vector<464x128xf32>
    %cst_3 = arith.constant dense<0.000000e+00> : vector<128xf32>
    %3 = vector.multi_reduction <add>, %2, %cst_3 [0] : vector<464x128xf32> to vector<128xf32>
    %4 = vector.shape_cast %3 : vector<128xf32> to vector<1x128xf32>
    %cst_4 = arith.constant 0.00222222228 : f32
    %5 = vector.broadcast %cst_4 : f32 to vector<1x128xf32>
    %6 = arith.mulf %4, %5 : vector<1x128xf32>
    %7 = arith.mulf %2, %2 : vector<464x128xf32>
    %cst_5 = arith.constant dense<0.000000e+00> : vector<128xf32>
    %8 = vector.multi_reduction <add>, %7, %cst_5 [0] : vector<464x128xf32> to vector<128xf32>
    %9 = vector.shape_cast %8 : vector<128xf32> to vector<1x128xf32>
    %cst_6 = arith.constant 0.00222222228 : f32
    %10 = vector.broadcast %cst_6 : f32 to vector<1x128xf32>
    %11 = arith.mulf %9, %10 : vector<1x128xf32>
    %12 = arith.mulf %6, %6 : vector<1x128xf32>
    %13 = arith.subf %11, %12 : vector<1x128xf32>
    %cst_7 = arith.constant 0.000000e+00 : f32
    %14 = vector.broadcast %cst_7 : f32 to vector<1x128xf32>
    %15 = arith.maximumf %13, %14 : vector<1x128xf32>
    %c0_8 = arith.constant 0 : index
    %c0_9 = arith.constant 0 : index
    %16 = vector.load %arg2[%c0_8, %c0_9] : memref<1x128xf32, #tpu.memory_space<vmem>>, vector<1x128xf32>
    %cst_10 = arith.constant 9.99999974E-6 : f32
    %17 = vector.broadcast %cst_10 : f32 to vector<1x128xf32>
    %18 = arith.addf %15, %17 : vector<1x128xf32>
    %19 = math.rsqrt %18 : vector<1x128xf32>
    %20 = arith.mulf %16, %19 : vector<1x128xf32>
    %c0_11 = arith.constant 0 : index
    %c0_12 = arith.constant 0 : index
    %21 = vector.load %arg3[%c0_11, %c0_12] : memref<1x128xf32, #tpu.memory_space<vmem>>, vector<1x128xf32>
    %22 = arith.mulf %6, %20 : vector<1x128xf32>
    %23 = arith.subf %21, %22 : vector<1x128xf32>
    %24 = vector.broadcast %20 : vector<1x128xf32> to vector<464x128xf32>
    %25 = arith.mulf %2, %24 : vector<464x128xf32>
    %26 = vector.broadcast %23 : vector<1x128xf32> to vector<464x128xf32>
    %27 = arith.addf %25, %26 : vector<464x128xf32>
    %cst_13 = arith.constant 0.000000e+00 : f32
    %28 = vector.broadcast %cst_13 : f32 to vector<464x128xf32>
    %29 = arith.maximumf %27, %28 : vector<464x128xf32>
    %30 = vector.extract_strided_slice %29 {offsets = [0, 0], sizes = [450, 64], strides = [1, 1]} : vector<464x128xf32> to vector<450x64xf32>
    %31 = arith.truncf %30 : vector<450x64xf32> to vector<450x64xbf16>
    %c0_14 = arith.constant 0 : index
    %c0_15 = arith.constant 0 : index
    %32 = vector.load %arg4[%c0_14, %c0_15] : memref<450x64xbf16, #tpu.memory_space<vmem>>, vector<450x64xbf16>
    tpu.vector_store %arg4[%c0_14, %c0_15], %31 {strides = array<i32>} : memref<450x64xbf16, #tpu.memory_space<vmem>>, vector<450x64xbf16>,
    return
  }
}

module attributes {stable_mosaic.version = 11 : i64} {
  func.func @_fused_conv_bn_relu_kernel(%arg0: memref<112x576xbf16, #tpu.memory_space<vmem>>, %arg1: memref<576x128xbf16, #tpu.memory_space<vmem>>, %arg2: memref<1x128xf32, #tpu.memory_space<vmem>>, %arg3: memref<1x128xf32, #tpu.memory_space<vmem>>, %arg4: memref<98x96xbf16, #tpu.memory_space<vmem>>) attributes {dimension_semantics = [], scalar_prefetch = 0 : i64, scratch_operands = 0 : i64, tpu.core_type = #tpu.core_type<tc>} {
    %c0 = arith.constant 0 : index
    %c0_0 = arith.constant 0 : index
    %0 = vector.load %arg0[%c0, %c0_0] : memref<112x576xbf16, #tpu.memory_space<vmem>>, vector<112x576xbf16>
    %c0_1 = arith.constant 0 : index
    %c0_2 = arith.constant 0 : index
    %1 = vector.load %arg1[%c0_1, %c0_2] : memref<576x128xbf16, #tpu.memory_space<vmem>>, vector<576x128xbf16>
    %cst = arith.constant dense<0.000000e+00> : vector<112x128xf32>
    %2 = tpu.matmul %0, %1, %cst {dimension_numbers = #tpu.dot_dimension_numbers<[1], [0], [0], [1], [0, 0, 1, 1], [], []>} : vector<112x576xbf16>, vector<576x128xbf16>, vector<112x128xf32> -> vector<112x128xf32>
    %cst_3 = arith.constant dense<0.000000e+00> : vector<128xf32>
    %3 = vector.multi_reduction <add>, %2, %cst_3 [0] : vector<112x128xf32> to vector<128xf32>
    %4 = vector.shape_cast %3 : vector<128xf32> to vector<1x128xf32>
    %cst_4 = arith.constant 0.0102040814 : f32
    %5 = vector.broadcast %cst_4 : f32 to vector<1x128xf32>
    %6 = arith.mulf %4, %5 : vector<1x128xf32>
    %7 = arith.mulf %2, %2 : vector<112x128xf32>
    %cst_5 = arith.constant dense<0.000000e+00> : vector<128xf32>
    %8 = vector.multi_reduction <add>, %7, %cst_5 [0] : vector<112x128xf32> to vector<128xf32>
    %9 = vector.shape_cast %8 : vector<128xf32> to vector<1x128xf32>
    %cst_6 = arith.constant 0.0102040814 : f32
    %10 = vector.broadcast %cst_6 : f32 to vector<1x128xf32>
    %11 = arith.mulf %9, %10 : vector<1x128xf32>
    %12 = arith.mulf %6, %6 : vector<1x128xf32>
    %13 = arith.subf %11, %12 : vector<1x128xf32>
    %cst_7 = arith.constant 0.000000e+00 : f32
    %14 = vector.broadcast %cst_7 : f32 to vector<1x128xf32>
    %15 = arith.maximumf %13, %14 : vector<1x128xf32>
    %c0_8 = arith.constant 0 : index
    %c0_9 = arith.constant 0 : index
    %16 = vector.load %arg2[%c0_8, %c0_9] : memref<1x128xf32, #tpu.memory_space<vmem>>, vector<1x128xf32>
    %cst_10 = arith.constant 9.99999974E-6 : f32
    %17 = vector.broadcast %cst_10 : f32 to vector<1x128xf32>
    %18 = arith.addf %15, %17 : vector<1x128xf32>
    %19 = math.rsqrt %18 : vector<1x128xf32>
    %20 = arith.mulf %16, %19 : vector<1x128xf32>
    %c0_11 = arith.constant 0 : index
    %c0_12 = arith.constant 0 : index
    %21 = vector.load %arg3[%c0_11, %c0_12] : memref<1x128xf32, #tpu.memory_space<vmem>>, vector<1x128xf32>
    %22 = arith.mulf %6, %20 : vector<1x128xf32>
    %23 = arith.subf %21, %22 : vector<1x128xf32>
    %24 = vector.broadcast %20 : vector<1x128xf32> to vector<112x128xf32>
    %25 = arith.mulf %2, %24 : vector<112x128xf32>
    %26 = vector.broadcast %23 : vector<1x128xf32> to vector<112x128xf32>
    %27 = arith.addf %25, %26 : vector<112x128xf32>
    %cst_13 = arith.constant 0.000000e+00 : f32
    %28 = vector.broadcast %cst_13 : f32 to vector<112x128xf32>
    %29 = arith.maximumf %27, %28 : vector<112x128xf32>
    %30 = vector.extract_strided_slice %29 {offsets = [0, 0], sizes = [98, 96], strides = [1, 1]} : vector<112x128xf32> to vector<98x96xf32>
    %31 = arith.truncf %30 : vector<98x96xf32> to vector<98x96xbf16>
    %c0_14 = arith.constant 0 : index
    %c0_15 = arith.constant 0 : index
    %32 = vector.load %arg4[%c0_14, %c0_15] : memref<98x96xbf16, #tpu.memory_space<vmem>>, vector<98x96xbf16>
    tpu.vector_store %arg4[%c0_14, %c0_15], %31 {strides = array<i32>} : memref<98x96xbf16, #tpu.memory_space<vmem>>, vector<98x96xbf16>,
    return
  }
}

module attributes {stable_mosaic.version = 11 : i64} {
  func.func @_fused_conv_bn_relu_kernel(%arg0: memref<112x160xbf16, #tpu.memory_space<vmem>>, %arg1: memref<160x128xbf16, #tpu.memory_space<vmem>>, %arg2: memref<1x128xf32, #tpu.memory_space<vmem>>, %arg3: memref<1x128xf32, #tpu.memory_space<vmem>>, %arg4: memref<98x128xbf16, #tpu.memory_space<vmem>>) attributes {dimension_semantics = [], scalar_prefetch = 0 : i64, scratch_operands = 0 : i64, tpu.core_type = #tpu.core_type<tc>} {
    %c0 = arith.constant 0 : index
    %c0_0 = arith.constant 0 : index
    %0 = vector.load %arg0[%c0, %c0_0] : memref<112x160xbf16, #tpu.memory_space<vmem>>, vector<112x160xbf16>
    %c0_1 = arith.constant 0 : index
    %c0_2 = arith.constant 0 : index
    %1 = vector.load %arg1[%c0_1, %c0_2] : memref<160x128xbf16, #tpu.memory_space<vmem>>, vector<160x128xbf16>
    %cst = arith.constant dense<0.000000e+00> : vector<112x128xf32>
    %2 = tpu.matmul %0, %1, %cst {dimension_numbers = #tpu.dot_dimension_numbers<[1], [0], [0], [1], [0, 0, 1, 1], [], []>} : vector<112x160xbf16>, vector<160x128xbf16>, vector<112x128xf32> -> vector<112x128xf32>
    %cst_3 = arith.constant dense<0.000000e+00> : vector<128xf32>
    %3 = vector.multi_reduction <add>, %2, %cst_3 [0] : vector<112x128xf32> to vector<128xf32>
    %4 = vector.shape_cast %3 : vector<128xf32> to vector<1x128xf32>
    %cst_4 = arith.constant 0.0102040814 : f32
    %5 = vector.broadcast %cst_4 : f32 to vector<1x128xf32>
    %6 = arith.mulf %4, %5 : vector<1x128xf32>
    %7 = arith.mulf %2, %2 : vector<112x128xf32>
    %cst_5 = arith.constant dense<0.000000e+00> : vector<128xf32>
    %8 = vector.multi_reduction <add>, %7, %cst_5 [0] : vector<112x128xf32> to vector<128xf32>
    %9 = vector.shape_cast %8 : vector<128xf32> to vector<1x128xf32>
    %cst_6 = arith.constant 0.0102040814 : f32
    %10 = vector.broadcast %cst_6 : f32 to vector<1x128xf32>
    %11 = arith.mulf %9, %10 : vector<1x128xf32>
    %12 = arith.mulf %6, %6 : vector<1x128xf32>
    %13 = arith.subf %11, %12 : vector<1x128xf32>
    %cst_7 = arith.constant 0.000000e+00 : f32
    %14 = vector.broadcast %cst_7 : f32 to vector<1x128xf32>
    %15 = arith.maximumf %13, %14 : vector<1x128xf32>
    %c0_8 = arith.constant 0 : index
    %c0_9 = arith.constant 0 : index
    %16 = vector.load %arg2[%c0_8, %c0_9] : memref<1x128xf32, #tpu.memory_space<vmem>>, vector<1x128xf32>
    %cst_10 = arith.constant 9.99999974E-6 : f32
    %17 = vector.broadcast %cst_10 : f32 to vector<1x128xf32>
    %18 = arith.addf %15, %17 : vector<1x128xf32>
    %19 = math.rsqrt %18 : vector<1x128xf32>
    %20 = arith.mulf %16, %19 : vector<1x128xf32>
    %c0_11 = arith.constant 0 : index
    %c0_12 = arith.constant 0 : index
    %21 = vector.load %arg3[%c0_11, %c0_12] : memref<1x128xf32, #tpu.memory_space<vmem>>, vector<1x128xf32>
    %22 = arith.mulf %6, %20 : vector<1x128xf32>
    %23 = arith.subf %21, %22 : vector<1x128xf32>
    %24 = vector.broadcast %20 : vector<1x128xf32> to vector<112x128xf32>
    %25 = arith.mulf %2, %24 : vector<112x128xf32>
    %26 = vector.broadcast %23 : vector<1x128xf32> to vector<112x128xf32>
    %27 = arith.addf %25, %26 : vector<112x128xf32>
    %cst_13 = arith.constant 0.000000e+00 : f32
    %28 = vector.broadcast %cst_13 : f32 to vector<112x128xf32>
    %29 = arith.maximumf %27, %28 : vector<112x128xf32>
    %30 = vector.extract_strided_slice %29 {offsets = [0, 0], sizes = [98, 128], strides = [1, 1]} : vector<112x128xf32> to vector<98x128xf32>
    %31 = arith.truncf %30 : vector<98x128xf32> to vector<98x128xbf16>
    %c0_14 = arith.constant 0 : index
    %c0_15 = arith.constant 0 : index
    %32 = vector.load %arg4[%c0_14, %c0_15] : memref<98x128xbf16, #tpu.memory_space<vmem>>, vector<98x128xbf16>
    tpu.vector_store %arg4[%c0_14, %c0_15], %31 {strides = array<i32>} : memref<98x128xbf16, #tpu.memory_space<vmem>>, vector<98x128xbf16>,
    return
  }
}

module attributes {stable_mosaic.version = 11 : i64} {
  func.func @_fused_conv_bn_relu_kernel(%arg0: memref<64x576xbf16, #tpu.memory_space<vmem>>, %arg1: memref<576x128xbf16, #tpu.memory_space<vmem>>, %arg2: memref<1x128xf32, #tpu.memory_space<vmem>>, %arg3: memref<1x128xf32, #tpu.memory_space<vmem>>, %arg4: memref<50x96xbf16, #tpu.memory_space<vmem>>) attributes {dimension_semantics = [], scalar_prefetch = 0 : i64, scratch_operands = 0 : i64, tpu.core_type = #tpu.core_type<tc>} {
    %c0 = arith.constant 0 : index
    %c0_0 = arith.constant 0 : index
    %0 = vector.load %arg0[%c0, %c0_0] : memref<64x576xbf16, #tpu.memory_space<vmem>>, vector<64x576xbf16>
    %c0_1 = arith.constant 0 : index
    %c0_2 = arith.constant 0 : index
    %1 = vector.load %arg1[%c0_1, %c0_2] : memref<576x128xbf16, #tpu.memory_space<vmem>>, vector<576x128xbf16>
    %cst = arith.constant dense<0.000000e+00> : vector<64x128xf32>
    %2 = tpu.matmul %0, %1, %cst {dimension_numbers = #tpu.dot_dimension_numbers<[1], [0], [0], [1], [0, 0, 1, 1], [], []>} : vector<64x576xbf16>, vector<576x128xbf16>, vector<64x128xf32> -> vector<64x128xf32>
    %cst_3 = arith.constant dense<0.000000e+00> : vector<128xf32>
    %3 = vector.multi_reduction <add>, %2, %cst_3 [0] : vector<64x128xf32> to vector<128xf32>
    %4 = vector.shape_cast %3 : vector<128xf32> to vector<1x128xf32>
    %cst_4 = arith.constant 2.000000e-02 : f32
    %5 = vector.broadcast %cst_4 : f32 to vector<1x128xf32>
    %6 = arith.mulf %4, %5 : vector<1x128xf32>
    %7 = arith.mulf %2, %2 : vector<64x128xf32>
    %cst_5 = arith.constant dense<0.000000e+00> : vector<128xf32>
    %8 = vector.multi_reduction <add>, %7, %cst_5 [0] : vector<64x128xf32> to vector<128xf32>
    %9 = vector.shape_cast %8 : vector<128xf32> to vector<1x128xf32>
    %cst_6 = arith.constant 2.000000e-02 : f32
    %10 = vector.broadcast %cst_6 : f32 to vector<1x128xf32>
    %11 = arith.mulf %9, %10 : vector<1x128xf32>
    %12 = arith.mulf %6, %6 : vector<1x128xf32>
    %13 = arith.subf %11, %12 : vector<1x128xf32>
    %cst_7 = arith.constant 0.000000e+00 : f32
    %14 = vector.broadcast %cst_7 : f32 to vector<1x128xf32>
    %15 = arith.maximumf %13, %14 : vector<1x128xf32>
    %c0_8 = arith.constant 0 : index
    %c0_9 = arith.constant 0 : index
    %16 = vector.load %arg2[%c0_8, %c0_9] : memref<1x128xf32, #tpu.memory_space<vmem>>, vector<1x128xf32>
    %cst_10 = arith.constant 9.99999974E-6 : f32
    %17 = vector.broadcast %cst_10 : f32 to vector<1x128xf32>
    %18 = arith.addf %15, %17 : vector<1x128xf32>
    %19 = math.rsqrt %18 : vector<1x128xf32>
    %20 = arith.mulf %16, %19 : vector<1x128xf32>
    %c0_11 = arith.constant 0 : index
    %c0_12 = arith.constant 0 : index
    %21 = vector.load %arg3[%c0_11, %c0_12] : memref<1x128xf32, #tpu.memory_space<vmem>>, vector<1x128xf32>
    %22 = arith.mulf %6, %20 : vector<1x128xf32>
    %23 = arith.subf %21, %22 : vector<1x128xf32>
    %24 = vector.broadcast %20 : vector<1x128xf32> to vector<64x128xf32>
    %25 = arith.mulf %2, %24 : vector<64x128xf32>
    %26 = vector.broadcast %23 : vector<1x128xf32> to vector<64x128xf32>
    %27 = arith.addf %25, %26 : vector<64x128xf32>
    %cst_13 = arith.constant 0.000000e+00 : f32
    %28 = vector.broadcast %cst_13 : f32 to vector<64x128xf32>
    %29 = arith.maximumf %27, %28 : vector<64x128xf32>
    %30 = vector.extract_strided_slice %29 {offsets = [0, 0], sizes = [50, 96], strides = [1, 1]} : vector<64x128xf32> to vector<50x96xf32>
    %31 = arith.truncf %30 : vector<50x96xf32> to vector<50x96xbf16>
    %c0_14 = arith.constant 0 : index
    %c0_15 = arith.constant 0 : index
    %32 = vector.load %arg4[%c0_14, %c0_15] : memref<50x96xbf16, #tpu.memory_space<vmem>>, vector<50x96xbf16>
    tpu.vector_store %arg4[%c0_14, %c0_15], %31 {strides = array<i32>} : memref<50x96xbf16, #tpu.memory_space<vmem>>, vector<50x96xbf16>,
    return
  }
}

module attributes {stable_mosaic.version = 11 : i64} {
  func.func @_fused_conv_bn_relu_kernel(%arg0: memref<112x448xbf16, #tpu.memory_space<vmem>>, %arg1: memref<448x128xbf16, #tpu.memory_space<vmem>>, %arg2: memref<1x128xf32, #tpu.memory_space<vmem>>, %arg3: memref<1x128xf32, #tpu.memory_space<vmem>>, %arg4: memref<98x64xbf16, #tpu.memory_space<vmem>>) attributes {dimension_semantics = [], scalar_prefetch = 0 : i64, scratch_operands = 0 : i64, tpu.core_type = #tpu.core_type<tc>} {
    %c0 = arith.constant 0 : index
    %c0_0 = arith.constant 0 : index
    %0 = vector.load %arg0[%c0, %c0_0] : memref<112x448xbf16, #tpu.memory_space<vmem>>, vector<112x448xbf16>
    %c0_1 = arith.constant 0 : index
    %c0_2 = arith.constant 0 : index
    %1 = vector.load %arg1[%c0_1, %c0_2] : memref<448x128xbf16, #tpu.memory_space<vmem>>, vector<448x128xbf16>
    %cst = arith.constant dense<0.000000e+00> : vector<112x128xf32>
    %2 = tpu.matmul %0, %1, %cst {dimension_numbers = #tpu.dot_dimension_numbers<[1], [0], [0], [1], [0, 0, 1, 1], [], []>} : vector<112x448xbf16>, vector<448x128xbf16>, vector<112x128xf32> -> vector<112x128xf32>
    %cst_3 = arith.constant dense<0.000000e+00> : vector<128xf32>
    %3 = vector.multi_reduction <add>, %2, %cst_3 [0] : vector<112x128xf32> to vector<128xf32>
    %4 = vector.shape_cast %3 : vector<128xf32> to vector<1x128xf32>
    %cst_4 = arith.constant 0.0102040814 : f32
    %5 = vector.broadcast %cst_4 : f32 to vector<1x128xf32>
    %6 = arith.mulf %4, %5 : vector<1x128xf32>
    %7 = arith.mulf %2, %2 : vector<112x128xf32>
    %cst_5 = arith.constant dense<0.000000e+00> : vector<128xf32>
    %8 = vector.multi_reduction <add>, %7, %cst_5 [0] : vector<112x128xf32> to vector<128xf32>
    %9 = vector.shape_cast %8 : vector<128xf32> to vector<1x128xf32>
    %cst_6 = arith.constant 0.0102040814 : f32
    %10 = vector.broadcast %cst_6 : f32 to vector<1x128xf32>
    %11 = arith.mulf %9, %10 : vector<1x128xf32>
    %12 = arith.mulf %6, %6 : vector<1x128xf32>
    %13 = arith.subf %11, %12 : vector<1x128xf32>
    %cst_7 = arith.constant 0.000000e+00 : f32
    %14 = vector.broadcast %cst_7 : f32 to vector<1x128xf32>
    %15 = arith.maximumf %13, %14 : vector<1x128xf32>
    %c0_8 = arith.constant 0 : index
    %c0_9 = arith.constant 0 : index
    %16 = vector.load %arg2[%c0_8, %c0_9] : memref<1x128xf32, #tpu.memory_space<vmem>>, vector<1x128xf32>
    %cst_10 = arith.constant 9.99999974E-6 : f32
    %17 = vector.broadcast %cst_10 : f32 to vector<1x128xf32>
    %18 = arith.addf %15, %17 : vector<1x128xf32>
    %19 = math.rsqrt %18 : vector<1x128xf32>
    %20 = arith.mulf %16, %19 : vector<1x128xf32>
    %c0_11 = arith.constant 0 : index
    %c0_12 = arith.constant 0 : index
    %21 = vector.load %arg3[%c0_11, %c0_12] : memref<1x128xf32, #tpu.memory_space<vmem>>, vector<1x128xf32>
    %22 = arith.mulf %6, %20 : vector<1x128xf32>
    %23 = arith.subf %21, %22 : vector<1x128xf32>
    %24 = vector.broadcast %20 : vector<1x128xf32> to vector<112x128xf32>
    %25 = arith.mulf %2, %24 : vector<112x128xf32>
    %26 = vector.broadcast %23 : vector<1x128xf32> to vector<112x128xf32>
    %27 = arith.addf %25, %26 : vector<112x128xf32>
    %cst_13 = arith.constant 0.000000e+00 : f32
    %28 = vector.broadcast %cst_13 : f32 to vector<112x128xf32>
    %29 = arith.maximumf %27, %28 : vector<112x128xf32>
    %30 = vector.extract_strided_slice %29 {offsets = [0, 0], sizes = [98, 64], strides = [1, 1]} : vector<112x128xf32> to vector<98x64xf32>
    %31 = arith.truncf %30 : vector<98x64xf32> to vector<98x64xbf16>
    %c0_14 = arith.constant 0 : index
    %c0_15 = arith.constant 0 : index
    %32 = vector.load %arg4[%c0_14, %c0_15] : memref<98x64xbf16, #tpu.memory_space<vmem>>, vector<98x64xbf16>
    tpu.vector_store %arg4[%c0_14, %c0_15], %31 {strides = array<i32>} : memref<98x64xbf16, #tpu.memory_space<vmem>>, vector<98x64xbf16>,
    return
  }
}

module attributes {stable_mosaic.version = 11 : i64} {
  func.func @_fused_conv_bn_relu_kernel(%arg0: memref<16x1728xbf16, #tpu.memory_space<vmem>>, %arg1: memref<1728x192xbf16, #tpu.memory_space<vmem>>, %arg2: memref<1x192xf32, #tpu.memory_space<vmem>>, %arg3: memref<1x192xf32, #tpu.memory_space<vmem>>, %arg4: memref<8x192xbf16, #tpu.memory_space<vmem>>) attributes {dimension_semantics = [], scalar_prefetch = 0 : i64, scratch_operands = 0 : i64, tpu.core_type = #tpu.core_type<tc>} {
    %c0 = arith.constant 0 : index
    %c0_0 = arith.constant 0 : index
    %0 = vector.load %arg0[%c0, %c0_0] : memref<16x1728xbf16, #tpu.memory_space<vmem>>, vector<16x1728xbf16>
    %c0_1 = arith.constant 0 : index
    %c0_2 = arith.constant 0 : index
    %1 = vector.load %arg1[%c0_1, %c0_2] : memref<1728x192xbf16, #tpu.memory_space<vmem>>, vector<1728x192xbf16>
    %cst = arith.constant dense<0.000000e+00> : vector<16x192xf32>
    %2 = tpu.matmul %0, %1, %cst {dimension_numbers = #tpu.dot_dimension_numbers<[1], [0], [0], [1], [0, 0, 1, 1], [], []>} : vector<16x1728xbf16>, vector<1728x192xbf16>, vector<16x192xf32> -> vector<16x192xf32>
    %cst_3 = arith.constant dense<0.000000e+00> : vector<192xf32>
    %3 = vector.multi_reduction <add>, %2, %cst_3 [0] : vector<16x192xf32> to vector<192xf32>
    %4 = vector.shape_cast %3 : vector<192xf32> to vector<1x192xf32>
    %cst_4 = arith.constant 1.250000e-01 : f32
    %5 = vector.broadcast %cst_4 : f32 to vector<1x192xf32>
    %6 = arith.mulf %4, %5 : vector<1x192xf32>
    %7 = arith.mulf %2, %2 : vector<16x192xf32>
    %cst_5 = arith.constant dense<0.000000e+00> : vector<192xf32>
    %8 = vector.multi_reduction <add>, %7, %cst_5 [0] : vector<16x192xf32> to vector<192xf32>
    %9 = vector.shape_cast %8 : vector<192xf32> to vector<1x192xf32>
    %cst_6 = arith.constant 1.250000e-01 : f32
    %10 = vector.broadcast %cst_6 : f32 to vector<1x192xf32>
    %11 = arith.mulf %9, %10 : vector<1x192xf32>
    %12 = arith.mulf %6, %6 : vector<1x192xf32>
    %13 = arith.subf %11, %12 : vector<1x192xf32>
    %cst_7 = arith.constant 0.000000e+00 : f32
    %14 = vector.broadcast %cst_7 : f32 to vector<1x192xf32>
    %15 = arith.maximumf %13, %14 : vector<1x192xf32>
    %c0_8 = arith.constant 0 : index
    %c0_9 = arith.constant 0 : index
    %16 = vector.load %arg2[%c0_8, %c0_9] : memref<1x192xf32, #tpu.memory_space<vmem>>, vector<1x192xf32>
    %cst_10 = arith.constant 9.99999974E-6 : f32
    %17 = vector.broadcast %cst_10 : f32 to vector<1x192xf32>
    %18 = arith.addf %15, %17 : vector<1x192xf32>
    %19 = math.rsqrt %18 : vector<1x192xf32>
    %20 = arith.mulf %16, %19 : vector<1x192xf32>
    %c0_11 = arith.constant 0 : index
    %c0_12 = arith.constant 0 : index
    %21 = vector.load %arg3[%c0_11, %c0_12] : memref<1x192xf32, #tpu.memory_space<vmem>>, vector<1x192xf32>
    %22 = arith.mulf %6, %20 : vector<1x192xf32>
    %23 = arith.subf %21, %22 : vector<1x192xf32>
    %24 = vector.broadcast %20 : vector<1x192xf32> to vector<16x192xf32>
    %25 = arith.mulf %2, %24 : vector<16x192xf32>
    %26 = vector.broadcast %23 : vector<1x192xf32> to vector<16x192xf32>
    %27 = arith.addf %25, %26 : vector<16x192xf32>
    %cst_13 = arith.constant 0.000000e+00 : f32
    %28 = vector.broadcast %cst_13 : f32 to vector<16x192xf32>
    %29 = arith.maximumf %27, %28 : vector<16x192xf32>
    %30 = vector.extract_strided_slice %29 {offsets = [0, 0], sizes = [8, 192], strides = [1, 1]} : vector<16x192xf32> to vector<8x192xf32>
    %31 = arith.truncf %30 : vector<8x192xf32> to vector<8x192xbf16>
    %c0_14 = arith.constant 0 : index
    %c0_15 = arith.constant 0 : index
    %32 = vector.load %arg4[%c0_14, %c0_15] : memref<8x192xbf16, #tpu.memory_space<vmem>>, vector<8x192xbf16>
    tpu.vector_store %arg4[%c0_14, %c0_15], %31 {strides = array<i32>} : memref<8x192xbf16, #tpu.memory_space<vmem>>, vector<8x192xbf16>,
    return
  }
}

</mosaic_0001>

<bundles_post_ra>
// kernel: stem_forward.10
= control target key start
LH: loop header
LB: loop body
LE: loop exit
PB: predicated region body
PF: predicated region fallthrough
CT: control target
= control target key end

     0   :  { %v2041_v0 = vmov 0.0   ;;  %vm2042_vm0 = vmmov 0   ;;  %vm293_vm1 = vcmask 261120   ;;  %vm1502_vm2 = vcmask 257024   ;;  %s3864_s1 = inlined_call_operand.vmem [shape: bf16[32,128], index: 1, kind: input, shape index: {}]   ;;  %s3865_s0 = inlined_call_operand.vmem [shape: bf16[592,32], index: 0, kind: input, shape index: {}]   ;;  %s3866_s2 = inlined_call_operand.vmem [shape: f32[1,128], index: 2, kind: input, shape index: {}]   ;;  %s3867_s3 = inlined_call_operand.vmem [shape: f32[1,128], index: 3, kind: input, shape index: {}]   ;;  %s3868_s4 = inlined_call_operand.vmem [shape: bf16[578,32], index: 4, kind: output, shape index: {}]  }
   0x1   :  { %1842 = vmatprep.subr.bf16.mxu0 %v2041_v0  ;;  %v2000_v1 = vld [vmem:[%s3864_s1] sm:$0xff]   ;;  %1846 = vmatprep.mubr.msk.bf16.mxu0 %vm2042_vm0, %v2041_v0  ;;  %v2001_v2 = vld [vmem:[%s3864_s1 + $0x8] sm:$0xff]   ;;  %v2012_v4 = vld [vmem:[%s3865_s0 + $0x98] sm:$0xff]   ;;  %vm1575_vm3 = vcmask 253952  }
   0x2   :  { %1994 = vmatprep.subr.bf16.mxu1 %v2041_v0  ;;  %1922 = vmatprep.mubr.msk.bf16.mxu1 %vm2042_vm0, %v2041_v0  ;;  %v2002_v3 = vld [vmem:[%s3865_s0] sm:$0xff]   ;;  %v2003_v5 = vld [vmem:[%s3865_s0 + $0x8] sm:$0xff]   ;;  %v2004_v7 = vld [vmem:[%s3865_s0 + $0x10] sm:$0xff]  }
   0x3   :  { %1843 = vmatpush3.bf16.msra.mxu0 %v2000_v1  ;;  %1996 = vmatpush3.bf16.msra.mxu1 %v2000_v1  ;;  %v2014_v6 = vld [vmem:[%s3865_s0 + $0xa0] sm:$0xff]   ;;  %v2016_v8 = vld [vmem:[%s3865_s0 + $0xa8] sm:$0xff]   ;;  %v2005_v9 = vld [vmem:[%s3865_s0 + $0x18] sm:$0xff]  }
   0x4   :  { %1844 = vmatprep.subr.bf16.mxu0 %v2041_v0  ;;  %1995 = vmatprep.subr.bf16.mxu1 %v2041_v0  ;;  %v2018_v10 = vld [vmem:[%s3865_s0 + $0xb0] sm:$0xff]   ;;  %v2006_v11 = vld [vmem:[%s3865_s0 + $0x20] sm:$0xff]   ;;  %v2020_v12 = vld [vmem:[%s3865_s0 + $0xb8] sm:$0xff]  }
   0x5   :  { %v2007_v13 = vld [vmem:[%s3865_s0 + $0x28] sm:$0xff]   ;;  %v2022_v14 = vld [vmem:[%s3865_s0 + $0xc0] sm:$0xff]   ;;  %v2008_v15 = vld [vmem:[%s3865_s0 + $0x30] sm:$0xff]  }
   0x6   :  { %v2024_v16 = vld [vmem:[%s3865_s0 + $0xc8] sm:$0xff]   ;;  %v2009_v17 = vld [vmem:[%s3865_s0 + $0x38] sm:$0xff]   ;;  %v2026_v18 = vld [vmem:[%s3865_s0 + $0xd0] sm:$0xff]  }
   0x7   :  { %1845 = vmatpush3.bf16.msra.mxu0 %v2001_v2  ;;  %1997 = vmatpush3.bf16.msra.mxu1 %v2001_v2  ;;  %v2010_v19 = vld [vmem:[%s3865_s0 + $0x40] sm:$0xff]   ;;  %v2028_v20 = vld [vmem:[%s3865_s0 + $0xd8] sm:$0xff]   ;;  %v2011_v21 = vld [vmem:[%s3865_s0 + $0x48] sm:$0xff]  }
   0x8   :  { %v2030_v22 = vld [vmem:[%s3865_s0 + $0xe0] sm:$0xff]   ;;  %v2013_v23 = vld [vmem:[%s3865_s0 + $0x50] sm:$0xff]   ;;  %v2031_v24 = vld [vmem:[%s3865_s0 + $0xe8] sm:$0xff]  }
   0x9   :  { %v2015_v25 = vld [vmem:[%s3865_s0 + $0x58] sm:$0xff]   ;;  %v2032_v26 = vld [vmem:[%s3865_s0 + $0xf0] sm:$0xff]   ;;  %v2017_v27 = vld [vmem:[%s3865_s0 + $0x60] sm:$0xff]  }
   0xa   :  { %1847 = vmatmul.mubr.msk.bf16.vlgmr.msra.gmra.mrb[0].mxu0 %vm293_vm1, %v2002_v3  ;;  %1923 = vmatmul.mubr.msk.bf16.vlgmr.msra.gmra.mrb[0].mxu1 %vm293_vm1, %v2012_v4  ;;  %v2033_v28 = vld [vmem:[%s3865_s0 + $0xf8] sm:$0xff]   ;;  %v2019_v29 = vld [vmem:[%s3865_s0 + $0x68] sm:$0xff]   ;;  %v2034_v30 = vld [vmem:[%s3865_s0 + $0x100] sm:$0xff]  }
   0xb   :  { %1850 = vmatprep.mubr.msk.bf16.mxu0 %vm2042_vm0, %v2041_v0  ;;  %1926 = vmatprep.mubr.msk.bf16.mxu1 %vm2042_vm0, %v2041_v0  ;;  %v2021_v31 = vld [vmem:[%s3865_s0 + $0x70] sm:$0xff]   ;;  %v2035_v32 = vld [vmem:[%s3865_s0 + $0x108] sm:$0xff]   ;;  %v2023_v33 = vld [vmem:[%s3865_s0 + $0x78] sm:$0xff]  }
   0xc   :  { %v2036_v34 = vld [vmem:[%s3865_s0 + $0x110] sm:$0xff]   ;;  %v2025_v35 = vld [vmem:[%s3865_s0 + $0x80] sm:$0xff]   ;;  %v2037_v36 = vld [vmem:[%s3865_s0 + $0x118] sm:$0xff]  }
   0xd   :  { %v2027_v37 = vld [vmem:[%s3865_s0 + $0x88] sm:$0xff]   ;;  %v2038_v38 = vld [vmem:[%s3865_s0 + $0x120] sm:$0xff]   ;;  %v2029_v39 = vld [vmem:[%s3865_s0 + $0x90] sm:$0xff]  }
  0x12   :  { %1851 = vmatmul.mubr.msk.bf16.gmra.mrb[4].mxu0 %vm293_vm1, %v2003_v5  ;;  %1927 = vmatmul.mubr.msk.bf16.gmra.mrb[4].mxu1 %vm293_vm1, %v2014_v6 }
  0x13   :  { %1854 = vmatprep.mubr.msk.bf16.mxu0 %vm2042_vm0, %v2041_v0  ;;  %1930 = vmatprep.mubr.msk.bf16.mxu1 %vm2042_vm0, %v2041_v0 }
  0x1a   :  { %1855 = vmatmul.mubr.msk.bf16.gmra.mrb[8].mxu0 %vm293_vm1, %v2004_v7  ;;  %1931 = vmatmul.mubr.msk.bf16.gmra.mrb[8].mxu1 %vm293_vm1, %v2016_v8 }
  0x1b   :  { %1858 = vmatprep.mubr.msk.bf16.mxu0 %vm2042_vm0, %v2041_v0  ;;  %1934 = vmatprep.mubr.msk.bf16.mxu1 %vm2042_vm0, %v2041_v0 }
  0x22   :  { %1859 = vmatmul.mubr.msk.bf16.gmra.mrb[12].mxu0 %vm293_vm1, %v2005_v9  ;;  %1935 = vmatmul.mubr.msk.bf16.gmra.mrb[12].mxu1 %vm293_vm1, %v2018_v10 }
  0x23   :  { %1862 = vmatprep.mubr.msk.bf16.mxu0 %vm2042_vm0, %v2041_v0  ;;  %1938 = vmatprep.mubr.msk.bf16.mxu1 %vm2042_vm0, %v2041_v0 }
  0x2a   :  { %1863 = vmatmul.mubr.msk.bf16.gmra.mrb[16].mxu0 %vm293_vm1, %v2006_v11  ;;  %1939 = vmatmul.mubr.msk.bf16.gmra.mrb[16].mxu1 %vm293_vm1, %v2020_v12 }
  0x2b   :  { %1866 = vmatprep.mubr.msk.bf16.mxu0 %vm2042_vm0, %v2041_v0  ;;  %1942 = vmatprep.mubr.msk.bf16.mxu1 %vm2042_vm0, %v2041_v0 }
  0x32   :  { %1867 = vmatmul.mubr.msk.bf16.gmra.mrb[20].mxu0 %vm293_vm1, %v2007_v13  ;;  %1943 = vmatmul.mubr.msk.bf16.gmra.mrb[20].mxu1 %vm293_vm1, %v2022_v14 }
  0x33   :  { %1870 = vmatprep.mubr.msk.bf16.mxu0 %vm2042_vm0, %v2041_v0  ;;  %1946 = vmatprep.mubr.msk.bf16.mxu1 %vm2042_vm0, %v2041_v0 }
  0x3a   :  { %1871 = vmatmul.mubr.msk.bf16.gmra.mrb[24].mxu0 %vm293_vm1, %v2008_v15  ;;  %1947 = vmatmul.mubr.msk.bf16.gmra.mrb[24].mxu1 %vm293_vm1, %v2024_v16 }
  0x3b   :  { %1874 = vmatprep.mubr.msk.bf16.mxu0 %vm2042_vm0, %v2041_v0  ;;  %1950 = vmatprep.mubr.msk.bf16.mxu1 %vm2042_vm0, %v2041_v0 }
  0x42   :  { %1875 = vmatmul.mubr.msk.bf16.gmra.mrb[28].mxu0 %vm293_vm1, %v2009_v17  ;;  %1951 = vmatmul.mubr.msk.bf16.gmra.mrb[28].mxu1 %vm293_vm1, %v2026_v18 }
  0x43   :  { %1878 = vmatprep.mubr.msk.bf16.mxu0 %vm2042_vm0, %v2041_v0  ;;  %1954 = vmatprep.mubr.msk.bf16.mxu1 %vm2042_vm0, %v2041_v0 }
  0x4a   :  { %1879 = vmatmul.mubr.msk.bf16.gmra.mrb[32].mxu0 %vm293_vm1, %v2010_v19  ;;  %1955 = vmatmul.mubr.msk.bf16.gmra.mrb[32].mxu1 %vm293_vm1, %v2028_v20 }
  0x4b   :  { %1882 = vmatprep.mubr.msk.bf16.mxu0 %vm2042_vm0, %v2041_v0  ;;  %1958 = vmatprep.mubr.msk.bf16.mxu1 %vm2042_vm0, %v2041_v0 }
  0x52   :  { %1883 = vmatmul.mubr.msk.bf16.gmra.mrb[36].mxu0 %vm293_vm1, %v2011_v21  ;;  %1959 = vmatmul.mubr.msk.bf16.gmra.mrb[36].mxu1 %vm293_vm1, %v2030_v22 }
  0x53   :  { %1886 = vmatprep.mubr.msk.bf16.mxu0 %vm2042_vm0, %v2041_v0  ;;  %1962 = vmatprep.mubr.msk.bf16.mxu1 %vm2042_vm0, %v2041_v0 }
  0x5a   :  { %1887 = vmatmul.mubr.msk.bf16.gmra.mrb[40].mxu0 %vm293_vm1, %v2013_v23  ;;  %1963 = vmatmul.mubr.msk.bf16.gmra.mrb[40].mxu1 %vm293_vm1, %v2031_v24 }
  0x5b   :  { %1890 = vmatprep.mubr.msk.bf16.mxu0 %vm2042_vm0, %v2041_v0  ;;  %1966 = vmatprep.mubr.msk.bf16.mxu1 %vm2042_vm0, %v2041_v0 }
  0x62   :  { %1891 = vmatmul.mubr.msk.bf16.gmra.mrb[44].mxu0 %vm293_vm1, %v2015_v25  ;;  %1967 = vmatmul.mubr.msk.bf16.gmra.mrb[44].mxu1 %vm293_vm1, %v2032_v26 }
  0x63   :  { %1894 = vmatprep.mubr.msk.bf16.mxu0 %vm2042_vm0, %v2041_v0  ;;  %1970 = vmatprep.mubr.msk.bf16.mxu1 %vm2042_vm0, %v2041_v0 }
  0x6a   :  { %1895 = vmatmul.mubr.msk.bf16.gmra.mrb[48].mxu0 %vm293_vm1, %v2017_v27  ;;  %1971 = vmatmul.mubr.msk.bf16.gmra.mrb[48].mxu1 %vm293_vm1, %v2033_v28 }
  0x6b   :  { %1898 = vmatprep.mubr.msk.bf16.mxu0 %vm2042_vm0, %v2041_v0  ;;  %1974 = vmatprep.mubr.msk.bf16.mxu1 %vm2042_vm0, %v2041_v0 }
  0x72   :  { %1899 = vmatmul.mubr.msk.bf16.gmra.mrb[52].mxu0 %vm293_vm1, %v2019_v29  ;;  %1975 = vmatmul.mubr.msk.bf16.gmra.mrb[52].mxu1 %vm293_vm1, %v2034_v30 }
  0x73   :  { %1902 = vmatprep.mubr.msk.bf16.mxu0 %vm2042_vm0, %v2041_v0  ;;  %1978 = vmatprep.mubr.msk.bf16.mxu1 %vm2042_vm0, %v2041_v0 }
  0x7a   :  { %1903 = vmatmul.mubr.msk.bf16.gmra.mrb[56].mxu0 %vm293_vm1, %v2021_v31  ;;  %1979 = vmatmul.mubr.msk.bf16.gmra.mrb[56].mxu1 %vm293_vm1, %v2035_v32 }
  0x7b   :  { %1906 = vmatprep.mubr.msk.bf16.mxu0 %vm2042_vm0, %v2041_v0  ;;  %1982 = vmatprep.mubr.msk.bf16.mxu1 %vm2042_vm0, %v2041_v0 }
  0x82   :  { %1907 = vmatmul.mubr.msk.bf16.gmra.mrb[60].mxu0 %vm293_vm1, %v2023_v33  ;;  %1983 = vmatmul.mubr.msk.bf16.gmra.mrb[60].mxu1 %vm293_vm1, %v2036_v34 }
  0x83   :  { %1910 = vmatprep.mubr.msk.bf16.mxu0 %vm2042_vm0, %v2041_v0  ;;  %1986 = vmatprep.mubr.msk.bf16.mxu1 %vm2042_vm0, %v2041_v0 }
  0x8a   :  { %1911 = vmatmul.mubr.msk.bf16.gmra.mrb[64].mxu0 %vm293_vm1, %v2025_v35  ;;  %1987 = vmatmul.mubr.msk.bf16.gmra.mrb[64].mxu1 %vm293_vm1, %v2037_v36 }
  0x8b   :  { %1914 = vmatprep.mubr.msk.bf16.mxu0 %vm2042_vm0, %v2041_v0  ;;  %1990 = vmatprep.mubr.msk.bf16.mxu1 %vm2042_vm0, %v2041_v0 }
  0x92   :  { %1915 = vmatmul.mubr.msk.bf16.gmra.mrb[68].mxu0 %vm293_vm1, %v2027_v37  ;;  %1991 = vmatmul.mubr.msk.bf16.gmra.mrb[68].mxu1 %vm293_vm1, %v2038_v38 }
  0x93   :  { %1918 = vmatprep.mubr.msk.bf16.mxu0 %vm2042_vm0, %v2041_v0 }
  0x9a   :  { %1919 = vmatmul.mubr.msk.bf16.gmra.mrb[72].mxu0 %vm293_vm1, %v2029_v39 }
  0xdd   :  { %v2300_v40 = vpop.f32.mrb[0].mxu0  ;;  %v2310_v48 = vpop.f32.mrb[0].mxu1 }
  0xde   :  { %v1848_v41 = vpop.f32.mrb[1].mxu0  ;;  %v814_v43 = vmul.f32 %v2300_v40, %v2300_v40  ;;  %v1924_v49 = vpop.f32.mrb[1].mxu1 }
  0xdf   :  { %v2302_v42 = vpop.f32.mrb[2].mxu0  ;;  %v2312_v50 = vpop.f32.mrb[2].mxu1 }
  0xe0   :  { %v734_v44 = vadd.f32 %v2302_v42, %v2300_v40  ;;  %v815_v45 = vmul.f32 %v2302_v42, %v2302_v42  ;;  %v1849_v46 = vpop.f32.mrb[3].mxu0  ;;  %v1925_v52 = vpop.f32.mrb[3].mxu1 }
  0xe2   :  { %v888_v47 = vadd.f32 %v815_v45, %v814_v43 }
  0xe5   :  { %v2314_v51 = vpop.f32.mrb[4].mxu0  ;;  %v2324_v62 = vpop.f32.mrb[4].mxu1 }
  0xe6   :  { %v735_v53 = vadd.f32 %v734_v44, %v2314_v51  ;;  %v816_v54 = vmul.f32 %v2314_v51, %v2314_v51  ;;  %v1852_v55 = vpop.f32.mrb[5].mxu0  ;;  %v1928_v63 = vpop.f32.mrb[5].mxu1 }
  0xe7   :  { %v2319_v56 = vpop.f32.mrb[6].mxu0  ;;  %v2326_v0 = vpop.f32.mrb[6].mxu1 }
  0xe8   :  { %v889_v57 = vadd.f32 %v888_v47, %v816_v54  ;;  %v736_v58 = vadd.f32 %v735_v53, %v2319_v56  ;;  %v817_v59 = vmul.f32 %v2319_v56, %v2319_v56  ;;  %v1853_v60 = vpop.f32.mrb[7].mxu0  ;;  %v1929_v2 = vpop.f32.mrb[7].mxu1 }
  0xea   :  { %v890_v61 = vadd.f32 %v889_v57, %v817_v59 }
  0xed   :  { %v2328_v1 = vpop.f32.mrb[8].mxu0  ;;  %v2338_v12 = vpop.f32.mrb[8].mxu1 }
  0xee   :  { %v737_v3 = vadd.f32 %v736_v58, %v2328_v1  ;;  %v818_v4 = vmul.f32 %v2328_v1, %v2328_v1  ;;  %v1856_v5 = vpop.f32.mrb[9].mxu0  ;;  %v1932_v13 = vpop.f32.mrb[9].mxu1 }
  0xef   :  { %v2333_v6 = vpop.f32.mrb[10].mxu0  ;;  %v2340_v14 = vpop.f32.mrb[10].mxu1 }
  0xf0   :  { %v891_v7 = vadd.f32 %v890_v61, %v818_v4  ;;  %v738_v8 = vadd.f32 %v737_v3, %v2333_v6  ;;  %v819_v9 = vmul.f32 %v2333_v6, %v2333_v6  ;;  %v1857_v10 = vpop.f32.mrb[11].mxu0  ;;  %v1933_v16 = vpop.f32.mrb[11].mxu1 }
  0xf2   :  { %v892_v11 = vadd.f32 %v891_v7, %v819_v9 }
  0xf5   :  { %v2342_v15 = vpop.f32.mrb[12].mxu0  ;;  %v2352_v26 = vpop.f32.mrb[12].mxu1 }
  0xf6   :  { %v739_v17 = vadd.f32 %v738_v8, %v2342_v15  ;;  %v820_v18 = vmul.f32 %v2342_v15, %v2342_v15  ;;  %v1860_v19 = vpop.f32.mrb[13].mxu0  ;;  %v1936_v27 = vpop.f32.mrb[13].mxu1 }
  0xf7   :  { %v2347_v20 = vpop.f32.mrb[14].mxu0  ;;  %v2354_v28 = vpop.f32.mrb[14].mxu1 }
  0xf8   :  { %v893_v21 = vadd.f32 %v892_v11, %v820_v18  ;;  %v740_v22 = vadd.f32 %v739_v17, %v2347_v20  ;;  %v821_v23 = vmul.f32 %v2347_v20, %v2347_v20  ;;  %v1861_v24 = vpop.f32.mrb[15].mxu0  ;;  %v1937_v30 = vpop.f32.mrb[15].mxu1 }
  0xfa   :  { %v894_v25 = vadd.f32 %v893_v21, %v821_v23 }
  0xfd   :  { %v2356_v29 = vpop.f32.mrb[16].mxu0  ;;  %v2366_v41 = vpop.f32.mrb[16].mxu1 }
  0xfe   :  { %v741_v31 = vadd.f32 %v740_v22, %v2356_v29  ;;  %v822_v32 = vmul.f32 %v2356_v29, %v2356_v29  ;;  %v1864_v33 = vpop.f32.mrb[17].mxu0  ;;  %v1940_v43 = vpop.f32.mrb[17].mxu1 }
  0xff   :  { %v2361_v34 = vpop.f32.mrb[18].mxu0  ;;  %v2368_v44 = vpop.f32.mrb[18].mxu1 }
 0x100   :  { %v895_v35 = vadd.f32 %v894_v25, %v822_v32  ;;  %v742_v36 = vadd.f32 %v741_v31, %v2361_v34  ;;  %v823_v37 = vmul.f32 %v2361_v34, %v2361_v34  ;;  %v1865_v38 = vpop.f32.mrb[19].mxu0  ;;  %v1941_v46 = vpop.f32.mrb[19].mxu1 }
 0x102   :  { %v896_v39 = vadd.f32 %v895_v35, %v823_v37 }
 0x105   :  { %v2370_v45 = vpop.f32.mrb[20].mxu0  ;;  %v2380_v60 = vpop.f32.mrb[20].mxu1 }
 0x106   :  { %v743_v47 = vadd.f32 %v742_v36, %v2370_v45  ;;  %v824_v49 = vmul.f32 %v2370_v45, %v2370_v45  ;;  %v1868_v52 = vpop.f32.mrb[21].mxu0  ;;  %v1944_v61 = vpop.f32.mrb[21].mxu1 }
 0x107   :  { %v2375_v53 = vpop.f32.mrb[22].mxu0  ;;  %v2382_v63 = vpop.f32.mrb[22].mxu1 }
 0x108   :  { %v897_v54 = vadd.f32 %v896_v39, %v824_v49  ;;  %v744_v55 = vadd.f32 %v743_v47, %v2375_v53  ;;  %v825_v57 = vmul.f32 %v2375_v53, %v2375_v53  ;;  %v1869_v58 = vpop.f32.mrb[23].mxu0  ;;  %v1945_v3 = vpop.f32.mrb[23].mxu1 }
 0x10a   :  { %v898_v59 = vadd.f32 %v897_v54, %v825_v57 }
 0x10d   :  { %v2384_v2 = vpop.f32.mrb[24].mxu0  ;;  %v2394_v17 = vpop.f32.mrb[24].mxu1 }
 0x10e   :  { %v745_v4 = vadd.f32 %v744_v55, %v2384_v2  ;;  %v826_v5 = vmul.f32 %v2384_v2, %v2384_v2  ;;  %v1872_v7 = vpop.f32.mrb[25].mxu0  ;;  %v1948_v18 = vpop.f32.mrb[25].mxu1 }
 0x10f   :  { %v2389_v8 = vpop.f32.mrb[26].mxu0  ;;  %v2396_v19 = vpop.f32.mrb[26].mxu1 }
 0x110   :  { %3937 = vst [vmem:[#allocation2_spill] sm:$0xff] %v2389_v8  ;;  %v899_v9 = vadd.f32 %v898_v59, %v826_v5  ;;  %v746_v10 = vadd.f32 %v745_v4, %v2389_v8  ;;  %v827_v11 = vmul.f32 %v2389_v8, %v2389_v8  ;;  %v1873_v13 = vpop.f32.mrb[27].mxu0  ;;  %v1949_v22 = vpop.f32.mrb[27].mxu1 }
 0x112   :  { %v900_v16 = vadd.f32 %v899_v9, %v827_v11 }
 0x115   :  { %v2398_v21 = vpop.f32.mrb[28].mxu0  ;;  %v2408_v36 = vpop.f32.mrb[28].mxu1 }
 0x116   :  { %3938 = vst [vmem:[#allocation3_spill] sm:$0xff] %v2398_v21  ;;  %v747_v23 = vadd.f32 %v746_v10, %v2398_v21  ;;  %v828_v24 = vmul.f32 %v2398_v21, %v2398_v21  ;;  %v1876_v25 = vpop.f32.mrb[29].mxu0  ;;  %v1952_v37 = vpop.f32.mrb[29].mxu1 }
 0x117   :  { %v2403_v27 = vpop.f32.mrb[30].mxu0  ;;  %v2410_v38 = vpop.f32.mrb[30].mxu1 }
 0x118   :  { %3939 = vst [vmem:[#allocation4_spill] sm:$0xff] %v2403_v27  ;;  %v901_v30 = vadd.f32 %v900_v16, %v828_v24  ;;  %v748_v31 = vadd.f32 %v747_v23, %v2403_v27  ;;  %v829_v32 = vmul.f32 %v2403_v27, %v2403_v27  ;;  %v1877_v33 = vpop.f32.mrb[31].mxu0  ;;  %v1953_v43 = vpop.f32.mrb[31].mxu1 }
 0x11a   :  { %v902_v35 = vadd.f32 %v901_v30, %v829_v32 }
 0x11d   :  { %v2412_v39 = vpop.f32.mrb[32].mxu0  ;;  %v2422_v61 = vpop.f32.mrb[32].mxu1 }
 0x11e   :  { %3940 = vst [vmem:[#allocation5_spill] sm:$0xff] %v2412_v39  ;;  %v749_v46 = vadd.f32 %v748_v31, %v2412_v39  ;;  %v830_v47 = vmul.f32 %v2412_v39, %v2412_v39  ;;  %v1880_v49 = vpop.f32.mrb[33].mxu0  ;;  %v1956_v3 = vpop.f32.mrb[33].mxu1 }
 0x11f   :  { %v2417_v52 = vpop.f32.mrb[34].mxu0  ;;  %v2424_v4 = vpop.f32.mrb[34].mxu1 }
 0x120   :  { %3941 = vst [vmem:[#allocation6_spill] sm:$0xff] %v2417_v52  ;;  %v903_v54 = vadd.f32 %v902_v35, %v830_v47  ;;  %v750_v55 = vadd.f32 %v749_v46, %v2417_v52  ;;  %v831_v57 = vmul.f32 %v2417_v52, %v2417_v52  ;;  %v1881_v58 = vpop.f32.mrb[35].mxu0  ;;  %v1957_v7 = vpop.f32.mrb[35].mxu1 }
 0x122   :  { %v904_v59 = vadd.f32 %v903_v54, %v831_v57 }
 0x125   :  { %v2426_v5 = vpop.f32.mrb[36].mxu0  ;;  %v2436_v25 = vpop.f32.mrb[36].mxu1 }
 0x126   :  { %3942 = vst [vmem:[#allocation7_spill] sm:$0xff] %v2426_v5  ;;  %v751_v9 = vadd.f32 %v750_v55, %v2426_v5  ;;  %v832_v10 = vmul.f32 %v2426_v5, %v2426_v5  ;;  %v1884_v11 = vpop.f32.mrb[37].mxu0  ;;  %v1960_v30 = vpop.f32.mrb[37].mxu1 }
 0x127   :  { %v2431_v13 = vpop.f32.mrb[38].mxu0  ;;  %v2438_v31 = vpop.f32.mrb[38].mxu1 }
 0x128   :  { %3943 = vst [vmem:[#allocation8_spill] sm:$0xff] %v2431_v13  ;;  %v905_v16 = vadd.f32 %v904_v59, %v832_v10  ;;  %v752_v18 = vadd.f32 %v751_v9, %v2431_v13  ;;  %v833_v22 = vmul.f32 %v2431_v13, %v2431_v13  ;;  %v1885_v23 = vpop.f32.mrb[39].mxu0  ;;  %v1961_v33 = vpop.f32.mrb[39].mxu1 }
 0x12a   :  { %v906_v24 = vadd.f32 %v905_v16, %v833_v22 }
 0x12d   :  { %v2440_v32 = vpop.f32.mrb[40].mxu0  ;;  %v2450_v58 = vpop.f32.mrb[40].mxu1 }
 0x12e   :  { %3944 = vst [vmem:[#allocation9_spill] sm:$0xff] %v2440_v32  ;;  %v753_v35 = vadd.f32 %v752_v18, %v2440_v32  ;;  %v834_v37 = vmul.f32 %v2440_v32, %v2440_v32  ;;  %v1888_v43 = vpop.f32.mrb[41].mxu0  ;;  %v1964_v59 = vpop.f32.mrb[41].mxu1 }
 0x12f   :  { %v2445_v46 = vpop.f32.mrb[42].mxu0  ;;  %v2452_v3 = vpop.f32.mrb[42].mxu1 }
 0x130   :  { %3945 = vst [vmem:[#allocation10_spill] sm:$0xff] %v2445_v46  ;;  %v907_v47 = vadd.f32 %v906_v24, %v834_v37  ;;  %v754_v49 = vadd.f32 %v753_v35, %v2445_v46  ;;  %v835_v54 = vmul.f32 %v2445_v46, %v2445_v46  ;;  %v1889_v55 = vpop.f32.mrb[43].mxu0  ;;  %v1965_v9 = vpop.f32.mrb[43].mxu1 }
 0x132   :  { %v908_v57 = vadd.f32 %v907_v47, %v835_v54 }
 0x135   :  { %v2454_v7 = vpop.f32.mrb[44].mxu0  ;;  %v2464_v35 = vpop.f32.mrb[44].mxu1 }
 0x136   :  { %3946 = vst [vmem:[#allocation11_spill] sm:$0xff] %v2454_v7  ;;  %v755_v10 = vadd.f32 %v754_v49, %v2454_v7  ;;  %v836_v11 = vmul.f32 %v2454_v7, %v2454_v7  ;;  %v1892_v16 = vpop.f32.mrb[45].mxu0  ;;  %v1968_v37 = vpop.f32.mrb[45].mxu1 }
 0x137   :  { %v2459_v18 = vpop.f32.mrb[46].mxu0  ;;  %v2466_v43 = vpop.f32.mrb[46].mxu1 }
 0x138   :  { %3947 = vst [vmem:[#allocation12_spill] sm:$0xff] %v2459_v18  ;;  %v909_v22 = vadd.f32 %v908_v57, %v836_v11  ;;  %v756_v23 = vadd.f32 %v755_v10, %v2459_v18  ;;  %v837_v24 = vmul.f32 %v2459_v18, %v2459_v18  ;;  %v1893_v30 = vpop.f32.mrb[47].mxu0  ;;  %v1969_v49 = vpop.f32.mrb[47].mxu1 }
 0x13a   :  { %v910_v33 = vadd.f32 %v909_v22, %v837_v24 }
 0x13d   :  { %v2468_v47 = vpop.f32.mrb[48].mxu0  ;;  %v2478_v24 = vpop.f32.mrb[48].mxu1 }
 0x13e   :  { %3948 = vst [vmem:[#allocation13_spill] sm:$0xff] %v2468_v47  ;;  %v757_v54 = vadd.f32 %v756_v23, %v2468_v47  ;;  %v838_v55 = vmul.f32 %v2468_v47, %v2468_v47  ;;  %v1896_v57 = vpop.f32.mrb[49].mxu0  ;;  %v1972_v30 = vpop.f32.mrb[49].mxu1 }
 0x13f   :  { %v2473_v59 = vpop.f32.mrb[50].mxu0  ;;  %v2480_v37 = vpop.f32.mrb[50].mxu1 }
 0x140   :  { %3949 = vst [vmem:[#allocation14_spill] sm:$0xff] %v2473_v59  ;;  %v911_v9 = vadd.f32 %v910_v33, %v838_v55  ;;  %v758_v10 = vadd.f32 %v757_v54, %v2473_v59  ;;  %v839_v11 = vmul.f32 %v2473_v59, %v2473_v59  ;;  %v1897_v16 = vpop.f32.mrb[51].mxu0  ;;  %v1973_v49 = vpop.f32.mrb[51].mxu1 }
 0x142   :  { %v912_v22 = vadd.f32 %v911_v9, %v839_v11 }
 0x145   :  { %v2482_v23 = vpop.f32.mrb[52].mxu0  ;;  %v2492_v59 = vpop.f32.mrb[52].mxu1 }
 0x146   :  { %3950 = vst [vmem:[#allocation15_spill] sm:$0xff] %v2482_v23  ;;  %v759_v57 = vadd.f32 %v758_v10, %v2482_v23  ;;  %v840_v33 = vmul.f32 %v2482_v23, %v2482_v23  ;;  %v1900_v55 = vpop.f32.mrb[53].mxu0  ;;  %v1976_v18 = vpop.f32.mrb[53].mxu1 }
 0x147   :  { %v2487_v54 = vpop.f32.mrb[54].mxu0  ;;  %v2494_v49 = vpop.f32.mrb[54].mxu1 }
 0x148   :  { %3951 = vst [vmem:[#allocation16_spill] sm:$0xff] %v2487_v54  ;;  %v913_v47 = vadd.f32 %v912_v22, %v840_v33  ;;  %v760_v16 = vadd.f32 %v759_v57, %v2487_v54  ;;  %v841_v9 = vmul.f32 %v2487_v54, %v2487_v54  ;;  %v1901_v11 = vpop.f32.mrb[55].mxu0  ;;  %v1977_v7 = vpop.f32.mrb[55].mxu1 }
 0x14a   :  { %v914_v30 = vadd.f32 %v913_v47, %v841_v9 }
 0x14d   :  { %v2496_v10 = vpop.f32.mrb[56].mxu0  ;;  %v2506_v54 = vpop.f32.mrb[56].mxu1 }
 0x14e   :  { %3952 = vst [vmem:[#allocation17_spill] sm:$0xff] %v2496_v10  ;;  %v761_v55 = vadd.f32 %v760_v16, %v2496_v10  ;;  %v842_v22 = vmul.f32 %v2496_v10, %v2496_v10  ;;  %v1904_v33 = vpop.f32.mrb[57].mxu0  ;;  %3954 = vst [vmem:[#allocation19_spill] sm:$0xff] %v2506_v54  ;;  %v1980_v46 = vpop.f32.mrb[57].mxu1 }
 0x14f   :  { %v2501_v57 = vpop.f32.mrb[58].mxu0  ;;  %v2508_v7 = vpop.f32.mrb[58].mxu1 }
 0x150   :  { %3953 = vst [vmem:[#allocation18_spill] sm:$0xff] %v2501_v57  ;;  %v915_v23 = vadd.f32 %v914_v30, %v842_v22  ;;  %v762_v11 = vadd.f32 %v761_v55, %v2501_v57  ;;  %v843_v47 = vmul.f32 %v2501_v57, %v2501_v57  ;;  %v1905_v18 = vpop.f32.mrb[59].mxu0  ;;  %3955 = vst [vmem:[#allocation20_spill] sm:$0xff] %v2508_v7  ;;  %v1981_v32 = vpop.f32.mrb[59].mxu1 }
 0x152   :  { %v916_v9 = vadd.f32 %v915_v23, %v843_v47 }
 0x155   :  { %v2510_v16 = vpop.f32.mrb[60].mxu0  ;;  %v2520_v57 = vpop.f32.mrb[60].mxu1 }
 0x156   :  { %3956 = vst [vmem:[#allocation21_spill] sm:$0xff] %v2510_v16  ;;  %v763_v33 = vadd.f32 %v762_v11, %v2510_v16  ;;  %v844_v30 = vmul.f32 %v2510_v16, %v2510_v16  ;;  %v1908_v22 = vpop.f32.mrb[61].mxu0  ;;  %3958 = vst [vmem:[#allocation23_spill] sm:$0xff] %v2520_v57  ;;  %v1984_v13 = vpop.f32.mrb[61].mxu1 }
 0x157   :  { %v2515_v55 = vpop.f32.mrb[62].mxu0  ;;  %v2522_v32 = vpop.f32.mrb[62].mxu1 }
 0x158   :  { %3957 = vst [vmem:[#allocation22_spill] sm:$0xff] %v2515_v55  ;;  %v917_v10 = vadd.f32 %v916_v9, %v844_v30  ;;  %v764_v18 = vadd.f32 %v763_v33, %v2515_v55  ;;  %v845_v23 = vmul.f32 %v2515_v55, %v2515_v55  ;;  %v1909_v46 = vpop.f32.mrb[63].mxu0  ;;  %3959 = vst [vmem:[#allocation24_spill] sm:$0xff] %v2522_v32  ;;  %v1985_v5 = vpop.f32.mrb[63].mxu1 }
 0x15a   :  { %v918_v47 = vadd.f32 %v917_v10, %v845_v23 }
 0x15d   :  { %v2524_v11 = vpop.f32.mrb[64].mxu0  ;;  %v2534_v55 = vpop.f32.mrb[64].mxu1 }
 0x15e   :  { %3960 = vst [vmem:[#allocation25_spill] sm:$0xff] %v2524_v11  ;;  %v765_v22 = vadd.f32 %v764_v18, %v2524_v11  ;;  %v846_v9 = vmul.f32 %v2524_v11, %v2524_v11  ;;  %v1912_v30 = vpop.f32.mrb[65].mxu0  ;;  %3962 = vst [vmem:[#allocation27_spill] sm:$0xff] %v2534_v55  ;;  %v1988_v52 = vpop.f32.mrb[65].mxu1 }
 0x15f   :  { %v2529_v33 = vpop.f32.mrb[66].mxu0  ;;  %v2536_v5 = vpop.f32.mrb[66].mxu1 }
 0x160   :  { %3961 = vst [vmem:[#allocation26_spill] sm:$0xff] %v2529_v33  ;;  %v919_v16 = vadd.f32 %v918_v47, %v846_v9  ;;  %v766_v46 = vadd.f32 %v765_v22, %v2529_v33  ;;  %v847_v10 = vmul.f32 %v2529_v33, %v2529_v33  ;;  %v1913_v13 = vpop.f32.mrb[67].mxu0  ;;  %3963 = vst [vmem:[#allocation28_spill] sm:$0xff] %v2536_v5  ;;  %v1989_v39 = vpop.f32.mrb[67].mxu1 }
 0x162   :  { %v920_v23 = vadd.f32 %v919_v16, %v847_v10 }
 0x165   :  { %v2538_v18 = vpop.f32.mrb[68].mxu0  ;;  %v2548_v33 = vpop.f32.mrb[68].mxu1 }
 0x166   :  { %3964 = vst [vmem:[#allocation29_spill] sm:$0xff] %v2538_v18  ;;  %v767_v30 = vadd.f32 %v766_v46, %v2538_v18  ;;  %v848_v47 = vmul.f32 %v2538_v18, %v2538_v18  ;;  %v1916_v9 = vpop.f32.mrb[69].mxu0  ;;  %3966 = vst [vmem:[#allocation31_spill] sm:$0xff] %v2548_v33  ;;  %v1992_v27 = vpop.f32.mrb[69].mxu1 }
 0x167   :  { %v2543_v22 = vpop.f32.mrb[70].mxu0  ;;  %v2550_v39 = vpop.f32.mrb[70].mxu1 }
 0x168   :  { %3965 = vst [vmem:[#allocation30_spill] sm:$0xff] %v2543_v22  ;;  %v921_v11 = vadd.f32 %v920_v23, %v848_v47  ;;  %v768_v13 = vadd.f32 %v767_v30, %v2543_v22  ;;  %v849_v16 = vmul.f32 %v2543_v22, %v2543_v22  ;;  %v1917_v52 = vpop.f32.mrb[71].mxu0  ;;  %v1993_v21 = vpop.f32.mrb[71].mxu1 }
 0x16a   :  { %v922_v10 = vadd.f32 %v921_v11, %v849_v16  ;;  %v852_v16 = vmul.f32 %v2310_v48, %v2310_v48 }
 0x16d   :  { %v2552_v46 = vpop.f32.mrb[72].mxu0 }
 0x16e   :  { %3967 = vst [vmem:[#allocation32_spill] sm:$0xff] %v2552_v46  ;;  %v769_v9 = vadd.f32 %v768_v13, %v2552_v46  ;;  %v850_v23 = vmul.f32 %v2552_v46, %v2552_v46  ;;  %v1920_v47 = vpop.f32.mrb[73].mxu0  ;;  %v853_v13 = vmul.f32 %v2312_v50, %v2312_v50 }
 0x16f   :  { %v2557_v30 = vpop.f32.mrb[74].mxu0 }
 0x170   :  { %3968 = vst [vmem:[#allocation33_spill] sm:$0xff] %v2557_v30  ;;  %v923_v18 = vadd.f32 %v922_v10, %v850_v23  ;;  %v770_v52 = vadd.f32 %v769_v9, %v2557_v30  ;;  %v851_v11 = vmul.f32 %v2557_v30, %v2557_v30  ;;  %v1921_v27 = vpop.f32.mrb[75].mxu0  ;;  %v854_v10 = vmul.f32 %v2324_v62, %v2324_v62 }
 0x171   :  { %v855_v27 = vmul.f32 %v2326_v0, %v2326_v0 }
 0x172   :  { %v771_v21 = vadd.f32 %v770_v52, %v2310_v48  ;;  %v924_v22 = vadd.f32 %v923_v18, %v851_v11  ;;  %v856_v18 = vmul.f32 %v2338_v12, %v2338_v12 }
 0x174   :  { %v772_v47 = vadd.f32 %v771_v21, %v2312_v50  ;;  %v925_v46 = vadd.f32 %v924_v22, %v852_v16  ;;  %v857_v22 = vmul.f32 %v2340_v14, %v2340_v14 }
 0x176   :  { %v773_v9 = vadd.f32 %v772_v47, %v2324_v62  ;;  %v926_v23 = vadd.f32 %v925_v46, %v853_v13  ;;  %v858_v46 = vmul.f32 %v2352_v26, %v2352_v26 }
 0x178   :  { %v774_v30 = vadd.f32 %v773_v9, %v2326_v0  ;;  %v927_v8 = vadd.f32 %v926_v23, %v854_v10  ;;  %v859_v10 = vmul.f32 %v2354_v28, %v2354_v28 }
 0x17a   :  { %v775_v52 = vadd.f32 %v774_v30, %v2338_v12  ;;  %v928_v11 = vadd.f32 %v927_v8, %v855_v27  ;;  %v860_v8 = vmul.f32 %v2366_v41, %v2366_v41 }
 0x17c   :  { %v776_v16 = vadd.f32 %v775_v52, %v2340_v14  ;;  %v929_v21 = vadd.f32 %v928_v11, %v856_v18  ;;  %v861_v18 = vmul.f32 %v2368_v44, %v2368_v44 }
 0x17e   :  { %v777_v13 = vadd.f32 %v776_v16, %v2352_v26  ;;  %v930_v47 = vadd.f32 %v929_v21, %v857_v22  ;;  %v862_v22 = vmul.f32 %v2380_v60, %v2380_v60 }
 0x180   :  { %v778_v9 = vadd.f32 %v777_v13, %v2354_v28  ;;  %v931_v23 = vadd.f32 %v930_v47, %v858_v46  ;;  %v863_v46 = vmul.f32 %v2382_v63, %v2382_v63 }
 0x182   :  { %v779_v30 = vadd.f32 %v778_v9, %v2366_v41  ;;  %v932_v27 = vadd.f32 %v931_v23, %v859_v10  ;;  %v864_v10 = vmul.f32 %v2394_v17, %v2394_v17 }
 0x184   :  { %v933_v52 = vadd.f32 %v932_v27, %v860_v8  ;;  %v780_v11 = vadd.f32 %v779_v30, %v2368_v44  ;;  %v865_v8 = vmul.f32 %v2396_v19, %v2396_v19 }
 0x186   :  { %v781_v16 = vadd.f32 %v780_v11, %v2380_v60  ;;  %v934_v21 = vadd.f32 %v933_v52, %v861_v18  ;;  %v866_v18 = vmul.f32 %v2408_v36, %v2408_v36 }
 0x188   :  { %v782_v13 = vadd.f32 %v781_v16, %v2382_v63  ;;  %v935_v47 = vadd.f32 %v934_v21, %v862_v22  ;;  %v867_v22 = vmul.f32 %v2410_v38, %v2410_v38 }
 0x18a   :  { %v783_v9 = vadd.f32 %v782_v13, %v2394_v17  ;;  %v936_v23 = vadd.f32 %v935_v47, %v863_v46  ;;  %v868_v46 = vmul.f32 %v2422_v61, %v2422_v61 }
 0x18c   :  { %v784_v30 = vadd.f32 %v783_v9, %v2396_v19  ;;  %v937_v27 = vadd.f32 %v936_v23, %v864_v10  ;;  %v869_v10 = vmul.f32 %v2424_v4, %v2424_v4 }
 0x18e   :  { %v785_v52 = vadd.f32 %v784_v30, %v2408_v36  ;;  %v938_v11 = vadd.f32 %v937_v27, %v865_v8  ;;  %v870_v30 = vmul.f32 %v2436_v25, %v2436_v25 }
 0x190   :  { %v786_v16 = vadd.f32 %v785_v52, %v2410_v38  ;;  %v939_v21 = vadd.f32 %v938_v11, %v866_v18  ;;  %v871_v11 = vmul.f32 %v2438_v31, %v2438_v31 }
 0x192   :  { %v787_v13 = vadd.f32 %v786_v16, %v2422_v61  ;;  %v940_v47 = vadd.f32 %v939_v21, %v867_v22  ;;  %v872_v21 = vmul.f32 %v2450_v58, %v2450_v58 }
 0x194   :  { %v788_v9 = vadd.f32 %v787_v13, %v2424_v4  ;;  %v941_v23 = vadd.f32 %v940_v47, %v868_v46  ;;  %v873_v47 = vmul.f32 %v2452_v3, %v2452_v3 }
 0x196   :  { %v789_v8 = vadd.f32 %v788_v9, %v2436_v25  ;;  %v942_v27 = vadd.f32 %v941_v23, %v869_v10  ;;  %v874_v23 = vmul.f32 %v2464_v35, %v2464_v35 }
 0x198   :  { %v943_v52 = vadd.f32 %v942_v27, %v870_v30  ;;  %v790_v18 = vadd.f32 %v789_v8, %v2438_v31  ;;  %v875_v27 = vmul.f32 %v2466_v43, %v2466_v43 }
 0x19a   :  { %v944_v16 = vadd.f32 %v943_v52, %v871_v11  ;;  %v791_v22 = vadd.f32 %v790_v18, %v2450_v58  ;;  %v876_v11 = vmul.f32 %v2478_v24, %v2478_v24 }
 0x19c   :  { %v945_v13 = vadd.f32 %v944_v16, %v872_v21  ;;  %v792_v46 = vadd.f32 %v791_v22, %v2452_v3  ;;  %v877_v21 = vmul.f32 %v2480_v37, %v2480_v37 }
 0x19e   :  { %v946_v9 = vadd.f32 %v945_v13, %v873_v47  ;;  %v793_v10 = vadd.f32 %v792_v46, %v2464_v35  ;;  %v878_v47 = vmul.f32 %v2492_v59, %v2492_v59 }
 0x1a0   :  { %v947_v8 = vadd.f32 %v946_v9, %v874_v23  ;;  %v794_v30 = vadd.f32 %v793_v10, %v2466_v43  ;;  %v879_v23 = vmul.f32 %v2494_v49, %v2494_v49 }
 0x1a2   :  { %v948_v52 = vadd.f32 %v947_v8, %v875_v27  ;;  %v795_v18 = vadd.f32 %v794_v30, %v2478_v24  ;;  %v880_v27 = vmul.f32 %v2506_v54, %v2506_v54 }
 0x1a4   :  { %v949_v16 = vadd.f32 %v948_v52, %v876_v11  ;;  %v796_v22 = vadd.f32 %v795_v18, %v2480_v37  ;;  %v881_v11 = vmul.f32 %v2508_v7, %v2508_v7 }
 0x1a6   :  { %v950_v13 = vadd.f32 %v949_v16, %v877_v21  ;;  %v797_v46 = vadd.f32 %v796_v22, %v2492_v59  ;;  %v882_v21 = vmul.f32 %v2520_v57, %v2520_v57 }
 0x1a8   :  { %v951_v9 = vadd.f32 %v950_v13, %v878_v47  ;;  %v798_v10 = vadd.f32 %v797_v46, %v2494_v49  ;;  %v883_v47 = vmul.f32 %v2522_v32, %v2522_v32 }
 0x1aa   :  { %v952_v8 = vadd.f32 %v951_v9, %v879_v23  ;;  %v799_v30 = vadd.f32 %v798_v10, %v2506_v54  ;;  %v884_v23 = vmul.f32 %v2534_v55, %v2534_v55 }
 0x1ac   :  { %v953_v52 = vadd.f32 %v952_v8, %v880_v27  ;;  %v800_v18 = vadd.f32 %v799_v30, %v2508_v7  ;;  %v885_v27 = vmul.f32 %v2536_v5, %v2536_v5 }
 0x1ae   :  { %v954_v16 = vadd.f32 %v953_v52, %v881_v11  ;;  %v801_v22 = vadd.f32 %v800_v18, %v2520_v57  ;;  %v886_v52 = vmul.f32 %v2548_v33, %v2548_v33 }
 0x1b0   :  { %v955_v13 = vadd.f32 %v954_v16, %v882_v21  ;;  %v802_v46 = vadd.f32 %v801_v22, %v2522_v32  ;;  %v887_v21 = vmul.f32 %v2550_v39, %v2550_v39 }
 0x1b2   :  { %v956_v9 = vadd.f32 %v955_v13, %v883_v47  ;;  %v803_v10 = vadd.f32 %v802_v46, %v2534_v55 }
 0x1b4   :  { %v957_v8 = vadd.f32 %v956_v9, %v884_v23  ;;  %v804_v30 = vadd.f32 %v803_v10, %v2536_v5 }
 0x1b6   :  { %v958_v18 = vadd.f32 %v957_v8, %v885_v27  ;;  %v805_v11 = vadd.f32 %v804_v30, %v2548_v33 }
 0x1b8   :  { %v959_v16 = vadd.f32 %v958_v18, %v886_v52  ;;  %v806_v22 = vadd.f32 %v805_v11, %v2550_v39  ;;  %v979_v39 = vlaneseq }
 0x1ba   :  { %v807_v13 = vrot.slane %v806_v22, 4  ;;  %v960_v46 = vadd.f32 %v959_v16, %v887_v21  ;;  %v2670_v16 = vshrl.u32 %v979_v39, 7 }
 0x1bc   :  { %v808_v47 = vadd.f32 %v807_v13, %v806_v22  ;;  %v961_v9 = vrot.slane %v960_v46, 4  ;;  %v971_v22 = vld [vmem:[%s3866_s2] sm:$0x1]  ;;  %v3901_v21 = vsub.s32 0, %v2670_v16 }
 0x1be   :  { %v809_v10 = vrot.slane %v808_v47, 2  ;;  %v962_v23 = vadd.f32 %v961_v9, %v960_v46 }
 0x1c0   :  { %v810_v55 = vadd.f32 %v809_v10, %v808_v47  ;;  %v963_v5 = vrot.slane %v962_v23, 2  ;;  %v3969_v10 = vld [vmem:[#allocation2_spill] sm:$0xff] }
 0x1c2   :  { %v811_v32 = vrot.slane %v810_v55, 1  ;;  %v964_v57 = vadd.f32 %v963_v5, %v962_v23  ;;  %v3970_v23 = vld [vmem:[#allocation3_spill] sm:$0xff] }
 0x1c4   :  { %v812_v7 = vadd.f32 %v811_v32, %v810_v55  ;;  %v965_v8 = vrot.slane %v964_v57, 1  ;;  %v3985_v32 = vld [vmem:[#allocation14_spill] sm:$0xff] }
 0x1c6   :  { %v813_v27 = vmul.f32 0.0017301039, %v812_v7  ;;  %v966_v30 = vadd.f32 %v965_v8, %v964_v57  ;;  %v2679_v57 = vld [vmem:[%s3867_s3] sm:$0x1]  ;;  %v3971_v8 = vld [vmem:[#allocation4_spill] sm:$0xff] }
 0x1c8   :  { %v967_v52 = vmul.f32 0.0017301039, %v966_v30  ;;  %v968_v18 = vmul.f32 %v813_v27, %v813_v27  ;;  %v3973_v30 = vld [vmem:[#allocation6_spill] sm:$0xff] }
 0x1ca   :  { %v969_v11 = vsub.f32 %v967_v52, %v968_v18  ;;  %v3974_v52 = vld [vmem:[#allocation7_spill] sm:$0xff] }
 0x1cc   :  { %v970_v33 = vmax.f32 %v969_v11, 0.0  ;;  %v3975_v11 = vld [vmem:[#allocation8_spill] sm:$0xff] }
 0x1ce   :  { %v972_v54 = vadd.f32 1e-05, %v970_v33 }
 0x1d0   :  { %2039 = vrsqrt.f32 %v972_v54 }
 0x1da   :  { %v2040_v5 = vpop.eup %2039 }
 0x1db   :  { %v974_v55 = vmul.f32 %v2040_v5, %v971_v22  ;;  %v3976_v22 = vld [vmem:[#allocation9_spill] sm:$0xff] }
 0x1dd   :  { %v2681_v7 = vmul.f32 %v974_v55, %v813_v27  ;;  %v2685_v54 = vrot.slane %v974_v55, %v3901_v21  ;;  %v3972_v27 = vld [vmem:[#allocation5_spill] sm:$0xff]  ;;  %v3977_v55 = vld [vmem:[#allocation10_spill] sm:$0xff]  ;;  %v3987_v21 = vld [vmem:[#allocation15_spill] sm:$0xff] }
 0x1df   :  { %v2691_v33 = vmul.f32 %v2685_v54, %v2300_v40  ;;  %v2695_v13 = vmul.f32 %v2685_v54, %v2302_v42  ;;  %v2699_v46 = vmul.f32 %v2685_v54, %v2314_v51  ;;  %v2703_v47 = vmul.f32 %v2685_v54, %v2319_v56 }
 0x1e0   :  { %v2707_v9 = vmul.f32 %v2685_v54, %v2328_v1  ;;  %v2711_v40 = vmul.f32 %v2685_v54, %v2333_v6  ;;  %v2715_v42 = vmul.f32 %v2685_v54, %v2342_v15  ;;  %v2719_v51 = vmul.f32 %v2685_v54, %v2347_v20 }
 0x1e1   :  { %v2723_v56 = vmul.f32 %v2685_v54, %v2356_v29  ;;  %v2727_v1 = vmul.f32 %v2685_v54, %v2361_v34  ;;  %v2731_v6 = vmul.f32 %v2685_v54, %v2370_v45  ;;  %v2735_v15 = vmul.f32 %v2685_v54, %v2375_v53 }
 0x1e2   :  { %v2739_v20 = vmul.f32 %v2685_v54, %v2384_v2  ;;  %v2743_v29 = vmul.f32 %v2685_v54, %v3969_v10  ;;  %v2747_v34 = vmul.f32 %v2685_v54, %v3970_v23  ;;  %v2751_v45 = vmul.f32 %v2685_v54, %v3971_v8  ;;  %v3979_v23 = vld [vmem:[#allocation11_spill] sm:$0xff] }
 0x1e3   :  { %v2755_v53 = vmul.f32 %v2685_v54, %v3972_v27  ;;  %v2759_v2 = vmul.f32 %v2685_v54, %v3973_v30  ;;  %v2763_v18 = vmul.f32 %v2685_v54, %v3974_v52  ;;  %v2767_v39 = vmul.f32 %v2685_v54, %v3975_v11  ;;  %v3981_v27 = vld [vmem:[#allocation12_spill] sm:$0xff]  ;;  %v3983_v52 = vld [vmem:[#allocation13_spill] sm:$0xff] }
 0x1e4   :  { %v2771_v5 = vmul.f32 %v2685_v54, %v3976_v22  ;;  %v2775_v10 = vmul.f32 %v2685_v54, %v3977_v55  ;;  %v2779_v8 = vmul.f32 %v2685_v54, %v3979_v23  ;;  %v2783_v30 = vmul.f32 %v2685_v54, %v3981_v27 }
 0x1e5   :  { %v2787_v11 = vmul.f32 %v2685_v54, %v3983_v52  ;;  %v2791_v22 = vmul.f32 %v2685_v54, %v3985_v32  ;;  %v2795_v55 = vmul.f32 %v2685_v54, %v3987_v21 }
 0x1e6   :  { %3978 = vst [vmem:[#allocation2_spill] sm:$0xff] %v2775_v10  ;;  %3980 = vst [vmem:[#allocation3_spill] sm:$0xff] %v2779_v8  ;;  %v3989_v10 = vld [vmem:[#allocation16_spill] sm:$0xff]  ;;  %v3991_v8 = vld [vmem:[#allocation17_spill] sm:$0xff] }
 0x1e7   :  { %3982 = vst [vmem:[#allocation4_spill] sm:$0xff] %v2783_v30  ;;  %3984 = vst [vmem:[#allocation5_spill] sm:$0xff] %v2787_v11  ;;  %v2799_v23 = vmul.f32 %v2685_v54, %v3989_v10  ;;  %v2803_v27 = vmul.f32 %v2685_v54, %v3991_v8  ;;  %v3993_v30 = vld [vmem:[#allocation18_spill] sm:$0xff]  ;;  %v3995_v11 = vld [vmem:[#allocation21_spill] sm:$0xff] }
 0x1e8   :  { %3986 = vst [vmem:[#allocation6_spill] sm:$0xff] %v2791_v22  ;;  %3988 = vst [vmem:[#allocation7_spill] sm:$0xff] %v2795_v55  ;;  %v2807_v52 = vmul.f32 %v2685_v54, %v3993_v30  ;;  %v2811_v32 = vmul.f32 %v2685_v54, %v3995_v11  ;;  %v3997_v22 = vld [vmem:[#allocation22_spill] sm:$0xff]  ;;  %v3999_v55 = vld [vmem:[#allocation25_spill] sm:$0xff] }
 0x1e9   :  { %3990 = vst [vmem:[#allocation8_spill] sm:$0xff] %v2799_v23  ;;  %3992 = vst [vmem:[#allocation9_spill] sm:$0xff] %v2803_v27  ;;  %v2815_v21 = vmul.f32 %v2685_v54, %v3997_v22  ;;  %v2819_v10 = vmul.f32 %v2685_v54, %v3999_v55  ;;  %v4000_v23 = vld [vmem:[#allocation26_spill] sm:$0xff]  ;;  %v4001_v27 = vld [vmem:[#allocation29_spill] sm:$0xff] }
 0x1ea   :  { %3994 = vst [vmem:[#allocation10_spill] sm:$0xff] %v2807_v52  ;;  %3996 = vst [vmem:[#allocation11_spill] sm:$0xff] %v2811_v32  ;;  %v2823_v8 = vmul.f32 %v2685_v54, %v4000_v23  ;;  %v2827_v30 = vmul.f32 %v2685_v54, %v4001_v27  ;;  %v4002_v52 = vld [vmem:[#allocation30_spill] sm:$0xff]  ;;  %v4003_v32 = vld [vmem:[#allocation32_spill] sm:$0xff]  ;;  %v2843_v23 = vmul.f32 %v2685_v54, %v2310_v48 }
 0x1eb   :  { %3998 = vst [vmem:[#allocation12_spill] sm:$0xff] %v2815_v21  ;;  %v2831_v11 = vmul.f32 %v2685_v54, %v4002_v52  ;;  %v2835_v22 = vmul.f32 %v2685_v54, %v4003_v32  ;;  %v4004_v21 = vld [vmem:[#allocation33_spill] sm:$0xff]  ;;  %v2847_v27 = vmul.f32 %v2685_v54, %v2312_v50  ;;  %v2851_v52 = vmul.f32 %v2685_v54, %v2324_v62 }
 0x1ec   :  { %v2839_v55 = vmul.f32 %v2685_v54, %v4004_v21  ;;  %v2855_v32 = vmul.f32 %v2685_v54, %v2326_v0  ;;  %v2859_v21 = vmul.f32 %v2685_v54, %v2338_v12  ;;  %v2863_v48 = vmul.f32 %v2685_v54, %v2340_v14 }
 0x1ed   :  { %v2867_v50 = vmul.f32 %v2685_v54, %v2352_v26  ;;  %v2871_v62 = vmul.f32 %v2685_v54, %v2354_v28  ;;  %v2875_v0 = vmul.f32 %v2685_v54, %v2366_v41  ;;  %v2879_v12 = vmul.f32 %v2685_v54, %v2368_v44 }
 0x1ee   :  { %v2883_v14 = vmul.f32 %v2685_v54, %v2380_v60  ;;  %v2887_v26 = vmul.f32 %v2685_v54, %v2382_v63  ;;  %v2891_v28 = vmul.f32 %v2685_v54, %v2394_v17  ;;  %v2895_v41 = vmul.f32 %v2685_v54, %v2396_v19 }
 0x1ef   :  { %v2899_v44 = vmul.f32 %v2685_v54, %v2408_v36  ;;  %v2903_v60 = vmul.f32 %v2685_v54, %v2410_v38  ;;  %v2907_v63 = vmul.f32 %v2685_v54, %v2422_v61  ;;  %v2911_v17 = vmul.f32 %v2685_v54, %v2424_v4 }
 0x1f0   :  { %v2915_v19 = vmul.f32 %v2685_v54, %v2436_v25  ;;  %v2919_v36 = vmul.f32 %v2685_v54, %v2438_v31  ;;  %v2923_v38 = vmul.f32 %v2685_v54, %v2450_v58  ;;  %v2927_v61 = vmul.f32 %v2685_v54, %v2452_v3 }
 0x1f1   :  { %v2931_v4 = vmul.f32 %v2685_v54, %v2464_v35  ;;  %v2935_v25 = vmul.f32 %v2685_v54, %v2466_v43  ;;  %v2939_v31 = vmul.f32 %v2685_v54, %v2478_v24  ;;  %v2943_v58 = vmul.f32 %v2685_v54, %v2480_v37 }
 0x1f2   :  { %v2947_v3 = vmul.f32 %v2685_v54, %v2492_v59  ;;  %v2951_v35 = vmul.f32 %v2685_v54, %v2494_v49 }
 0x1f3   :  { %4005 = vst [vmem:[#allocation13_spill] sm:$0xff] %v2931_v4  ;;  %4006 = vst [vmem:[#allocation14_spill] sm:$0xff] %v2935_v25  ;;  %v4011_v4 = vld [vmem:[#allocation19_spill] sm:$0xff]  ;;  %v4013_v25 = vld [vmem:[#allocation20_spill] sm:$0xff] }
 0x1f4   :  { %4007 = vst [vmem:[#allocation15_spill] sm:$0xff] %v2939_v31  ;;  %4008 = vst [vmem:[#allocation16_spill] sm:$0xff] %v2943_v58  ;;  %v2955_v43 = vmul.f32 %v2685_v54, %v4011_v4  ;;  %v2959_v24 = vmul.f32 %v2685_v54, %v4013_v25  ;;  %v4015_v31 = vld [vmem:[#allocation23_spill] sm:$0xff]  ;;  %v4017_v58 = vld [vmem:[#allocation24_spill] sm:$0xff] }
 0x1f5   :  { %4009 = vst [vmem:[#allocation17_spill] sm:$0xff] %v2947_v3  ;;  %4010 = vst [vmem:[#allocation18_spill] sm:$0xff] %v2951_v35  ;;  %v2963_v37 = vmul.f32 %v2685_v54, %v4015_v31  ;;  %v2967_v59 = vmul.f32 %v2685_v54, %v4017_v58  ;;  %v4018_v3 = vld [vmem:[#allocation27_spill] sm:$0xff]  ;;  %v4019_v35 = vld [vmem:[#allocation28_spill] sm:$0xff]  ;;  %v4022_v31 = vsub.f32 %v2679_v57, %v2681_v7 }
 0x1f6   :  { %4012 = vst [vmem:[#allocation21_spill] sm:$0xff] %v2955_v43  ;;  %4014 = vst [vmem:[#allocation22_spill] sm:$0xff] %v2959_v24  ;;  %v2971_v49 = vmul.f32 %v2685_v54, %v4018_v3  ;;  %v2975_v4 = vmul.f32 %v2685_v54, %v4019_v35  ;;  %v4020_v43 = vld [vmem:[#allocation31_spill] sm:$0xff]  ;;  %v4021_v24 = vsub.s32 0, %v2670_v16 }
 0x1f7   :  { %4016 = vst [vmem:[#allocation25_spill] sm:$0xff] %v2963_v37  ;;  %v2979_v25 = vmul.f32 %v2685_v54, %v4020_v43  ;;  %v4033_v43 = vld [vmem:[#allocation4_spill] sm:$0xff] }
 0x1f8   :  { %v2986_v37 = vrot.slane %v4022_v31, %v4021_v24  ;;  %v4035_v24 = vld [vmem:[#allocation5_spill] sm:$0xff]  ;;  %v4037_v31 = vld [vmem:[#allocation6_spill] sm:$0xff] }
 0x1fa   :  { %v2990_v58 = vadd.f32 %v2986_v37, %v2691_v33  ;;  %v2994_v3 = vadd.f32 %v2986_v37, %v2695_v13  ;;  %v2998_v35 = vadd.f32 %v2986_v37, %v2699_v46  ;;  %v3002_v16 = vadd.f32 %v2986_v37, %v2703_v47 }
 0x1fb   :  { %v3006_v57 = vadd.f32 %v2986_v37, %v2707_v9  ;;  %v3010_v7 = vadd.f32 %v2986_v37, %v2711_v40  ;;  %v3014_v54 = vadd.f32 %v2986_v37, %v2715_v42  ;;  %v3018_v33 = vadd.f32 %v2986_v37, %v2719_v51 }
 0x1fc   :  { %v3022_v13 = vadd.f32 %v2986_v37, %v2723_v56  ;;  %v3026_v46 = vadd.f32 %v2986_v37, %v2727_v1  ;;  %v3030_v47 = vadd.f32 %v2986_v37, %v2731_v6  ;;  %v3034_v9 = vadd.f32 %v2986_v37, %v2735_v15 }
 0x1fd   :  { %v3038_v40 = vadd.f32 %v2986_v37, %v2739_v20  ;;  %v3042_v42 = vadd.f32 %v2986_v37, %v2743_v29  ;;  %v3046_v51 = vadd.f32 %v2986_v37, %v2747_v34  ;;  %v3050_v56 = vadd.f32 %v2986_v37, %v2751_v45  ;;  %v4029_v34 = vld [vmem:[#allocation2_spill] sm:$0xff] }
 0x1fe   :  { %4023 = vst [vmem:[#allocation26_spill] sm:$0xff] %v3030_v47  ;;  %4024 = vst [vmem:[#allocation29_spill] sm:$0xff] %v3034_v9  ;;  %v3054_v1 = vadd.f32 %v2986_v37, %v2755_v53  ;;  %v3058_v6 = vadd.f32 %v2986_v37, %v2759_v2  ;;  %v3062_v15 = vadd.f32 %v2986_v37, %v2763_v18  ;;  %v4031_v53 = vld [vmem:[#allocation3_spill] sm:$0xff] }
 0x1ff   :  { %4025 = vst [vmem:[#allocation30_spill] sm:$0xff] %v3038_v40  ;;  %4026 = vst [vmem:[#allocation32_spill] sm:$0xff] %v3042_v42  ;;  %v3066_v20 = vadd.f32 %v2986_v37, %v2767_v39  ;;  %v3070_v29 = vadd.f32 %v2986_v37, %v2771_v5  ;;  %v3074_v45 = vadd.f32 %v2986_v37, %v4029_v34 }
 0x200   :  { %4027 = vst [vmem:[#allocation33_spill] sm:$0xff] %v3046_v51  ;;  %v3078_v2 = vadd.f32 %v2986_v37, %v4031_v53  ;;  %v3082_v18 = vadd.f32 %v2986_v37, %v4033_v43  ;;  %v3086_v39 = vadd.f32 %v2986_v37, %v4035_v24  ;;  %v3090_v5 = vadd.f32 %v2986_v37, %v4037_v31 }
 0x201   :  { %4028 = vst [vmem:[#allocation19_spill] sm:$0xff] %v3070_v29  ;;  %4030 = vst [vmem:[#allocation20_spill] sm:$0xff] %v3074_v45  ;;  %v4039_v29 = vld [vmem:[#allocation7_spill] sm:$0xff]  ;;  %v4040_v45 = vld [vmem:[#allocation8_spill] sm:$0xff] }
 0x202   :  { %4032 = vst [vmem:[#allocation23_spill] sm:$0xff] %v3078_v2  ;;  %4034 = vst [vmem:[#allocation24_spill] sm:$0xff] %v3082_v18  ;;  %v3094_v34 = vadd.f32 %v2986_v37, %v4039_v29  ;;  %v3098_v53 = vadd.f32 %v2986_v37, %v4040_v45  ;;  %v4041_v2 = vld [vmem:[#allocation9_spill] sm:$0xff]  ;;  %v4042_v18 = vld [vmem:[#allocation10_spill] sm:$0xff]  ;;  %v3118_v45 = vadd.f32 %v2986_v37, %v2819_v10 }
 0x203   :  { %4036 = vst [vmem:[#allocation27_spill] sm:$0xff] %v3086_v39  ;;  %4038 = vst [vmem:[#allocation28_spill] sm:$0xff] %v3090_v5  ;;  %v3102_v43 = vadd.f32 %v2986_v37, %v4041_v2  ;;  %v3106_v24 = vadd.f32 %v2986_v37, %v4042_v18  ;;  %v4043_v39 = vld [vmem:[#allocation11_spill] sm:$0xff]  ;;  %v4044_v5 = vld [vmem:[#allocation12_spill] sm:$0xff]  ;;  %v3122_v2 = vadd.f32 %v2986_v37, %v2823_v8 }
 0x204   :  { %v3110_v31 = vadd.f32 %v2986_v37, %v4043_v39  ;;  %v3114_v29 = vadd.f32 %v2986_v37, %v4044_v5  ;;  %v3126_v18 = vadd.f32 %v2986_v37, %v2827_v30  ;;  %v3130_v39 = vadd.f32 %v2986_v37, %v2831_v11 }
 0x205   :  { %v3134_v5 = vadd.f32 %v2986_v37, %v2835_v22  ;;  %v3138_v10 = vadd.f32 %v2986_v37, %v2839_v55  ;;  %v3142_v8 = vadd.f32 %v2986_v37, %v2843_v23  ;;  %v3146_v30 = vadd.f32 %v2986_v37, %v2847_v27 }
 0x206   :  { %v3150_v11 = vadd.f32 %v2986_v37, %v2851_v52  ;;  %v3154_v22 = vadd.f32 %v2986_v37, %v2855_v32  ;;  %v3158_v55 = vadd.f32 %v2986_v37, %v2859_v21  ;;  %v3162_v23 = vadd.f32 %v2986_v37, %v2863_v48 }
 0x207   :  { %v3166_v27 = vadd.f32 %v2986_v37, %v2867_v50  ;;  %v3170_v52 = vadd.f32 %v2986_v37, %v2871_v62  ;;  %v3174_v32 = vadd.f32 %v2986_v37, %v2875_v0  ;;  %v3178_v21 = vadd.f32 %v2986_v37, %v2879_v12 }
 0x208   :  { %4045 = vst [vmem:[#allocation31_spill] sm:$0xff] %v3162_v23  ;;  %v3182_v48 = vadd.f32 %v2986_v37, %v2883_v14  ;;  %v3186_v50 = vadd.f32 %v2986_v37, %v2887_v26  ;;  %v3190_v62 = vadd.f32 %v2986_v37, %v2891_v28  ;;  %v3194_v0 = vadd.f32 %v2986_v37, %v2895_v41  ;;  %v4079_v47 = vld [vmem:[#allocation20_spill] sm:$0xff] }
 0x209   :  { %4046 = vst [vmem:[#allocation2_spill] sm:$0xff] %v3166_v27  ;;  %4047 = vst [vmem:[#allocation3_spill] sm:$0xff] %v3170_v52  ;;  %v3198_v12 = vadd.f32 %v2986_v37, %v2899_v44  ;;  %v3202_v14 = vadd.f32 %v2986_v37, %v2903_v60  ;;  %v3206_v26 = vadd.f32 %v2986_v37, %v2907_v63  ;;  %v4080_v9 = vld [vmem:[#allocation23_spill] sm:$0xff]  ;;  %v4081_v40 = vld [vmem:[#allocation24_spill] sm:$0xff] }
 0x20a   :  { %4048 = vst [vmem:[#allocation4_spill] sm:$0xff] %v3174_v32  ;;  %4049 = vst [vmem:[#allocation5_spill] sm:$0xff] %v3178_v21  ;;  %v3210_v28 = vadd.f32 %v2986_v37, %v2911_v17  ;;  %v3214_v41 = vadd.f32 %v2986_v37, %v2915_v19  ;;  %v3218_v44 = vadd.f32 %v2986_v37, %v2919_v36  ;;  %v4082_v42 = vld [vmem:[#allocation27_spill] sm:$0xff]  ;;  %v4083_v51 = vld [vmem:[#allocation28_spill] sm:$0xff] }
 0x20b   :  { %4050 = vst [vmem:[#allocation6_spill] sm:$0xff] %v3182_v48  ;;  %4051 = vst [vmem:[#allocation7_spill] sm:$0xff] %v3186_v50  ;;  %v3222_v60 = vadd.f32 %v2986_v37, %v2923_v38  ;;  %v3226_v63 = vadd.f32 %v2986_v37, %v2927_v61 }
 0x20c   :  { %4052 = vst [vmem:[#allocation8_spill] sm:$0xff] %v3190_v62  ;;  %4053 = vst [vmem:[#allocation9_spill] sm:$0xff] %v3194_v0 }
 0x20d   :  { %4054 = vst [vmem:[#allocation10_spill] sm:$0xff] %v3206_v26  ;;  %4055 = vst [vmem:[#allocation11_spill] sm:$0xff] %v3210_v28  ;;  %v4060_v26 = vld [vmem:[#allocation13_spill] sm:$0xff]  ;;  %v4062_v28 = vld [vmem:[#allocation14_spill] sm:$0xff] }
 0x20e   :  { %4056 = vst [vmem:[#allocation12_spill] sm:$0xff] %v3214_v41  ;;  %4057 = vst [vmem:[#allocation34_spill] sm:$0xff] %v3218_v44  ;;  %v3230_v17 = vadd.f32 %v2986_v37, %v4060_v26  ;;  %v3234_v19 = vadd.f32 %v2986_v37, %v4062_v28  ;;  %v4064_v41 = vld [vmem:[#allocation15_spill] sm:$0xff]  ;;  %v4066_v44 = vld [vmem:[#allocation16_spill] sm:$0xff] }
 0x20f   :  { %4058 = vst [vmem:[#allocation35_spill] sm:$0xff] %v3222_v60  ;;  %4059 = vst [vmem:[#allocation36_spill] sm:$0xff] %v3226_v63  ;;  %v3238_v36 = vadd.f32 %v2986_v37, %v4064_v41  ;;  %v3242_v38 = vadd.f32 %v2986_v37, %v4066_v44  ;;  %v4067_v60 = vld [vmem:[#allocation17_spill] sm:$0xff]  ;;  %v4068_v63 = vld [vmem:[#allocation18_spill] sm:$0xff] }
 0x210   :  { %4061 = vst [vmem:[#allocation13_spill] sm:$0xff] %v3230_v17  ;;  %4063 = vst [vmem:[#allocation14_spill] sm:$0xff] %v3234_v19  ;;  %v3246_v61 = vadd.f32 %v2986_v37, %v4067_v60  ;;  %v3250_v26 = vadd.f32 %v2986_v37, %v4068_v63  ;;  %v4069_v17 = vld [vmem:[#allocation21_spill] sm:$0xff]  ;;  %v4070_v19 = vld [vmem:[#allocation22_spill] sm:$0xff]  ;;  %v3266_v60 = vadd.f32 %v2986_v37, %v2967_v59  ;;  %v4098_v59 = vmax.f32 %v2990_v58, 0.0 }
 0x211   :  { %4065 = vst [vmem:[#allocation15_spill] sm:$0xff] %v3238_v36  ;;  %v3254_v28 = vadd.f32 %v2986_v37, %v4069_v17  ;;  %v3258_v41 = vadd.f32 %v2986_v37, %v4070_v19  ;;  %v4072_v36 = vld [vmem:[#allocation25_spill] sm:$0xff]  ;;  %v3270_v63 = vadd.f32 %v2986_v37, %v2971_v49  ;;  %v3274_v17 = vadd.f32 %v2986_v37, %v2975_v4 }
 0x212   :  { %v3262_v44 = vadd.f32 %v2986_v37, %v4072_v36  ;;  %4074 = vst [vmem:[#allocation18_spill] sm:$0xff] %v3266_v60  ;;  %v3278_v19 = vadd.f32 %v2986_v37, %v2979_v25  ;;  %v4095_v21 = vmov %v3266_v60  ;;  %v1730_v60 = vpack.c.bf16 %v4098_v59, %v4098_v59 }
 0x213   :  { %4071 = vst [vmem:[#allocation16_spill] sm:$0xff] %v3258_v41  ;;  %4075 = vst [vmem:[#allocation21_spill] sm:$0xff] %v3270_v63  ;;  %v4078_v41 = vld [vmem:[#allocation19_spill] sm:$0xff]  ;;  %v4096_v48 = vmov %v3270_v63  ;;  %v4097_v50 = vmov %v3274_v17  ;;  %v4099_v49 = vmax.f32 %v2994_v3, 0.0  ;;  %v4100_v4 = vmax.f32 %v2998_v35, 0.0 }
 0x214   :  { %4073 = vst [vmem:[#allocation17_spill] sm:$0xff] %v3262_v44  ;;  %4076 = vst [vmem:[#allocation22_spill] sm:$0xff] %v3274_v17  ;;  %v4084_v23 = vld [vmem:[#allocation10_spill] sm:$0xff]  ;;  %v4085_v27 = vld [vmem:[#allocation11_spill] sm:$0xff]  ;;  %v4094_v32 = vmov %v3262_v44  ;;  %v4101_v37 = vmax.f32 %v3002_v16, 0.0  ;;  %v4102_v36 = vmax.f32 %v3006_v57, 0.0 }
 0x215   :  { %4077 = vst [vmem:[#allocation25_spill] sm:$0xff] %v3278_v19  ;;  %v1731_v63 = vpack.c.bf16 %v4099_v49, %v4099_v49  ;;  %v1732_v17 = vpack.c.bf16 %v4100_v4, %v4100_v4  ;;  %v4103_v58 = vmax.f32 %v3010_v7, 0.0  ;;  %v4104_v3 = vmax.f32 %v3014_v54, 0.0  ;;  %1503 = vst.msk [vmem:[%s3868_s4] sm:$0xf] %vm1502_vm2, %v1730_v60  ;;  %v4108_v7 = vld [vmem:[#allocation26_spill] sm:$0xff] }
 0x216   :  { %v1733_v25 = vpack.c.bf16 %v4101_v37, %v4101_v37  ;;  %v1734_v44 = vpack.c.bf16 %v4102_v36, %v4102_v36  ;;  %v4105_v35 = vmax.f32 %v3018_v33, 0.0  ;;  %v4106_v16 = vmax.f32 %v3022_v13, 0.0  ;;  %v4110_v13 = vld [vmem:[#allocation29_spill] sm:$0xff] }
 0x217   :  { %v4091_v62 = vld [vmem:[#allocation14_spill] sm:$0xff]  ;;  %v1735_v59 = vpack.c.bf16 %v4103_v58, %v4103_v58  ;;  %v1736_v49 = vpack.c.bf16 %v4104_v3, %v4104_v3  ;;  %v4107_v57 = vmax.f32 %v3026_v46, 0.0  ;;  %1504 = vst.msk [vmem:[%s3868_s4 + $0x4] sm:$0xf] %vm1502_vm2, %v1731_v63  ;;  %v4109_v54 = vmax.f32 %v4108_v7, 0.0  ;;  %v4116_v63 = vld [vmem:[#allocation33_spill] sm:$0xff] }
 0x218   :  { %v4092_v0 = vld [vmem:[#allocation15_spill] sm:$0xff]  ;;  %v1737_v4 = vpack.c.bf16 %v4105_v35, %v4105_v35  ;;  %v1738_v37 = vpack.c.bf16 %v4106_v16, %v4106_v16  ;;  %v4111_v58 = vmax.f32 %v4110_v13, 0.0  ;;  %v4112_v3 = vld [vmem:[#allocation30_spill] sm:$0xff]  ;;  %1505 = vst.msk [vmem:[%s3868_s4 + $0x8] sm:$0xf] %vm1502_vm2, %v1732_v17  ;;  %v4118_v17 = vmax.f32 %v3050_v56, 0.0 }
 0x219   :  { %v1739_v36 = vpack.c.bf16 %v4107_v57, %v4107_v57  ;;  %v1740_v33 = vpack.c.bf16 %v4109_v54, %v4109_v54  ;;  %v4113_v35 = vmax.f32 %v4112_v3, 0.0  ;;  %v4114_v57 = vld [vmem:[#allocation32_spill] sm:$0xff]  ;;  %1506 = vst.msk [vmem:[%s3868_s4 + $0xc] sm:$0xf] %vm1502_vm2, %v1733_v25  ;;  %1507 = vst.msk [vmem:[%s3868_s4 + $0x10] sm:$0xf] %vm1502_vm2, %v1734_v44 }
 0x21a   :  { %v4093_v52 = vld [vmem:[#allocation16_spill] sm:$0xff]  ;;  %v1741_v46 = vpack.c.bf16 %v4111_v58, %v4111_v58  ;;  %v4115_v19 = vmax.f32 %v4114_v57, 0.0  ;;  %1508 = vst.msk [vmem:[%s3868_s4 + $0x14] sm:$0xf] %vm1502_vm2, %v1735_v59  ;;  %v1745_v54 = vpack.c.bf16 %v4118_v17, %v4118_v17  ;;  %v4119_v25 = vmax.f32 %v3054_v1, 0.0 }
 0x21b   :  { %v1742_v16 = vpack.c.bf16 %v4113_v35, %v4113_v35  ;;  %v4120_v58 = vmax.f32 %v3058_v6, 0.0  ;;  %1509 = vst.msk [vmem:[%s3868_s4 + $0x18] sm:$0xf] %vm1502_vm2, %v1736_v49  ;;  %1510 = vst.msk [vmem:[%s3868_s4 + $0x1c] sm:$0xf] %vm1502_vm2, %v1737_v4  ;;  %v4121_v56 = vmax.f32 %v3062_v15, 0.0 }
 0x21c   :  { %v1743_v60 = vpack.c.bf16 %v4115_v19, %v4115_v19  ;;  %v4117_v19 = vmax.f32 %v4116_v63, 0.0  ;;  %v1746_v13 = vpack.c.bf16 %v4119_v25, %v4119_v25  ;;  %1511 = vst.msk [vmem:[%s3868_s4 + $0x20] sm:$0xf] %vm1502_vm2, %v1738_v37  ;;  %1512 = vst.msk [vmem:[%s3868_s4 + $0x24] sm:$0xf] %vm1502_vm2, %v1739_v36  ;;  %v4122_v6 = vmax.f32 %v3066_v20, 0.0 }
 0x21d   :  { %v1747_v44 = vpack.c.bf16 %v4120_v58, %v4120_v58  ;;  %v1748_v1 = vpack.c.bf16 %v4121_v56, %v4121_v56  ;;  %v4123_v49 = vmax.f32 %v4078_v41, 0.0  ;;  %v4124_v3 = vmax.f32 %v4079_v47, 0.0  ;;  %1513 = vst.msk [vmem:[%s3868_s4 + $0x28] sm:$0xf] %vm1502_vm2, %v1740_v33  ;;  %1514 = vst.msk [vmem:[%s3868_s4 + $0x2c] sm:$0xf] %vm1502_vm2, %v1741_v46 }
 0x21e   :  { %v1744_v7 = vpack.c.bf16 %v4117_v19, %v4117_v19  ;;  %v1749_v59 = vpack.c.bf16 %v4122_v6, %v4122_v6  ;;  %1515 = vst.msk [vmem:[%s3868_s4 + $0x30] sm:$0xf] %vm1502_vm2, %v1742_v16  ;;  %1516 = vst.msk [vmem:[%s3868_s4 + $0x34] sm:$0xf] %vm1502_vm2, %v1743_v60  ;;  %v4125_v47 = vmax.f32 %v4080_v9, 0.0  ;;  %v4126_v20 = vmax.f32 %v4081_v40, 0.0 }
 0x21f   :  { %v1750_v4 = vpack.c.bf16 %v4123_v49, %v4123_v49  ;;  %v1751_v37 = vpack.c.bf16 %v4124_v3, %v4124_v3  ;;  %v4127_v36 = vmax.f32 %v4082_v42, 0.0  ;;  %v4128_v46 = vmax.f32 %v4083_v51, 0.0  ;;  %1518 = vst.msk [vmem:[%s3868_s4 + $0x3c] sm:$0xf] %vm1502_vm2, %v1745_v54  ;;  %1519 = vst.msk [vmem:[%s3868_s4 + $0x40] sm:$0xf] %vm1502_vm2, %v1746_v13 }
 0x220   :  { %v1752_v15 = vpack.c.bf16 %v4125_v47, %v4125_v47  ;;  %v1753_v41 = vpack.c.bf16 %v4126_v20, %v4126_v20  ;;  %1517 = vst.msk [vmem:[%s3868_s4 + $0x38] sm:$0xf] %vm1502_vm2, %v1744_v7  ;;  %1520 = vst.msk [vmem:[%s3868_s4 + $0x44] sm:$0xf] %vm1502_vm2, %v1747_v44  ;;  %v4129_v9 = vmax.f32 %v3094_v34, 0.0  ;;  %v4130_v42 = vmax.f32 %v3098_v53, 0.0 }
 0x221   :  { %v1754_v33 = vpack.c.bf16 %v4127_v36, %v4127_v36  ;;  %v1755_v35 = vpack.c.bf16 %v4128_v46, %v4128_v46  ;;  %v4131_v16 = vmax.f32 %v3102_v43, 0.0  ;;  %v4132_v60 = vmax.f32 %v3106_v24, 0.0  ;;  %1521 = vst.msk [vmem:[%s3868_s4 + $0x48] sm:$0xf] %vm1502_vm2, %v1748_v1  ;;  %1522 = vst.msk [vmem:[%s3868_s4 + $0x4c] sm:$0xf] %vm1502_vm2, %v1749_v59 }
 0x222   :  { %v1756_v40 = vpack.c.bf16 %v4129_v9, %v4129_v9  ;;  %v1757_v51 = vpack.c.bf16 %v4130_v42, %v4130_v42  ;;  %1523 = vst.msk [vmem:[%s3868_s4 + $0x50] sm:$0xf] %vm1502_vm2, %v1750_v4  ;;  %1524 = vst.msk [vmem:[%s3868_s4 + $0x54] sm:$0xf] %vm1502_vm2, %v1751_v37  ;;  %v4133_v34 = vmax.f32 %v3110_v31, 0.0  ;;  %v4134_v43 = vmax.f32 %v3114_v29, 0.0 }
 0x223   :  { %v1758_v57 = vpack.c.bf16 %v4131_v16, %v4131_v16  ;;  %v1759_v63 = vpack.c.bf16 %v4132_v60, %v4132_v60  ;;  %v4135_v19 = vmax.f32 %v3118_v45, 0.0  ;;  %v4136_v17 = vmax.f32 %v3122_v2, 0.0  ;;  %1525 = vst.msk [vmem:[%s3868_s4 + $0x58] sm:$0xf] %vm1502_vm2, %v1752_v15  ;;  %1526 = vst.msk [vmem:[%s3868_s4 + $0x5c] sm:$0xf] %vm1502_vm2, %v1753_v41 }
 0x224   :  { %v1760_v53 = vpack.c.bf16 %v4133_v34, %v4133_v34  ;;  %v1761_v24 = vpack.c.bf16 %v4134_v43, %v4134_v43  ;;  %1527 = vst.msk [vmem:[%s3868_s4 + $0x60] sm:$0xf] %vm1502_vm2, %v1754_v33  ;;  %1528 = vst.msk [vmem:[%s3868_s4 + $0x64] sm:$0xf] %vm1502_vm2, %v1755_v35  ;;  %v4137_v31 = vmax.f32 %v3126_v18, 0.0  ;;  %v4138_v45 = vmax.f32 %v3130_v39, 0.0 }
 0x225   :  { %v1762_v7 = vpack.c.bf16 %v4135_v19, %v4135_v19  ;;  %v1763_v54 = vpack.c.bf16 %v4136_v17, %v4136_v17  ;;  %v4139_v25 = vmax.f32 %v3134_v5, 0.0  ;;  %v4140_v58 = vmax.f32 %v3138_v10, 0.0  ;;  %1529 = vst.msk [vmem:[%s3868_s4 + $0x68] sm:$0xf] %vm1502_vm2, %v1756_v40  ;;  %1530 = vst.msk [vmem:[%s3868_s4 + $0x6c] sm:$0xf] %vm1502_vm2, %v1757_v51 }
 0x226   :  { %v1764_v29 = vpack.c.bf16 %v4137_v31, %v4137_v31  ;;  %v1765_v2 = vpack.c.bf16 %v4138_v45, %v4138_v45  ;;  %1531 = vst.msk [vmem:[%s3868_s4 + $0x70] sm:$0xf] %vm1502_vm2, %v1758_v57  ;;  %1532 = vst.msk [vmem:[%s3868_s4 + $0x74] sm:$0xf] %vm1502_vm2, %v1759_v63  ;;  %v4141_v18 = vmax.f32 %v3142_v8, 0.0  ;;  %v4142_v5 = vmax.f32 %v3146_v30, 0.0 }
 0x227   :  { %v1766_v13 = vpack.c.bf16 %v4139_v25, %v4139_v25  ;;  %v1767_v44 = vpack.c.bf16 %v4140_v58, %v4140_v58  ;;  %v4143_v56 = vmax.f32 %v3150_v11, 0.0  ;;  %v4144_v6 = vmax.f32 %v3154_v22, 0.0  ;;  %1533 = vst.msk [vmem:[%s3868_s4 + $0x78] sm:$0xf] %vm1502_vm2, %v1760_v53  ;;  %1534 = vst.msk [vmem:[%s3868_s4 + $0x7c] sm:$0xf] %vm1502_vm2, %v1761_v24 }
 0x228   :  { %v1768_v39 = vpack.c.bf16 %v4141_v18, %v4141_v18  ;;  %v1769_v10 = vpack.c.bf16 %v4142_v5, %v4142_v5  ;;  %1535 = vst.msk [vmem:[%s3868_s4 + $0x80] sm:$0xf] %vm1502_vm2, %v1762_v7  ;;  %1536 = vst.msk [vmem:[%s3868_s4 + $0x84] sm:$0xf] %vm1502_vm2, %v1763_v54  ;;  %v4145_v8 = vmax.f32 %v3158_v55, 0.0  ;;  %v4146_v11 = vld [vmem:[#allocation31_spill] sm:$0xff] }
 0x229   :  { %v1770_v1 = vpack.c.bf16 %v4143_v56, %v4143_v56  ;;  %v1771_v59 = vpack.c.bf16 %v4144_v6, %v4144_v6  ;;  %v4147_v22 = vmax.f32 %v4146_v11, 0.0  ;;  %v4148_v4 = vld [vmem:[#allocation2_spill] sm:$0xff]  ;;  %v4150_v47 = vld [vmem:[#allocation3_spill] sm:$0xff]  ;;  %1537 = vst.msk [vmem:[%s3868_s4 + $0x88] sm:$0xf] %vm1502_vm2, %v1764_v29  ;;  %v4152_v55 = vld [vmem:[#allocation4_spill] sm:$0xff] }
 0x22a   :  { %v1772_v30 = vpack.c.bf16 %v4145_v8, %v4145_v8  ;;  %v4149_v3 = vmax.f32 %v4148_v4, 0.0  ;;  %v4151_v15 = vmax.f32 %v4150_v47, 0.0  ;;  %1538 = vst.msk [vmem:[%s3868_s4 + $0x8c] sm:$0xf] %vm1502_vm2, %v1765_v2  ;;  %1539 = vst.msk [vmem:[%s3868_s4 + $0x90] sm:$0xf] %vm1502_vm2, %v1766_v13 }
 0x22b   :  { %v1773_v49 = vpack.c.bf16 %v4147_v22, %v4147_v22  ;;  %1540 = vst.msk [vmem:[%s3868_s4 + $0x94] sm:$0xf] %vm1502_vm2, %v1767_v44  ;;  %v4153_v41 = vmax.f32 %v4152_v55, 0.0  ;;  %v4154_v33 = vld [vmem:[#allocation5_spill] sm:$0xff]  ;;  %v4156_v9 = vld [vmem:[#allocation6_spill] sm:$0xff]  ;;  %v4158_v51 = vld [vmem:[#allocation7_spill] sm:$0xff] }
 0x22c   :  { %v1774_v37 = vpack.c.bf16 %v4149_v3, %v4149_v3  ;;  %v1775_v20 = vpack.c.bf16 %v4151_v15, %v4151_v15  ;;  %v4155_v46 = vmax.f32 %v4154_v33, 0.0  ;;  %v4157_v40 = vmax.f32 %v4156_v9, 0.0  ;;  %1541 = vst.msk [vmem:[%s3868_s4 + $0x98] sm:$0xf] %vm1502_vm2, %v1768_v39  ;;  %1542 = vst.msk [vmem:[%s3868_s4 + $0x9c] sm:$0xf] %vm1502_vm2, %v1769_v10 }
 0x22d   :  { %v1776_v36 = vpack.c.bf16 %v4153_v41, %v4153_v41  ;;  %v4159_v16 = vmax.f32 %v4158_v51, 0.0  ;;  %1543 = vst.msk [vmem:[%s3868_s4 + $0xa0] sm:$0xf] %vm1502_vm2, %v1770_v1  ;;  %1544 = vst.msk [vmem:[%s3868_s4 + $0xa4] sm:$0xf] %vm1502_vm2, %v1771_v59  ;;  %v4160_v60 = vld [vmem:[#allocation8_spill] sm:$0xff] }
 0x22e   :  { %v1777_v35 = vpack.c.bf16 %v4155_v46, %v4155_v46  ;;  %v1778_v42 = vpack.c.bf16 %v4157_v40, %v4157_v40  ;;  %v4161_v63 = vmax.f32 %v4160_v60, 0.0  ;;  %v4162_v53 = vld [vmem:[#allocation9_spill] sm:$0xff]  ;;  %v4164_v19 = vmax.f32 %v3198_v12, 0.0  ;;  %1545 = vst.msk [vmem:[%s3868_s4 + $0xa8] sm:$0xf] %vm1502_vm2, %v1772_v30  ;;  %v4168_v45 = vld [vmem:[#allocation12_spill] sm:$0xff] }
 0x22f   :  { %v1779_v57 = vpack.c.bf16 %v4159_v16, %v4159_v16  ;;  %v4163_v43 = vmax.f32 %v4162_v53, 0.0  ;;  %v4165_v17 = vmax.f32 %v3202_v14, 0.0  ;;  %1546 = vst.msk [vmem:[%s3868_s4 + $0xac] sm:$0xf] %vm1502_vm2, %v1773_v49  ;;  %1547 = vst.msk [vmem:[%s3868_s4 + $0xb0] sm:$0xf] %vm1502_vm2, %v1774_v37 }
 0x230   :  { %v1780_v34 = vpack.c.bf16 %v4161_v63, %v4161_v63  ;;  %v1782_v7 = vpack.c.bf16 %v4164_v19, %v4164_v19  ;;  %1548 = vst.msk [vmem:[%s3868_s4 + $0xb4] sm:$0xf] %vm1502_vm2, %v1775_v20  ;;  %v4166_v12 = vmax.f32 %v4084_v23, 0.0  ;;  %v4167_v31 = vmax.f32 %v4085_v27, 0.0  ;;  %v4170_v13 = vld [vmem:[#allocation34_spill] sm:$0xff]  ;;  %v4172_v23 = vld [vmem:[#allocation35_spill] sm:$0xff] }
 0x231   :  { %v1781_v24 = vpack.c.bf16 %v4163_v43, %v4163_v43  ;;  %v1783_v54 = vpack.c.bf16 %v4165_v17, %v4165_v17  ;;  %v4169_v2 = vmax.f32 %v4168_v45, 0.0  ;;  %v4171_v58 = vmax.f32 %v4170_v13, 0.0  ;;  %1549 = vst.msk [vmem:[%s3868_s4 + $0xb8] sm:$0xf] %vm1502_vm2, %v1776_v36  ;;  %1550 = vst.msk [vmem:[%s3868_s4 + $0xbc] sm:$0xf] %vm1502_vm2, %v1777_v35 }
 0x232   :  { %v1784_v14 = vpack.c.bf16 %v4166_v12, %v4166_v12  ;;  %v1785_v29 = vpack.c.bf16 %v4167_v31, %v4167_v31  ;;  %1551 = vst.msk [vmem:[%s3868_s4 + $0xc0] sm:$0xf] %vm1502_vm2, %v1778_v42  ;;  %1552 = vst.msk [vmem:[%s3868_s4 + $0xc4] sm:$0xf] %vm1502_vm2, %v1779_v57  ;;  %v4173_v27 = vmax.f32 %v4172_v23, 0.0  ;;  %v4174_v39 = vld [vmem:[#allocation36_spill] sm:$0xff] }
 0x233   :  { %v1786_v25 = vpack.c.bf16 %v4169_v2, %v4169_v2  ;;  %v1787_v44 = vpack.c.bf16 %v4171_v58, %v4171_v58  ;;  %v4175_v5 = vmax.f32 %v4174_v39, 0.0  ;;  %v4176_v56 = vld [vmem:[#allocation13_spill] sm:$0xff]  ;;  %v4178_v59 = vmax.f32 %v4091_v62, 0.0  ;;  %1553 = vst.msk [vmem:[%s3868_s4 + $0xc8] sm:$0xf] %vm1502_vm2, %v1780_v34 }
 0x234   :  { %v1788_v18 = vpack.c.bf16 %v4173_v27, %v4173_v27  ;;  %v4177_v1 = vmax.f32 %v4176_v56, 0.0  ;;  %1554 = vst.msk [vmem:[%s3868_s4 + $0xcc] sm:$0xf] %vm1502_vm2, %v1781_v24  ;;  %1555 = vst.msk [vmem:[%s3868_s4 + $0xd0] sm:$0xf] %vm1502_vm2, %v1782_v7  ;;  %v4179_v62 = vmax.f32 %v4092_v0, 0.0 }
 0x235   :  { %v1789_v10 = vpack.c.bf16 %v4175_v5, %v4175_v5  ;;  %v1791_v8 = vpack.c.bf16 %v4178_v59, %v4178_v59  ;;  %1556 = vst.msk [vmem:[%s3868_s4 + $0xd4] sm:$0xf] %vm1502_vm2, %v1783_v54  ;;  %v4180_v11 = vmax.f32 %v3242_v38, 0.0  ;;  %v4181_v49 = vmax.f32 %v3246_v61, 0.0  ;;  %1557 = vst.msk [vmem:[%s3868_s4 + $0xd8] sm:$0xf] %vm1502_vm2, %v1784_v14 }
 0x236   :  { %v1790_v6 = vpack.c.bf16 %v4177_v1, %v4177_v1  ;;  %v1792_v30 = vpack.c.bf16 %v4179_v62, %v4179_v62  ;;  %v4182_v3 = vmax.f32 %v3250_v26, 0.0  ;;  %1558 = vst.msk [vmem:[%s3868_s4 + $0xdc] sm:$0xf] %vm1502_vm2, %v1785_v29  ;;  %1559 = vst.msk [vmem:[%s3868_s4 + $0xe0] sm:$0xf] %vm1502_vm2, %v1786_v25  ;;  %v4183_v0 = vmax.f32 %v3254_v28, 0.0 }
 0x237   :  { %v1793_v22 = vpack.c.bf16 %v4180_v11, %v4180_v11  ;;  %v1794_v4 = vpack.c.bf16 %v4181_v49, %v4181_v49  ;;  %1560 = vst.msk [vmem:[%s3868_s4 + $0xe4] sm:$0xf] %vm1502_vm2, %v1787_v44  ;;  %v4184_v61 = vmax.f32 %v4093_v52, 0.0  ;;  %v4185_v47 = vmax.f32 %v4094_v32, 0.0  ;;  %1561 = vst.msk [vmem:[%s3868_s4 + $0xe8] sm:$0xf] %vm1502_vm2, %v1788_v18 }
 0x238   :  { %v1795_v37 = vpack.c.bf16 %v4182_v3, %v4182_v3  ;;  %v1796_v38 = vpack.c.bf16 %v4183_v0, %v4183_v0  ;;  %v4186_v20 = vmax.f32 %v4095_v21, 0.0  ;;  %1562 = vst.msk [vmem:[%s3868_s4 + $0xec] sm:$0xf] %vm1502_vm2, %v1789_v10  ;;  %1563 = vst.msk [vmem:[%s3868_s4 + $0xf0] sm:$0xf] %vm1502_vm2, %v1790_v6  ;;  %v4187_v52 = vmax.f32 %v4096_v48, 0.0 }
 0x239   :  { %v1797_v26 = vpack.c.bf16 %v4184_v61, %v4184_v61  ;;  %v1798_v15 = vpack.c.bf16 %v4185_v47, %v4185_v47  ;;  %1564 = vst.msk [vmem:[%s3868_s4 + $0xf4] sm:$0xf] %vm1502_vm2, %v1791_v8  ;;  %v4188_v21 = vmax.f32 %v4097_v50, 0.0  ;;  %v4189_v41 = vld [vmem:[#allocation25_spill] sm:$0xff]  ;;  %1565 = vst.msk [vmem:[%s3868_s4 + $0xf8] sm:$0xf] %vm1502_vm2, %v1792_v30 }
 0x23a   :  { %v1799_v55 = vpack.c.bf16 %v4186_v20, %v4186_v20  ;;  %v1800_v32 = vpack.c.bf16 %v4187_v52, %v4187_v52  ;;  %v4190_v36 = vmax.f32 %v4189_v41, 0.0  ;;  %1566 = vst.msk [vmem:[%s3868_s4 + $0xfc] sm:$0xf] %vm1502_vm2, %v1793_v22  ;;  %1567 = vst.msk [vmem:[%s3868_s4 + $0x100] sm:$0xf] %vm1502_vm2, %v1794_v4 }
 0x23b   :  { %v1801_v28 = vpack.c.bf16 %v4188_v21, %v4188_v21  ;;  %1568 = vst.msk [vmem:[%s3868_s4 + $0x104] sm:$0xf] %vm1502_vm2, %v1795_v37  ;;  %1569 = vst.msk [vmem:[%s3868_s4 + $0x108] sm:$0xf] %vm1502_vm2, %v1796_v38 }
 0x23c   :  { %v1802_v33 = vpack.c.bf16 %v4190_v36, %v4190_v36  ;;  %1570 = vst.msk [vmem:[%s3868_s4 + $0x10c] sm:$0xf] %vm1502_vm2, %v1797_v26  ;;  %1571 = vst.msk [vmem:[%s3868_s4 + $0x110] sm:$0xf] %vm1502_vm2, %v1798_v15 }
 0x23d   :  { %1572 = vst.msk [vmem:[%s3868_s4 + $0x114] sm:$0xf] %vm1502_vm2, %v1799_v55  ;;  %1573 = vst.msk [vmem:[%s3868_s4 + $0x118] sm:$0xf] %vm1502_vm2, %v1800_v32 }
 0x23e   :  { %1574 = vst.msk [vmem:[%s3868_s4 + $0x11c] sm:$0xf] %vm1502_vm2, %v1801_v28 }
 0x23f   :  { %1576 = vst.msk [vmem:[%s3868_s4 + $0x120] sm:$0x1] %vm1575_vm3, %v1802_v33 }

// kernel: stem_forward.11
= control target key start
LH: loop header
LB: loop body
LE: loop exit
PB: predicated region body
PF: predicated region fallthrough
CT: control target
= control target key end

     0   :  { %v2598_v0 = vmov 0   ;;  %v2599_v2 = vmov 0.0   ;;  %vm2600_vm0 = vmmov 0   ;;  %vm713_vm1 = vcmask 261120   ;;  %s4060_s1 = inlined_call_operand.vmem [shape: bf16[288,128], index: 1, kind: input, shape index: {}]   ;;  %s4061_s0 = inlined_call_operand.vmem [shape: bf16[464,288], index: 0, kind: input, shape index: {}]   ;;  %s4062_s2 = inlined_call_operand.vmem [shape: f32[1,128], index: 2, kind: input, shape index: {}]   ;;  %s4063_s3 = inlined_call_operand.vmem [shape: f32[1,128], index: 3, kind: input, shape index: {}]   ;;  %s4064_s4 = inlined_call_operand.vmem [shape: bf16[450,32], index: 4, kind: output, shape index: {}]  }
   0x1   :  { %801 = vmatprep.subr.bf16.mxu1 %v2598_v0  ;;  %v2462_v1 = vld [vmem:[%s4060_s1] sm:$0xff]   ;;  %2281 = vmatprep.subr.bf16.mxu0 %v2599_v2  ;;  %v2463_v3 = vld [vmem:[%s4060_s1 + $0x8] sm:$0xff]   ;;  %v2464_v4 = vld [vmem:[%s4060_s1 + $0x10] sm:$0xff]   ;;  %vm1939_vm2 = vcmask 257024   ;;  %vm1996_vm3 = vcmask 253952  }
   0x2   :  { %2285 = vmatprep.mubr.msk.bf16.mxu0 %vm2600_vm0, %v2599_v2  ;;  %802 = vmatpush1.bf16.msra.mxu1 %v2462_v1  ;;  %v2465_v5 = vld [vmem:[%s4060_s1 + $0x18] sm:$0xff]   ;;  %v2466_v6 = vld [vmem:[%s4060_s1 + $0x20] sm:$0xff]   ;;  %v2478_v8 = vld [vmem:[%s4060_s1 + $0x88] sm:$0xff]  }
   0x3   :  { %803 = vmatprep.subr.bf16.mxu1 %v2598_v0  ;;  %v2476_v7 = vld [vmem:[%s4060_s1 + $0x80] sm:$0xff]   ;;  %v2467_v9 = vld [vmem:[%s4060_s1 + $0x28] sm:$0xff]   ;;  %v2468_v12 = vld [vmem:[%s4060_s1 + $0x30] sm:$0xff]  }
   0x4   :  { %2282 = vmatpush3.bf16.msra.mxu0 %v2476_v7  ;;  %v2480_v10 = vld [vmem:[%s4061_s0 + $0x8] ss:$12 sps:$4 sm:$0xff]   ;;  %v2483_v11 = vld [vmem:[%s4061_s0 + $0x4] ss:$12 sps:$4 sm:$0xff]   ;;  %v2469_v13 = vld [vmem:[%s4060_s1 + $0x38] sm:$0xff]  }
   0x5   :  { %2283 = vmatprep.subr.bf16.mxu0 %v2599_v2  ;;  %833 = vmatprep.mubr.bf16.mxu1 %v2483_v11  ;;  %v2484_v14 = vld [vmem:[%s4061_s0 + $0x20] ss:$12 sps:$4 sm:$0xff]   ;;  %v2488_v17 = vld [vmem:[%s4061_s0 + $0x38] ss:$12 sps:$4 sm:$0xff]   ;;  %v2472_v18 = vld [vmem:[%s4060_s1 + $0x50] sm:$0xff]  }
   0x6   :  { %804 = vmatpush1.bf16.msra.mxu1 %v2463_v3  ;;  %v2470_v15 = vld [vmem:[%s4060_s1 + $0x40] sm:$0xff]   ;;  %v2471_v16 = vld [vmem:[%s4060_s1 + $0x48] sm:$0xff]   ;;  %v2473_v19 = vld [vmem:[%s4060_s1 + $0x58] sm:$0xff]  }
   0x7   :  { %805 = vmatprep.subr.bf16.mxu1 %v2598_v0  ;;  %v2492_v20 = vld [vmem:[%s4061_s0 + $0x50] ss:$12 sps:$4 sm:$0xff]   ;;  %v2474_v21 = vld [vmem:[%s4060_s1 + $0x60] sm:$0xff]   ;;  %v2475_v22 = vld [vmem:[%s4060_s1 + $0x68] sm:$0xff]  }
   0x8   :  { %2284 = vmatpush3.bf16.msra.mxu0 %v2478_v8  ;;  %v2496_v23 = vld [vmem:[%s4061_s0 + $0x68] ss:$12 sps:$4 sm:$0xff]   ;;  %v2479_v25 = vld [vmem:[%s4060_s1 + $0x78] sm:$0xff]   ;;  %v2500_v26 = vld [vmem:[%s4061_s0 + $0x80] ss:$12 sps:$4 sm:$0xff]  }
   0x9   :  { %v2477_v24 = vld [vmem:[%s4060_s1 + $0x70] sm:$0xff]   ;;  %v2481_v27 = vld [vmem:[%s4061_s0] ss:$12 sps:$4 sm:$0xff]   ;;  %v2485_v28 = vld [vmem:[%s4061_s0 + $0x1c] ss:$12 sps:$4 sm:$0xff]  }
   0xa   :  { %806 = vmatpush1.bf16.msra.mxu1 %v2464_v4  ;;  %v2504_v29 = vld [vmem:[%s4061_s0 + $0x98] ss:$12 sps:$4 sm:$0xff]   ;;  %v2489_v31 = vld [vmem:[%s4061_s0 + $0x34] ss:$12 sps:$4 sm:$0xff]   ;;  %v2508_v32 = vld [vmem:[%s4061_s0 + $0xb0] ss:$12 sps:$4 sm:$0xff]  }
   0xb   :  { %807 = vmatprep.subr.bf16.mxu1 %v2598_v0  ;;  %2286 = vmatmul.mubr.msk.bf16.vlgmr.msra.gmra.mrb[0].mxu0 %vm713_vm1, %v2480_v10  ;;  %v2487_v30 = vld [vmem:[%s4061_s0 + $0x18] ss:$12 sps:$4 sm:$0xff]   ;;  %v2491_v33 = vld [vmem:[%s4061_s0 + $0x30] ss:$12 sps:$4 sm:$0xff]   ;;  %v2512_v35 = vld [vmem:[%s4061_s0 + $0xc8] ss:$12 sps:$4 sm:$0xff]  }
   0xc   :  { %2289 = vmatprep.mubr.msk.bf16.mxu0 %vm2600_vm0, %v2599_v2  ;;  %v2493_v34 = vld [vmem:[%s4061_s0 + $0x4c] ss:$12 sps:$4 sm:$0xff]   ;;  %v2495_v36 = vld [vmem:[%s4061_s0 + $0x48] ss:$12 sps:$4 sm:$0xff]   ;;  %v2497_v37 = vld [vmem:[%s4061_s0 + $0x64] ss:$12 sps:$4 sm:$0xff]  }
   0xd   :  { %v2516_v38 = vld [vmem:[%s4061_s0 + $0xe0] ss:$12 sps:$4 sm:$0xff]   ;;  %v2501_v40 = vld [vmem:[%s4061_s0 + $0x7c] ss:$12 sps:$4 sm:$0xff]   ;;  %v2520_v41 = vld [vmem:[%s4061_s0 + $0xf8] ss:$12 sps:$4 sm:$0xff]  }
   0xe   :  { %808 = vmatpush1.bf16.msra.mxu1 %v2465_v5  ;;  %v2499_v39 = vld [vmem:[%s4061_s0 + $0x60] ss:$12 sps:$4 sm:$0xff]   ;;  %v2503_v42 = vld [vmem:[%s4061_s0 + $0x78] ss:$12 sps:$4 sm:$0xff]   ;;  %v2524_v44 = vld [vmem:[%s4061_s0 + $0x110] ss:$12 sps:$4 sm:$0xff]  }
   0xf   :  { %809 = vmatprep.subr.bf16.mxu1 %v2598_v0  ;;  %v2505_v43 = vld [vmem:[%s4061_s0 + $0x94] ss:$12 sps:$4 sm:$0xff]   ;;  %v2507_v45 = vld [vmem:[%s4061_s0 + $0x90] ss:$12 sps:$4 sm:$0xff]   ;;  %v2509_v46 = vld [vmem:[%s4061_s0 + $0xac] ss:$12 sps:$4 sm:$0xff]  }
  0x10   :  { %v2528_v47 = vld [vmem:[%s4061_s0 + $0x128] ss:$12 sps:$4 sm:$0xff]   ;;  %v2513_v49 = vld [vmem:[%s4061_s0 + $0xc4] ss:$12 sps:$4 sm:$0xff]   ;;  %v2532_v50 = vld [vmem:[%s4061_s0 + $0x140] ss:$12 sps:$4 sm:$0xff]  }
  0x11   :  { %v2511_v48 = vld [vmem:[%s4061_s0 + $0xa8] ss:$12 sps:$4 sm:$0xff]   ;;  %v2515_v51 = vld [vmem:[%s4061_s0 + $0xc0] ss:$12 sps:$4 sm:$0xff]   ;;  %v2536_v53 = vld [vmem:[%s4061_s0 + $0x158] ss:$12 sps:$4 sm:$0xff]  }
  0x12   :  { %810 = vmatpush1.bf16.msra.mxu1 %v2466_v6  ;;  %v2517_v52 = vld [vmem:[%s4061_s0 + $0xdc] ss:$12 sps:$4 sm:$0xff]   ;;  %v2519_v54 = vld [vmem:[%s4061_s0 + $0xd8] ss:$12 sps:$4 sm:$0xff]   ;;  %v2521_v55 = vld [vmem:[%s4061_s0 + $0xf4] ss:$12 sps:$4 sm:$0xff]  }
  0x13   :  { %811 = vmatprep.subr.bf16.mxu1 %v2598_v0  ;;  %2290 = vmatmul.mubr.msk.bf16.gmra.mrb[4].mxu0 %vm713_vm1, %v2484_v14  ;;  %v2540_v56 = vld [vmem:[%s4061_s0 + $0x170] ss:$12 sps:$4 sm:$0xff]   ;;  %v2525_v58 = vld [vmem:[%s4061_s0 + $0x10c] ss:$12 sps:$4 sm:$0xff]   ;;  %v2544_v59 = vld [vmem:[%s4061_s0 + $0x188] ss:$12 sps:$4 sm:$0xff]  }
  0x14   :  { %2293 = vmatprep.mubr.msk.bf16.mxu0 %vm2600_vm0, %v2599_v2  ;;  %v2523_v57 = vld [vmem:[%s4061_s0 + $0xf0] ss:$12 sps:$4 sm:$0xff]   ;;  %v2527_v60 = vld [vmem:[%s4061_s0 + $0x108] ss:$12 sps:$4 sm:$0xff]   ;;  %v2548_v62 = vld [vmem:[%s4061_s0 + $0x1a0] ss:$12 sps:$4 sm:$0xff]  }
  0x15   :  { %v2529_v61 = vld [vmem:[%s4061_s0 + $0x124] ss:$12 sps:$4 sm:$0xff]   ;;  %v2531_v63 = vld [vmem:[%s4061_s0 + $0x120] ss:$12 sps:$4 sm:$0xff]   ;;  %v2560_v8 = vld [vmem:[%s4061_s0 + $0x1e8] ss:$12 sps:$4 sm:$0xff]  }
  0x16   :  { %812 = vmatpush1.bf16.msra.mxu1 %v2467_v9  ;;  %v2552_v1 = vld [vmem:[%s4061_s0 + $0x1b8] ss:$12 sps:$4 sm:$0xff]   ;;  %v2537_v4 = vld [vmem:[%s4061_s0 + $0x154] ss:$12 sps:$4 sm:$0xff]   ;;  %v2556_v5 = vld [vmem:[%s4061_s0 + $0x1d0] ss:$12 sps:$4 sm:$0xff]  }
  0x17   :  { %813 = vmatprep.subr.bf16.mxu1 %v2598_v0  ;;  %v2535_v3 = vld [vmem:[%s4061_s0 + $0x138] ss:$12 sps:$4 sm:$0xff]   ;;  %v2539_v6 = vld [vmem:[%s4061_s0 + $0x150] ss:$12 sps:$4 sm:$0xff]   ;;  %v2543_v9 = vld [vmem:[%s4061_s0 + $0x168] ss:$12 sps:$4 sm:$0xff]  }
  0x18   :  { %v2541_v7 = vld [vmem:[%s4061_s0 + $0x16c] ss:$12 sps:$4 sm:$0xff]   ;;  %v2545_v10 = vld [vmem:[%s4061_s0 + $0x184] ss:$12 sps:$4 sm:$0xff]  }
  0x19   :  { %v2564_v11 = vld [vmem:[%s4061_s0 + $0x200] ss:$12 sps:$4 sm:$0xff]   ;;  %v2568_v14 = vld [vmem:[%s4061_s0 + $0x218] ss:$12 sps:$4 sm:$0xff]  }
  0x1a   :  { %814 = vmatpush1.bf16.msra.mxu1 %v2468_v12  ;;  %v2547_v12 = vld [vmem:[%s4061_s0 + $0x180] ss:$12 sps:$4 sm:$0xff]  }
  0x1b   :  { %815 = vmatprep.subr.bf16.mxu1 %v2598_v0  ;;  %2294 = vmatmul.mubr.msk.bf16.gmra.mrb[8].mxu0 %vm713_vm1, %v2488_v17  ;;  %v2572_v17 = vld [vmem:[%s4061_s0 + $0x230] ss:$12 sps:$4 sm:$0xff]  }
  0x1c   :  { %2297 = vmatprep.mubr.msk.bf16.mxu0 %vm2600_vm0, %v2599_v2 }
  0x1e   :  { %816 = vmatpush1.bf16.msra.mxu1 %v2469_v13  ;;  %v2549_v13 = vld [vmem:[%s4061_s0 + $0x19c] ss:$12 sps:$4 sm:$0xff]  }
  0x1f   :  { %817 = vmatprep.subr.bf16.mxu1 %v2598_v0 }
  0x22   :  { %818 = vmatpush1.bf16.msra.mxu1 %v2470_v15  ;;  %v2551_v15 = vld [vmem:[%s4061_s0 + $0x198] ss:$12 sps:$4 sm:$0xff]  }
  0x23   :  { %819 = vmatprep.subr.bf16.mxu1 %v2598_v0  ;;  %2298 = vmatmul.mubr.msk.bf16.gmra.mrb[12].mxu0 %vm713_vm1, %v2492_v20  ;;  %v2576_v20 = vld [vmem:[%s4061_s0 + $0x248] ss:$12 sps:$4 sm:$0xff]  }
  0x24   :  { %2301 = vmatprep.mubr.msk.bf16.mxu0 %vm2600_vm0, %v2599_v2 }
  0x26   :  { %820 = vmatpush1.bf16.msra.mxu1 %v2471_v16  ;;  %v2553_v16 = vld [vmem:[%s4061_s0 + $0x1b4] ss:$12 sps:$4 sm:$0xff]  }
  0x27   :  { %821 = vmatprep.subr.bf16.mxu1 %v2598_v0 }
  0x2a   :  { %822 = vmatpush1.bf16.msra.mxu1 %v2472_v18  ;;  %v2555_v18 = vld [vmem:[%s4061_s0 + $0x1b0] ss:$12 sps:$4 sm:$0xff]  }
  0x2b   :  { %823 = vmatprep.subr.bf16.mxu1 %v2598_v0  ;;  %2302 = vmatmul.mubr.msk.bf16.gmra.mrb[16].mxu0 %vm713_vm1, %v2496_v23  ;;  %v2580_v23 = vld [vmem:[%s4061_s0 + $0x260] ss:$12 sps:$4 sm:$0xff]  }
  0x2c   :  { %2305 = vmatprep.mubr.msk.bf16.mxu0 %vm2600_vm0, %v2599_v2 }
  0x2e   :  { %824 = vmatpush1.bf16.msra.mxu1 %v2473_v19  ;;  %v2557_v19 = vld [vmem:[%s4061_s0 + $0x1cc] ss:$12 sps:$4 sm:$0xff]  }
  0x2f   :  { %825 = vmatprep.subr.bf16.mxu1 %v2598_v0 }
  0x32   :  { %826 = vmatpush1.bf16.msra.mxu1 %v2474_v21  ;;  %v2559_v21 = vld [vmem:[%s4061_s0 + $0x1c8] ss:$12 sps:$4 sm:$0xff]  }
  0x33   :  { %827 = vmatprep.subr.bf16.mxu1 %v2598_v0  ;;  %2306 = vmatmul.mubr.msk.bf16.gmra.mrb[20].mxu0 %vm713_vm1, %v2500_v26  ;;  %v2584_v26 = vld [vmem:[%s4061_s0 + $0x278] ss:$12 sps:$4 sm:$0xff]  }
  0x34   :  { %2309 = vmatprep.mubr.msk.bf16.mxu0 %vm2600_vm0, %v2599_v2 }
  0x36   :  { %828 = vmatpush1.bf16.msra.mxu1 %v2475_v22  ;;  %v2561_v22 = vld [vmem:[%s4061_s0 + $0x1e4] ss:$12 sps:$4 sm:$0xff]  }
  0x37   :  { %829 = vmatprep.subr.bf16.mxu1 %v2598_v0 }
  0x3a   :  { %830 = vmatpush1.bf16.msra.mxu1 %v2477_v24  ;;  %v2563_v24 = vld [vmem:[%s4061_s0 + $0x1e0] ss:$12 sps:$4 sm:$0xff]  }
  0x3b   :  { %831 = vmatprep.subr.bf16.mxu1 %v2598_v0  ;;  %2310 = vmatmul.mubr.msk.bf16.gmra.mrb[24].mxu0 %vm713_vm1, %v2504_v29  ;;  %v2533_v0 = vld [vmem:[%s4061_s0 + $0x13c] ss:$12 sps:$4 sm:$0xff]  }
  0x3c   :  { %2313 = vmatprep.mubr.msk.bf16.mxu0 %vm2600_vm0, %v2599_v2 }
  0x3e   :  { %832 = vmatpush1.bf16.msra.mxu1 %v2479_v25  ;;  %v2565_v25 = vld [vmem:[%s4061_s0 + $0x1fc] ss:$12 sps:$4 sm:$0xff]  }
  0x41   :  { %834 = vmatmul.mubr.bf16.vlgmr.msra.gmra.mrb[0].mxu1 %v2481_v27  ;;  %v2567_v27 = vld [vmem:[%s4061_s0 + $0x1f8] ss:$12 sps:$4 sm:$0xff]  }
  0x42   :  { %841 = vmatprep.mubr.bf16.mxu1 %v2485_v28  ;;  %v2569_v28 = vld [vmem:[%s4061_s0 + $0x214] ss:$12 sps:$4 sm:$0xff]  }
  0x43   :  { %2314 = vmatmul.mubr.msk.bf16.gmra.mrb[28].mxu0 %vm713_vm1, %v2508_v32 }
  0x44   :  { %2317 = vmatprep.mubr.msk.bf16.mxu0 %vm2600_vm0, %v2599_v2 }
  0x49   :  { %842 = vmatmul.mubr.bf16.gmra.mrb[4].mxu1 %v2487_v30 }
  0x4a   :  { %849 = vmatprep.mubr.bf16.mxu1 %v2489_v31  ;;  %v2588_v31 = vld [vmem:[%s4061_s0 + $0x290] ss:$12 sps:$4 sm:$0xff]  }
  0x4b   :  { %2318 = vmatmul.mubr.msk.bf16.gmra.mrb[32].mxu0 %vm713_vm1, %v2512_v35  ;;  %v2573_v35 = vld [vmem:[%s4061_s0 + $0x22c] ss:$12 sps:$4 sm:$0xff]  }
  0x4c   :  { %2321 = vmatprep.mubr.msk.bf16.mxu0 %vm2600_vm0, %v2599_v2 }
  0x51   :  { %850 = vmatmul.mubr.bf16.gmra.mrb[8].mxu1 %v2491_v33  ;;  %v2571_v33 = vld [vmem:[%s4061_s0 + $0x210] ss:$12 sps:$4 sm:$0xff]  }
  0x52   :  { %857 = vmatprep.mubr.bf16.mxu1 %v2493_v34 }
  0x53   :  { %2322 = vmatmul.mubr.msk.bf16.gmra.mrb[36].mxu0 %vm713_vm1, %v2516_v38  ;;  %v2592_v38 = vld [vmem:[%s4061_s0 + $0x2a8] ss:$12 sps:$4 sm:$0xff]  }
  0x54   :  { %2325 = vmatprep.mubr.msk.bf16.mxu0 %vm2600_vm0, %v2599_v2 }
  0x59   :  { %858 = vmatmul.mubr.bf16.gmra.mrb[12].mxu1 %v2495_v36 }
  0x5a   :  { %865 = vmatprep.mubr.bf16.mxu1 %v2497_v37 }
  0x5b   :  { %2326 = vmatmul.mubr.msk.bf16.gmra.mrb[40].mxu0 %vm713_vm1, %v2520_v41 }
  0x5c   :  { %2329 = vmatprep.mubr.msk.bf16.mxu0 %vm2600_vm0, %v2599_v2 }
  0x61   :  { %866 = vmatmul.mubr.bf16.gmra.mrb[16].mxu1 %v2499_v39 }
  0x62   :  { %873 = vmatprep.mubr.bf16.mxu1 %v2501_v40  ;;  %v2575_v40 = vld [vmem:[%s4061_s0 + $0x228] ss:$12 sps:$4 sm:$0xff]  }
  0x63   :  { %2330 = vmatmul.mubr.msk.bf16.gmra.mrb[44].mxu0 %vm713_vm1, %v2524_v44 }
  0x64   :  { %2333 = vmatprep.mubr.msk.bf16.mxu0 %vm2600_vm0, %v2599_v2 }
  0x69   :  { %874 = vmatmul.mubr.bf16.gmra.mrb[20].mxu1 %v2503_v42  ;;  %v2577_v42 = vld [vmem:[%s4061_s0 + $0x244] ss:$12 sps:$4 sm:$0xff]  }
  0x6a   :  { %881 = vmatprep.mubr.bf16.mxu1 %v2505_v43 }
  0x6b   :  { %2334 = vmatmul.mubr.msk.bf16.gmra.mrb[48].mxu0 %vm713_vm1, %v2528_v47  ;;  %v2581_v47 = vld [vmem:[%s4061_s0 + $0x25c] ss:$12 sps:$4 sm:$0xff]  }
  0x6c   :  { %2337 = vmatprep.mubr.msk.bf16.mxu0 %vm2600_vm0, %v2599_v2 }
  0x71   :  { %882 = vmatmul.mubr.bf16.gmra.mrb[24].mxu1 %v2507_v45  ;;  %v2579_v45 = vld [vmem:[%s4061_s0 + $0x240] ss:$12 sps:$4 sm:$0xff]  }
  0x72   :  { %889 = vmatprep.mubr.bf16.mxu1 %v2509_v46 }
  0x73   :  { %2338 = vmatmul.mubr.msk.bf16.gmra.mrb[52].mxu0 %vm713_vm1, %v2532_v50 }
  0x74   :  { %2341 = vmatprep.mubr.msk.bf16.mxu0 %vm2600_vm0, %v2599_v2 }
  0x79   :  { %890 = vmatmul.mubr.bf16.gmra.mrb[28].mxu1 %v2511_v48 }
  0x7a   :  { %897 = vmatprep.mubr.bf16.mxu1 %v2513_v49 }
  0x7b   :  { %2342 = vmatmul.mubr.msk.bf16.gmra.mrb[56].mxu0 %vm713_vm1, %v2536_v53  ;;  %v2585_v53 = vld [vmem:[%s4061_s0 + $0x274] ss:$12 sps:$4 sm:$0xff]  }
  0x7c   :  { %2345 = vmatprep.mubr.msk.bf16.mxu0 %vm2600_vm0, %v2599_v2 }
  0x81   :  { %898 = vmatmul.mubr.bf16.gmra.mrb[32].mxu1 %v2515_v51  ;;  %v2583_v51 = vld [vmem:[%s4061_s0 + $0x258] ss:$12 sps:$4 sm:$0xff]  }
  0x82   :  { %905 = vmatprep.mubr.bf16.mxu1 %v2517_v52 }
  0x83   :  { %2346 = vmatmul.mubr.msk.bf16.gmra.mrb[60].mxu0 %vm713_vm1, %v2540_v56 }
  0x84   :  { %2349 = vmatprep.mubr.msk.bf16.mxu0 %vm2600_vm0, %v2599_v2 }
  0x89   :  { %906 = vmatmul.mubr.bf16.gmra.mrb[36].mxu1 %v2519_v54 }
  0x8a   :  { %913 = vmatprep.mubr.bf16.mxu1 %v2521_v55 }
  0x8b   :  { %2350 = vmatmul.mubr.msk.bf16.gmra.mrb[64].mxu0 %vm713_vm1, %v2544_v59  ;;  %v2589_v59 = vld [vmem:[%s4061_s0 + $0x28c] ss:$12 sps:$4 sm:$0xff]  }
  0x8c   :  { %2353 = vmatprep.mubr.msk.bf16.mxu0 %vm2600_vm0, %v2599_v2 }
  0x91   :  { %914 = vmatmul.mubr.bf16.gmra.mrb[40].mxu1 %v2523_v57  ;;  %v2587_v57 = vld [vmem:[%s4061_s0 + $0x270] ss:$12 sps:$4 sm:$0xff]  }
  0x92   :  { %921 = vmatprep.mubr.bf16.mxu1 %v2525_v58 }
  0x93   :  { %2354 = vmatmul.mubr.msk.bf16.gmra.mrb[68].mxu0 %vm713_vm1, %v2548_v62 }
  0x94   :  { %2357 = vmatprep.mubr.msk.bf16.mxu0 %vm2600_vm0, %v2599_v2 }
  0x99   :  { %922 = vmatmul.mubr.bf16.gmra.mrb[44].mxu1 %v2527_v60 }
  0x9a   :  { %929 = vmatprep.mubr.bf16.mxu1 %v2529_v61 }
  0x9b   :  { %2358 = vmatmul.mubr.msk.bf16.gmra.mrb[72].mxu0 %vm713_vm1, %v2552_v1 }
  0x9c   :  { %2361 = vmatprep.mubr.msk.bf16.mxu0 %vm2600_vm0, %v2599_v2 }
  0xa1   :  { %930 = vmatmul.mubr.bf16.gmra.mrb[48].mxu1 %v2531_v63 }
  0xa2   :  { %937 = vmatprep.mubr.bf16.mxu1 %v2533_v0 }
  0xa3   :  { %2362 = vmatmul.mubr.msk.bf16.gmra.mrb[76].mxu0 %vm713_vm1, %v2556_v5 }
  0xa4   :  { %2365 = vmatprep.mubr.msk.bf16.mxu0 %vm2600_vm0, %v2599_v2 }
  0xa9   :  { %938 = vmatmul.mubr.bf16.gmra.mrb[52].mxu1 %v2535_v3  ;;  %v2591_v3 = vld [vmem:[%s4061_s0 + $0x288] ss:$12 sps:$4 sm:$0xff]  }
  0xaa   :  { %945 = vmatprep.mubr.bf16.mxu1 %v2537_v4 }
  0xab   :  { %2366 = vmatmul.mubr.msk.bf16.gmra.mrb[80].mxu0 %vm713_vm1, %v2560_v8 }
  0xac   :  { %2369 = vmatprep.mubr.msk.bf16.mxu0 %vm2600_vm0, %v2599_v2 }
  0xb1   :  { %946 = vmatmul.mubr.bf16.gmra.mrb[56].mxu1 %v2539_v6  ;;  %v2593_v6 = vld [vmem:[%s4061_s0 + $0x2a4] ss:$12 sps:$4 sm:$0xff]  }
  0xb2   :  { %953 = vmatprep.mubr.bf16.mxu1 %v2541_v7 }
  0xb3   :  { %2370 = vmatmul.mubr.msk.bf16.gmra.mrb[84].mxu0 %vm713_vm1, %v2564_v11 }
  0xb4   :  { %2373 = vmatprep.mubr.msk.bf16.mxu0 %vm2600_vm0, %v2599_v2 }
  0xb9   :  { %954 = vmatmul.mubr.bf16.gmra.mrb[60].mxu1 %v2543_v9 }
  0xba   :  { %961 = vmatprep.mubr.bf16.mxu1 %v2545_v10 }
  0xbb   :  { %2374 = vmatmul.mubr.msk.bf16.gmra.mrb[88].mxu0 %vm713_vm1, %v2568_v14 }
  0xbc   :  { %2377 = vmatprep.mubr.msk.bf16.mxu0 %vm2600_vm0, %v2599_v2 }
  0xc1   :  { %962 = vmatmul.mubr.bf16.gmra.mrb[64].mxu1 %v2547_v12 }
  0xc2   :  { %969 = vmatprep.mubr.bf16.mxu1 %v2549_v13 }
  0xc3   :  { %2378 = vmatmul.mubr.msk.bf16.gmra.mrb[92].mxu0 %vm713_vm1, %v2572_v17 }
  0xc4   :  { %2381 = vmatprep.mubr.msk.bf16.mxu0 %vm2600_vm0, %v2599_v2 }
  0xc9   :  { %970 = vmatmul.mubr.bf16.gmra.mrb[68].mxu1 %v2551_v15  ;;  %v2595_v15 = vld [vmem:[%s4061_s0 + $0x2a0] ss:$12 sps:$4 sm:$0xff]  }
  0xca   :  { %977 = vmatprep.mubr.bf16.mxu1 %v2553_v16 }
  0xcb   :  { %2382 = vmatmul.mubr.msk.bf16.gmra.mrb[96].mxu0 %vm713_vm1, %v2576_v20 }
  0xcc   :  { %2385 = vmatprep.mubr.msk.bf16.mxu0 %vm2600_vm0, %v2599_v2 }
  0xd1   :  { %978 = vmatmul.mubr.bf16.gmra.mrb[72].mxu1 %v2555_v18 }
  0xd2   :  { %985 = vmatprep.mubr.bf16.mxu1 %v2557_v19 }
  0xd3   :  { %2386 = vmatmul.mubr.msk.bf16.gmra.mrb[100].mxu0 %vm713_vm1, %v2580_v23 }
  0xd4   :  { %2389 = vmatprep.mubr.msk.bf16.mxu0 %vm2600_vm0, %v2599_v2 }
  0xd9   :  { %986 = vmatmul.mubr.bf16.gmra.mrb[76].mxu1 %v2559_v21 }
  0xda   :  { %993 = vmatprep.mubr.bf16.mxu1 %v2561_v22 }
  0xdb   :  { %2390 = vmatmul.mubr.msk.bf16.gmra.mrb[104].mxu0 %vm713_vm1, %v2584_v26 }
  0xdc   :  { %2393 = vmatprep.mubr.msk.bf16.mxu0 %vm2600_vm0, %v2599_v2 }
  0xde   :  { %v1100_v29 = vpop.f32.mrb[0].mxu0 }
  0xdf   :  { %v2287_v30 = vpop.f32.mrb[1].mxu0 }
  0xe0   :  { %v1103_v32 = vpop.f32.mrb[2].mxu0 }
  0xe1   :  { %994 = vmatmul.mubr.bf16.gmra.mrb[80].mxu1 %v2563_v24  ;;  %v2288_v34 = vpop.f32.mrb[3].mxu0 }
  0xe2   :  { %1001 = vmatprep.mubr.bf16.mxu1 %v2565_v25 }
  0xe3   :  { %2394 = vmatmul.mubr.msk.bf16.gmra.mrb[108].mxu0 %vm713_vm1, %v2588_v31 }
  0xe4   :  { %2397 = vmatprep.mubr.msk.bf16.mxu0 %vm2600_vm0, %v2599_v2 }
  0xe6   :  { %v1108_v36 = vpop.f32.mrb[4].mxu0 }
  0xe7   :  { %v2291_v37 = vpop.f32.mrb[5].mxu0 }
  0xe8   :  { %v1111_v39 = vpop.f32.mrb[6].mxu0 }
  0xe9   :  { %1002 = vmatmul.mubr.bf16.gmra.mrb[84].mxu1 %v2567_v27  ;;  %v2292_v41 = vpop.f32.mrb[7].mxu0 }
  0xea   :  { %1009 = vmatprep.mubr.bf16.mxu1 %v2569_v28 }
  0xeb   :  { %2398 = vmatmul.mubr.msk.bf16.gmra.mrb[112].mxu0 %vm713_vm1, %v2592_v38 }
  0xee   :  { %v1116_v2 = vpop.f32.mrb[8].mxu0 }
  0xef   :  { %v2295_v43 = vpop.f32.mrb[9].mxu0 }
  0xf0   :  { %v1119_v44 = vpop.f32.mrb[10].mxu0 }
  0xf1   :  { %1010 = vmatmul.mubr.bf16.gmra.mrb[88].mxu1 %v2571_v33  ;;  %v2296_v46 = vpop.f32.mrb[11].mxu0 }
  0xf2   :  { %1017 = vmatprep.mubr.bf16.mxu1 %v2573_v35 }
  0xf6   :  { %v1124_v48 = vpop.f32.mrb[12].mxu0 }
  0xf7   :  { %v2299_v49 = vpop.f32.mrb[13].mxu0 }
  0xf8   :  { %v1127_v50 = vpop.f32.mrb[14].mxu0 }
  0xf9   :  { %1018 = vmatmul.mubr.bf16.gmra.mrb[92].mxu1 %v2575_v40  ;;  %v2300_v52 = vpop.f32.mrb[15].mxu0 }
  0xfa   :  { %1025 = vmatprep.mubr.bf16.mxu1 %v2577_v42 }
  0xfe   :  { %v1132_v54 = vpop.f32.mrb[16].mxu0 }
  0xff   :  { %v2303_v55 = vpop.f32.mrb[17].mxu0 }
 0x100   :  { %v1135_v56 = vpop.f32.mrb[18].mxu0 }
 0x101   :  { %1026 = vmatmul.mubr.bf16.gmra.mrb[96].mxu1 %v2579_v45  ;;  %v2304_v58 = vpop.f32.mrb[19].mxu0 }
 0x102   :  { %1033 = vmatprep.mubr.bf16.mxu1 %v2581_v47 }
 0x106   :  { %v1140_v60 = vpop.f32.mrb[20].mxu0 }
 0x107   :  { %v2307_v61 = vpop.f32.mrb[21].mxu0 }
 0x108   :  { %v1143_v63 = vpop.f32.mrb[22].mxu0 }
 0x109   :  { %1034 = vmatmul.mubr.bf16.gmra.mrb[100].mxu1 %v2583_v51  ;;  %v2308_v4 = vpop.f32.mrb[23].mxu0 }
 0x10a   :  { %1041 = vmatprep.mubr.bf16.mxu1 %v2585_v53 }
 0x10e   :  { %v1148_v9 = vpop.f32.mrb[24].mxu0 }
 0x10f   :  { %v2311_v10 = vpop.f32.mrb[25].mxu0 }
 0x110   :  { %v1151_v12 = vpop.f32.mrb[26].mxu0 }
 0x111   :  { %1042 = vmatmul.mubr.bf16.gmra.mrb[104].mxu1 %v2587_v57  ;;  %v2312_v16 = vpop.f32.mrb[27].mxu0 }
 0x112   :  { %1049 = vmatprep.mubr.bf16.mxu1 %v2589_v59 }
 0x114   :  { %v835_v62 = vpop.f32.mrb[0].mxu1 }
 0x115   :  { %v3037_v0 = vadd.f32 %v1100_v29, %v835_v62  ;;  %v837_v1 = vpop.f32.mrb[1].mxu1 }
 0x116   :  { %v838_v5 = vpop.f32.mrb[2].mxu1  ;;  %v1156_v20 = vpop.f32.mrb[28].mxu0 }
 0x117   :  { %v3045_v7 = vadd.f32 %v1103_v32, %v838_v5  ;;  %v840_v8 = vpop.f32.mrb[3].mxu1  ;;  %v2315_v21 = vpop.f32.mrb[29].mxu0 }
 0x118   :  { %v1159_v23 = vpop.f32.mrb[30].mxu0  ;;  %v1395_v21 = vmul.f32 %v3037_v0, %v3037_v0 }
 0x119   :  { %1050 = vmatmul.mubr.bf16.gmra.mrb[108].mxu1 %v2591_v3  ;;  %v2316_v26 = vpop.f32.mrb[31].mxu0 }
 0x11a   :  { %1057 = vmatprep.mubr.bf16.mxu1 %v2593_v6 }
 0x11c   :  { %v843_v11 = vpop.f32.mrb[4].mxu1 }
 0x11d   :  { %v3047_v13 = vadd.f32 %v1108_v36, %v843_v11  ;;  %v845_v14 = vpop.f32.mrb[5].mxu1 }
 0x11e   :  { %v846_v17 = vpop.f32.mrb[6].mxu1  ;;  %v3058_v30 = vpop.f32.mrb[32].mxu0 }
 0x11f   :  { %v3052_v18 = vadd.f32 %v1111_v39, %v846_v17  ;;  %v848_v19 = vpop.f32.mrb[7].mxu1  ;;  %v2319_v31 = vpop.f32.mrb[33].mxu0 }
 0x120   :  { %v3060_v33 = vpop.f32.mrb[34].mxu0 }
 0x121   :  { %1058 = vmatmul.mubr.bf16.gmra.mrb[112].mxu1 %v2595_v15  ;;  %v2320_v36 = vpop.f32.mrb[35].mxu0  ;;  %v1396_v15 = vmul.f32 %v3045_v7, %v3045_v7 }
 0x124   :  { %v851_v22 = vpop.f32.mrb[8].mxu1 }
 0x125   :  { %v3054_v24 = vadd.f32 %v1116_v2, %v851_v22  ;;  %v853_v25 = vpop.f32.mrb[9].mxu1  ;;  %v1397_v22 = vmul.f32 %v3047_v13, %v3047_v13 }
 0x126   :  { %v854_v27 = vpop.f32.mrb[10].mxu1  ;;  %v3066_v40 = vpop.f32.mrb[36].mxu0 }
 0x127   :  { %v3056_v28 = vadd.f32 %v1119_v44, %v854_v27  ;;  %v856_v29 = vpop.f32.mrb[11].mxu1  ;;  %v2323_v41 = vpop.f32.mrb[37].mxu0  ;;  %v1453_v27 = vadd.f32 %v1396_v15, %v1395_v21 }
 0x128   :  { %v3068_v2 = vpop.f32.mrb[38].mxu0 }
 0x129   :  { %v2324_v45 = vpop.f32.mrb[39].mxu0  ;;  %v1454_v31 = vadd.f32 %v1453_v27, %v1397_v22 }
 0x12c   :  { %v859_v32 = vpop.f32.mrb[12].mxu1 }
 0x12d   :  { %v3062_v34 = vadd.f32 %v1124_v48, %v859_v32  ;;  %v861_v35 = vpop.f32.mrb[13].mxu1  ;;  %v1398_v32 = vmul.f32 %v3052_v18, %v3052_v18 }
 0x12e   :  { %v862_v37 = vpop.f32.mrb[14].mxu1  ;;  %v3074_v49 = vpop.f32.mrb[40].mxu0 }
 0x12f   :  { %v3064_v38 = vadd.f32 %v1127_v50, %v862_v37  ;;  %v864_v39 = vpop.f32.mrb[15].mxu1  ;;  %v2327_v51 = vpop.f32.mrb[41].mxu0 }
 0x130   :  { %v3076_v52 = vpop.f32.mrb[42].mxu0 }
 0x131   :  { %v2328_v57 = vpop.f32.mrb[43].mxu0 }
 0x132   :  { %v1400_v57 = vmul.f32 %v3056_v28, %v3056_v28 }
 0x134   :  { %v867_v42 = vpop.f32.mrb[16].mxu1 }
 0x135   :  { %v3070_v43 = vadd.f32 %v1132_v54, %v867_v42  ;;  %v869_v44 = vpop.f32.mrb[17].mxu1 }
 0x136   :  { %v870_v46 = vpop.f32.mrb[18].mxu1  ;;  %v3082_v61 = vpop.f32.mrb[44].mxu0 }
 0x137   :  { %v3072_v47 = vadd.f32 %v1135_v56, %v870_v46  ;;  %v872_v48 = vpop.f32.mrb[19].mxu1  ;;  %v2331_v62 = vpop.f32.mrb[45].mxu0  ;;  %v1455_v46 = vadd.f32 %v1454_v31, %v1398_v32 }
 0x138   :  { %v3084_v1 = vpop.f32.mrb[46].mxu0 }
 0x139   :  { %v2332_v5 = vpop.f32.mrb[47].mxu0 }
 0x13c   :  { %v875_v50 = vpop.f32.mrb[20].mxu1 }
 0x13d   :  { %v3078_v53 = vadd.f32 %v1140_v60, %v875_v50  ;;  %v877_v55 = vpop.f32.mrb[21].mxu1 }
 0x13e   :  { %v878_v58 = vpop.f32.mrb[22].mxu1  ;;  %v3090_v10 = vpop.f32.mrb[48].mxu0 }
 0x13f   :  { %v3080_v59 = vadd.f32 %v1143_v63, %v878_v58  ;;  %v880_v54 = vpop.f32.mrb[23].mxu1  ;;  %v2335_v11 = vpop.f32.mrb[49].mxu0 }
 0x140   :  { %v3092_v14 = vpop.f32.mrb[50].mxu0 }
 0x144   :  { %v883_v56 = vpop.f32.mrb[24].mxu1 }
 0x145   :  { %v3086_v3 = vadd.f32 %v1148_v9, %v883_v56  ;;  %v885_v4 = vpop.f32.mrb[25].mxu1  ;;  %v2336_v9 = vpop.f32.mrb[51].mxu0 }
 0x146   :  { %v886_v6 = vpop.f32.mrb[26].mxu1 }
 0x147   :  { %v3088_v8 = vadd.f32 %v1151_v12, %v886_v6  ;;  %v888_v60 = vpop.f32.mrb[27].mxu1  ;;  %v1331_v12 = vadd.f32 %v3045_v7, %v3037_v0 }
 0x149   :  { %v1332_v29 = vadd.f32 %v1331_v12, %v3047_v13  ;;  %v1403_v12 = vmul.f32 %v3070_v43, %v3070_v43 }
 0x14b   :  { %v1333_v39 = vadd.f32 %v1332_v29, %v3052_v18 }
 0x14c   :  { %v891_v63 = vpop.f32.mrb[28].mxu1 }
 0x14d   :  { %v3096_v16 = vadd.f32 %v1156_v20, %v891_v63  ;;  %v893_v17 = vpop.f32.mrb[29].mxu1  ;;  %v3107_v20 = vpop.f32.mrb[52].mxu0  ;;  %v1334_v48 = vadd.f32 %v1333_v39, %v3054_v24 }
 0x14e   :  { %v894_v19 = vpop.f32.mrb[30].mxu1  ;;  %v2339_v35 = vpop.f32.mrb[53].mxu0  ;;  %v1402_v17 = vmul.f32 %v3064_v38, %v3064_v38 }
 0x14f   :  { %v3104_v25 = vadd.f32 %v1159_v23, %v894_v19  ;;  %v896_v26 = vpop.f32.mrb[31].mxu1  ;;  %v3111_v37 = vpop.f32.mrb[54].mxu0  ;;  %v1399_v23 = vmul.f32 %v3054_v24, %v3054_v24  ;;  %v1335_v54 = vadd.f32 %v1334_v48, %v3056_v28 }
 0x150   :  { %v2340_v44 = vpop.f32.mrb[55].mxu0 }
 0x151   :  { %v1456_v55 = vadd.f32 %v1455_v46, %v1399_v23  ;;  %v3125_v58 = vpop.f32.mrb[56].mxu0  ;;  %v1405_v44 = vmul.f32 %v3078_v53, %v3078_v53 }
 0x152   :  { %v2343_v62 = vpop.f32.mrb[57].mxu0 }
 0x153   :  { %v3130_v4 = vpop.f32.mrb[58].mxu0  ;;  %v1457_v5 = vadd.f32 %v1456_v55, %v1400_v57 }
 0x154   :  { %v899_v36 = vpop.f32.mrb[32].mxu1  ;;  %v2344_v11 = vpop.f32.mrb[59].mxu0 }
 0x155   :  { %v3117_v41 = vadd.f32 %v3058_v30, %v899_v36  ;;  %v901_v42 = vpop.f32.mrb[33].mxu1  ;;  %v1401_v30 = vmul.f32 %v3062_v34, %v3062_v34 }
 0x156   :  { %v902_v45 = vpop.f32.mrb[34].mxu1  ;;  %v3144_v22 = vpop.f32.mrb[60].mxu0 }
 0x157   :  { %v3121_v51 = vadd.f32 %v3060_v33, %v902_v45  ;;  %v904_v50 = vpop.f32.mrb[35].mxu1  ;;  %v1336_v33 = vadd.f32 %v1335_v54, %v3062_v34  ;;  %v1458_v15 = vadd.f32 %v1457_v5, %v1401_v30  ;;  %v2347_v27 = vpop.f32.mrb[61].mxu0 }
 0x158   :  { %v3147_v31 = vpop.f32.mrb[62].mxu0 }
 0x159   :  { %v1337_v21 = vadd.f32 %v1336_v33, %v3064_v38  ;;  %v2348_v39 = vpop.f32.mrb[63].mxu0 }
 0x15b   :  { %v1338_v26 = vadd.f32 %v1337_v21, %v3070_v43 }
 0x15c   :  { %v907_v56 = vpop.f32.mrb[36].mxu1 }
 0x15d   :  { %v3134_v6 = vadd.f32 %v3066_v40, %v907_v56  ;;  %v909_v60 = vpop.f32.mrb[37].mxu1  ;;  %v1459_v40 = vadd.f32 %v1458_v15, %v1402_v17  ;;  %v1339_v42 = vadd.f32 %v1338_v26, %v3072_v47 }
 0x15e   :  { %v910_v63 = vpop.f32.mrb[38].mxu1  ;;  %v3161_v55 = vpop.f32.mrb[64].mxu0 }
 0x15f   :  { %v3139_v9 = vadd.f32 %v3068_v2, %v910_v63  ;;  %v912_v19 = vpop.f32.mrb[39].mxu1  ;;  %v1460_v32 = vadd.f32 %v1459_v40, %v1403_v12  ;;  %v1404_v2 = vmul.f32 %v3072_v47, %v3072_v47  ;;  %v1340_v50 = vadd.f32 %v1339_v42, %v3078_v53  ;;  %v2351_v54 = vpop.f32.mrb[65].mxu0 }
 0x160   :  { %v3165_v62 = vpop.f32.mrb[66].mxu0  ;;  %v1408_v12 = vmul.f32 %v3088_v8, %v3088_v8 }
 0x161   :  { %v1461_v48 = vadd.f32 %v1460_v32, %v1404_v2  ;;  %v1341_v56 = vadd.f32 %v1340_v50, %v3080_v59  ;;  %v2352_v60 = vpop.f32.mrb[67].mxu0 }
 0x163   :  { %v1462_v57 = vadd.f32 %v1461_v48, %v1405_v44  ;;  %v1342_v15 = vadd.f32 %v1341_v56, %v3086_v3 }
 0x164   :  { %v915_v29 = vpop.f32.mrb[40].mxu1 }
 0x165   :  { %v3152_v35 = vadd.f32 %v3074_v49, %v915_v29  ;;  %v917_v36 = vpop.f32.mrb[41].mxu1  ;;  %v1406_v49 = vmul.f32 %v3080_v59, %v3080_v59  ;;  %v1343_v26 = vadd.f32 %v1342_v15, %v3088_v8 }
 0x166   :  { %v918_v23 = vpop.f32.mrb[42].mxu1  ;;  %v3179_v40 = vpop.f32.mrb[68].mxu0 }
 0x167   :  { %v3158_v45 = vadd.f32 %v3076_v52, %v918_v23  ;;  %v920_v46 = vpop.f32.mrb[43].mxu1  ;;  %v1407_v52 = vmul.f32 %v3086_v3, %v3086_v3  ;;  %v1463_v63 = vadd.f32 %v1462_v57, %v1406_v49  ;;  %v2355_v27 = vpop.f32.mrb[69].mxu0  ;;  %v1411_v49 = vmul.f32 %v3117_v41, %v3117_v41 }
 0x168   :  { %v3184_v32 = vpop.f32.mrb[70].mxu0  ;;  %v1410_v46 = vmul.f32 %v3104_v25, %v3104_v25 }
 0x169   :  { %v1464_v21 = vadd.f32 %v1463_v63, %v1407_v52  ;;  %v2356_v23 = vpop.f32.mrb[71].mxu0 }
 0x16b   :  { %v1465_v2 = vadd.f32 %v1464_v21, %v1408_v12  ;;  %v1413_v12 = vmul.f32 %v3134_v6, %v3134_v6 }
 0x16c   :  { %v923_v30 = vpop.f32.mrb[44].mxu1 }
 0x16d   :  { %v3171_v5 = vadd.f32 %v3082_v61, %v923_v30  ;;  %v925_v33 = vpop.f32.mrb[45].mxu1  ;;  %v1409_v61 = vmul.f32 %v3096_v16, %v3096_v16 }
 0x16e   :  { %v926_v11 = vpop.f32.mrb[46].mxu1  ;;  %v3198_v54 = vpop.f32.mrb[72].mxu0 }
 0x16f   :  { %v3175_v17 = vadd.f32 %v3084_v1, %v926_v11  ;;  %v928_v19 = vpop.f32.mrb[47].mxu1  ;;  %v1344_v1 = vadd.f32 %v1343_v26, %v3096_v16  ;;  %v1466_v44 = vadd.f32 %v1465_v2, %v1409_v61  ;;  %v2359_v56 = vpop.f32.mrb[73].mxu0 }
 0x170   :  { %v3201_v33 = vpop.f32.mrb[74].mxu0 }
 0x171   :  { %v1345_v57 = vadd.f32 %v1344_v1, %v3104_v25  ;;  %v2360_v15 = vpop.f32.mrb[75].mxu0 }
 0x173   :  { %v1346_v30 = vadd.f32 %v1345_v57, %v3117_v41 }
 0x174   :  { %v931_v29 = vpop.f32.mrb[48].mxu1 }
 0x175   :  { %v3188_v36 = vadd.f32 %v3090_v10, %v931_v29  ;;  %v933_v39 = vpop.f32.mrb[49].mxu1  ;;  %v1467_v10 = vadd.f32 %v1466_v44, %v1410_v46  ;;  %v1347_v21 = vadd.f32 %v1346_v30, %v3121_v51 }
 0x176   :  { %v934_v42 = vpop.f32.mrb[50].mxu1  ;;  %v3215_v2 = vpop.f32.mrb[76].mxu0 }
 0x177   :  { %v3193_v48 = vadd.f32 %v3092_v14, %v934_v42  ;;  %v936_v50 = vpop.f32.mrb[51].mxu1  ;;  %v1468_v60 = vadd.f32 %v1467_v10, %v1411_v49  ;;  %v1412_v14 = vmul.f32 %v3121_v51, %v3121_v51  ;;  %v1348_v29 = vadd.f32 %v1347_v21, %v3134_v6  ;;  %v2363_v39 = vpop.f32.mrb[77].mxu0 }
 0x178   :  { %v3219_v42 = vpop.f32.mrb[78].mxu0 }
 0x179   :  { %v1469_v27 = vadd.f32 %v1468_v60, %v1412_v14  ;;  %v1349_v44 = vadd.f32 %v1348_v29, %v3139_v9  ;;  %v2364_v57 = vpop.f32.mrb[79].mxu0  ;;  %v1416_v14 = vmul.f32 %v3158_v45, %v3158_v45 }
 0x17a   :  { %v1419_v57 = vmul.f32 %v3188_v36, %v3188_v36 }
 0x17b   :  { %v1470_v1 = vadd.f32 %v1469_v27, %v1413_v12  ;;  %v1350_v30 = vadd.f32 %v1349_v44, %v3152_v35 }
 0x17c   :  { %v939_v52 = vpop.f32.mrb[52].mxu1 }
 0x17d   :  { %v3206_v11 = vadd.f32 %v3107_v20, %v939_v52  ;;  %v941_v63 = vpop.f32.mrb[53].mxu1  ;;  %v1414_v20 = vmul.f32 %v3139_v9, %v3139_v9  ;;  %v1351_v15 = vadd.f32 %v1350_v30, %v3158_v45 }
 0x17e   :  { %v942_v19 = vpop.f32.mrb[54].mxu1  ;;  %v3233_v63 = vpop.f32.mrb[80].mxu0 }
 0x17f   :  { %v3212_v26 = vadd.f32 %v3111_v37, %v942_v19  ;;  %v944_v61 = vpop.f32.mrb[55].mxu1  ;;  %v1415_v37 = vmul.f32 %v3152_v35, %v3152_v35  ;;  %v1471_v10 = vadd.f32 %v1470_v1, %v1414_v20  ;;  %v2367_v19 = vpop.f32.mrb[81].mxu0 }
 0x180   :  { %v3238_v12 = vpop.f32.mrb[82].mxu0 }
 0x181   :  { %v1472_v60 = vadd.f32 %v1471_v10, %v1415_v37  ;;  %v2368_v1 = vpop.f32.mrb[83].mxu0 }
 0x183   :  { %v1473_v61 = vadd.f32 %v1472_v60, %v1416_v14 }
 0x184   :  { %v947_v23 = vpop.f32.mrb[56].mxu1 }
 0x185   :  { %v3225_v46 = vadd.f32 %v3125_v58, %v947_v23  ;;  %v949_v50 = vpop.f32.mrb[57].mxu1  ;;  %v1417_v58 = vmul.f32 %v3171_v5, %v3171_v5  ;;  %v1418_v23 = vmul.f32 %v3175_v17, %v3175_v17 }
 0x186   :  { %v950_v49 = vpop.f32.mrb[58].mxu1 }
 0x187   :  { %v3229_v56 = vadd.f32 %v3130_v4, %v950_v49  ;;  %v952_v52 = vpop.f32.mrb[59].mxu1  ;;  %v1352_v4 = vadd.f32 %v1351_v15, %v3171_v5  ;;  %v1474_v39 = vadd.f32 %v1473_v61, %v1417_v58  ;;  %v3252_v49 = vpop.f32.mrb[84].mxu0 }
 0x188   :  { %v2371_v30 = vpop.f32.mrb[85].mxu0 }
 0x189   :  { %v1353_v50 = vadd.f32 %v1352_v4, %v3175_v17  ;;  %v3255_v60 = vpop.f32.mrb[86].mxu0  ;;  %v1421_v4 = vmul.f32 %v3206_v11, %v3206_v11 }
 0x18a   :  { %v2372_v19 = vpop.f32.mrb[87].mxu0 }
 0x18b   :  { %v1354_v10 = vadd.f32 %v1353_v50, %v3188_v36 }
 0x18c   :  { %v955_v21 = vpop.f32.mrb[60].mxu1 }
 0x18d   :  { %v3242_v27 = vadd.f32 %v3144_v22, %v955_v21  ;;  %v957_v29 = vpop.f32.mrb[61].mxu1  ;;  %v1475_v22 = vadd.f32 %v1474_v39, %v1418_v23  ;;  %v1355_v61 = vadd.f32 %v1354_v10, %v3193_v48 }
 0x18e   :  { %v958_v20 = vpop.f32.mrb[62].mxu1  ;;  %v3269_v23 = vpop.f32.mrb[88].mxu0 }
 0x18f   :  { %v3247_v44 = vadd.f32 %v3147_v31, %v958_v20  ;;  %v960_v37 = vpop.f32.mrb[63].mxu1  ;;  %v1476_v14 = vadd.f32 %v1475_v22, %v1419_v57  ;;  %v1420_v31 = vmul.f32 %v3193_v48, %v3193_v48  ;;  %v1356_v39 = vadd.f32 %v1355_v61, %v3206_v11  ;;  %v2375_v50 = vpop.f32.mrb[89].mxu0 }
 0x190   :  { %v3273_v22 = vpop.f32.mrb[90].mxu0 }
 0x191   :  { %4094 = vst [vmem:[#allocation2_spill] sm:$0xff] %v3247_v44  ;;  %v1477_v20 = vadd.f32 %v1476_v14, %v1420_v31  ;;  %v1357_v10 = vadd.f32 %v1356_v39, %v3212_v26  ;;  %v2376_v14 = vpop.f32.mrb[91].mxu0 }
 0x193   :  { %v1478_v37 = vadd.f32 %v1477_v20, %v1421_v4  ;;  %v1358_v19 = vadd.f32 %v1357_v10, %v3225_v46 }
 0x194   :  { %v963_v52 = vpop.f32.mrb[64].mxu1 }
 0x195   :  { %v3260_v15 = vadd.f32 %v3161_v55, %v963_v52  ;;  %v965_v58 = vpop.f32.mrb[65].mxu1  ;;  %v1422_v55 = vmul.f32 %v3212_v26, %v3212_v26  ;;  %v1359_v39 = vadd.f32 %v1358_v19, %v3229_v56 }
 0x196   :  { %v966_v21 = vpop.f32.mrb[66].mxu1  ;;  %v3287_v20 = vpop.f32.mrb[92].mxu0 }
 0x197   :  { %4095 = vst [vmem:[#allocation3_spill] sm:$0xff] %v3260_v15  ;;  %v3266_v29 = vadd.f32 %v3165_v62, %v966_v21  ;;  %v968_v1 = vpop.f32.mrb[67].mxu1  ;;  %v1423_v62 = vmul.f32 %v3225_v46, %v3225_v46  ;;  %v1479_v58 = vadd.f32 %v1478_v37, %v1422_v55  ;;  %v2379_v50 = vpop.f32.mrb[93].mxu0 }
 0x198   :  { %v1424_v1 = vmul.f32 %v3229_v56, %v3229_v56  ;;  %v3292_v37 = vpop.f32.mrb[94].mxu0 }
 0x199   :  { %4096 = vst [vmem:[#allocation4_spill] sm:$0xff] %v3266_v29  ;;  %v1480_v4 = vadd.f32 %v1479_v58, %v1423_v62  ;;  %v1426_v58 = vmul.f32 %v3247_v44, %v3247_v44 }
 0x19b   :  { %v1481_v55 = vadd.f32 %v1480_v4, %v1424_v1  ;;  %v1427_v4 = vmul.f32 %v3260_v15, %v3260_v15 }
 0x19c   :  { %v971_v57 = vpop.f32.mrb[68].mxu1 }
 0x19d   :  { %v3279_v30 = vadd.f32 %v3179_v40, %v971_v57  ;;  %v973_v52 = vpop.f32.mrb[69].mxu1  ;;  %v1425_v40 = vmul.f32 %v3242_v27, %v3242_v27 }
 0x19e   :  { %v974_v31 = vpop.f32.mrb[70].mxu1  ;;  %v2380_v52 = vpop.f32.mrb[95].mxu0 }
 0x19f   :  { %4097 = vst [vmem:[#allocation5_spill] sm:$0xff] %v3279_v30  ;;  %v3283_v21 = vadd.f32 %v3184_v32, %v974_v31  ;;  %v976_v61 = vpop.f32.mrb[71].mxu1  ;;  %v1360_v32 = vadd.f32 %v1359_v39, %v3242_v27  ;;  %v1482_v31 = vadd.f32 %v1481_v55, %v1425_v40  ;;  %v3306_v1 = vpop.f32.mrb[96].mxu0 }
 0x1a1   :  { %4098 = vst [vmem:[#allocation6_spill] sm:$0xff] %v3283_v21  ;;  %v1361_v50 = vadd.f32 %v1360_v32, %v3247_v44 }
 0x1a3   :  { %v1362_v39 = vadd.f32 %v1361_v50, %v3260_v15 }
 0x1a4   :  { %v979_v57 = vpop.f32.mrb[72].mxu1 }
 0x1a5   :  { %v3296_v10 = vadd.f32 %v3198_v54, %v979_v57  ;;  %v981_v62 = vpop.f32.mrb[73].mxu1  ;;  %v1483_v54 = vadd.f32 %v1482_v31, %v1426_v58  ;;  %v2383_v57 = vpop.f32.mrb[97].mxu0  ;;  %v1363_v44 = vadd.f32 %v1362_v39, %v3266_v29  ;;  %v1429_v31 = vmul.f32 %v3279_v30, %v3279_v30 }
 0x1a6   :  { %v982_v14 = vpop.f32.mrb[74].mxu1  ;;  %v3309_v40 = vpop.f32.mrb[98].mxu0 }
 0x1a7   :  { %v3301_v19 = vadd.f32 %v3201_v33, %v982_v14  ;;  %v984_v61 = vpop.f32.mrb[75].mxu1  ;;  %v1484_v55 = vadd.f32 %v1483_v54, %v1427_v4  ;;  %v1428_v33 = vmul.f32 %v3266_v29, %v3266_v29  ;;  %v2384_v14 = vpop.f32.mrb[99].mxu0  ;;  %v1364_v4 = vadd.f32 %v1363_v44, %v3279_v30 }
 0x1a8   :  { %v3323_v54 = vpop.f32.mrb[100].mxu0 }
 0x1a9   :  { %4099 = vst [vmem:[#allocation7_spill] sm:$0xff] %v3301_v19  ;;  %v1485_v57 = vadd.f32 %v1484_v55, %v1428_v33  ;;  %v1365_v39 = vadd.f32 %v1364_v4, %v3283_v21  ;;  %v1432_v4 = vmul.f32 %v3301_v19, %v3301_v19 }
 0x1ab   :  { %v1486_v15 = vadd.f32 %v1485_v57, %v1429_v31  ;;  %v1366_v31 = vadd.f32 %v1365_v39, %v3296_v10 }
 0x1ac   :  { %v987_v62 = vpop.f32.mrb[76].mxu1 }
 0x1ad   :  { %v3314_v52 = vadd.f32 %v3215_v2, %v987_v62  ;;  %v989_v32 = vpop.f32.mrb[77].mxu1  ;;  %v1430_v2 = vmul.f32 %v3283_v21, %v3283_v21  ;;  %v2387_v62 = vpop.f32.mrb[101].mxu0  ;;  %v1367_v29 = vadd.f32 %v1366_v31, %v3301_v19 }
 0x1ae   :  { %v990_v61 = vpop.f32.mrb[78].mxu1  ;;  %v3327_v14 = vpop.f32.mrb[102].mxu0 }
 0x1af   :  { %v3320_v58 = vadd.f32 %v3219_v42, %v990_v61  ;;  %v992_v50 = vpop.f32.mrb[79].mxu1  ;;  %v1431_v42 = vmul.f32 %v3296_v10, %v3296_v10  ;;  %v2388_v44 = vpop.f32.mrb[103].mxu0 }
 0x1b0   :  { %v1487_v50 = vadd.f32 %v1486_v15, %v1430_v2  ;;  %v3341_v21 = vpop.f32.mrb[104].mxu0 }
 0x1b1   :  { %4100 = vst [vmem:[#allocation8_spill] sm:$0xff] %v3320_v58  ;;  %v1434_v31 = vmul.f32 %v3320_v58, %v3320_v58 }
 0x1b2   :  { %v1488_v30 = vadd.f32 %v1487_v50, %v1431_v42 }
 0x1b4   :  { %v995_v32 = vpop.f32.mrb[80].mxu1  ;;  %v1489_v2 = vadd.f32 %v1488_v30, %v1432_v4 }
 0x1b5   :  { %v3333_v61 = vadd.f32 %v3233_v63, %v995_v32  ;;  %v997_v55 = vpop.f32.mrb[81].mxu1  ;;  %v1433_v63 = vmul.f32 %v3314_v52, %v3314_v52  ;;  %v2391_v32 = vpop.f32.mrb[105].mxu0 }
 0x1b6   :  { %v998_v33 = vpop.f32.mrb[82].mxu1  ;;  %v3346_v15 = vpop.f32.mrb[106].mxu0 }
 0x1b7   :  { %4101 = vst [vmem:[#allocation9_spill] sm:$0xff] %v3333_v61  ;;  %v3337_v57 = vadd.f32 %v3238_v12, %v998_v33  ;;  %v1000_v62 = vpop.f32.mrb[83].mxu1  ;;  %v1368_v12 = vadd.f32 %v1367_v29, %v3314_v52  ;;  %v2392_v44 = vpop.f32.mrb[107].mxu0  ;;  %v1490_v50 = vadd.f32 %v1489_v2, %v1433_v63  ;;  %v1435_v30 = vmul.f32 %v3333_v61, %v3333_v61 }
 0x1b8   :  { %v3360_v29 = vpop.f32.mrb[108].mxu0 }
 0x1b9   :  { %v1369_v19 = vadd.f32 %v1368_v12, %v3320_v58 }
 0x1bb   :  { %v1370_v4 = vadd.f32 %v1369_v19, %v3333_v61 }
 0x1bc   :  { %v1003_v55 = vpop.f32.mrb[84].mxu1 }
 0x1bd   :  { %v3350_v39 = vadd.f32 %v3252_v49, %v1003_v55  ;;  %v1005_v42 = vpop.f32.mrb[85].mxu1  ;;  %v1491_v49 = vadd.f32 %v1490_v50, %v1434_v31  ;;  %v2395_v55 = vpop.f32.mrb[109].mxu0  ;;  %v1371_v58 = vadd.f32 %v1370_v4, %v3337_v57 }
 0x1be   :  { %v1006_v33 = vpop.f32.mrb[86].mxu1  ;;  %v3363_v63 = vpop.f32.mrb[110].mxu0 }
 0x1bf   :  { %4102 = vst [vmem:[#allocation10_spill] sm:$0xff] %v3350_v39  ;;  %v3355_v62 = vadd.f32 %v3255_v60, %v1006_v33  ;;  %v1008_v32 = vpop.f32.mrb[87].mxu1  ;;  %v1492_v2 = vadd.f32 %v1491_v49, %v1435_v30  ;;  %v1436_v60 = vmul.f32 %v3337_v57, %v3337_v57  ;;  %v2396_v33 = vpop.f32.mrb[111].mxu0  ;;  %v1437_v50 = vmul.f32 %v3350_v39, %v3350_v39 }
 0x1c0   :  { %v1372_v30 = vadd.f32 %v1371_v58, %v3350_v39  ;;  %v3377_v49 = vpop.f32.mrb[112].mxu0 }
 0x1c1   :  { %4103 = vst [vmem:[#allocation11_spill] sm:$0xff] %v3355_v62  ;;  %v1493_v55 = vadd.f32 %v1492_v2, %v1436_v60 }
 0x1c2   :  { %v1373_v4 = vadd.f32 %v1372_v30, %v3355_v62 }
 0x1c3   :  { %v1494_v61 = vadd.f32 %v1493_v55, %v1437_v50 }
 0x1c4   :  { %v1011_v42 = vpop.f32.mrb[88].mxu1 }
 0x1c5   :  { %v3368_v44 = vadd.f32 %v3269_v23, %v1011_v42  ;;  %v1013_v12 = vpop.f32.mrb[89].mxu1  ;;  %v1438_v23 = vmul.f32 %v3355_v62, %v3355_v62  ;;  %v2399_v42 = vpop.f32.mrb[113].mxu0 }
 0x1c6   :  { %v1014_v32 = vpop.f32.mrb[90].mxu1  ;;  %v3381_v33 = vpop.f32.mrb[114].mxu0 }
 0x1c7   :  { %v3374_v19 = vadd.f32 %v3273_v22, %v1014_v32  ;;  %v1016_v31 = vpop.f32.mrb[91].mxu1  ;;  %v1439_v22 = vmul.f32 %v3368_v44, %v3368_v44  ;;  %v2400_v58 = vpop.f32.mrb[115].mxu0  ;;  %v1374_v50 = vadd.f32 %v1373_v4, %v3368_v44 }
 0x1c8   :  { %v1495_v31 = vadd.f32 %v1494_v61, %v1438_v23 }
 0x1c9   :  { %v1440_v30 = vmul.f32 %v3374_v19, %v3374_v19  ;;  %v1375_v62 = vadd.f32 %v1374_v50, %v3374_v19 }
 0x1ca   :  { %v1496_v39 = vadd.f32 %v1495_v31, %v1439_v22 }
 0x1cc   :  { %v1019_v12 = vpop.f32.mrb[92].mxu1 }
 0x1cd   :  { %v3387_v32 = vadd.f32 %v3287_v20, %v1019_v12  ;;  %v1021_v2 = vpop.f32.mrb[93].mxu1 }
 0x1ce   :  { %v1022_v60 = vpop.f32.mrb[94].mxu1  ;;  %v1497_v2 = vadd.f32 %v1496_v39, %v1440_v30 }
 0x1cf   :  { %v3391_v55 = vadd.f32 %v3292_v37, %v1022_v60  ;;  %v1024_v42 = vpop.f32.mrb[95].mxu1  ;;  %v1441_v20 = vmul.f32 %v3387_v32, %v3387_v32  ;;  %v1376_v58 = vadd.f32 %v1375_v62, %v3387_v32 }
 0x1d1   :  { %4104 = vst [vmem:[#allocation12_spill] sm:$0xff] %v3391_v55  ;;  %v1498_v4 = vadd.f32 %v1497_v2, %v1441_v20  ;;  %v1442_v22 = vmul.f32 %v3391_v55, %v3391_v55  ;;  %v1377_v50 = vadd.f32 %v1376_v58, %v3391_v55 }
 0x1d3   :  { %v1499_v42 = vadd.f32 %v1498_v4, %v1442_v22 }
 0x1d4   :  { %v1027_v12 = vpop.f32.mrb[96].mxu1 }
 0x1d5   :  { %v3400_v61 = vadd.f32 %v3306_v1, %v1027_v12  ;;  %v1029_v23 = vpop.f32.mrb[97].mxu1 }
 0x1d6   :  { %v1030_v37 = vpop.f32.mrb[98].mxu1 }
 0x1d7   :  { %4105 = vst [vmem:[#allocation13_spill] sm:$0xff] %v3400_v61  ;;  %v3405_v60 = vadd.f32 %v3309_v40, %v1030_v37  ;;  %v1032_v31 = vpop.f32.mrb[99].mxu1  ;;  %v1443_v39 = vmul.f32 %v3400_v61, %v3400_v61  ;;  %v1378_v62 = vadd.f32 %v1377_v50, %v3400_v61 }
 0x1d9   :  { %4106 = vst [vmem:[#allocation14_spill] sm:$0xff] %v3405_v60  ;;  %v1500_v30 = vadd.f32 %v1499_v42, %v1443_v39  ;;  %v1444_v20 = vmul.f32 %v3405_v60, %v3405_v60  ;;  %v1379_v23 = vadd.f32 %v1378_v62, %v3405_v60 }
 0x1db   :  { %v1501_v22 = vadd.f32 %v1500_v30, %v1444_v20 }
 0x1dc   :  { %v1035_v1 = vpop.f32.mrb[100].mxu1 }
 0x1dd   :  { %v3414_v12 = vadd.f32 %v3323_v54, %v1035_v1  ;;  %v1037_v2 = vpop.f32.mrb[101].mxu1 }
 0x1de   :  { %v1038_v40 = vpop.f32.mrb[102].mxu1 }
 0x1df   :  { %4107 = vst [vmem:[#allocation15_spill] sm:$0xff] %v3414_v12  ;;  %v1445_v58 = vmul.f32 %v3414_v12, %v3414_v12  ;;  %v3420_v37 = vadd.f32 %v3327_v14, %v1038_v40  ;;  %v1040_v4 = vpop.f32.mrb[103].mxu1  ;;  %v1380_v31 = vadd.f32 %v1379_v23, %v3414_v12 }
 0x1e1   :  { %4108 = vst [vmem:[#allocation16_spill] sm:$0xff] %v3420_v37  ;;  %v1502_v50 = vadd.f32 %v1501_v22, %v1445_v58  ;;  %v1446_v39 = vmul.f32 %v3420_v37, %v3420_v37  ;;  %v1381_v42 = vadd.f32 %v1380_v31, %v3420_v37 }
 0x1e3   :  { %v1503_v60 = vadd.f32 %v1502_v50, %v1446_v39 }
 0x1e4   :  { %v1043_v54 = vpop.f32.mrb[104].mxu1 }
 0x1e5   :  { %v3427_v1 = vadd.f32 %v3341_v21, %v1043_v54  ;;  %v1045_v62 = vpop.f32.mrb[105].mxu1 }
 0x1e6   :  { %v1046_v2 = vpop.f32.mrb[106].mxu1 }
 0x1e7   :  { %v1382_v14 = vadd.f32 %v1381_v42, %v3427_v1  ;;  %v1447_v30 = vmul.f32 %v3427_v1, %v3427_v1  ;;  %v3433_v20 = vadd.f32 %v3346_v15, %v1046_v2  ;;  %v1048_v40 = vpop.f32.mrb[107].mxu1 }
 0x1e9   :  { %v1504_v23 = vadd.f32 %v1503_v60, %v1447_v30  ;;  %v1383_v58 = vadd.f32 %v1382_v14, %v3433_v20  ;;  %v1448_v4 = vmul.f32 %v3433_v20, %v3433_v20 }
 0x1eb   :  { %v1505_v21 = vadd.f32 %v1504_v23, %v1448_v4 }
 0x1ec   :  { %v1051_v22 = vpop.f32.mrb[108].mxu1 }
 0x1ed   :  { %v3439_v31 = vadd.f32 %v3360_v29, %v1051_v22  ;;  %v1053_v50 = vpop.f32.mrb[109].mxu1 }
 0x1ee   :  { %v1054_v39 = vpop.f32.mrb[110].mxu1 }
 0x1ef   :  { %4109 = vst [vmem:[#allocation17_spill] sm:$0xff] %v3439_v31  ;;  %v1384_v54 = vadd.f32 %v1383_v58, %v3439_v31  ;;  %v1449_v15 = vmul.f32 %v3439_v31, %v3439_v31  ;;  %v3445_v42 = vadd.f32 %v3363_v63, %v1054_v39  ;;  %v1056_v60 = vpop.f32.mrb[111].mxu1 }
 0x1f1   :  { %4110 = vst [vmem:[#allocation18_spill] sm:$0xff] %v3445_v42  ;;  %v1506_v62 = vadd.f32 %v1505_v21, %v1449_v15  ;;  %v1385_v2 = vadd.f32 %v1384_v54, %v3445_v42  ;;  %v1450_v14 = vmul.f32 %v3445_v42, %v3445_v42 }
 0x1f3   :  { %v1507_v30 = vadd.f32 %v1506_v62, %v1450_v14 }
 0x1f4   :  { %v1059_v29 = vpop.f32.mrb[112].mxu1 }
 0x1f5   :  { %v3451_v40 = vadd.f32 %v3377_v49, %v1059_v29  ;;  %v1061_v23 = vpop.f32.mrb[113].mxu1 }
 0x1f6   :  { %v1062_v58 = vpop.f32.mrb[114].mxu1 }
 0x1f7   :  { %4111 = vst [vmem:[#allocation19_spill] sm:$0xff] %v3451_v40  ;;  %v1451_v4 = vmul.f32 %v3451_v40, %v3451_v40  ;;  %v1328_v63 = vadd.f32 %v3381_v33, %v1062_v58  ;;  %v1386_v22 = vadd.f32 %v1385_v2, %v3451_v40  ;;  %v1064_v21 = vpop.f32.mrb[115].mxu1 }
 0x1f9   :  { %v1387_v50 = vadd.f32 %v1386_v22, %v1328_v63  ;;  %v1452_v39 = vmul.f32 %v1328_v63, %v1328_v63  ;;  %v1508_v54 = vadd.f32 %v1507_v30, %v1451_v4  ;;  %v1528_v30 = vlaneseq }
 0x1fb   :  { %v1388_v15 = vrot.slane %v1387_v50, 4  ;;  %v1509_v60 = vadd.f32 %v1508_v54, %v1452_v39  ;;  %v3457_v4 = vshrl.u32 %v1528_v30, 7  ;;  %v4116_v30 = vld [vmem:[#allocation6_spill] sm:$0xff] }
 0x1fd   :  { %v1389_v62 = vadd.f32 %v1388_v15, %v1387_v50  ;;  %v1510_v14 = vrot.slane %v1509_v60, 4  ;;  %v1530_v50 = vsub.s32 0, %v3457_v4  ;;  %v4117_v4 = vld [vmem:[#allocation7_spill] sm:$0xff] }
 0x1ff   :  { %v1390_v37 = vrot.slane %v1389_v62, 2  ;;  %v1511_v49 = vadd.f32 %v1510_v14, %v1509_v60 }
 0x201   :  { %v1391_v29 = vadd.f32 %v1390_v37, %v1389_v62  ;;  %v1512_v23 = vrot.slane %v1511_v49, 2  ;;  %v1520_v37 = vld [vmem:[%s4062_s2] sm:$0x1] }
 0x203   :  { %v1392_v12 = vrot.slane %v1391_v29, 1  ;;  %v1513_v61 = vadd.f32 %v1512_v23, %v1511_v49 }
 0x205   :  { %v1393_v42 = vadd.f32 %v1392_v12, %v1391_v29  ;;  %v1514_v55 = vrot.slane %v1513_v61, 1 }
 0x207   :  { %v1394_v31 = vmul.f32 0.0022222223, %v1393_v42  ;;  %v1515_v33 = vadd.f32 %v1514_v55, %v1513_v61  ;;  %v1524_v55 = vld [vmem:[%s4063_s3] sm:$0x1] }
 0x209   :  { %v1516_v58 = vmul.f32 0.0022222223, %v1515_v33  ;;  %v1517_v2 = vmul.f32 %v1394_v31, %v1394_v31 }
 0x20b   :  { %v1518_v21 = vsub.f32 %v1516_v58, %v1517_v2  ;;  %v4112_v2 = vld [vmem:[#allocation2_spill] sm:$0xff] }
 0x20d   :  { %v1519_v22 = vmax.f32 %v1518_v21, 0.0  ;;  %v4113_v21 = vld [vmem:[#allocation3_spill] sm:$0xff] }
 0x20f   :  { %v1521_v63 = vadd.f32 1e-05, %v1519_v22  ;;  %v4114_v22 = vld [vmem:[#allocation4_spill] sm:$0xff] }
 0x211   :  { %2596 = vrsqrt.f32 %v1521_v63  ;;  %v4115_v63 = vld [vmem:[#allocation5_spill] sm:$0xff] }
 0x21b   :  { %v2597_v39 = vpop.eup %2596 }
 0x21c   :  { %v1523_v12 = vmul.f32 %v2597_v39, %v1520_v37  ;;  %v4118_v37 = vld [vmem:[#allocation8_spill] sm:$0xff]  ;;  %v4119_v39 = vld [vmem:[#allocation9_spill] sm:$0xff] }
 0x21e   :  { %v1525_v61 = vmul.f32 %v1523_v12, %v1394_v31  ;;  %v1531_v42 = vrot.slane %v1523_v12, %v1530_v50 }
 0x220   :  { %v1526_v54 = vsub.f32 %v1524_v55, %v1525_v61  ;;  %v1533_v15 = vmul.f32 %v1531_v42, %v3037_v0  ;;  %v1534_v60 = vmul.f32 %v1531_v42, %v3045_v7  ;;  %v1535_v62 = vmul.f32 %v1531_v42, %v3047_v13  ;;  %v4120_v55 = vld [vmem:[#allocation10_spill] sm:$0xff] }
 0x221   :  { %v1536_v14 = vmul.f32 %v1531_v42, %v3052_v18  ;;  %v1537_v49 = vmul.f32 %v1531_v42, %v3054_v24  ;;  %v1538_v29 = vmul.f32 %v1531_v42, %v3056_v28  ;;  %v1539_v23 = vmul.f32 %v1531_v42, %v3062_v34 }
 0x222   :  { %v1540_v33 = vmul.f32 %v1531_v42, %v3064_v38  ;;  %v1541_v31 = vmul.f32 %v1531_v42, %v3070_v43  ;;  %v1542_v58 = vmul.f32 %v1531_v42, %v3072_v47  ;;  %v1543_v0 = vmul.f32 %v1531_v42, %v3078_v53 }
 0x223   :  { %v1544_v7 = vmul.f32 %v1531_v42, %v3080_v59  ;;  %v1545_v13 = vmul.f32 %v1531_v42, %v3086_v3  ;;  %v1546_v18 = vmul.f32 %v1531_v42, %v3088_v8  ;;  %v1547_v24 = vmul.f32 %v1531_v42, %v3096_v16 }
 0x224   :  { %v1548_v28 = vmul.f32 %v1531_v42, %v3104_v25  ;;  %v1549_v34 = vmul.f32 %v1531_v42, %v3117_v41  ;;  %v1550_v38 = vmul.f32 %v1531_v42, %v3121_v51  ;;  %v1551_v43 = vmul.f32 %v1531_v42, %v3134_v6 }
 0x225   :  { %v1552_v47 = vmul.f32 %v1531_v42, %v3139_v9  ;;  %v1553_v53 = vmul.f32 %v1531_v42, %v3152_v35  ;;  %v1554_v59 = vmul.f32 %v1531_v42, %v3158_v45  ;;  %v1555_v3 = vmul.f32 %v1531_v42, %v3171_v5 }
 0x226   :  { %v1556_v8 = vmul.f32 %v1531_v42, %v3175_v17  ;;  %v1557_v16 = vmul.f32 %v1531_v42, %v3188_v36  ;;  %v1558_v25 = vmul.f32 %v1531_v42, %v3193_v48  ;;  %v1559_v41 = vmul.f32 %v1531_v42, %v3206_v11 }
 0x227   :  { %v1560_v51 = vmul.f32 %v1531_v42, %v3212_v26  ;;  %v1561_v6 = vmul.f32 %v1531_v42, %v3225_v46  ;;  %v1562_v9 = vmul.f32 %v1531_v42, %v3229_v56  ;;  %v1563_v35 = vmul.f32 %v1531_v42, %v3242_v27 }
 0x228   :  { %v1564_v45 = vmul.f32 %v1531_v42, %v4112_v2  ;;  %v1565_v5 = vmul.f32 %v1531_v42, %v4113_v21  ;;  %v1566_v17 = vmul.f32 %v1531_v42, %v4114_v22  ;;  %v1567_v36 = vmul.f32 %v1531_v42, %v4115_v63  ;;  %v4121_v2 = vld [vmem:[#allocation11_spill] sm:$0xff] }
 0x229   :  { %v1568_v48 = vmul.f32 %v1531_v42, %v4116_v30  ;;  %v1569_v11 = vmul.f32 %v1531_v42, %v3296_v10  ;;  %v1570_v26 = vmul.f32 %v1531_v42, %v4117_v4  ;;  %v1571_v46 = vmul.f32 %v1531_v42, %v3314_v52  ;;  %v4124_v4 = vld [vmem:[#allocation17_spill] sm:$0xff] }
 0x22a   :  { %v1572_v56 = vmul.f32 %v1531_v42, %v4118_v37  ;;  %v1573_v27 = vmul.f32 %v1531_v42, %v4119_v39  ;;  %v1574_v12 = vmul.f32 %v1531_v42, %v3337_v57  ;;  %v1575_v61 = vmul.f32 %v1531_v42, %v4120_v55  ;;  %v4126_v57 = vld [vmem:[#allocation12_spill] sm:$0xff]  ;;  %v4127_v55 = vld [vmem:[#allocation18_spill] sm:$0xff] }
 0x22b   :  { %v1576_v21 = vmul.f32 %v1531_v42, %v4121_v2  ;;  %v1577_v22 = vmul.f32 %v1531_v42, %v3368_v44  ;;  %v1578_v63 = vmul.f32 %v1531_v42, %v3374_v19  ;;  %v1579_v10 = vmul.f32 %v1531_v42, %v3387_v32  ;;  %v4128_v2 = vld [vmem:[#allocation19_spill] sm:$0xff]  ;;  %v4129_v32 = vld [vmem:[#allocation13_spill] sm:$0xff] }
 0x22c   :  { %v3514_v30 = vmul.f32 %v1531_v42, %v3427_v1  ;;  %v3517_v52 = vmul.f32 %v1531_v42, %v3433_v20  ;;  %v3520_v37 = vmul.f32 %v1531_v42, %v4124_v4  ;;  %v1580_v39 = vmul.f32 %v1531_v42, %v4126_v57 }
 0x22d   :  { %v1588_v40 = vmul.f32 %v1531_v42, %v4127_v55  ;;  %v1589_v44 = vmul.f32 %v1531_v42, %v4128_v2  ;;  %v1594_v19 = vrot.slane %v1526_v54, %v1530_v50  ;;  %v1581_v1 = vmul.f32 %v1531_v42, %v4129_v32 }
 0x22e   :  { %4122 = vst [vmem:[#allocation2_spill] sm:$0xff] %v3514_v30  ;;  %4123 = vst [vmem:[#allocation3_spill] sm:$0xff] %v3517_v52  ;;  %v4130_v30 = vld [vmem:[#allocation14_spill] sm:$0xff]  ;;  %v4131_v52 = vld [vmem:[#allocation15_spill] sm:$0xff] }
 0x22f   :  { %4125 = vst [vmem:[#allocation4_spill] sm:$0xff] %v3520_v37  ;;  %v1582_v20 = vmul.f32 %v1531_v42, %v4130_v30  ;;  %v1583_v4 = vmul.f32 %v1531_v42, %v4131_v52  ;;  %v4132_v37 = vld [vmem:[#allocation16_spill] sm:$0xff]  ;;  %v3529_v55 = vadd.f32 %v1594_v19, %v1533_v15  ;;  %v3531_v2 = vadd.f32 %v1594_v19, %v1534_v60 }
 0x230   :  { %v1584_v57 = vmul.f32 %v1531_v42, %v4132_v37  ;;  %v3533_v50 = vadd.f32 %v1594_v19, %v1535_v62  ;;  %v3535_v54 = vadd.f32 %v1594_v19, %v1536_v14  ;;  %v3537_v32 = vadd.f32 %v1594_v19, %v1537_v49 }
 0x231   :  { %4133 = vst [vmem:[#allocation5_spill] sm:$0xff] %v3529_v55  ;;  %v3539_v30 = vadd.f32 %v1594_v19, %v1538_v29  ;;  %v3541_v52 = vadd.f32 %v1594_v19, %v1539_v23  ;;  %v3543_v37 = vadd.f32 %v1594_v19, %v1540_v33  ;;  %v3545_v42 = vadd.f32 %v1594_v19, %v1541_v31 }
 0x232   :  { %v3547_v15 = vadd.f32 %v1594_v19, %v1542_v58  ;;  %v3549_v55 = vadd.f32 %v1594_v19, %v1543_v0  ;;  %v3551_v60 = vadd.f32 %v1594_v19, %v1544_v7  ;;  %v3553_v62 = vadd.f32 %v1594_v19, %v1545_v13 }
 0x233   :  { %v3555_v14 = vadd.f32 %v1594_v19, %v1546_v18  ;;  %v3557_v49 = vadd.f32 %v1594_v19, %v1547_v24  ;;  %v3559_v29 = vadd.f32 %v1594_v19, %v1548_v28  ;;  %v3561_v23 = vadd.f32 %v1594_v19, %v1549_v34 }
 0x234   :  { %v3563_v33 = vadd.f32 %v1594_v19, %v1550_v38  ;;  %v3565_v31 = vadd.f32 %v1594_v19, %v1551_v43  ;;  %v3567_v58 = vadd.f32 %v1594_v19, %v1552_v47  ;;  %v3569_v0 = vadd.f32 %v1594_v19, %v1553_v53 }
 0x235   :  { %v3571_v7 = vadd.f32 %v1594_v19, %v1554_v59  ;;  %v3573_v13 = vadd.f32 %v1594_v19, %v1555_v3  ;;  %v3575_v18 = vadd.f32 %v1594_v19, %v1556_v8  ;;  %v3577_v24 = vadd.f32 %v1594_v19, %v1557_v16 }
 0x236   :  { %v3579_v28 = vadd.f32 %v1594_v19, %v1558_v25  ;;  %v3581_v34 = vadd.f32 %v1594_v19, %v1559_v41  ;;  %v3583_v38 = vadd.f32 %v1594_v19, %v1560_v51  ;;  %v3585_v43 = vadd.f32 %v1594_v19, %v1561_v6 }
 0x237   :  { %v3587_v47 = vadd.f32 %v1594_v19, %v1562_v9  ;;  %v3589_v53 = vadd.f32 %v1594_v19, %v1563_v35  ;;  %v3591_v59 = vadd.f32 %v1594_v19, %v1564_v45  ;;  %v3593_v3 = vadd.f32 %v1594_v19, %v1565_v5 }
 0x238   :  { %v3595_v8 = vadd.f32 %v1594_v19, %v1566_v17  ;;  %v3597_v16 = vadd.f32 %v1594_v19, %v1567_v36  ;;  %v3599_v25 = vadd.f32 %v1594_v19, %v1568_v48  ;;  %v3601_v41 = vadd.f32 %v1594_v19, %v1569_v11 }
 0x239   :  { %v3603_v51 = vadd.f32 %v1594_v19, %v1570_v26  ;;  %v3605_v6 = vadd.f32 %v1594_v19, %v1571_v46  ;;  %v3607_v9 = vadd.f32 %v1594_v19, %v1572_v56  ;;  %v3609_v35 = vadd.f32 %v1594_v19, %v1573_v27 }
 0x23a   :  { %4134 = vst [vmem:[#allocation6_spill] sm:$0xff] %v3597_v16  ;;  %v3611_v45 = vadd.f32 %v1594_v19, %v1574_v12  ;;  %v3613_v5 = vadd.f32 %v1594_v19, %v1575_v61  ;;  %v3615_v17 = vadd.f32 %v1594_v19, %v1576_v21  ;;  %v3617_v36 = vadd.f32 %v1594_v19, %v1577_v22  ;;  %v4144_v61 = vld [vmem:[#allocation2_spill] sm:$0xff]  ;;  %v4145_v21 = vld [vmem:[#allocation3_spill] sm:$0xff] }
 0x23b   :  { %4135 = vst [vmem:[#allocation7_spill] sm:$0xff] %v3609_v35  ;;  %v3619_v48 = vadd.f32 %v1594_v19, %v1578_v63  ;;  %v3621_v11 = vadd.f32 %v1594_v19, %v1579_v10  ;;  %v3623_v26 = vadd.f32 %v1594_v19, %v1580_v39  ;;  %v3625_v46 = vadd.f32 %v1594_v19, %v1581_v1  ;;  %v4147_v63 = vld [vmem:[#allocation4_spill] sm:$0xff]  ;;  %v4148_v1 = vld [vmem:[#allocation5_spill] sm:$0xff] }
 0x23c   :  { %4136 = vst [vmem:[#allocation8_spill] sm:$0xff] %v3613_v5  ;;  %v3627_v56 = vadd.f32 %v1594_v19, %v1582_v20  ;;  %v3629_v27 = vadd.f32 %v1594_v19, %v1583_v4  ;;  %v3631_v12 = vadd.f32 %v1594_v19, %v1584_v57  ;;  %v3634_v5 = vadd.f32 %v1594_v19, %v4144_v61 }
 0x23d   :  { %4137 = vst [vmem:[#allocation9_spill] sm:$0xff] %v3619_v48  ;;  %4138 = vst [vmem:[#allocation10_spill] sm:$0xff] %v3621_v11  ;;  %v3637_v22 = vadd.f32 %v1594_v19, %v4145_v21  ;;  %v3640_v48 = vadd.f32 %v1594_v19, %v4147_v63  ;;  %v3642_v10 = vadd.f32 %v1594_v19, %v1588_v40  ;;  %v1653_v20 = vmax.f32 %v4148_v1, 0.0 }
 0x23e   :  { %4139 = vst [vmem:[#allocation11_spill] sm:$0xff] %v3623_v26  ;;  %4140 = vst [vmem:[#allocation17_spill] sm:$0xff] %v3625_v46  ;;  %v3644_v39 = vadd.f32 %v1594_v19, %v1589_v44  ;;  %v1654_v4 = vmax.f32 %v3531_v2, 0.0  ;;  %v1655_v57 = vmax.f32 %v3533_v50, 0.0  ;;  %v1657_v61 = vmax.f32 %v3537_v32, 0.0 }
 0x23f   :  { %4141 = vst [vmem:[#allocation12_spill] sm:$0xff] %v3627_v56  ;;  %4142 = vst [vmem:[#allocation18_spill] sm:$0xff] %v3629_v27  ;;  %v1658_v21 = vmax.f32 %v3539_v30, 0.0  ;;  %v1660_v63 = vmax.f32 %v3543_v37, 0.0  ;;  %v1661_v40 = vmax.f32 %v3545_v42, 0.0  ;;  %v1662_v44 = vmax.f32 %v3547_v15, 0.0 }
 0x240   :  { %4143 = vst [vmem:[#allocation19_spill] sm:$0xff] %v3631_v12  ;;  %4146 = vst [vmem:[#allocation13_spill] sm:$0xff] %v3637_v22  ;;  %v1656_v12 = vmax.f32 %v3535_v54, 0.0  ;;  %v1659_v22 = vmax.f32 %v3541_v52, 0.0  ;;  %v1663_v19 = vmax.f32 %v3549_v55, 0.0  ;;  %v1664_v2 = vmax.f32 %v3551_v60, 0.0 }
 0x241   :  { %v1665_v50 = vmax.f32 %v3553_v62, 0.0  ;;  %v1666_v54 = vmax.f32 %v3555_v14, 0.0  ;;  %v1705_v62 = vmax.f32 %v3634_v5, 0.0  ;;  %v1707_v1 = vmax.f32 %v3640_v48, 0.0 }
 0x242   :  { %v1708_v30 = vmax.f32 %v3642_v10, 0.0  ;;  %v1709_v52 = vmax.f32 %v3644_v39, 0.0  ;;  %v2193_v11 = vpack.c.bf16 %v1653_v20, %v1653_v20  ;;  %v2194_v37 = vpack.c.bf16 %v1654_v4, %v1654_v4 }
 0x243   :  { %v2195_v26 = vpack.c.bf16 %v1655_v57, %v1655_v57  ;;  %v2196_v42 = vpack.c.bf16 %v1656_v12, %v1656_v12  ;;  %v2197_v46 = vpack.c.bf16 %v1657_v61, %v1657_v61  ;;  %v2198_v15 = vpack.c.bf16 %v1658_v21, %v1658_v21 }
 0x244   :  { %v4150_v16 = vld [vmem:[#allocation9_spill] sm:$0xff]  ;;  %v2199_v56 = vpack.c.bf16 %v1659_v22, %v1659_v22  ;;  %v2200_v55 = vpack.c.bf16 %v1660_v63, %v1660_v63  ;;  %v2201_v27 = vpack.c.bf16 %v1661_v40, %v1661_v40  ;;  %v2202_v60 = vpack.c.bf16 %v1662_v44, %v1662_v44  ;;  %1940 = vst.msk [vmem:[%s4064_s4] sm:$0xf] %vm1939_vm2, %v2193_v11 }
 0x245   :  { %1941 = vst.msk [vmem:[%s4064_s4 + $0x4] sm:$0xf] %vm1939_vm2, %v2194_v37  ;;  %v2203_v20 = vpack.c.bf16 %v1663_v19, %v1663_v19  ;;  %v2204_v4 = vpack.c.bf16 %v1664_v2, %v1664_v2  ;;  %v2205_v57 = vpack.c.bf16 %v1665_v50, %v1665_v50  ;;  %v2206_v12 = vpack.c.bf16 %v1666_v54, %v1666_v54 }
 0x246   :  { %1942 = vst.msk [vmem:[%s4064_s4 + $0x8] sm:$0xf] %vm1939_vm2, %v2195_v26  ;;  %1943 = vst.msk [vmem:[%s4064_s4 + $0xc] sm:$0xf] %vm1939_vm2, %v2196_v42  ;;  %v4153_v11 = vmax.f32 %v3557_v49, 0.0  ;;  %v4154_v26 = vmax.f32 %v3559_v29, 0.0  ;;  %v2248_v5 = vpack.c.bf16 %v1708_v30, %v1708_v30 }
 0x247   :  { %v4151_v35 = vld [vmem:[#allocation19_spill] sm:$0xff]  ;;  %v4152_v32 = vld [vmem:[#allocation13_spill] sm:$0xff]  ;;  %1944 = vst.msk [vmem:[%s4064_s4 + $0x10] sm:$0xf] %vm1939_vm2, %v2197_v46  ;;  %1945 = vst.msk [vmem:[%s4064_s4 + $0x14] sm:$0xf] %vm1939_vm2, %v2198_v15 }
 0x248   :  { %v1706_v14 = vmax.f32 %v4152_v32, 0.0  ;;  %v2207_v22 = vpack.c.bf16 %v4153_v11, %v4153_v11  ;;  %v2208_v61 = vpack.c.bf16 %v4154_v26, %v4154_v26  ;;  %v4155_v21 = vmax.f32 %v3561_v23, 0.0  ;;  %1946 = vst.msk [vmem:[%s4064_s4 + $0x18] sm:$0xf] %vm1939_vm2, %v2199_v56  ;;  %1947 = vst.msk [vmem:[%s4064_s4 + $0x1c] sm:$0xf] %vm1939_vm2, %v2200_v55 }
 0x249   :  { %v4156_v40 = vmax.f32 %v3563_v33, 0.0  ;;  %1948 = vst.msk [vmem:[%s4064_s4 + $0x20] sm:$0xf] %vm1939_vm2, %v2201_v27  ;;  %1949 = vst.msk [vmem:[%s4064_s4 + $0x24] sm:$0xf] %vm1939_vm2, %v2202_v60  ;;  %v4157_v49 = vmax.f32 %v3565_v31, 0.0  ;;  %v2249_v32 = vpack.c.bf16 %v1709_v52, %v1709_v52 }
 0x24a   :  { %v2209_v63 = vpack.c.bf16 %v4155_v21, %v4155_v21  ;;  %v4158_v23 = vmax.f32 %v3567_v58, 0.0  ;;  %v4159_v56 = vmax.f32 %v3569_v0, 0.0  ;;  %v4160_v19 = vmax.f32 %v3571_v7, 0.0  ;;  %1950 = vst.msk [vmem:[%s4064_s4 + $0x28] sm:$0xf] %vm1939_vm2, %v2203_v20 }
 0x24b   :  { %v2210_v46 = vpack.c.bf16 %v4156_v40, %v4156_v40  ;;  %v2211_v29 = vpack.c.bf16 %v4157_v49, %v4157_v49  ;;  %1951 = vst.msk [vmem:[%s4064_s4 + $0x2c] sm:$0xf] %vm1939_vm2, %v2204_v4  ;;  %1952 = vst.msk [vmem:[%s4064_s4 + $0x30] sm:$0xf] %vm1939_vm2, %v2205_v57  ;;  %v4161_v31 = vmax.f32 %v3573_v13, 0.0  ;;  %v4162_v0 = vmax.f32 %v3575_v18, 0.0 }
 0x24c   :  { %v2212_v33 = vpack.c.bf16 %v4158_v23, %v4158_v23  ;;  %v2213_v44 = vpack.c.bf16 %v4159_v56, %v4159_v56  ;;  %v2214_v27 = vpack.c.bf16 %v4160_v19, %v4160_v19  ;;  %1953 = vst.msk [vmem:[%s4064_s4 + $0x34] sm:$0xf] %vm1939_vm2, %v2206_v12  ;;  %v4163_v2 = vmax.f32 %v3577_v24, 0.0  ;;  %1954 = vst.msk [vmem:[%s4064_s4 + $0x38] sm:$0xf] %vm1939_vm2, %v2207_v22  ;;  %v4180_v40 = vld [vmem:[#allocation7_spill] sm:$0xff] }
 0x24d   :  { %v2215_v58 = vpack.c.bf16 %v4161_v31, %v4161_v31  ;;  %v2216_v7 = vpack.c.bf16 %v4162_v0, %v4162_v0  ;;  %v4164_v54 = vmax.f32 %v3579_v28, 0.0  ;;  %1955 = vst.msk [vmem:[%s4064_s4 + $0x3c] sm:$0xf] %vm1939_vm2, %v2208_v61  ;;  %1956 = vst.msk [vmem:[%s4064_s4 + $0x40] sm:$0xf] %vm1939_vm2, %v2209_v63  ;;  %v4165_v13 = vmax.f32 %v3581_v34, 0.0 }
 0x24e   :  { %v2217_v50 = vpack.c.bf16 %v4163_v2, %v4163_v2  ;;  %1957 = vst.msk [vmem:[%s4064_s4 + $0x44] sm:$0xf] %vm1939_vm2, %v2210_v46  ;;  %v4166_v24 = vmax.f32 %v3583_v38, 0.0  ;;  %v4167_v42 = vmax.f32 %v3585_v43, 0.0  ;;  %v4168_v55 = vmax.f32 %v3587_v47, 0.0  ;;  %v4192_v2 = vld [vmem:[#allocation17_spill] sm:$0xff] }
 0x24f   :  { %v2218_v37 = vpack.c.bf16 %v4164_v54, %v4164_v54  ;;  %v2219_v18 = vpack.c.bf16 %v4165_v13, %v4165_v13  ;;  %1958 = vst.msk [vmem:[%s4064_s4 + $0x48] sm:$0xf] %vm1939_vm2, %v2211_v29  ;;  %1959 = vst.msk [vmem:[%s4064_s4 + $0x4c] sm:$0xf] %vm1939_vm2, %v2212_v33  ;;  %v4169_v34 = vmax.f32 %v3589_v53, 0.0  ;;  %v4170_v43 = vmax.f32 %v3591_v59, 0.0 }
 0x250   :  { %v2220_v28 = vpack.c.bf16 %v4166_v24, %v4166_v24  ;;  %v2221_v15 = vpack.c.bf16 %v4167_v42, %v4167_v42  ;;  %v2222_v60 = vpack.c.bf16 %v4168_v55, %v4168_v55  ;;  %1960 = vst.msk [vmem:[%s4064_s4 + $0x50] sm:$0xf] %vm1939_vm2, %v2213_v44  ;;  %1961 = vst.msk [vmem:[%s4064_s4 + $0x54] sm:$0xf] %vm1939_vm2, %v2214_v27  ;;  %v4171_v20 = vmax.f32 %v3593_v3, 0.0  ;;  %v4173_v53 = vld [vmem:[#allocation6_spill] sm:$0xff] }
 0x251   :  { %v2223_v38 = vpack.c.bf16 %v4169_v34, %v4169_v34  ;;  %v2224_v47 = vpack.c.bf16 %v4170_v43, %v4170_v43  ;;  %v4172_v57 = vmax.f32 %v3595_v8, 0.0  ;;  %1962 = vst.msk [vmem:[%s4064_s4 + $0x58] sm:$0xf] %vm1939_vm2, %v2215_v58  ;;  %1963 = vst.msk [vmem:[%s4064_s4 + $0x5c] sm:$0xf] %vm1939_vm2, %v2216_v7  ;;  %v4174_v59 = vmax.f32 %v4173_v53, 0.0 }
 0x252   :  { %v2225_v4 = vpack.c.bf16 %v4171_v20, %v4171_v20  ;;  %1964 = vst.msk [vmem:[%s4064_s4 + $0x60] sm:$0xf] %vm1939_vm2, %v2217_v50  ;;  %1965 = vst.msk [vmem:[%s4064_s4 + $0x64] sm:$0xf] %vm1939_vm2, %v2218_v37  ;;  %v4175_v8 = vmax.f32 %v3599_v25, 0.0  ;;  %v4176_v22 = vmax.f32 %v3601_v41, 0.0  ;;  %v2246_v34 = vpack.c.bf16 %v1706_v14, %v1706_v14 }
 0x253   :  { %v2226_v12 = vpack.c.bf16 %v4172_v57, %v4172_v57  ;;  %v2227_v3 = vpack.c.bf16 %v4174_v59, %v4174_v59  ;;  %v4177_v61 = vmax.f32 %v3603_v51, 0.0  ;;  %1966 = vst.msk [vmem:[%s4064_s4 + $0x68] sm:$0xf] %vm1939_vm2, %v2219_v18  ;;  %1967 = vst.msk [vmem:[%s4064_s4 + $0x6c] sm:$0xf] %vm1939_vm2, %v2220_v28  ;;  %v4178_v25 = vmax.f32 %v3605_v6, 0.0 }
 0x254   :  { %v2228_v11 = vpack.c.bf16 %v4175_v8, %v4175_v8  ;;  %v2229_v26 = vpack.c.bf16 %v4176_v22, %v4176_v22  ;;  %1968 = vst.msk [vmem:[%s4064_s4 + $0x70] sm:$0xf] %vm1939_vm2, %v2221_v15  ;;  %1969 = vst.msk [vmem:[%s4064_s4 + $0x74] sm:$0xf] %vm1939_vm2, %v2222_v60  ;;  %v4179_v51 = vmax.f32 %v3607_v9, 0.0  ;;  %v4181_v46 = vmax.f32 %v4180_v40, 0.0 }
 0x255   :  { %v2230_v21 = vpack.c.bf16 %v4177_v61, %v4177_v61  ;;  %v2231_v41 = vpack.c.bf16 %v4178_v25, %v4178_v25  ;;  %v4182_v29 = vmax.f32 %v3611_v45, 0.0  ;;  %1970 = vst.msk [vmem:[%s4064_s4 + $0x78] sm:$0xf] %vm1939_vm2, %v2223_v38  ;;  %1971 = vst.msk [vmem:[%s4064_s4 + $0x7c] sm:$0xf] %vm1939_vm2, %v2224_v47  ;;  %v4183_v6 = vld [vmem:[#allocation8_spill] sm:$0xff]  ;;  %v2245_v60 = vpack.c.bf16 %v1705_v62, %v1705_v62 }
 0x256   :  { %v2232_v63 = vpack.c.bf16 %v4179_v51, %v4179_v51  ;;  %v2233_v49 = vpack.c.bf16 %v4181_v46, %v4181_v46  ;;  %1972 = vst.msk [vmem:[%s4064_s4 + $0x80] sm:$0xf] %vm1939_vm2, %v2225_v4  ;;  %1973 = vst.msk [vmem:[%s4064_s4 + $0x84] sm:$0xf] %vm1939_vm2, %v2226_v12  ;;  %v4184_v9 = vmax.f32 %v4183_v6, 0.0  ;;  %v4185_v33 = vmax.f32 %v3615_v17, 0.0 }
 0x257   :  { %v2234_v23 = vpack.c.bf16 %v4182_v29, %v4182_v29  ;;  %v4186_v44 = vmax.f32 %v3617_v36, 0.0  ;;  %v4187_v27 = vmax.f32 %v4150_v16, 0.0  ;;  %1974 = vst.msk [vmem:[%s4064_s4 + $0x88] sm:$0xf] %vm1939_vm2, %v2227_v3  ;;  %1975 = vst.msk [vmem:[%s4064_s4 + $0x8c] sm:$0xf] %vm1939_vm2, %v2228_v11 }
 0x258   :  { %v2235_v45 = vpack.c.bf16 %v4184_v9, %v4184_v9  ;;  %v2236_v56 = vpack.c.bf16 %v4185_v33, %v4185_v33  ;;  %1976 = vst.msk [vmem:[%s4064_s4 + $0x90] sm:$0xf] %vm1939_vm2, %v2229_v26  ;;  %1977 = vst.msk [vmem:[%s4064_s4 + $0x94] sm:$0xf] %vm1939_vm2, %v2230_v21  ;;  %v4188_v16 = vld [vmem:[#allocation10_spill] sm:$0xff]  ;;  %v4190_v58 = vld [vmem:[#allocation11_spill] sm:$0xff] }
 0x259   :  { %v2237_v19 = vpack.c.bf16 %v4186_v44, %v4186_v44  ;;  %v2238_v31 = vpack.c.bf16 %v4187_v27, %v4187_v27  ;;  %v4189_v17 = vmax.f32 %v4188_v16, 0.0  ;;  %v4191_v0 = vmax.f32 %v4190_v58, 0.0  ;;  %v4194_v37 = vld [vmem:[#allocation12_spill] sm:$0xff]  ;;  %1978 = vst.msk [vmem:[%s4064_s4 + $0x98] sm:$0xf] %vm1939_vm2, %v2231_v41  ;;  %v4196_v24 = vld [vmem:[#allocation18_spill] sm:$0xff] }
 0x25a   :  { %v4193_v50 = vmax.f32 %v4192_v2, 0.0  ;;  %v4195_v13 = vmax.f32 %v4194_v37, 0.0  ;;  %1979 = vst.msk [vmem:[%s4064_s4 + $0x9c] sm:$0xf] %vm1939_vm2, %v2232_v63  ;;  %1980 = vst.msk [vmem:[%s4064_s4 + $0xa0] sm:$0xf] %vm1939_vm2, %v2233_v49 }
 0x25b   :  { %v2239_v36 = vpack.c.bf16 %v4189_v17, %v4189_v17  ;;  %v2240_v7 = vpack.c.bf16 %v4191_v0, %v4191_v0  ;;  %1981 = vst.msk [vmem:[%s4064_s4 + $0xa4] sm:$0xf] %vm1939_vm2, %v2234_v23  ;;  %v4197_v28 = vmax.f32 %v4196_v24, 0.0  ;;  %v4198_v15 = vmax.f32 %v4151_v35, 0.0  ;;  %1982 = vst.msk [vmem:[%s4064_s4 + $0xa8] sm:$0xf] %vm1939_vm2, %v2235_v45 }
 0x25c   :  { %v2241_v54 = vpack.c.bf16 %v4193_v50, %v4193_v50  ;;  %v2242_v18 = vpack.c.bf16 %v4195_v13, %v4195_v13  ;;  %1983 = vst.msk [vmem:[%s4064_s4 + $0xac] sm:$0xf] %vm1939_vm2, %v2236_v56  ;;  %1984 = vst.msk [vmem:[%s4064_s4 + $0xb0] sm:$0xf] %vm1939_vm2, %v2237_v19  ;;  %v2247_v35 = vpack.c.bf16 %v1707_v1, %v1707_v1 }
 0x25d   :  { %v2243_v42 = vpack.c.bf16 %v4197_v28, %v4197_v28  ;;  %v2244_v55 = vpack.c.bf16 %v4198_v15, %v4198_v15  ;;  %1985 = vst.msk [vmem:[%s4064_s4 + $0xb4] sm:$0xf] %vm1939_vm2, %v2238_v31  ;;  %1986 = vst.msk [vmem:[%s4064_s4 + $0xb8] sm:$0xf] %vm1939_vm2, %v2239_v36 }
 0x25e   :  { %1987 = vst.msk [vmem:[%s4064_s4 + $0xbc] sm:$0xf] %vm1939_vm2, %v2240_v7  ;;  %1988 = vst.msk [vmem:[%s4064_s4 + $0xc0] sm:$0xf] %vm1939_vm2, %v2241_v54 }
 0x25f   :  { %1989 = vst.msk [vmem:[%s4064_s4 + $0xc4] sm:$0xf] %vm1939_vm2, %v2242_v18  ;;  %1990 = vst.msk [vmem:[%s4064_s4 + $0xc8] sm:$0xf] %vm1939_vm2, %v2243_v42 }
 0x260   :  { %1991 = vst.msk [vmem:[%s4064_s4 + $0xcc] sm:$0xf] %vm1939_vm2, %v2244_v55  ;;  %1992 = vst.msk [vmem:[%s4064_s4 + $0xd0] sm:$0xf] %vm1939_vm2, %v2245_v60 }
 0x261   :  { %1993 = vst.msk [vmem:[%s4064_s4 + $0xd4] sm:$0xf] %vm1939_vm2, %v2246_v34  ;;  %1994 = vst.msk [vmem:[%s4064_s4 + $0xd8] sm:$0xf] %vm1939_vm2, %v2247_v35 }
 0x262   :  { %1995 = vst.msk [vmem:[%s4064_s4 + $0xdc] sm:$0xf] %vm1939_vm2, %v2248_v5 }
 0x263   :  { %1997 = vst.msk [vmem:[%s4064_s4 + $0xe0] sm:$0x1] %vm1996_vm3, %v2249_v32 }

// kernel: stem_forward.12
= control target key start
LH: loop header
LB: loop body
LE: loop exit
PB: predicated region body
PF: predicated region fallthrough
CT: control target
= control target key end

     0   :  { %v2598_v0 = vmov 0   ;;  %v2599_v2 = vmov 0.0   ;;  %vm2600_vm0 = vmmov 0   ;;  %vm713_vm1 = vcmask 261120   ;;  %s4060_s1 = inlined_call_operand.vmem [shape: bf16[288,128], index: 1, kind: input, shape index: {}]   ;;  %s4061_s0 = inlined_call_operand.vmem [shape: bf16[464,288], index: 0, kind: input, shape index: {}]   ;;  %s4062_s2 = inlined_call_operand.vmem [shape: f32[1,128], index: 2, kind: input, shape index: {}]   ;;  %s4063_s3 = inlined_call_operand.vmem [shape: f32[1,128], index: 3, kind: input, shape index: {}]   ;;  %s4064_s4 = inlined_call_operand.vmem [shape: bf16[450,64], index: 4, kind: output, shape index: {}]  }
   0x1   :  { %801 = vmatprep.subr.bf16.mxu1 %v2598_v0  ;;  %v2462_v1 = vld [vmem:[%s4060_s1] sm:$0xff]   ;;  %2281 = vmatprep.subr.bf16.mxu0 %v2599_v2  ;;  %v2463_v3 = vld [vmem:[%s4060_s1 + $0x8] sm:$0xff]   ;;  %v2464_v4 = vld [vmem:[%s4060_s1 + $0x10] sm:$0xff]   ;;  %vm1939_vm2 = vcmask 519168   ;;  %vm1996_vm3 = vcmask 516096  }
   0x2   :  { %2285 = vmatprep.mubr.msk.bf16.mxu0 %vm2600_vm0, %v2599_v2  ;;  %802 = vmatpush1.bf16.msra.mxu1 %v2462_v1  ;;  %v2465_v5 = vld [vmem:[%s4060_s1 + $0x18] sm:$0xff]   ;;  %v2466_v6 = vld [vmem:[%s4060_s1 + $0x20] sm:$0xff]   ;;  %v2478_v8 = vld [vmem:[%s4060_s1 + $0x88] sm:$0xff]  }
   0x3   :  { %803 = vmatprep.subr.bf16.mxu1 %v2598_v0  ;;  %v2476_v7 = vld [vmem:[%s4060_s1 + $0x80] sm:$0xff]   ;;  %v2467_v9 = vld [vmem:[%s4060_s1 + $0x28] sm:$0xff]   ;;  %v2468_v12 = vld [vmem:[%s4060_s1 + $0x30] sm:$0xff]  }
   0x4   :  { %2282 = vmatpush3.bf16.msra.mxu0 %v2476_v7  ;;  %v2480_v10 = vld [vmem:[%s4061_s0 + $0x8] ss:$12 sps:$4 sm:$0xff]   ;;  %v2483_v11 = vld [vmem:[%s4061_s0 + $0x4] ss:$12 sps:$4 sm:$0xff]   ;;  %v2469_v13 = vld [vmem:[%s4060_s1 + $0x38] sm:$0xff]  }
   0x5   :  { %2283 = vmatprep.subr.bf16.mxu0 %v2599_v2  ;;  %833 = vmatprep.mubr.bf16.mxu1 %v2483_v11  ;;  %v2484_v14 = vld [vmem:[%s4061_s0 + $0x20] ss:$12 sps:$4 sm:$0xff]   ;;  %v2488_v17 = vld [vmem:[%s4061_s0 + $0x38] ss:$12 sps:$4 sm:$0xff]   ;;  %v2472_v18 = vld [vmem:[%s4060_s1 + $0x50] sm:$0xff]  }
   0x6   :  { %804 = vmatpush1.bf16.msra.mxu1 %v2463_v3  ;;  %v2470_v15 = vld [vmem:[%s4060_s1 + $0x40] sm:$0xff]   ;;  %v2471_v16 = vld [vmem:[%s4060_s1 + $0x48] sm:$0xff]   ;;  %v2473_v19 = vld [vmem:[%s4060_s1 + $0x58] sm:$0xff]  }
   0x7   :  { %805 = vmatprep.subr.bf16.mxu1 %v2598_v0  ;;  %v2492_v20 = vld [vmem:[%s4061_s0 + $0x50] ss:$12 sps:$4 sm:$0xff]   ;;  %v2474_v21 = vld [vmem:[%s4060_s1 + $0x60] sm:$0xff]   ;;  %v2475_v22 = vld [vmem:[%s4060_s1 + $0x68] sm:$0xff]  }
   0x8   :  { %2284 = vmatpush3.bf16.msra.mxu0 %v2478_v8  ;;  %v2496_v23 = vld [vmem:[%s4061_s0 + $0x68] ss:$12 sps:$4 sm:$0xff]   ;;  %v2479_v25 = vld [vmem:[%s4060_s1 + $0x78] sm:$0xff]   ;;  %v2500_v26 = vld [vmem:[%s4061_s0 + $0x80] ss:$12 sps:$4 sm:$0xff]  }
   0x9   :  { %v2477_v24 = vld [vmem:[%s4060_s1 + $0x70] sm:$0xff]   ;;  %v2481_v27 = vld [vmem:[%s4061_s0] ss:$12 sps:$4 sm:$0xff]   ;;  %v2485_v28 = vld [vmem:[%s4061_s0 + $0x1c] ss:$12 sps:$4 sm:$0xff]  }
   0xa   :  { %806 = vmatpush1.bf16.msra.mxu1 %v2464_v4  ;;  %v2504_v29 = vld [vmem:[%s4061_s0 + $0x98] ss:$12 sps:$4 sm:$0xff]   ;;  %v2489_v31 = vld [vmem:[%s4061_s0 + $0x34] ss:$12 sps:$4 sm:$0xff]   ;;  %v2508_v32 = vld [vmem:[%s4061_s0 + $0xb0] ss:$12 sps:$4 sm:$0xff]  }
   0xb   :  { %807 = vmatprep.subr.bf16.mxu1 %v2598_v0  ;;  %2286 = vmatmul.mubr.msk.bf16.vlgmr.msra.gmra.mrb[0].mxu0 %vm713_vm1, %v2480_v10  ;;  %v2487_v30 = vld [vmem:[%s4061_s0 + $0x18] ss:$12 sps:$4 sm:$0xff]   ;;  %v2491_v33 = vld [vmem:[%s4061_s0 + $0x30] ss:$12 sps:$4 sm:$0xff]   ;;  %v2512_v35 = vld [vmem:[%s4061_s0 + $0xc8] ss:$12 sps:$4 sm:$0xff]  }
   0xc   :  { %2289 = vmatprep.mubr.msk.bf16.mxu0 %vm2600_vm0, %v2599_v2  ;;  %v2493_v34 = vld [vmem:[%s4061_s0 + $0x4c] ss:$12 sps:$4 sm:$0xff]   ;;  %v2495_v36 = vld [vmem:[%s4061_s0 + $0x48] ss:$12 sps:$4 sm:$0xff]   ;;  %v2497_v37 = vld [vmem:[%s4061_s0 + $0x64] ss:$12 sps:$4 sm:$0xff]  }
   0xd   :  { %v2516_v38 = vld [vmem:[%s4061_s0 + $0xe0] ss:$12 sps:$4 sm:$0xff]   ;;  %v2501_v40 = vld [vmem:[%s4061_s0 + $0x7c] ss:$12 sps:$4 sm:$0xff]   ;;  %v2520_v41 = vld [vmem:[%s4061_s0 + $0xf8] ss:$12 sps:$4 sm:$0xff]  }
   0xe   :  { %808 = vmatpush1.bf16.msra.mxu1 %v2465_v5  ;;  %v2499_v39 = vld [vmem:[%s4061_s0 + $0x60] ss:$12 sps:$4 sm:$0xff]   ;;  %v2503_v42 = vld [vmem:[%s4061_s0 + $0x78] ss:$12 sps:$4 sm:$0xff]   ;;  %v2524_v44 = vld [vmem:[%s4061_s0 + $0x110] ss:$12 sps:$4 sm:$0xff]  }
   0xf   :  { %809 = vmatprep.subr.bf16.mxu1 %v2598_v0  ;;  %v2505_v43 = vld [vmem:[%s4061_s0 + $0x94] ss:$12 sps:$4 sm:$0xff]   ;;  %v2507_v45 = vld [vmem:[%s4061_s0 + $0x90] ss:$12 sps:$4 sm:$0xff]   ;;  %v2509_v46 = vld [vmem:[%s4061_s0 + $0xac] ss:$12 sps:$4 sm:$0xff]  }
  0x10   :  { %v2528_v47 = vld [vmem:[%s4061_s0 + $0x128] ss:$12 sps:$4 sm:$0xff]   ;;  %v2513_v49 = vld [vmem:[%s4061_s0 + $0xc4] ss:$12 sps:$4 sm:$0xff]   ;;  %v2532_v50 = vld [vmem:[%s4061_s0 + $0x140] ss:$12 sps:$4 sm:$0xff]  }
  0x11   :  { %v2511_v48 = vld [vmem:[%s4061_s0 + $0xa8] ss:$12 sps:$4 sm:$0xff]   ;;  %v2515_v51 = vld [vmem:[%s4061_s0 + $0xc0] ss:$12 sps:$4 sm:$0xff]   ;;  %v2536_v53 = vld [vmem:[%s4061_s0 + $0x158] ss:$12 sps:$4 sm:$0xff]  }
  0x12   :  { %810 = vmatpush1.bf16.msra.mxu1 %v2466_v6  ;;  %v2517_v52 = vld [vmem:[%s4061_s0 + $0xdc] ss:$12 sps:$4 sm:$0xff]   ;;  %v2519_v54 = vld [vmem:[%s4061_s0 + $0xd8] ss:$12 sps:$4 sm:$0xff]   ;;  %v2521_v55 = vld [vmem:[%s4061_s0 + $0xf4] ss:$12 sps:$4 sm:$0xff]  }
  0x13   :  { %811 = vmatprep.subr.bf16.mxu1 %v2598_v0  ;;  %2290 = vmatmul.mubr.msk.bf16.gmra.mrb[4].mxu0 %vm713_vm1, %v2484_v14  ;;  %v2540_v56 = vld [vmem:[%s4061_s0 + $0x170] ss:$12 sps:$4 sm:$0xff]   ;;  %v2525_v58 = vld [vmem:[%s4061_s0 + $0x10c] ss:$12 sps:$4 sm:$0xff]   ;;  %v2544_v59 = vld [vmem:[%s4061_s0 + $0x188] ss:$12 sps:$4 sm:$0xff]  }
  0x14   :  { %2293 = vmatprep.mubr.msk.bf16.mxu0 %vm2600_vm0, %v2599_v2  ;;  %v2523_v57 = vld [vmem:[%s4061_s0 + $0xf0] ss:$12 sps:$4 sm:$0xff]   ;;  %v2527_v60 = vld [vmem:[%s4061_s0 + $0x108] ss:$12 sps:$4 sm:$0xff]   ;;  %v2548_v62 = vld [vmem:[%s4061_s0 + $0x1a0] ss:$12 sps:$4 sm:$0xff]  }
  0x15   :  { %v2529_v61 = vld [vmem:[%s4061_s0 + $0x124] ss:$12 sps:$4 sm:$0xff]   ;;  %v2531_v63 = vld [vmem:[%s4061_s0 + $0x120] ss:$12 sps:$4 sm:$0xff]   ;;  %v2560_v8 = vld [vmem:[%s4061_s0 + $0x1e8] ss:$12 sps:$4 sm:$0xff]  }
  0x16   :  { %812 = vmatpush1.bf16.msra.mxu1 %v2467_v9  ;;  %v2552_v1 = vld [vmem:[%s4061_s0 + $0x1b8] ss:$12 sps:$4 sm:$0xff]   ;;  %v2537_v4 = vld [vmem:[%s4061_s0 + $0x154] ss:$12 sps:$4 sm:$0xff]   ;;  %v2556_v5 = vld [vmem:[%s4061_s0 + $0x1d0] ss:$12 sps:$4 sm:$0xff]  }
  0x17   :  { %813 = vmatprep.subr.bf16.mxu1 %v2598_v0  ;;  %v2535_v3 = vld [vmem:[%s4061_s0 + $0x138] ss:$12 sps:$4 sm:$0xff]   ;;  %v2539_v6 = vld [vmem:[%s4061_s0 + $0x150] ss:$12 sps:$4 sm:$0xff]   ;;  %v2543_v9 = vld [vmem:[%s4061_s0 + $0x168] ss:$12 sps:$4 sm:$0xff]  }
  0x18   :  { %v2541_v7 = vld [vmem:[%s4061_s0 + $0x16c] ss:$12 sps:$4 sm:$0xff]   ;;  %v2545_v10 = vld [vmem:[%s4061_s0 + $0x184] ss:$12 sps:$4 sm:$0xff]  }
  0x19   :  { %v2564_v11 = vld [vmem:[%s4061_s0 + $0x200] ss:$12 sps:$4 sm:$0xff]   ;;  %v2568_v14 = vld [vmem:[%s4061_s0 + $0x218] ss:$12 sps:$4 sm:$0xff]  }
  0x1a   :  { %814 = vmatpush1.bf16.msra.mxu1 %v2468_v12  ;;  %v2547_v12 = vld [vmem:[%s4061_s0 + $0x180] ss:$12 sps:$4 sm:$0xff]  }
  0x1b   :  { %815 = vmatprep.subr.bf16.mxu1 %v2598_v0  ;;  %2294 = vmatmul.mubr.msk.bf16.gmra.mrb[8].mxu0 %vm713_vm1, %v2488_v17  ;;  %v2572_v17 = vld [vmem:[%s4061_s0 + $0x230] ss:$12 sps:$4 sm:$0xff]  }
  0x1c   :  { %2297 = vmatprep.mubr.msk.bf16.mxu0 %vm2600_vm0, %v2599_v2 }
  0x1e   :  { %816 = vmatpush1.bf16.msra.mxu1 %v2469_v13  ;;  %v2549_v13 = vld [vmem:[%s4061_s0 + $0x19c] ss:$12 sps:$4 sm:$0xff]  }
  0x1f   :  { %817 = vmatprep.subr.bf16.mxu1 %v2598_v0 }
  0x22   :  { %818 = vmatpush1.bf16.msra.mxu1 %v2470_v15  ;;  %v2551_v15 = vld [vmem:[%s4061_s0 + $0x198] ss:$12 sps:$4 sm:$0xff]  }
  0x23   :  { %819 = vmatprep.subr.bf16.mxu1 %v2598_v0  ;;  %2298 = vmatmul.mubr.msk.bf16.gmra.mrb[12].mxu0 %vm713_vm1, %v2492_v20  ;;  %v2576_v20 = vld [vmem:[%s4061_s0 + $0x248] ss:$12 sps:$4 sm:$0xff]  }
  0x24   :  { %2301 = vmatprep.mubr.msk.bf16.mxu0 %vm2600_vm0, %v2599_v2 }
  0x26   :  { %820 = vmatpush1.bf16.msra.mxu1 %v2471_v16  ;;  %v2553_v16 = vld [vmem:[%s4061_s0 + $0x1b4] ss:$12 sps:$4 sm:$0xff]  }
  0x27   :  { %821 = vmatprep.subr.bf16.mxu1 %v2598_v0 }
  0x2a   :  { %822 = vmatpush1.bf16.msra.mxu1 %v2472_v18  ;;  %v2555_v18 = vld [vmem:[%s4061_s0 + $0x1b0] ss:$12 sps:$4 sm:$0xff]  }
  0x2b   :  { %823 = vmatprep.subr.bf16.mxu1 %v2598_v0  ;;  %2302 = vmatmul.mubr.msk.bf16.gmra.mrb[16].mxu0 %vm713_vm1, %v2496_v23  ;;  %v2580_v23 = vld [vmem:[%s4061_s0 + $0x260] ss:$12 sps:$4 sm:$0xff]  }
  0x2c   :  { %2305 = vmatprep.mubr.msk.bf16.mxu0 %vm2600_vm0, %v2599_v2 }
  0x2e   :  { %824 = vmatpush1.bf16.msra.mxu1 %v2473_v19  ;;  %v2557_v19 = vld [vmem:[%s4061_s0 + $0x1cc] ss:$12 sps:$4 sm:$0xff]  }
  0x2f   :  { %825 = vmatprep.subr.bf16.mxu1 %v2598_v0 }
  0x32   :  { %826 = vmatpush1.bf16.msra.mxu1 %v2474_v21  ;;  %v2559_v21 = vld [vmem:[%s4061_s0 + $0x1c8] ss:$12 sps:$4 sm:$0xff]  }
  0x33   :  { %827 = vmatprep.subr.bf16.mxu1 %v2598_v0  ;;  %2306 = vmatmul.mubr.msk.bf16.gmra.mrb[20].mxu0 %vm713_vm1, %v2500_v26  ;;  %v2584_v26 = vld [vmem:[%s4061_s0 + $0x278] ss:$12 sps:$4 sm:$0xff]  }
  0x34   :  { %2309 = vmatprep.mubr.msk.bf16.mxu0 %vm2600_vm0, %v2599_v2 }
  0x36   :  { %828 = vmatpush1.bf16.msra.mxu1 %v2475_v22  ;;  %v2561_v22 = vld [vmem:[%s4061_s0 + $0x1e4] ss:$12 sps:$4 sm:$0xff]  }
  0x37   :  { %829 = vmatprep.subr.bf16.mxu1 %v2598_v0 }
  0x3a   :  { %830 = vmatpush1.bf16.msra.mxu1 %v2477_v24  ;;  %v2563_v24 = vld [vmem:[%s4061_s0 + $0x1e0] ss:$12 sps:$4 sm:$0xff]  }
  0x3b   :  { %831 = vmatprep.subr.bf16.mxu1 %v2598_v0  ;;  %2310 = vmatmul.mubr.msk.bf16.gmra.mrb[24].mxu0 %vm713_vm1, %v2504_v29  ;;  %v2533_v0 = vld [vmem:[%s4061_s0 + $0x13c] ss:$12 sps:$4 sm:$0xff]  }
  0x3c   :  { %2313 = vmatprep.mubr.msk.bf16.mxu0 %vm2600_vm0, %v2599_v2 }
  0x3e   :  { %832 = vmatpush1.bf16.msra.mxu1 %v2479_v25  ;;  %v2565_v25 = vld [vmem:[%s4061_s0 + $0x1fc] ss:$12 sps:$4 sm:$0xff]  }
  0x41   :  { %834 = vmatmul.mubr.bf16.vlgmr.msra.gmra.mrb[0].mxu1 %v2481_v27  ;;  %v2567_v27 = vld [vmem:[%s4061_s0 + $0x1f8] ss:$12 sps:$4 sm:$0xff]  }
  0x42   :  { %841 = vmatprep.mubr.bf16.mxu1 %v2485_v28  ;;  %v2569_v28 = vld [vmem:[%s4061_s0 + $0x214] ss:$12 sps:$4 sm:$0xff]  }
  0x43   :  { %2314 = vmatmul.mubr.msk.bf16.gmra.mrb[28].mxu0 %vm713_vm1, %v2508_v32 }
  0x44   :  { %2317 = vmatprep.mubr.msk.bf16.mxu0 %vm2600_vm0, %v2599_v2 }
  0x49   :  { %842 = vmatmul.mubr.bf16.gmra.mrb[4].mxu1 %v2487_v30 }
  0x4a   :  { %849 = vmatprep.mubr.bf16.mxu1 %v2489_v31  ;;  %v2588_v31 = vld [vmem:[%s4061_s0 + $0x290] ss:$12 sps:$4 sm:$0xff]  }
  0x4b   :  { %2318 = vmatmul.mubr.msk.bf16.gmra.mrb[32].mxu0 %vm713_vm1, %v2512_v35  ;;  %v2573_v35 = vld [vmem:[%s4061_s0 + $0x22c] ss:$12 sps:$4 sm:$0xff]  }
  0x4c   :  { %2321 = vmatprep.mubr.msk.bf16.mxu0 %vm2600_vm0, %v2599_v2 }
  0x51   :  { %850 = vmatmul.mubr.bf16.gmra.mrb[8].mxu1 %v2491_v33  ;;  %v2571_v33 = vld [vmem:[%s4061_s0 + $0x210] ss:$12 sps:$4 sm:$0xff]  }
  0x52   :  { %857 = vmatprep.mubr.bf16.mxu1 %v2493_v34 }
  0x53   :  { %2322 = vmatmul.mubr.msk.bf16.gmra.mrb[36].mxu0 %vm713_vm1, %v2516_v38  ;;  %v2592_v38 = vld [vmem:[%s4061_s0 + $0x2a8] ss:$12 sps:$4 sm:$0xff]  }
  0x54   :  { %2325 = vmatprep.mubr.msk.bf16.mxu0 %vm2600_vm0, %v2599_v2 }
  0x59   :  { %858 = vmatmul.mubr.bf16.gmra.mrb[12].mxu1 %v2495_v36 }
  0x5a   :  { %865 = vmatprep.mubr.bf16.mxu1 %v2497_v37 }
  0x5b   :  { %2326 = vmatmul.mubr.msk.bf16.gmra.mrb[40].mxu0 %vm713_vm1, %v2520_v41 }
  0x5c   :  { %2329 = vmatprep.mubr.msk.bf16.mxu0 %vm2600_vm0, %v2599_v2 }
  0x61   :  { %866 = vmatmul.mubr.bf16.gmra.mrb[16].mxu1 %v2499_v39 }
  0x62   :  { %873 = vmatprep.mubr.bf16.mxu1 %v2501_v40  ;;  %v2575_v40 = vld [vmem:[%s4061_s0 + $0x228] ss:$12 sps:$4 sm:$0xff]  }
  0x63   :  { %2330 = vmatmul.mubr.msk.bf16.gmra.mrb[44].mxu0 %vm713_vm1, %v2524_v44 }
  0x64   :  { %2333 = vmatprep.mubr.msk.bf16.mxu0 %vm2600_vm0, %v2599_v2 }
  0x69   :  { %874 = vmatmul.mubr.bf16.gmra.mrb[20].mxu1 %v2503_v42  ;;  %v2577_v42 = vld [vmem:[%s4061_s0 + $0x244] ss:$12 sps:$4 sm:$0xff]  }
  0x6a   :  { %881 = vmatprep.mubr.bf16.mxu1 %v2505_v43 }
  0x6b   :  { %2334 = vmatmul.mubr.msk.bf16.gmra.mrb[48].mxu0 %vm713_vm1, %v2528_v47  ;;  %v2581_v47 = vld [vmem:[%s4061_s0 + $0x25c] ss:$12 sps:$4 sm:$0xff]  }
  0x6c   :  { %2337 = vmatprep.mubr.msk.bf16.mxu0 %vm2600_vm0, %v2599_v2 }
  0x71   :  { %882 = vmatmul.mubr.bf16.gmra.mrb[24].mxu1 %v2507_v45  ;;  %v2579_v45 = vld [vmem:[%s4061_s0 + $0x240] ss:$12 sps:$4 sm:$0xff]  }
  0x72   :  { %889 = vmatprep.mubr.bf16.mxu1 %v2509_v46 }
  0x73   :  { %2338 = vmatmul.mubr.msk.bf16.gmra.mrb[52].mxu0 %vm713_vm1, %v2532_v50 }
  0x74   :  { %2341 = vmatprep.mubr.msk.bf16.mxu0 %vm2600_vm0, %v2599_v2 }
  0x79   :  { %890 = vmatmul.mubr.bf16.gmra.mrb[28].mxu1 %v2511_v48 }
  0x7a   :  { %897 = vmatprep.mubr.bf16.mxu1 %v2513_v49 }
  0x7b   :  { %2342 = vmatmul.mubr.msk.bf16.gmra.mrb[56].mxu0 %vm713_vm1, %v2536_v53  ;;  %v2585_v53 = vld [vmem:[%s4061_s0 + $0x274] ss:$12 sps:$4 sm:$0xff]  }
  0x7c   :  { %2345 = vmatprep.mubr.msk.bf16.mxu0 %vm2600_vm0, %v2599_v2 }
  0x81   :  { %898 = vmatmul.mubr.bf16.gmra.mrb[32].mxu1 %v2515_v51  ;;  %v2583_v51 = vld [vmem:[%s4061_s0 + $0x258] ss:$12 sps:$4 sm:$0xff]  }
  0x82   :  { %905 = vmatprep.mubr.bf16.mxu1 %v2517_v52 }
  0x83   :  { %2346 = vmatmul.mubr.msk.bf16.gmra.mrb[60].mxu0 %vm713_vm1, %v2540_v56 }
  0x84   :  { %2349 = vmatprep.mubr.msk.bf16.mxu0 %vm2600_vm0, %v2599_v2 }
  0x89   :  { %906 = vmatmul.mubr.bf16.gmra.mrb[36].mxu1 %v2519_v54 }
  0x8a   :  { %913 = vmatprep.mubr.bf16.mxu1 %v2521_v55 }
  0x8b   :  { %2350 = vmatmul.mubr.msk.bf16.gmra.mrb[64].mxu0 %vm713_vm1, %v2544_v59  ;;  %v2589_v59 = vld [vmem:[%s4061_s0 + $0x28c] ss:$12 sps:$4 sm:$0xff]  }
  0x8c   :  { %2353 = vmatprep.mubr.msk.bf16.mxu0 %vm2600_vm0, %v2599_v2 }
  0x91   :  { %914 = vmatmul.mubr.bf16.gmra.mrb[40].mxu1 %v2523_v57  ;;  %v2587_v57 = vld [vmem:[%s4061_s0 + $0x270] ss:$12 sps:$4 sm:$0xff]  }
  0x92   :  { %921 = vmatprep.mubr.bf16.mxu1 %v2525_v58 }
  0x93   :  { %2354 = vmatmul.mubr.msk.bf16.gmra.mrb[68].mxu0 %vm713_vm1, %v2548_v62 }
  0x94   :  { %2357 = vmatprep.mubr.msk.bf16.mxu0 %vm2600_vm0, %v2599_v2 }
  0x99   :  { %922 = vmatmul.mubr.bf16.gmra.mrb[44].mxu1 %v2527_v60 }
  0x9a   :  { %929 = vmatprep.mubr.bf16.mxu1 %v2529_v61 }
  0x9b   :  { %2358 = vmatmul.mubr.msk.bf16.gmra.mrb[72].mxu0 %vm713_vm1, %v2552_v1 }
  0x9c   :  { %2361 = vmatprep.mubr.msk.bf16.mxu0 %vm2600_vm0, %v2599_v2 }
  0xa1   :  { %930 = vmatmul.mubr.bf16.gmra.mrb[48].mxu1 %v2531_v63 }
  0xa2   :  { %937 = vmatprep.mubr.bf16.mxu1 %v2533_v0 }
  0xa3   :  { %2362 = vmatmul.mubr.msk.bf16.gmra.mrb[76].mxu0 %vm713_vm1, %v2556_v5 }
  0xa4   :  { %2365 = vmatprep.mubr.msk.bf16.mxu0 %vm2600_vm0, %v2599_v2 }
  0xa9   :  { %938 = vmatmul.mubr.bf16.gmra.mrb[52].mxu1 %v2535_v3  ;;  %v2591_v3 = vld [vmem:[%s4061_s0 + $0x288] ss:$12 sps:$4 sm:$0xff]  }
  0xaa   :  { %945 = vmatprep.mubr.bf16.mxu1 %v2537_v4 }
  0xab   :  { %2366 = vmatmul.mubr.msk.bf16.gmra.mrb[80].mxu0 %vm713_vm1, %v2560_v8 }
  0xac   :  { %2369 = vmatprep.mubr.msk.bf16.mxu0 %vm2600_vm0, %v2599_v2 }
  0xb1   :  { %946 = vmatmul.mubr.bf16.gmra.mrb[56].mxu1 %v2539_v6  ;;  %v2593_v6 = vld [vmem:[%s4061_s0 + $0x2a4] ss:$12 sps:$4 sm:$0xff]  }
  0xb2   :  { %953 = vmatprep.mubr.bf16.mxu1 %v2541_v7 }
  0xb3   :  { %2370 = vmatmul.mubr.msk.bf16.gmra.mrb[84].mxu0 %vm713_vm1, %v2564_v11 }
  0xb4   :  { %2373 = vmatprep.mubr.msk.bf16.mxu0 %vm2600_vm0, %v2599_v2 }
  0xb9   :  { %954 = vmatmul.mubr.bf16.gmra.mrb[60].mxu1 %v2543_v9 }
  0xba   :  { %961 = vmatprep.mubr.bf16.mxu1 %v2545_v10 }
  0xbb   :  { %2374 = vmatmul.mubr.msk.bf16.gmra.mrb[88].mxu0 %vm713_vm1, %v2568_v14 }
  0xbc   :  { %2377 = vmatprep.mubr.msk.bf16.mxu0 %vm2600_vm0, %v2599_v2 }
  0xc1   :  { %962 = vmatmul.mubr.bf16.gmra.mrb[64].mxu1 %v2547_v12 }
  0xc2   :  { %969 = vmatprep.mubr.bf16.mxu1 %v2549_v13 }
  0xc3   :  { %2378 = vmatmul.mubr.msk.bf16.gmra.mrb[92].mxu0 %vm713_vm1, %v2572_v17 }
  0xc4   :  { %2381 = vmatprep.mubr.msk.bf16.mxu0 %vm2600_vm0, %v2599_v2 }
  0xc9   :  { %970 = vmatmul.mubr.bf16.gmra.mrb[68].mxu1 %v2551_v15  ;;  %v2595_v15 = vld [vmem:[%s4061_s0 + $0x2a0] ss:$12 sps:$4 sm:$0xff]  }
  0xca   :  { %977 = vmatprep.mubr.bf16.mxu1 %v2553_v16 }
  0xcb   :  { %2382 = vmatmul.mubr.msk.bf16.gmra.mrb[96].mxu0 %vm713_vm1, %v2576_v20 }
  0xcc   :  { %2385 = vmatprep.mubr.msk.bf16.mxu0 %vm2600_vm0, %v2599_v2 }
  0xd1   :  { %978 = vmatmul.mubr.bf16.gmra.mrb[72].mxu1 %v2555_v18 }
  0xd2   :  { %985 = vmatprep.mubr.bf16.mxu1 %v2557_v19 }
  0xd3   :  { %2386 = vmatmul.mubr.msk.bf16.gmra.mrb[100].mxu0 %vm713_vm1, %v2580_v23 }
  0xd4   :  { %2389 = vmatprep.mubr.msk.bf16.mxu0 %vm2600_vm0, %v2599_v2 }
  0xd9   :  { %986 = vmatmul.mubr.bf16.gmra.mrb[76].mxu1 %v2559_v21 }
  0xda   :  { %993 = vmatprep.mubr.bf16.mxu1 %v2561_v22 }
  0xdb   :  { %2390 = vmatmul.mubr.msk.bf16.gmra.mrb[104].mxu0 %vm713_vm1, %v2584_v26 }
  0xdc   :  { %2393 = vmatprep.mubr.msk.bf16.mxu0 %vm2600_vm0, %v2599_v2 }
  0xde   :  { %v1100_v29 = vpop.f32.mrb[0].mxu0 }
  0xdf   :  { %v2287_v30 = vpop.f32.mrb[1].mxu0 }
  0xe0   :  { %v1103_v32 = vpop.f32.mrb[2].mxu0 }
  0xe1   :  { %994 = vmatmul.mubr.bf16.gmra.mrb[80].mxu1 %v2563_v24  ;;  %v2288_v34 = vpop.f32.mrb[3].mxu0 }
  0xe2   :  { %1001 = vmatprep.mubr.bf16.mxu1 %v2565_v25 }
  0xe3   :  { %2394 = vmatmul.mubr.msk.bf16.gmra.mrb[108].mxu0 %vm713_vm1, %v2588_v31 }
  0xe4   :  { %2397 = vmatprep.mubr.msk.bf16.mxu0 %vm2600_vm0, %v2599_v2 }
  0xe6   :  { %v1108_v36 = vpop.f32.mrb[4].mxu0 }
  0xe7   :  { %v2291_v37 = vpop.f32.mrb[5].mxu0 }
  0xe8   :  { %v1111_v39 = vpop.f32.mrb[6].mxu0 }
  0xe9   :  { %1002 = vmatmul.mubr.bf16.gmra.mrb[84].mxu1 %v2567_v27  ;;  %v2292_v41 = vpop.f32.mrb[7].mxu0 }
  0xea   :  { %1009 = vmatprep.mubr.bf16.mxu1 %v2569_v28 }
  0xeb   :  { %2398 = vmatmul.mubr.msk.bf16.gmra.mrb[112].mxu0 %vm713_vm1, %v2592_v38 }
  0xee   :  { %v1116_v2 = vpop.f32.mrb[8].mxu0 }
  0xef   :  { %v2295_v43 = vpop.f32.mrb[9].mxu0 }
  0xf0   :  { %v1119_v44 = vpop.f32.mrb[10].mxu0 }
  0xf1   :  { %1010 = vmatmul.mubr.bf16.gmra.mrb[88].mxu1 %v2571_v33  ;;  %v2296_v46 = vpop.f32.mrb[11].mxu0 }
  0xf2   :  { %1017 = vmatprep.mubr.bf16.mxu1 %v2573_v35 }
  0xf6   :  { %v1124_v48 = vpop.f32.mrb[12].mxu0 }
  0xf7   :  { %v2299_v49 = vpop.f32.mrb[13].mxu0 }
  0xf8   :  { %v1127_v50 = vpop.f32.mrb[14].mxu0 }
  0xf9   :  { %1018 = vmatmul.mubr.bf16.gmra.mrb[92].mxu1 %v2575_v40  ;;  %v2300_v52 = vpop.f32.mrb[15].mxu0 }
  0xfa   :  { %1025 = vmatprep.mubr.bf16.mxu1 %v2577_v42 }
  0xfe   :  { %v1132_v54 = vpop.f32.mrb[16].mxu0 }
  0xff   :  { %v2303_v55 = vpop.f32.mrb[17].mxu0 }
 0x100   :  { %v1135_v56 = vpop.f32.mrb[18].mxu0 }
 0x101   :  { %1026 = vmatmul.mubr.bf16.gmra.mrb[96].mxu1 %v2579_v45  ;;  %v2304_v58 = vpop.f32.mrb[19].mxu0 }
 0x102   :  { %1033 = vmatprep.mubr.bf16.mxu1 %v2581_v47 }
 0x106   :  { %v1140_v60 = vpop.f32.mrb[20].mxu0 }
 0x107   :  { %v2307_v61 = vpop.f32.mrb[21].mxu0 }
 0x108   :  { %v1143_v63 = vpop.f32.mrb[22].mxu0 }
 0x109   :  { %1034 = vmatmul.mubr.bf16.gmra.mrb[100].mxu1 %v2583_v51  ;;  %v2308_v4 = vpop.f32.mrb[23].mxu0 }
 0x10a   :  { %1041 = vmatprep.mubr.bf16.mxu1 %v2585_v53 }
 0x10e   :  { %v1148_v9 = vpop.f32.mrb[24].mxu0 }
 0x10f   :  { %v2311_v10 = vpop.f32.mrb[25].mxu0 }
 0x110   :  { %v1151_v12 = vpop.f32.mrb[26].mxu0 }
 0x111   :  { %1042 = vmatmul.mubr.bf16.gmra.mrb[104].mxu1 %v2587_v57  ;;  %v2312_v16 = vpop.f32.mrb[27].mxu0 }
 0x112   :  { %1049 = vmatprep.mubr.bf16.mxu1 %v2589_v59 }
 0x114   :  { %v835_v62 = vpop.f32.mrb[0].mxu1 }
 0x115   :  { %v3037_v0 = vadd.f32 %v1100_v29, %v835_v62  ;;  %v837_v1 = vpop.f32.mrb[1].mxu1 }
 0x116   :  { %v838_v5 = vpop.f32.mrb[2].mxu1  ;;  %v1156_v20 = vpop.f32.mrb[28].mxu0 }
 0x117   :  { %v3045_v7 = vadd.f32 %v1103_v32, %v838_v5  ;;  %v840_v8 = vpop.f32.mrb[3].mxu1  ;;  %v2315_v21 = vpop.f32.mrb[29].mxu0 }
 0x118   :  { %v1159_v23 = vpop.f32.mrb[30].mxu0  ;;  %v1395_v21 = vmul.f32 %v3037_v0, %v3037_v0 }
 0x119   :  { %1050 = vmatmul.mubr.bf16.gmra.mrb[108].mxu1 %v2591_v3  ;;  %v2316_v26 = vpop.f32.mrb[31].mxu0 }
 0x11a   :  { %1057 = vmatprep.mubr.bf16.mxu1 %v2593_v6 }
 0x11c   :  { %v843_v11 = vpop.f32.mrb[4].mxu1 }
 0x11d   :  { %v3047_v13 = vadd.f32 %v1108_v36, %v843_v11  ;;  %v845_v14 = vpop.f32.mrb[5].mxu1 }
 0x11e   :  { %v846_v17 = vpop.f32.mrb[6].mxu1  ;;  %v3058_v30 = vpop.f32.mrb[32].mxu0 }
 0x11f   :  { %v3052_v18 = vadd.f32 %v1111_v39, %v846_v17  ;;  %v848_v19 = vpop.f32.mrb[7].mxu1  ;;  %v2319_v31 = vpop.f32.mrb[33].mxu0 }
 0x120   :  { %v3060_v33 = vpop.f32.mrb[34].mxu0 }
 0x121   :  { %1058 = vmatmul.mubr.bf16.gmra.mrb[112].mxu1 %v2595_v15  ;;  %v2320_v36 = vpop.f32.mrb[35].mxu0  ;;  %v1396_v15 = vmul.f32 %v3045_v7, %v3045_v7 }
 0x124   :  { %v851_v22 = vpop.f32.mrb[8].mxu1 }
 0x125   :  { %v3054_v24 = vadd.f32 %v1116_v2, %v851_v22  ;;  %v853_v25 = vpop.f32.mrb[9].mxu1  ;;  %v1397_v22 = vmul.f32 %v3047_v13, %v3047_v13 }
 0x126   :  { %v854_v27 = vpop.f32.mrb[10].mxu1  ;;  %v3066_v40 = vpop.f32.mrb[36].mxu0 }
 0x127   :  { %v3056_v28 = vadd.f32 %v1119_v44, %v854_v27  ;;  %v856_v29 = vpop.f32.mrb[11].mxu1  ;;  %v2323_v41 = vpop.f32.mrb[37].mxu0  ;;  %v1453_v27 = vadd.f32 %v1396_v15, %v1395_v21 }
 0x128   :  { %v3068_v2 = vpop.f32.mrb[38].mxu0 }
 0x129   :  { %v2324_v45 = vpop.f32.mrb[39].mxu0  ;;  %v1454_v31 = vadd.f32 %v1453_v27, %v1397_v22 }
 0x12c   :  { %v859_v32 = vpop.f32.mrb[12].mxu1 }
 0x12d   :  { %v3062_v34 = vadd.f32 %v1124_v48, %v859_v32  ;;  %v861_v35 = vpop.f32.mrb[13].mxu1  ;;  %v1398_v32 = vmul.f32 %v3052_v18, %v3052_v18 }
 0x12e   :  { %v862_v37 = vpop.f32.mrb[14].mxu1  ;;  %v3074_v49 = vpop.f32.mrb[40].mxu0 }
 0x12f   :  { %v3064_v38 = vadd.f32 %v1127_v50, %v862_v37  ;;  %v864_v39 = vpop.f32.mrb[15].mxu1  ;;  %v2327_v51 = vpop.f32.mrb[41].mxu0 }
 0x130   :  { %v3076_v52 = vpop.f32.mrb[42].mxu0 }
 0x131   :  { %v2328_v57 = vpop.f32.mrb[43].mxu0 }
 0x132   :  { %v1400_v57 = vmul.f32 %v3056_v28, %v3056_v28 }
 0x134   :  { %v867_v42 = vpop.f32.mrb[16].mxu1 }
 0x135   :  { %v3070_v43 = vadd.f32 %v1132_v54, %v867_v42  ;;  %v869_v44 = vpop.f32.mrb[17].mxu1 }
 0x136   :  { %v870_v46 = vpop.f32.mrb[18].mxu1  ;;  %v3082_v61 = vpop.f32.mrb[44].mxu0 }
 0x137   :  { %v3072_v47 = vadd.f32 %v1135_v56, %v870_v46  ;;  %v872_v48 = vpop.f32.mrb[19].mxu1  ;;  %v2331_v62 = vpop.f32.mrb[45].mxu0  ;;  %v1455_v46 = vadd.f32 %v1454_v31, %v1398_v32 }
 0x138   :  { %v3084_v1 = vpop.f32.mrb[46].mxu0 }
 0x139   :  { %v2332_v5 = vpop.f32.mrb[47].mxu0 }
 0x13c   :  { %v875_v50 = vpop.f32.mrb[20].mxu1 }
 0x13d   :  { %v3078_v53 = vadd.f32 %v1140_v60, %v875_v50  ;;  %v877_v55 = vpop.f32.mrb[21].mxu1 }
 0x13e   :  { %v878_v58 = vpop.f32.mrb[22].mxu1  ;;  %v3090_v10 = vpop.f32.mrb[48].mxu0 }
 0x13f   :  { %v3080_v59 = vadd.f32 %v1143_v63, %v878_v58  ;;  %v880_v54 = vpop.f32.mrb[23].mxu1  ;;  %v2335_v11 = vpop.f32.mrb[49].mxu0 }
 0x140   :  { %v3092_v14 = vpop.f32.mrb[50].mxu0 }
 0x144   :  { %v883_v56 = vpop.f32.mrb[24].mxu1 }
 0x145   :  { %v3086_v3 = vadd.f32 %v1148_v9, %v883_v56  ;;  %v885_v4 = vpop.f32.mrb[25].mxu1  ;;  %v2336_v9 = vpop.f32.mrb[51].mxu0 }
 0x146   :  { %v886_v6 = vpop.f32.mrb[26].mxu1 }
 0x147   :  { %v3088_v8 = vadd.f32 %v1151_v12, %v886_v6  ;;  %v888_v60 = vpop.f32.mrb[27].mxu1  ;;  %v1331_v12 = vadd.f32 %v3045_v7, %v3037_v0 }
 0x149   :  { %v1332_v29 = vadd.f32 %v1331_v12, %v3047_v13  ;;  %v1403_v12 = vmul.f32 %v3070_v43, %v3070_v43 }
 0x14b   :  { %v1333_v39 = vadd.f32 %v1332_v29, %v3052_v18 }
 0x14c   :  { %v891_v63 = vpop.f32.mrb[28].mxu1 }
 0x14d   :  { %v3096_v16 = vadd.f32 %v1156_v20, %v891_v63  ;;  %v893_v17 = vpop.f32.mrb[29].mxu1  ;;  %v3107_v20 = vpop.f32.mrb[52].mxu0  ;;  %v1334_v48 = vadd.f32 %v1333_v39, %v3054_v24 }
 0x14e   :  { %v894_v19 = vpop.f32.mrb[30].mxu1  ;;  %v2339_v35 = vpop.f32.mrb[53].mxu0  ;;  %v1402_v17 = vmul.f32 %v3064_v38, %v3064_v38 }
 0x14f   :  { %v3104_v25 = vadd.f32 %v1159_v23, %v894_v19  ;;  %v896_v26 = vpop.f32.mrb[31].mxu1  ;;  %v3111_v37 = vpop.f32.mrb[54].mxu0  ;;  %v1399_v23 = vmul.f32 %v3054_v24, %v3054_v24  ;;  %v1335_v54 = vadd.f32 %v1334_v48, %v3056_v28 }
 0x150   :  { %v2340_v44 = vpop.f32.mrb[55].mxu0 }
 0x151   :  { %v1456_v55 = vadd.f32 %v1455_v46, %v1399_v23  ;;  %v3125_v58 = vpop.f32.mrb[56].mxu0  ;;  %v1405_v44 = vmul.f32 %v3078_v53, %v3078_v53 }
 0x152   :  { %v2343_v62 = vpop.f32.mrb[57].mxu0 }
 0x153   :  { %v3130_v4 = vpop.f32.mrb[58].mxu0  ;;  %v1457_v5 = vadd.f32 %v1456_v55, %v1400_v57 }
 0x154   :  { %v899_v36 = vpop.f32.mrb[32].mxu1  ;;  %v2344_v11 = vpop.f32.mrb[59].mxu0 }
 0x155   :  { %v3117_v41 = vadd.f32 %v3058_v30, %v899_v36  ;;  %v901_v42 = vpop.f32.mrb[33].mxu1  ;;  %v1401_v30 = vmul.f32 %v3062_v34, %v3062_v34 }
 0x156   :  { %v902_v45 = vpop.f32.mrb[34].mxu1  ;;  %v3144_v22 = vpop.f32.mrb[60].mxu0 }
 0x157   :  { %v3121_v51 = vadd.f32 %v3060_v33, %v902_v45  ;;  %v904_v50 = vpop.f32.mrb[35].mxu1  ;;  %v1336_v33 = vadd.f32 %v1335_v54, %v3062_v34  ;;  %v1458_v15 = vadd.f32 %v1457_v5, %v1401_v30  ;;  %v2347_v27 = vpop.f32.mrb[61].mxu0 }
 0x158   :  { %v3147_v31 = vpop.f32.mrb[62].mxu0 }
 0x159   :  { %v1337_v21 = vadd.f32 %v1336_v33, %v3064_v38  ;;  %v2348_v39 = vpop.f32.mrb[63].mxu0 }
 0x15b   :  { %v1338_v26 = vadd.f32 %v1337_v21, %v3070_v43 }
 0x15c   :  { %v907_v56 = vpop.f32.mrb[36].mxu1 }
 0x15d   :  { %v3134_v6 = vadd.f32 %v3066_v40, %v907_v56  ;;  %v909_v60 = vpop.f32.mrb[37].mxu1  ;;  %v1459_v40 = vadd.f32 %v1458_v15, %v1402_v17  ;;  %v1339_v42 = vadd.f32 %v1338_v26, %v3072_v47 }
 0x15e   :  { %v910_v63 = vpop.f32.mrb[38].mxu1  ;;  %v3161_v55 = vpop.f32.mrb[64].mxu0 }
 0x15f   :  { %v3139_v9 = vadd.f32 %v3068_v2, %v910_v63  ;;  %v912_v19 = vpop.f32.mrb[39].mxu1  ;;  %v1460_v32 = vadd.f32 %v1459_v40, %v1403_v12  ;;  %v1404_v2 = vmul.f32 %v3072_v47, %v3072_v47  ;;  %v1340_v50 = vadd.f32 %v1339_v42, %v3078_v53  ;;  %v2351_v54 = vpop.f32.mrb[65].mxu0 }
 0x160   :  { %v3165_v62 = vpop.f32.mrb[66].mxu0  ;;  %v1408_v12 = vmul.f32 %v3088_v8, %v3088_v8 }
 0x161   :  { %v1461_v48 = vadd.f32 %v1460_v32, %v1404_v2  ;;  %v1341_v56 = vadd.f32 %v1340_v50, %v3080_v59  ;;  %v2352_v60 = vpop.f32.mrb[67].mxu0 }
 0x163   :  { %v1462_v57 = vadd.f32 %v1461_v48, %v1405_v44  ;;  %v1342_v15 = vadd.f32 %v1341_v56, %v3086_v3 }
 0x164   :  { %v915_v29 = vpop.f32.mrb[40].mxu1 }
 0x165   :  { %v3152_v35 = vadd.f32 %v3074_v49, %v915_v29  ;;  %v917_v36 = vpop.f32.mrb[41].mxu1  ;;  %v1406_v49 = vmul.f32 %v3080_v59, %v3080_v59  ;;  %v1343_v26 = vadd.f32 %v1342_v15, %v3088_v8 }
 0x166   :  { %v918_v23 = vpop.f32.mrb[42].mxu1  ;;  %v3179_v40 = vpop.f32.mrb[68].mxu0 }
 0x167   :  { %v3158_v45 = vadd.f32 %v3076_v52, %v918_v23  ;;  %v920_v46 = vpop.f32.mrb[43].mxu1  ;;  %v1407_v52 = vmul.f32 %v3086_v3, %v3086_v3  ;;  %v1463_v63 = vadd.f32 %v1462_v57, %v1406_v49  ;;  %v2355_v27 = vpop.f32.mrb[69].mxu0  ;;  %v1411_v49 = vmul.f32 %v3117_v41, %v3117_v41 }
 0x168   :  { %v3184_v32 = vpop.f32.mrb[70].mxu0  ;;  %v1410_v46 = vmul.f32 %v3104_v25, %v3104_v25 }
 0x169   :  { %v1464_v21 = vadd.f32 %v1463_v63, %v1407_v52  ;;  %v2356_v23 = vpop.f32.mrb[71].mxu0 }
 0x16b   :  { %v1465_v2 = vadd.f32 %v1464_v21, %v1408_v12  ;;  %v1413_v12 = vmul.f32 %v3134_v6, %v3134_v6 }
 0x16c   :  { %v923_v30 = vpop.f32.mrb[44].mxu1 }
 0x16d   :  { %v3171_v5 = vadd.f32 %v3082_v61, %v923_v30  ;;  %v925_v33 = vpop.f32.mrb[45].mxu1  ;;  %v1409_v61 = vmul.f32 %v3096_v16, %v3096_v16 }
 0x16e   :  { %v926_v11 = vpop.f32.mrb[46].mxu1  ;;  %v3198_v54 = vpop.f32.mrb[72].mxu0 }
 0x16f   :  { %v3175_v17 = vadd.f32 %v3084_v1, %v926_v11  ;;  %v928_v19 = vpop.f32.mrb[47].mxu1  ;;  %v1344_v1 = vadd.f32 %v1343_v26, %v3096_v16  ;;  %v1466_v44 = vadd.f32 %v1465_v2, %v1409_v61  ;;  %v2359_v56 = vpop.f32.mrb[73].mxu0 }
 0x170   :  { %v3201_v33 = vpop.f32.mrb[74].mxu0 }
 0x171   :  { %v1345_v57 = vadd.f32 %v1344_v1, %v3104_v25  ;;  %v2360_v15 = vpop.f32.mrb[75].mxu0 }
 0x173   :  { %v1346_v30 = vadd.f32 %v1345_v57, %v3117_v41 }
 0x174   :  { %v931_v29 = vpop.f32.mrb[48].mxu1 }
 0x175   :  { %v3188_v36 = vadd.f32 %v3090_v10, %v931_v29  ;;  %v933_v39 = vpop.f32.mrb[49].mxu1  ;;  %v1467_v10 = vadd.f32 %v1466_v44, %v1410_v46  ;;  %v1347_v21 = vadd.f32 %v1346_v30, %v3121_v51 }
 0x176   :  { %v934_v42 = vpop.f32.mrb[50].mxu1  ;;  %v3215_v2 = vpop.f32.mrb[76].mxu0 }
 0x177   :  { %v3193_v48 = vadd.f32 %v3092_v14, %v934_v42  ;;  %v936_v50 = vpop.f32.mrb[51].mxu1  ;;  %v1468_v60 = vadd.f32 %v1467_v10, %v1411_v49  ;;  %v1412_v14 = vmul.f32 %v3121_v51, %v3121_v51  ;;  %v1348_v29 = vadd.f32 %v1347_v21, %v3134_v6  ;;  %v2363_v39 = vpop.f32.mrb[77].mxu0 }
 0x178   :  { %v3219_v42 = vpop.f32.mrb[78].mxu0 }
 0x179   :  { %v1469_v27 = vadd.f32 %v1468_v60, %v1412_v14  ;;  %v1349_v44 = vadd.f32 %v1348_v29, %v3139_v9  ;;  %v2364_v57 = vpop.f32.mrb[79].mxu0  ;;  %v1416_v14 = vmul.f32 %v3158_v45, %v3158_v45 }
 0x17a   :  { %v1419_v57 = vmul.f32 %v3188_v36, %v3188_v36 }
 0x17b   :  { %v1470_v1 = vadd.f32 %v1469_v27, %v1413_v12  ;;  %v1350_v30 = vadd.f32 %v1349_v44, %v3152_v35 }
 0x17c   :  { %v939_v52 = vpop.f32.mrb[52].mxu1 }
 0x17d   :  { %v3206_v11 = vadd.f32 %v3107_v20, %v939_v52  ;;  %v941_v63 = vpop.f32.mrb[53].mxu1  ;;  %v1414_v20 = vmul.f32 %v3139_v9, %v3139_v9  ;;  %v1351_v15 = vadd.f32 %v1350_v30, %v3158_v45 }
 0x17e   :  { %v942_v19 = vpop.f32.mrb[54].mxu1  ;;  %v3233_v63 = vpop.f32.mrb[80].mxu0 }
 0x17f   :  { %v3212_v26 = vadd.f32 %v3111_v37, %v942_v19  ;;  %v944_v61 = vpop.f32.mrb[55].mxu1  ;;  %v1415_v37 = vmul.f32 %v3152_v35, %v3152_v35  ;;  %v1471_v10 = vadd.f32 %v1470_v1, %v1414_v20  ;;  %v2367_v19 = vpop.f32.mrb[81].mxu0 }
 0x180   :  { %v3238_v12 = vpop.f32.mrb[82].mxu0 }
 0x181   :  { %v1472_v60 = vadd.f32 %v1471_v10, %v1415_v37  ;;  %v2368_v1 = vpop.f32.mrb[83].mxu0 }
 0x183   :  { %v1473_v61 = vadd.f32 %v1472_v60, %v1416_v14 }
 0x184   :  { %v947_v23 = vpop.f32.mrb[56].mxu1 }
 0x185   :  { %v3225_v46 = vadd.f32 %v3125_v58, %v947_v23  ;;  %v949_v50 = vpop.f32.mrb[57].mxu1  ;;  %v1417_v58 = vmul.f32 %v3171_v5, %v3171_v5  ;;  %v1418_v23 = vmul.f32 %v3175_v17, %v3175_v17 }
 0x186   :  { %v950_v49 = vpop.f32.mrb[58].mxu1 }
 0x187   :  { %v3229_v56 = vadd.f32 %v3130_v4, %v950_v49  ;;  %v952_v52 = vpop.f32.mrb[59].mxu1  ;;  %v1352_v4 = vadd.f32 %v1351_v15, %v3171_v5  ;;  %v1474_v39 = vadd.f32 %v1473_v61, %v1417_v58  ;;  %v3252_v49 = vpop.f32.mrb[84].mxu0 }
 0x188   :  { %v2371_v30 = vpop.f32.mrb[85].mxu0 }
 0x189   :  { %v1353_v50 = vadd.f32 %v1352_v4, %v3175_v17  ;;  %v3255_v60 = vpop.f32.mrb[86].mxu0  ;;  %v1421_v4 = vmul.f32 %v3206_v11, %v3206_v11 }
 0x18a   :  { %v2372_v19 = vpop.f32.mrb[87].mxu0 }
 0x18b   :  { %v1354_v10 = vadd.f32 %v1353_v50, %v3188_v36 }
 0x18c   :  { %v955_v21 = vpop.f32.mrb[60].mxu1 }
 0x18d   :  { %v3242_v27 = vadd.f32 %v3144_v22, %v955_v21  ;;  %v957_v29 = vpop.f32.mrb[61].mxu1  ;;  %v1475_v22 = vadd.f32 %v1474_v39, %v1418_v23  ;;  %v1355_v61 = vadd.f32 %v1354_v10, %v3193_v48 }
 0x18e   :  { %v958_v20 = vpop.f32.mrb[62].mxu1  ;;  %v3269_v23 = vpop.f32.mrb[88].mxu0 }
 0x18f   :  { %v3247_v44 = vadd.f32 %v3147_v31, %v958_v20  ;;  %v960_v37 = vpop.f32.mrb[63].mxu1  ;;  %v1476_v14 = vadd.f32 %v1475_v22, %v1419_v57  ;;  %v1420_v31 = vmul.f32 %v3193_v48, %v3193_v48  ;;  %v1356_v39 = vadd.f32 %v1355_v61, %v3206_v11  ;;  %v2375_v50 = vpop.f32.mrb[89].mxu0 }
 0x190   :  { %v3273_v22 = vpop.f32.mrb[90].mxu0 }
 0x191   :  { %4094 = vst [vmem:[#allocation2_spill] sm:$0xff] %v3247_v44  ;;  %v1477_v20 = vadd.f32 %v1476_v14, %v1420_v31  ;;  %v1357_v10 = vadd.f32 %v1356_v39, %v3212_v26  ;;  %v2376_v14 = vpop.f32.mrb[91].mxu0 }
 0x193   :  { %v1478_v37 = vadd.f32 %v1477_v20, %v1421_v4  ;;  %v1358_v19 = vadd.f32 %v1357_v10, %v3225_v46 }
 0x194   :  { %v963_v52 = vpop.f32.mrb[64].mxu1 }
 0x195   :  { %v3260_v15 = vadd.f32 %v3161_v55, %v963_v52  ;;  %v965_v58 = vpop.f32.mrb[65].mxu1  ;;  %v1422_v55 = vmul.f32 %v3212_v26, %v3212_v26  ;;  %v1359_v39 = vadd.f32 %v1358_v19, %v3229_v56 }
 0x196   :  { %v966_v21 = vpop.f32.mrb[66].mxu1  ;;  %v3287_v20 = vpop.f32.mrb[92].mxu0 }
 0x197   :  { %4095 = vst [vmem:[#allocation3_spill] sm:$0xff] %v3260_v15  ;;  %v3266_v29 = vadd.f32 %v3165_v62, %v966_v21  ;;  %v968_v1 = vpop.f32.mrb[67].mxu1  ;;  %v1423_v62 = vmul.f32 %v3225_v46, %v3225_v46  ;;  %v1479_v58 = vadd.f32 %v1478_v37, %v1422_v55  ;;  %v2379_v50 = vpop.f32.mrb[93].mxu0 }
 0x198   :  { %v1424_v1 = vmul.f32 %v3229_v56, %v3229_v56  ;;  %v3292_v37 = vpop.f32.mrb[94].mxu0 }
 0x199   :  { %4096 = vst [vmem:[#allocation4_spill] sm:$0xff] %v3266_v29  ;;  %v1480_v4 = vadd.f32 %v1479_v58, %v1423_v62  ;;  %v1426_v58 = vmul.f32 %v3247_v44, %v3247_v44 }
 0x19b   :  { %v1481_v55 = vadd.f32 %v1480_v4, %v1424_v1  ;;  %v1427_v4 = vmul.f32 %v3260_v15, %v3260_v15 }
 0x19c   :  { %v971_v57 = vpop.f32.mrb[68].mxu1 }
 0x19d   :  { %v3279_v30 = vadd.f32 %v3179_v40, %v971_v57  ;;  %v973_v52 = vpop.f32.mrb[69].mxu1  ;;  %v1425_v40 = vmul.f32 %v3242_v27, %v3242_v27 }
 0x19e   :  { %v974_v31 = vpop.f32.mrb[70].mxu1  ;;  %v2380_v52 = vpop.f32.mrb[95].mxu0 }
 0x19f   :  { %4097 = vst [vmem:[#allocation5_spill] sm:$0xff] %v3279_v30  ;;  %v3283_v21 = vadd.f32 %v3184_v32, %v974_v31  ;;  %v976_v61 = vpop.f32.mrb[71].mxu1  ;;  %v1360_v32 = vadd.f32 %v1359_v39, %v3242_v27  ;;  %v1482_v31 = vadd.f32 %v1481_v55, %v1425_v40  ;;  %v3306_v1 = vpop.f32.mrb[96].mxu0 }
 0x1a1   :  { %4098 = vst [vmem:[#allocation6_spill] sm:$0xff] %v3283_v21  ;;  %v1361_v50 = vadd.f32 %v1360_v32, %v3247_v44 }
 0x1a3   :  { %v1362_v39 = vadd.f32 %v1361_v50, %v3260_v15 }
 0x1a4   :  { %v979_v57 = vpop.f32.mrb[72].mxu1 }
 0x1a5   :  { %v3296_v10 = vadd.f32 %v3198_v54, %v979_v57  ;;  %v981_v62 = vpop.f32.mrb[73].mxu1  ;;  %v1483_v54 = vadd.f32 %v1482_v31, %v1426_v58  ;;  %v2383_v57 = vpop.f32.mrb[97].mxu0  ;;  %v1363_v44 = vadd.f32 %v1362_v39, %v3266_v29  ;;  %v1429_v31 = vmul.f32 %v3279_v30, %v3279_v30 }
 0x1a6   :  { %v982_v14 = vpop.f32.mrb[74].mxu1  ;;  %v3309_v40 = vpop.f32.mrb[98].mxu0 }
 0x1a7   :  { %v3301_v19 = vadd.f32 %v3201_v33, %v982_v14  ;;  %v984_v61 = vpop.f32.mrb[75].mxu1  ;;  %v1484_v55 = vadd.f32 %v1483_v54, %v1427_v4  ;;  %v1428_v33 = vmul.f32 %v3266_v29, %v3266_v29  ;;  %v2384_v14 = vpop.f32.mrb[99].mxu0  ;;  %v1364_v4 = vadd.f32 %v1363_v44, %v3279_v30 }
 0x1a8   :  { %v3323_v54 = vpop.f32.mrb[100].mxu0 }
 0x1a9   :  { %4099 = vst [vmem:[#allocation7_spill] sm:$0xff] %v3301_v19  ;;  %v1485_v57 = vadd.f32 %v1484_v55, %v1428_v33  ;;  %v1365_v39 = vadd.f32 %v1364_v4, %v3283_v21  ;;  %v1432_v4 = vmul.f32 %v3301_v19, %v3301_v19 }
 0x1ab   :  { %v1486_v15 = vadd.f32 %v1485_v57, %v1429_v31  ;;  %v1366_v31 = vadd.f32 %v1365_v39, %v3296_v10 }
 0x1ac   :  { %v987_v62 = vpop.f32.mrb[76].mxu1 }
 0x1ad   :  { %v3314_v52 = vadd.f32 %v3215_v2, %v987_v62  ;;  %v989_v32 = vpop.f32.mrb[77].mxu1  ;;  %v1430_v2 = vmul.f32 %v3283_v21, %v3283_v21  ;;  %v2387_v62 = vpop.f32.mrb[101].mxu0  ;;  %v1367_v29 = vadd.f32 %v1366_v31, %v3301_v19 }
 0x1ae   :  { %v990_v61 = vpop.f32.mrb[78].mxu1  ;;  %v3327_v14 = vpop.f32.mrb[102].mxu0 }
 0x1af   :  { %v3320_v58 = vadd.f32 %v3219_v42, %v990_v61  ;;  %v992_v50 = vpop.f32.mrb[79].mxu1  ;;  %v1431_v42 = vmul.f32 %v3296_v10, %v3296_v10  ;;  %v2388_v44 = vpop.f32.mrb[103].mxu0 }
 0x1b0   :  { %v1487_v50 = vadd.f32 %v1486_v15, %v1430_v2  ;;  %v3341_v21 = vpop.f32.mrb[104].mxu0 }
 0x1b1   :  { %4100 = vst [vmem:[#allocation8_spill] sm:$0xff] %v3320_v58  ;;  %v1434_v31 = vmul.f32 %v3320_v58, %v3320_v58 }
 0x1b2   :  { %v1488_v30 = vadd.f32 %v1487_v50, %v1431_v42 }
 0x1b4   :  { %v995_v32 = vpop.f32.mrb[80].mxu1  ;;  %v1489_v2 = vadd.f32 %v1488_v30, %v1432_v4 }
 0x1b5   :  { %v3333_v61 = vadd.f32 %v3233_v63, %v995_v32  ;;  %v997_v55 = vpop.f32.mrb[81].mxu1  ;;  %v1433_v63 = vmul.f32 %v3314_v52, %v3314_v52  ;;  %v2391_v32 = vpop.f32.mrb[105].mxu0 }
 0x1b6   :  { %v998_v33 = vpop.f32.mrb[82].mxu1  ;;  %v3346_v15 = vpop.f32.mrb[106].mxu0 }
 0x1b7   :  { %4101 = vst [vmem:[#allocation9_spill] sm:$0xff] %v3333_v61  ;;  %v3337_v57 = vadd.f32 %v3238_v12, %v998_v33  ;;  %v1000_v62 = vpop.f32.mrb[83].mxu1  ;;  %v1368_v12 = vadd.f32 %v1367_v29, %v3314_v52  ;;  %v2392_v44 = vpop.f32.mrb[107].mxu0  ;;  %v1490_v50 = vadd.f32 %v1489_v2, %v1433_v63  ;;  %v1435_v30 = vmul.f32 %v3333_v61, %v3333_v61 }
 0x1b8   :  { %v3360_v29 = vpop.f32.mrb[108].mxu0 }
 0x1b9   :  { %v1369_v19 = vadd.f32 %v1368_v12, %v3320_v58 }
 0x1bb   :  { %v1370_v4 = vadd.f32 %v1369_v19, %v3333_v61 }
 0x1bc   :  { %v1003_v55 = vpop.f32.mrb[84].mxu1 }
 0x1bd   :  { %v3350_v39 = vadd.f32 %v3252_v49, %v1003_v55  ;;  %v1005_v42 = vpop.f32.mrb[85].mxu1  ;;  %v1491_v49 = vadd.f32 %v1490_v50, %v1434_v31  ;;  %v2395_v55 = vpop.f32.mrb[109].mxu0  ;;  %v1371_v58 = vadd.f32 %v1370_v4, %v3337_v57 }
 0x1be   :  { %v1006_v33 = vpop.f32.mrb[86].mxu1  ;;  %v3363_v63 = vpop.f32.mrb[110].mxu0 }
 0x1bf   :  { %4102 = vst [vmem:[#allocation10_spill] sm:$0xff] %v3350_v39  ;;  %v3355_v62 = vadd.f32 %v3255_v60, %v1006_v33  ;;  %v1008_v32 = vpop.f32.mrb[87].mxu1  ;;  %v1492_v2 = vadd.f32 %v1491_v49, %v1435_v30  ;;  %v1436_v60 = vmul.f32 %v3337_v57, %v3337_v57  ;;  %v2396_v33 = vpop.f32.mrb[111].mxu0  ;;  %v1437_v50 = vmul.f32 %v3350_v39, %v3350_v39 }
 0x1c0   :  { %v1372_v30 = vadd.f32 %v1371_v58, %v3350_v39  ;;  %v3377_v49 = vpop.f32.mrb[112].mxu0 }
 0x1c1   :  { %4103 = vst [vmem:[#allocation11_spill] sm:$0xff] %v3355_v62  ;;  %v1493_v55 = vadd.f32 %v1492_v2, %v1436_v60 }
 0x1c2   :  { %v1373_v4 = vadd.f32 %v1372_v30, %v3355_v62 }
 0x1c3   :  { %v1494_v61 = vadd.f32 %v1493_v55, %v1437_v50 }
 0x1c4   :  { %v1011_v42 = vpop.f32.mrb[88].mxu1 }
 0x1c5   :  { %v3368_v44 = vadd.f32 %v3269_v23, %v1011_v42  ;;  %v1013_v12 = vpop.f32.mrb[89].mxu1  ;;  %v1438_v23 = vmul.f32 %v3355_v62, %v3355_v62  ;;  %v2399_v42 = vpop.f32.mrb[113].mxu0 }
 0x1c6   :  { %v1014_v32 = vpop.f32.mrb[90].mxu1  ;;  %v3381_v33 = vpop.f32.mrb[114].mxu0 }
 0x1c7   :  { %v3374_v19 = vadd.f32 %v3273_v22, %v1014_v32  ;;  %v1016_v31 = vpop.f32.mrb[91].mxu1  ;;  %v1439_v22 = vmul.f32 %v3368_v44, %v3368_v44  ;;  %v2400_v58 = vpop.f32.mrb[115].mxu0  ;;  %v1374_v50 = vadd.f32 %v1373_v4, %v3368_v44 }
 0x1c8   :  { %v1495_v31 = vadd.f32 %v1494_v61, %v1438_v23 }
 0x1c9   :  { %v1440_v30 = vmul.f32 %v3374_v19, %v3374_v19  ;;  %v1375_v62 = vadd.f32 %v1374_v50, %v3374_v19 }
 0x1ca   :  { %v1496_v39 = vadd.f32 %v1495_v31, %v1439_v22 }
 0x1cc   :  { %v1019_v12 = vpop.f32.mrb[92].mxu1 }
 0x1cd   :  { %v3387_v32 = vadd.f32 %v3287_v20, %v1019_v12  ;;  %v1021_v2 = vpop.f32.mrb[93].mxu1 }
 0x1ce   :  { %v1022_v60 = vpop.f32.mrb[94].mxu1  ;;  %v1497_v2 = vadd.f32 %v1496_v39, %v1440_v30 }
 0x1cf   :  { %v3391_v55 = vadd.f32 %v3292_v37, %v1022_v60  ;;  %v1024_v42 = vpop.f32.mrb[95].mxu1  ;;  %v1441_v20 = vmul.f32 %v3387_v32, %v3387_v32  ;;  %v1376_v58 = vadd.f32 %v1375_v62, %v3387_v32 }
 0x1d1   :  { %4104 = vst [vmem:[#allocation12_spill] sm:$0xff] %v3391_v55  ;;  %v1498_v4 = vadd.f32 %v1497_v2, %v1441_v20  ;;  %v1442_v22 = vmul.f32 %v3391_v55, %v3391_v55  ;;  %v1377_v50 = vadd.f32 %v1376_v58, %v3391_v55 }
 0x1d3   :  { %v1499_v42 = vadd.f32 %v1498_v4, %v1442_v22 }
 0x1d4   :  { %v1027_v12 = vpop.f32.mrb[96].mxu1 }
 0x1d5   :  { %v3400_v61 = vadd.f32 %v3306_v1, %v1027_v12  ;;  %v1029_v23 = vpop.f32.mrb[97].mxu1 }
 0x1d6   :  { %v1030_v37 = vpop.f32.mrb[98].mxu1 }
 0x1d7   :  { %4105 = vst [vmem:[#allocation13_spill] sm:$0xff] %v3400_v61  ;;  %v3405_v60 = vadd.f32 %v3309_v40, %v1030_v37  ;;  %v1032_v31 = vpop.f32.mrb[99].mxu1  ;;  %v1443_v39 = vmul.f32 %v3400_v61, %v3400_v61  ;;  %v1378_v62 = vadd.f32 %v1377_v50, %v3400_v61 }
 0x1d9   :  { %4106 = vst [vmem:[#allocation14_spill] sm:$0xff] %v3405_v60  ;;  %v1500_v30 = vadd.f32 %v1499_v42, %v1443_v39  ;;  %v1444_v20 = vmul.f32 %v3405_v60, %v3405_v60  ;;  %v1379_v23 = vadd.f32 %v1378_v62, %v3405_v60 }
 0x1db   :  { %v1501_v22 = vadd.f32 %v1500_v30, %v1444_v20 }
 0x1dc   :  { %v1035_v1 = vpop.f32.mrb[100].mxu1 }
 0x1dd   :  { %v3414_v12 = vadd.f32 %v3323_v54, %v1035_v1  ;;  %v1037_v2 = vpop.f32.mrb[101].mxu1 }
 0x1de   :  { %v1038_v40 = vpop.f32.mrb[102].mxu1 }
 0x1df   :  { %4107 = vst [vmem:[#allocation15_spill] sm:$0xff] %v3414_v12  ;;  %v1445_v58 = vmul.f32 %v3414_v12, %v3414_v12  ;;  %v3420_v37 = vadd.f32 %v3327_v14, %v1038_v40  ;;  %v1040_v4 = vpop.f32.mrb[103].mxu1  ;;  %v1380_v31 = vadd.f32 %v1379_v23, %v3414_v12 }
 0x1e1   :  { %4108 = vst [vmem:[#allocation16_spill] sm:$0xff] %v3420_v37  ;;  %v1502_v50 = vadd.f32 %v1501_v22, %v1445_v58  ;;  %v1446_v39 = vmul.f32 %v3420_v37, %v3420_v37  ;;  %v1381_v42 = vadd.f32 %v1380_v31, %v3420_v37 }
 0x1e3   :  { %v1503_v60 = vadd.f32 %v1502_v50, %v1446_v39 }
 0x1e4   :  { %v1043_v54 = vpop.f32.mrb[104].mxu1 }
 0x1e5   :  { %v3427_v1 = vadd.f32 %v3341_v21, %v1043_v54  ;;  %v1045_v62 = vpop.f32.mrb[105].mxu1 }
 0x1e6   :  { %v1046_v2 = vpop.f32.mrb[106].mxu1 }
 0x1e7   :  { %v1382_v14 = vadd.f32 %v1381_v42, %v3427_v1  ;;  %v1447_v30 = vmul.f32 %v3427_v1, %v3427_v1  ;;  %v3433_v20 = vadd.f32 %v3346_v15, %v1046_v2  ;;  %v1048_v40 = vpop.f32.mrb[107].mxu1 }
 0x1e9   :  { %v1504_v23 = vadd.f32 %v1503_v60, %v1447_v30  ;;  %v1383_v58 = vadd.f32 %v1382_v14, %v3433_v20  ;;  %v1448_v4 = vmul.f32 %v3433_v20, %v3433_v20 }
 0x1eb   :  { %v1505_v21 = vadd.f32 %v1504_v23, %v1448_v4 }
 0x1ec   :  { %v1051_v22 = vpop.f32.mrb[108].mxu1 }
 0x1ed   :  { %v3439_v31 = vadd.f32 %v3360_v29, %v1051_v22  ;;  %v1053_v50 = vpop.f32.mrb[109].mxu1 }
 0x1ee   :  { %v1054_v39 = vpop.f32.mrb[110].mxu1 }
 0x1ef   :  { %4109 = vst [vmem:[#allocation17_spill] sm:$0xff] %v3439_v31  ;;  %v1384_v54 = vadd.f32 %v1383_v58, %v3439_v31  ;;  %v1449_v15 = vmul.f32 %v3439_v31, %v3439_v31  ;;  %v3445_v42 = vadd.f32 %v3363_v63, %v1054_v39  ;;  %v1056_v60 = vpop.f32.mrb[111].mxu1 }
 0x1f1   :  { %4110 = vst [vmem:[#allocation18_spill] sm:$0xff] %v3445_v42  ;;  %v1506_v62 = vadd.f32 %v1505_v21, %v1449_v15  ;;  %v1385_v2 = vadd.f32 %v1384_v54, %v3445_v42  ;;  %v1450_v14 = vmul.f32 %v3445_v42, %v3445_v42 }
 0x1f3   :  { %v1507_v30 = vadd.f32 %v1506_v62, %v1450_v14 }
 0x1f4   :  { %v1059_v29 = vpop.f32.mrb[112].mxu1 }
 0x1f5   :  { %v3451_v40 = vadd.f32 %v3377_v49, %v1059_v29  ;;  %v1061_v23 = vpop.f32.mrb[113].mxu1 }
 0x1f6   :  { %v1062_v58 = vpop.f32.mrb[114].mxu1 }
 0x1f7   :  { %4111 = vst [vmem:[#allocation19_spill] sm:$0xff] %v3451_v40  ;;  %v1451_v4 = vmul.f32 %v3451_v40, %v3451_v40  ;;  %v1328_v63 = vadd.f32 %v3381_v33, %v1062_v58  ;;  %v1386_v22 = vadd.f32 %v1385_v2, %v3451_v40  ;;  %v1064_v21 = vpop.f32.mrb[115].mxu1 }
 0x1f9   :  { %v1387_v50 = vadd.f32 %v1386_v22, %v1328_v63  ;;  %v1452_v39 = vmul.f32 %v1328_v63, %v1328_v63  ;;  %v1508_v54 = vadd.f32 %v1507_v30, %v1451_v4  ;;  %v1528_v30 = vlaneseq }
 0x1fb   :  { %v1388_v15 = vrot.slane %v1387_v50, 4  ;;  %v1509_v60 = vadd.f32 %v1508_v54, %v1452_v39  ;;  %v3457_v4 = vshrl.u32 %v1528_v30, 7  ;;  %v4116_v30 = vld [vmem:[#allocation6_spill] sm:$0xff] }
 0x1fd   :  { %v1389_v62 = vadd.f32 %v1388_v15, %v1387_v50  ;;  %v1510_v14 = vrot.slane %v1509_v60, 4  ;;  %v1530_v50 = vsub.s32 0, %v3457_v4  ;;  %v4117_v4 = vld [vmem:[#allocation7_spill] sm:$0xff] }
 0x1ff   :  { %v1390_v37 = vrot.slane %v1389_v62, 2  ;;  %v1511_v49 = vadd.f32 %v1510_v14, %v1509_v60 }
 0x201   :  { %v1391_v29 = vadd.f32 %v1390_v37, %v1389_v62  ;;  %v1512_v23 = vrot.slane %v1511_v49, 2  ;;  %v1520_v37 = vld [vmem:[%s4062_s2] sm:$0x1] }
 0x203   :  { %v1392_v12 = vrot.slane %v1391_v29, 1  ;;  %v1513_v61 = vadd.f32 %v1512_v23, %v1511_v49 }
 0x205   :  { %v1393_v42 = vadd.f32 %v1392_v12, %v1391_v29  ;;  %v1514_v55 = vrot.slane %v1513_v61, 1 }
 0x207   :  { %v1394_v31 = vmul.f32 0.0022222223, %v1393_v42  ;;  %v1515_v33 = vadd.f32 %v1514_v55, %v1513_v61  ;;  %v1524_v55 = vld [vmem:[%s4063_s3] sm:$0x1] }
 0x209   :  { %v1516_v58 = vmul.f32 0.0022222223, %v1515_v33  ;;  %v1517_v2 = vmul.f32 %v1394_v31, %v1394_v31 }
 0x20b   :  { %v1518_v21 = vsub.f32 %v1516_v58, %v1517_v2  ;;  %v4112_v2 = vld [vmem:[#allocation2_spill] sm:$0xff] }
 0x20d   :  { %v1519_v22 = vmax.f32 %v1518_v21, 0.0  ;;  %v4113_v21 = vld [vmem:[#allocation3_spill] sm:$0xff] }
 0x20f   :  { %v1521_v63 = vadd.f32 1e-05, %v1519_v22  ;;  %v4114_v22 = vld [vmem:[#allocation4_spill] sm:$0xff] }
 0x211   :  { %2596 = vrsqrt.f32 %v1521_v63  ;;  %v4115_v63 = vld [vmem:[#allocation5_spill] sm:$0xff] }
 0x21b   :  { %v2597_v39 = vpop.eup %2596 }
 0x21c   :  { %v1523_v12 = vmul.f32 %v2597_v39, %v1520_v37  ;;  %v4118_v37 = vld [vmem:[#allocation8_spill] sm:$0xff]  ;;  %v4119_v39 = vld [vmem:[#allocation9_spill] sm:$0xff] }
 0x21e   :  { %v1525_v61 = vmul.f32 %v1523_v12, %v1394_v31  ;;  %v1531_v42 = vrot.slane %v1523_v12, %v1530_v50 }
 0x220   :  { %v1526_v54 = vsub.f32 %v1524_v55, %v1525_v61  ;;  %v1533_v15 = vmul.f32 %v1531_v42, %v3037_v0  ;;  %v1534_v60 = vmul.f32 %v1531_v42, %v3045_v7  ;;  %v1535_v62 = vmul.f32 %v1531_v42, %v3047_v13  ;;  %v4120_v55 = vld [vmem:[#allocation10_spill] sm:$0xff] }
 0x221   :  { %v1536_v14 = vmul.f32 %v1531_v42, %v3052_v18  ;;  %v1537_v49 = vmul.f32 %v1531_v42, %v3054_v24  ;;  %v1538_v29 = vmul.f32 %v1531_v42, %v3056_v28  ;;  %v1539_v23 = vmul.f32 %v1531_v42, %v3062_v34 }
 0x222   :  { %v1540_v33 = vmul.f32 %v1531_v42, %v3064_v38  ;;  %v1541_v31 = vmul.f32 %v1531_v42, %v3070_v43  ;;  %v1542_v58 = vmul.f32 %v1531_v42, %v3072_v47  ;;  %v1543_v0 = vmul.f32 %v1531_v42, %v3078_v53 }
 0x223   :  { %v1544_v7 = vmul.f32 %v1531_v42, %v3080_v59  ;;  %v1545_v13 = vmul.f32 %v1531_v42, %v3086_v3  ;;  %v1546_v18 = vmul.f32 %v1531_v42, %v3088_v8  ;;  %v1547_v24 = vmul.f32 %v1531_v42, %v3096_v16 }
 0x224   :  { %v1548_v28 = vmul.f32 %v1531_v42, %v3104_v25  ;;  %v1549_v34 = vmul.f32 %v1531_v42, %v3117_v41  ;;  %v1550_v38 = vmul.f32 %v1531_v42, %v3121_v51  ;;  %v1551_v43 = vmul.f32 %v1531_v42, %v3134_v6 }
 0x225   :  { %v1552_v47 = vmul.f32 %v1531_v42, %v3139_v9  ;;  %v1553_v53 = vmul.f32 %v1531_v42, %v3152_v35  ;;  %v1554_v59 = vmul.f32 %v1531_v42, %v3158_v45  ;;  %v1555_v3 = vmul.f32 %v1531_v42, %v3171_v5 }
 0x226   :  { %v1556_v8 = vmul.f32 %v1531_v42, %v3175_v17  ;;  %v1557_v16 = vmul.f32 %v1531_v42, %v3188_v36  ;;  %v1558_v25 = vmul.f32 %v1531_v42, %v3193_v48  ;;  %v1559_v41 = vmul.f32 %v1531_v42, %v3206_v11 }
 0x227   :  { %v1560_v51 = vmul.f32 %v1531_v42, %v3212_v26  ;;  %v1561_v6 = vmul.f32 %v1531_v42, %v3225_v46  ;;  %v1562_v9 = vmul.f32 %v1531_v42, %v3229_v56  ;;  %v1563_v35 = vmul.f32 %v1531_v42, %v3242_v27 }
 0x228   :  { %v1564_v45 = vmul.f32 %v1531_v42, %v4112_v2  ;;  %v1565_v5 = vmul.f32 %v1531_v42, %v4113_v21  ;;  %v1566_v17 = vmul.f32 %v1531_v42, %v4114_v22  ;;  %v1567_v36 = vmul.f32 %v1531_v42, %v4115_v63  ;;  %v4121_v2 = vld [vmem:[#allocation11_spill] sm:$0xff] }
 0x229   :  { %v1568_v48 = vmul.f32 %v1531_v42, %v4116_v30  ;;  %v1569_v11 = vmul.f32 %v1531_v42, %v3296_v10  ;;  %v1570_v26 = vmul.f32 %v1531_v42, %v4117_v4  ;;  %v1571_v46 = vmul.f32 %v1531_v42, %v3314_v52  ;;  %v4124_v4 = vld [vmem:[#allocation17_spill] sm:$0xff] }
 0x22a   :  { %v1572_v56 = vmul.f32 %v1531_v42, %v4118_v37  ;;  %v1573_v27 = vmul.f32 %v1531_v42, %v4119_v39  ;;  %v1574_v12 = vmul.f32 %v1531_v42, %v3337_v57  ;;  %v1575_v61 = vmul.f32 %v1531_v42, %v4120_v55  ;;  %v4126_v57 = vld [vmem:[#allocation12_spill] sm:$0xff]  ;;  %v4127_v55 = vld [vmem:[#allocation18_spill] sm:$0xff] }
 0x22b   :  { %v1576_v21 = vmul.f32 %v1531_v42, %v4121_v2  ;;  %v1577_v22 = vmul.f32 %v1531_v42, %v3368_v44  ;;  %v1578_v63 = vmul.f32 %v1531_v42, %v3374_v19  ;;  %v1579_v10 = vmul.f32 %v1531_v42, %v3387_v32  ;;  %v4128_v2 = vld [vmem:[#allocation19_spill] sm:$0xff]  ;;  %v4129_v32 = vld [vmem:[#allocation13_spill] sm:$0xff] }
 0x22c   :  { %v3514_v30 = vmul.f32 %v1531_v42, %v3427_v1  ;;  %v3517_v52 = vmul.f32 %v1531_v42, %v3433_v20  ;;  %v3520_v37 = vmul.f32 %v1531_v42, %v4124_v4  ;;  %v1580_v39 = vmul.f32 %v1531_v42, %v4126_v57 }
 0x22d   :  { %v1588_v40 = vmul.f32 %v1531_v42, %v4127_v55  ;;  %v1589_v44 = vmul.f32 %v1531_v42, %v4128_v2  ;;  %v1594_v19 = vrot.slane %v1526_v54, %v1530_v50  ;;  %v1581_v1 = vmul.f32 %v1531_v42, %v4129_v32 }
 0x22e   :  { %4122 = vst [vmem:[#allocation2_spill] sm:$0xff] %v3514_v30  ;;  %4123 = vst [vmem:[#allocation3_spill] sm:$0xff] %v3517_v52  ;;  %v4130_v30 = vld [vmem:[#allocation14_spill] sm:$0xff]  ;;  %v4131_v52 = vld [vmem:[#allocation15_spill] sm:$0xff] }
 0x22f   :  { %4125 = vst [vmem:[#allocation4_spill] sm:$0xff] %v3520_v37  ;;  %v1582_v20 = vmul.f32 %v1531_v42, %v4130_v30  ;;  %v1583_v4 = vmul.f32 %v1531_v42, %v4131_v52  ;;  %v4132_v37 = vld [vmem:[#allocation16_spill] sm:$0xff]  ;;  %v3529_v55 = vadd.f32 %v1594_v19, %v1533_v15  ;;  %v3531_v2 = vadd.f32 %v1594_v19, %v1534_v60 }
 0x230   :  { %v1584_v57 = vmul.f32 %v1531_v42, %v4132_v37  ;;  %v3533_v50 = vadd.f32 %v1594_v19, %v1535_v62  ;;  %v3535_v54 = vadd.f32 %v1594_v19, %v1536_v14  ;;  %v3537_v32 = vadd.f32 %v1594_v19, %v1537_v49 }
 0x231   :  { %4133 = vst [vmem:[#allocation5_spill] sm:$0xff] %v3529_v55  ;;  %v3539_v30 = vadd.f32 %v1594_v19, %v1538_v29  ;;  %v3541_v52 = vadd.f32 %v1594_v19, %v1539_v23  ;;  %v3543_v37 = vadd.f32 %v1594_v19, %v1540_v33  ;;  %v3545_v42 = vadd.f32 %v1594_v19, %v1541_v31 }
 0x232   :  { %v3547_v15 = vadd.f32 %v1594_v19, %v1542_v58  ;;  %v3549_v55 = vadd.f32 %v1594_v19, %v1543_v0  ;;  %v3551_v60 = vadd.f32 %v1594_v19, %v1544_v7  ;;  %v3553_v62 = vadd.f32 %v1594_v19, %v1545_v13 }
 0x233   :  { %v3555_v14 = vadd.f32 %v1594_v19, %v1546_v18  ;;  %v3557_v49 = vadd.f32 %v1594_v19, %v1547_v24  ;;  %v3559_v29 = vadd.f32 %v1594_v19, %v1548_v28  ;;  %v3561_v23 = vadd.f32 %v1594_v19, %v1549_v34 }
 0x234   :  { %v3563_v33 = vadd.f32 %v1594_v19, %v1550_v38  ;;  %v3565_v31 = vadd.f32 %v1594_v19, %v1551_v43  ;;  %v3567_v58 = vadd.f32 %v1594_v19, %v1552_v47  ;;  %v3569_v0 = vadd.f32 %v1594_v19, %v1553_v53 }
 0x235   :  { %v3571_v7 = vadd.f32 %v1594_v19, %v1554_v59  ;;  %v3573_v13 = vadd.f32 %v1594_v19, %v1555_v3  ;;  %v3575_v18 = vadd.f32 %v1594_v19, %v1556_v8  ;;  %v3577_v24 = vadd.f32 %v1594_v19, %v1557_v16 }
 0x236   :  { %v3579_v28 = vadd.f32 %v1594_v19, %v1558_v25  ;;  %v3581_v34 = vadd.f32 %v1594_v19, %v1559_v41  ;;  %v3583_v38 = vadd.f32 %v1594_v19, %v1560_v51  ;;  %v3585_v43 = vadd.f32 %v1594_v19, %v1561_v6 }
 0x237   :  { %v3587_v47 = vadd.f32 %v1594_v19, %v1562_v9  ;;  %v3589_v53 = vadd.f32 %v1594_v19, %v1563_v35  ;;  %v3591_v59 = vadd.f32 %v1594_v19, %v1564_v45  ;;  %v3593_v3 = vadd.f32 %v1594_v19, %v1565_v5 }
 0x238   :  { %v3595_v8 = vadd.f32 %v1594_v19, %v1566_v17  ;;  %v3597_v16 = vadd.f32 %v1594_v19, %v1567_v36  ;;  %v3599_v25 = vadd.f32 %v1594_v19, %v1568_v48  ;;  %v3601_v41 = vadd.f32 %v1594_v19, %v1569_v11 }
 0x239   :  { %v3603_v51 = vadd.f32 %v1594_v19, %v1570_v26  ;;  %v3605_v6 = vadd.f32 %v1594_v19, %v1571_v46  ;;  %v3607_v9 = vadd.f32 %v1594_v19, %v1572_v56  ;;  %v3609_v35 = vadd.f32 %v1594_v19, %v1573_v27 }
 0x23a   :  { %4134 = vst [vmem:[#allocation6_spill] sm:$0xff] %v3597_v16  ;;  %v3611_v45 = vadd.f32 %v1594_v19, %v1574_v12  ;;  %v3613_v5 = vadd.f32 %v1594_v19, %v1575_v61  ;;  %v3615_v17 = vadd.f32 %v1594_v19, %v1576_v21  ;;  %v3617_v36 = vadd.f32 %v1594_v19, %v1577_v22  ;;  %v4144_v61 = vld [vmem:[#allocation2_spill] sm:$0xff]  ;;  %v4145_v21 = vld [vmem:[#allocation3_spill] sm:$0xff] }
 0x23b   :  { %4135 = vst [vmem:[#allocation7_spill] sm:$0xff] %v3609_v35  ;;  %v3619_v48 = vadd.f32 %v1594_v19, %v1578_v63  ;;  %v3621_v11 = vadd.f32 %v1594_v19, %v1579_v10  ;;  %v3623_v26 = vadd.f32 %v1594_v19, %v1580_v39  ;;  %v3625_v46 = vadd.f32 %v1594_v19, %v1581_v1  ;;  %v4147_v63 = vld [vmem:[#allocation4_spill] sm:$0xff]  ;;  %v4148_v1 = vld [vmem:[#allocation5_spill] sm:$0xff] }
 0x23c   :  { %4136 = vst [vmem:[#allocation8_spill] sm:$0xff] %v3613_v5  ;;  %v3627_v56 = vadd.f32 %v1594_v19, %v1582_v20  ;;  %v3629_v27 = vadd.f32 %v1594_v19, %v1583_v4  ;;  %v3631_v12 = vadd.f32 %v1594_v19, %v1584_v57  ;;  %v3634_v5 = vadd.f32 %v1594_v19, %v4144_v61 }
 0x23d   :  { %4137 = vst [vmem:[#allocation9_spill] sm:$0xff] %v3619_v48  ;;  %4138 = vst [vmem:[#allocation10_spill] sm:$0xff] %v3621_v11  ;;  %v3637_v22 = vadd.f32 %v1594_v19, %v4145_v21  ;;  %v3640_v48 = vadd.f32 %v1594_v19, %v4147_v63  ;;  %v3642_v10 = vadd.f32 %v1594_v19, %v1588_v40  ;;  %v1653_v20 = vmax.f32 %v4148_v1, 0.0 }
 0x23e   :  { %4139 = vst [vmem:[#allocation11_spill] sm:$0xff] %v3623_v26  ;;  %4140 = vst [vmem:[#allocation17_spill] sm:$0xff] %v3625_v46  ;;  %v3644_v39 = vadd.f32 %v1594_v19, %v1589_v44  ;;  %v1654_v4 = vmax.f32 %v3531_v2, 0.0  ;;  %v1655_v57 = vmax.f32 %v3533_v50, 0.0  ;;  %v1657_v61 = vmax.f32 %v3537_v32, 0.0 }
 0x23f   :  { %4141 = vst [vmem:[#allocation12_spill] sm:$0xff] %v3627_v56  ;;  %4142 = vst [vmem:[#allocation18_spill] sm:$0xff] %v3629_v27  ;;  %v1658_v21 = vmax.f32 %v3539_v30, 0.0  ;;  %v1660_v63 = vmax.f32 %v3543_v37, 0.0  ;;  %v1661_v40 = vmax.f32 %v3545_v42, 0.0  ;;  %v1662_v44 = vmax.f32 %v3547_v15, 0.0 }
 0x240   :  { %4143 = vst [vmem:[#allocation19_spill] sm:$0xff] %v3631_v12  ;;  %4146 = vst [vmem:[#allocation13_spill] sm:$0xff] %v3637_v22  ;;  %v1656_v12 = vmax.f32 %v3535_v54, 0.0  ;;  %v1659_v22 = vmax.f32 %v3541_v52, 0.0  ;;  %v1663_v19 = vmax.f32 %v3549_v55, 0.0  ;;  %v1664_v2 = vmax.f32 %v3551_v60, 0.0 }
 0x241   :  { %v1665_v50 = vmax.f32 %v3553_v62, 0.0  ;;  %v1666_v54 = vmax.f32 %v3555_v14, 0.0  ;;  %v1705_v62 = vmax.f32 %v3634_v5, 0.0  ;;  %v1707_v1 = vmax.f32 %v3640_v48, 0.0 }
 0x242   :  { %v1708_v30 = vmax.f32 %v3642_v10, 0.0  ;;  %v1709_v52 = vmax.f32 %v3644_v39, 0.0  ;;  %v2193_v11 = vpack.c.bf16 %v1653_v20, %v1653_v20  ;;  %v2194_v37 = vpack.c.bf16 %v1654_v4, %v1654_v4 }
 0x243   :  { %v2195_v26 = vpack.c.bf16 %v1655_v57, %v1655_v57  ;;  %v2196_v42 = vpack.c.bf16 %v1656_v12, %v1656_v12  ;;  %v2197_v46 = vpack.c.bf16 %v1657_v61, %v1657_v61  ;;  %v2198_v15 = vpack.c.bf16 %v1658_v21, %v1658_v21 }
 0x244   :  { %v4150_v16 = vld [vmem:[#allocation9_spill] sm:$0xff]  ;;  %v2199_v56 = vpack.c.bf16 %v1659_v22, %v1659_v22  ;;  %v2200_v55 = vpack.c.bf16 %v1660_v63, %v1660_v63  ;;  %v2201_v27 = vpack.c.bf16 %v1661_v40, %v1661_v40  ;;  %v2202_v60 = vpack.c.bf16 %v1662_v44, %v1662_v44  ;;  %1940 = vst.msk [vmem:[%s4064_s4] sm:$0xf] %vm1939_vm2, %v2193_v11 }
 0x245   :  { %1941 = vst.msk [vmem:[%s4064_s4 + $0x4] sm:$0xf] %vm1939_vm2, %v2194_v37  ;;  %v2203_v20 = vpack.c.bf16 %v1663_v19, %v1663_v19  ;;  %v2204_v4 = vpack.c.bf16 %v1664_v2, %v1664_v2  ;;  %v2205_v57 = vpack.c.bf16 %v1665_v50, %v1665_v50  ;;  %v2206_v12 = vpack.c.bf16 %v1666_v54, %v1666_v54 }
 0x246   :  { %1942 = vst.msk [vmem:[%s4064_s4 + $0x8] sm:$0xf] %vm1939_vm2, %v2195_v26  ;;  %1943 = vst.msk [vmem:[%s4064_s4 + $0xc] sm:$0xf] %vm1939_vm2, %v2196_v42  ;;  %v4153_v11 = vmax.f32 %v3557_v49, 0.0  ;;  %v4154_v26 = vmax.f32 %v3559_v29, 0.0  ;;  %v2248_v5 = vpack.c.bf16 %v1708_v30, %v1708_v30 }
 0x247   :  { %v4151_v35 = vld [vmem:[#allocation19_spill] sm:$0xff]  ;;  %v4152_v32 = vld [vmem:[#allocation13_spill] sm:$0xff]  ;;  %1944 = vst.msk [vmem:[%s4064_s4 + $0x10] sm:$0xf] %vm1939_vm2, %v2197_v46  ;;  %1945 = vst.msk [vmem:[%s4064_s4 + $0x14] sm:$0xf] %vm1939_vm2, %v2198_v15 }
 0x248   :  { %v1706_v14 = vmax.f32 %v4152_v32, 0.0  ;;  %v2207_v22 = vpack.c.bf16 %v4153_v11, %v4153_v11  ;;  %v2208_v61 = vpack.c.bf16 %v4154_v26, %v4154_v26  ;;  %v4155_v21 = vmax.f32 %v3561_v23, 0.0  ;;  %1946 = vst.msk [vmem:[%s4064_s4 + $0x18] sm:$0xf] %vm1939_vm2, %v2199_v56  ;;  %1947 = vst.msk [vmem:[%s4064_s4 + $0x1c] sm:$0xf] %vm1939_vm2, %v2200_v55 }
 0x249   :  { %v4156_v40 = vmax.f32 %v3563_v33, 0.0  ;;  %1948 = vst.msk [vmem:[%s4064_s4 + $0x20] sm:$0xf] %vm1939_vm2, %v2201_v27  ;;  %1949 = vst.msk [vmem:[%s4064_s4 + $0x24] sm:$0xf] %vm1939_vm2, %v2202_v60  ;;  %v4157_v49 = vmax.f32 %v3565_v31, 0.0  ;;  %v2249_v32 = vpack.c.bf16 %v1709_v52, %v1709_v52 }
 0x24a   :  { %v2209_v63 = vpack.c.bf16 %v4155_v21, %v4155_v21  ;;  %v4158_v23 = vmax.f32 %v3567_v58, 0.0  ;;  %v4159_v56 = vmax.f32 %v3569_v0, 0.0  ;;  %v4160_v19 = vmax.f32 %v3571_v7, 0.0  ;;  %1950 = vst.msk [vmem:[%s4064_s4 + $0x28] sm:$0xf] %vm1939_vm2, %v2203_v20 }
 0x24b   :  { %v2210_v46 = vpack.c.bf16 %v4156_v40, %v4156_v40  ;;  %v2211_v29 = vpack.c.bf16 %v4157_v49, %v4157_v49  ;;  %1951 = vst.msk [vmem:[%s4064_s4 + $0x2c] sm:$0xf] %vm1939_vm2, %v2204_v4  ;;  %1952 = vst.msk [vmem:[%s4064_s4 + $0x30] sm:$0xf] %vm1939_vm2, %v2205_v57  ;;  %v4161_v31 = vmax.f32 %v3573_v13, 0.0  ;;  %v4162_v0 = vmax.f32 %v3575_v18, 0.0 }
 0x24c   :  { %v2212_v33 = vpack.c.bf16 %v4158_v23, %v4158_v23  ;;  %v2213_v44 = vpack.c.bf16 %v4159_v56, %v4159_v56  ;;  %v2214_v27 = vpack.c.bf16 %v4160_v19, %v4160_v19  ;;  %1953 = vst.msk [vmem:[%s4064_s4 + $0x34] sm:$0xf] %vm1939_vm2, %v2206_v12  ;;  %v4163_v2 = vmax.f32 %v3577_v24, 0.0  ;;  %1954 = vst.msk [vmem:[%s4064_s4 + $0x38] sm:$0xf] %vm1939_vm2, %v2207_v22  ;;  %v4180_v40 = vld [vmem:[#allocation7_spill] sm:$0xff] }
 0x24d   :  { %v2215_v58 = vpack.c.bf16 %v4161_v31, %v4161_v31  ;;  %v2216_v7 = vpack.c.bf16 %v4162_v0, %v4162_v0  ;;  %v4164_v54 = vmax.f32 %v3579_v28, 0.0  ;;  %1955 = vst.msk [vmem:[%s4064_s4 + $0x3c] sm:$0xf] %vm1939_vm2, %v2208_v61  ;;  %1956 = vst.msk [vmem:[%s4064_s4 + $0x40] sm:$0xf] %vm1939_vm2, %v2209_v63  ;;  %v4165_v13 = vmax.f32 %v3581_v34, 0.0 }
 0x24e   :  { %v2217_v50 = vpack.c.bf16 %v4163_v2, %v4163_v2  ;;  %1957 = vst.msk [vmem:[%s4064_s4 + $0x44] sm:$0xf] %vm1939_vm2, %v2210_v46  ;;  %v4166_v24 = vmax.f32 %v3583_v38, 0.0  ;;  %v4167_v42 = vmax.f32 %v3585_v43, 0.0  ;;  %v4168_v55 = vmax.f32 %v3587_v47, 0.0  ;;  %v4192_v2 = vld [vmem:[#allocation17_spill] sm:$0xff] }
 0x24f   :  { %v2218_v37 = vpack.c.bf16 %v4164_v54, %v4164_v54  ;;  %v2219_v18 = vpack.c.bf16 %v4165_v13, %v4165_v13  ;;  %1958 = vst.msk [vmem:[%s4064_s4 + $0x48] sm:$0xf] %vm1939_vm2, %v2211_v29  ;;  %1959 = vst.msk [vmem:[%s4064_s4 + $0x4c] sm:$0xf] %vm1939_vm2, %v2212_v33  ;;  %v4169_v34 = vmax.f32 %v3589_v53, 0.0  ;;  %v4170_v43 = vmax.f32 %v3591_v59, 0.0 }
 0x250   :  { %v2220_v28 = vpack.c.bf16 %v4166_v24, %v4166_v24  ;;  %v2221_v15 = vpack.c.bf16 %v4167_v42, %v4167_v42  ;;  %v2222_v60 = vpack.c.bf16 %v4168_v55, %v4168_v55  ;;  %1960 = vst.msk [vmem:[%s4064_s4 + $0x50] sm:$0xf] %vm1939_vm2, %v2213_v44  ;;  %1961 = vst.msk [vmem:[%s4064_s4 + $0x54] sm:$0xf] %vm1939_vm2, %v2214_v27  ;;  %v4171_v20 = vmax.f32 %v3593_v3, 0.0  ;;  %v4173_v53 = vld [vmem:[#allocation6_spill] sm:$0xff] }
 0x251   :  { %v2223_v38 = vpack.c.bf16 %v4169_v34, %v4169_v34  ;;  %v2224_v47 = vpack.c.bf16 %v4170_v43, %v4170_v43  ;;  %v4172_v57 = vmax.f32 %v3595_v8, 0.0  ;;  %1962 = vst.msk [vmem:[%s4064_s4 + $0x58] sm:$0xf] %vm1939_vm2, %v2215_v58  ;;  %1963 = vst.msk [vmem:[%s4064_s4 + $0x5c] sm:$0xf] %vm1939_vm2, %v2216_v7  ;;  %v4174_v59 = vmax.f32 %v4173_v53, 0.0 }
 0x252   :  { %v2225_v4 = vpack.c.bf16 %v4171_v20, %v4171_v20  ;;  %1964 = vst.msk [vmem:[%s4064_s4 + $0x60] sm:$0xf] %vm1939_vm2, %v2217_v50  ;;  %1965 = vst.msk [vmem:[%s4064_s4 + $0x64] sm:$0xf] %vm1939_vm2, %v2218_v37  ;;  %v4175_v8 = vmax.f32 %v3599_v25, 0.0  ;;  %v4176_v22 = vmax.f32 %v3601_v41, 0.0  ;;  %v2246_v34 = vpack.c.bf16 %v1706_v14, %v1706_v14 }
 0x253   :  { %v2226_v12 = vpack.c.bf16 %v4172_v57, %v4172_v57  ;;  %v2227_v3 = vpack.c.bf16 %v4174_v59, %v4174_v59  ;;  %v4177_v61 = vmax.f32 %v3603_v51, 0.0  ;;  %1966 = vst.msk [vmem:[%s4064_s4 + $0x68] sm:$0xf] %vm1939_vm2, %v2219_v18  ;;  %1967 = vst.msk [vmem:[%s4064_s4 + $0x6c] sm:$0xf] %vm1939_vm2, %v2220_v28  ;;  %v4178_v25 = vmax.f32 %v3605_v6, 0.0 }
 0x254   :  { %v2228_v11 = vpack.c.bf16 %v4175_v8, %v4175_v8  ;;  %v2229_v26 = vpack.c.bf16 %v4176_v22, %v4176_v22  ;;  %1968 = vst.msk [vmem:[%s4064_s4 + $0x70] sm:$0xf] %vm1939_vm2, %v2221_v15  ;;  %1969 = vst.msk [vmem:[%s4064_s4 + $0x74] sm:$0xf] %vm1939_vm2, %v2222_v60  ;;  %v4179_v51 = vmax.f32 %v3607_v9, 0.0  ;;  %v4181_v46 = vmax.f32 %v4180_v40, 0.0 }
 0x255   :  { %v2230_v21 = vpack.c.bf16 %v4177_v61, %v4177_v61  ;;  %v2231_v41 = vpack.c.bf16 %v4178_v25, %v4178_v25  ;;  %v4182_v29 = vmax.f32 %v3611_v45, 0.0  ;;  %1970 = vst.msk [vmem:[%s4064_s4 + $0x78] sm:$0xf] %vm1939_vm2, %v2223_v38  ;;  %1971 = vst.msk [vmem:[%s4064_s4 + $0x7c] sm:$0xf] %vm1939_vm2, %v2224_v47  ;;  %v4183_v6 = vld [vmem:[#allocation8_spill] sm:$0xff]  ;;  %v2245_v60 = vpack.c.bf16 %v1705_v62, %v1705_v62 }
 0x256   :  { %v2232_v63 = vpack.c.bf16 %v4179_v51, %v4179_v51  ;;  %v2233_v49 = vpack.c.bf16 %v4181_v46, %v4181_v46  ;;  %1972 = vst.msk [vmem:[%s4064_s4 + $0x80] sm:$0xf] %vm1939_vm2, %v2225_v4  ;;  %1973 = vst.msk [vmem:[%s4064_s4 + $0x84] sm:$0xf] %vm1939_vm2, %v2226_v12  ;;  %v4184_v9 = vmax.f32 %v4183_v6, 0.0  ;;  %v4185_v33 = vmax.f32 %v3615_v17, 0.0 }
 0x257   :  { %v2234_v23 = vpack.c.bf16 %v4182_v29, %v4182_v29  ;;  %v4186_v44 = vmax.f32 %v3617_v36, 0.0  ;;  %v4187_v27 = vmax.f32 %v4150_v16, 0.0  ;;  %1974 = vst.msk [vmem:[%s4064_s4 + $0x88] sm:$0xf] %vm1939_vm2, %v2227_v3  ;;  %1975 = vst.msk [vmem:[%s4064_s4 + $0x8c] sm:$0xf] %vm1939_vm2, %v2228_v11 }
 0x258   :  { %v2235_v45 = vpack.c.bf16 %v4184_v9, %v4184_v9  ;;  %v2236_v56 = vpack.c.bf16 %v4185_v33, %v4185_v33  ;;  %1976 = vst.msk [vmem:[%s4064_s4 + $0x90] sm:$0xf] %vm1939_vm2, %v2229_v26  ;;  %1977 = vst.msk [vmem:[%s4064_s4 + $0x94] sm:$0xf] %vm1939_vm2, %v2230_v21  ;;  %v4188_v16 = vld [vmem:[#allocation10_spill] sm:$0xff]  ;;  %v4190_v58 = vld [vmem:[#allocation11_spill] sm:$0xff] }
 0x259   :  { %v2237_v19 = vpack.c.bf16 %v4186_v44, %v4186_v44  ;;  %v2238_v31 = vpack.c.bf16 %v4187_v27, %v4187_v27  ;;  %v4189_v17 = vmax.f32 %v4188_v16, 0.0  ;;  %v4191_v0 = vmax.f32 %v4190_v58, 0.0  ;;  %v4194_v37 = vld [vmem:[#allocation12_spill] sm:$0xff]  ;;  %1978 = vst.msk [vmem:[%s4064_s4 + $0x98] sm:$0xf] %vm1939_vm2, %v2231_v41  ;;  %v4196_v24 = vld [vmem:[#allocation18_spill] sm:$0xff] }
 0x25a   :  { %v4193_v50 = vmax.f32 %v4192_v2, 0.0  ;;  %v4195_v13 = vmax.f32 %v4194_v37, 0.0  ;;  %1979 = vst.msk [vmem:[%s4064_s4 + $0x9c] sm:$0xf] %vm1939_vm2, %v2232_v63  ;;  %1980 = vst.msk [vmem:[%s4064_s4 + $0xa0] sm:$0xf] %vm1939_vm2, %v2233_v49 }
 0x25b   :  { %v2239_v36 = vpack.c.bf16 %v4189_v17, %v4189_v17  ;;  %v2240_v7 = vpack.c.bf16 %v4191_v0, %v4191_v0  ;;  %1981 = vst.msk [vmem:[%s4064_s4 + $0xa4] sm:$0xf] %vm1939_vm2, %v2234_v23  ;;  %v4197_v28 = vmax.f32 %v4196_v24, 0.0  ;;  %v4198_v15 = vmax.f32 %v4151_v35, 0.0  ;;  %1982 = vst.msk [vmem:[%s4064_s4 + $0xa8] sm:$0xf] %vm1939_vm2, %v2235_v45 }
 0x25c   :  { %v2241_v54 = vpack.c.bf16 %v4193_v50, %v4193_v50  ;;  %v2242_v18 = vpack.c.bf16 %v4195_v13, %v4195_v13  ;;  %1983 = vst.msk [vmem:[%s4064_s4 + $0xac] sm:$0xf] %vm1939_vm2, %v2236_v56  ;;  %1984 = vst.msk [vmem:[%s4064_s4 + $0xb0] sm:$0xf] %vm1939_vm2, %v2237_v19  ;;  %v2247_v35 = vpack.c.bf16 %v1707_v1, %v1707_v1 }
 0x25d   :  { %v2243_v42 = vpack.c.bf16 %v4197_v28, %v4197_v28  ;;  %v2244_v55 = vpack.c.bf16 %v4198_v15, %v4198_v15  ;;  %1985 = vst.msk [vmem:[%s4064_s4 + $0xb4] sm:$0xf] %vm1939_vm2, %v2238_v31  ;;  %1986 = vst.msk [vmem:[%s4064_s4 + $0xb8] sm:$0xf] %vm1939_vm2, %v2239_v36 }
 0x25e   :  { %1987 = vst.msk [vmem:[%s4064_s4 + $0xbc] sm:$0xf] %vm1939_vm2, %v2240_v7  ;;  %1988 = vst.msk [vmem:[%s4064_s4 + $0xc0] sm:$0xf] %vm1939_vm2, %v2241_v54 }
 0x25f   :  { %1989 = vst.msk [vmem:[%s4064_s4 + $0xc4] sm:$0xf] %vm1939_vm2, %v2242_v18  ;;  %1990 = vst.msk [vmem:[%s4064_s4 + $0xc8] sm:$0xf] %vm1939_vm2, %v2243_v42 }
 0x260   :  { %1991 = vst.msk [vmem:[%s4064_s4 + $0xcc] sm:$0xf] %vm1939_vm2, %v2244_v55  ;;  %1992 = vst.msk [vmem:[%s4064_s4 + $0xd0] sm:$0xf] %vm1939_vm2, %v2245_v60 }
 0x261   :  { %1993 = vst.msk [vmem:[%s4064_s4 + $0xd4] sm:$0xf] %vm1939_vm2, %v2246_v34  ;;  %1994 = vst.msk [vmem:[%s4064_s4 + $0xd8] sm:$0xf] %vm1939_vm2, %v2247_v35 }
 0x262   :  { %1995 = vst.msk [vmem:[%s4064_s4 + $0xdc] sm:$0xf] %vm1939_vm2, %v2248_v5 }
 0x263   :  { %1997 = vst.msk [vmem:[%s4064_s4 + $0xe0] sm:$0x1] %vm1996_vm3, %v2249_v32 }

// kernel: stem_forward.14
= control target key start
LH: loop header
LB: loop body
LE: loop exit
PB: predicated region body
PF: predicated region fallthrough
CT: control target
= control target key end

     0   :  { %v617_v0 = vmov 0   ;;  %vm175_vm0 = vcmask 261120   ;;  %s821_s1 = inlined_call_operand.vmem [shape: bf16[160,128], index: 1, kind: input, shape index: {}]   ;;  %s822_s0 = inlined_call_operand.vmem [shape: bf16[112,160], index: 0, kind: input, shape index: {}]   ;;  %s823_s2 = inlined_call_operand.vmem [shape: f32[1,128], index: 2, kind: input, shape index: {}]   ;;  %s824_s3 = inlined_call_operand.vmem [shape: f32[1,128], index: 3, kind: input, shape index: {}]   ;;  %s825_s4 = inlined_call_operand.vmem [shape: bf16[98,128], index: 4, kind: output, shape index: {}]  }
   0x1   :  { %197 = vmatprep.subr.bf16.mxu0 %v617_v0  ;;  %v584_v1 = vld [vmem:[%s821_s1] sm:$0xff]   ;;  %563 = vmatprep.subr.bf16.mxu1 %v617_v0  ;;  %v585_v2 = vld [vmem:[%s821_s1 + $0x8] sm:$0xff]   ;;  %v586_v3 = vld [vmem:[%s821_s1 + $0x10] sm:$0xff]  }
   0x2   :  { %198 = vmatpush1.bf16.msra.mxu0 %v584_v1  ;;  %573 = vmatpush1.bf16.msra.mxu1 %v584_v1  ;;  %v587_v4 = vld [vmem:[%s821_s1 + $0x18] sm:$0xff]   ;;  %v596_v5 = vld [vmem:[%s822_s0 + $0x4] ss:$8 sps:$4 sm:$0xff]   ;;  %v590_v9 = vld [vmem:[%s821_s1 + $0x30] sm:$0xff]  }
   0x3   :  { %199 = vmatprep.subr.bf16.mxu0 %v617_v0  ;;  %564 = vmatprep.subr.bf16.mxu1 %v617_v0  ;;  %v588_v6 = vld [vmem:[%s821_s1 + $0x20] sm:$0xff]   ;;  %v589_v8 = vld [vmem:[%s821_s1 + $0x28] sm:$0xff]   ;;  %v591_v10 = vld [vmem:[%s821_s1 + $0x38] sm:$0xff]  }
   0x4   :  { %495 = vmatprep.mubr.msk.bf16.mxu0 %vm175_vm0, %v596_v5  ;;  %v605_v7 = vld [vmem:[%s822_s0 + $0x44] ss:$8 sps:$4 sm:$0xff]   ;;  %v594_v13 = vld [vmem:[%s822_s0] ss:$8 sps:$4 sm:$0xff]   ;;  %v597_v15 = vld [vmem:[%s822_s0 + $0x14] ss:$8 sps:$4 sm:$0xff]  }
   0x5   :  { %499 = vmatprep.mubr.msk.bf16.mxu1 %vm175_vm0, %v605_v7  ;;  %v592_v11 = vld [vmem:[%s821_s1 + $0x40] sm:$0xff]   ;;  %v593_v12 = vld [vmem:[%s821_s1 + $0x48] sm:$0xff]   ;;  %v609_v16 = vld [vmem:[%s822_s0 + $0x54] ss:$8 sps:$4 sm:$0xff]  }
   0x6   :  { %200 = vmatpush1.bf16.msra.mxu0 %v585_v2  ;;  %574 = vmatpush1.bf16.msra.mxu1 %v585_v2  ;;  %v603_v14 = vld [vmem:[%s822_s0 + $0x40] ss:$8 sps:$4 sm:$0xff]   ;;  %v599_v17 = vld [vmem:[%s822_s0 + $0x10] ss:$8 sps:$4 sm:$0xff]   ;;  %v600_v19 = vld [vmem:[%s822_s0 + $0x24] ss:$8 sps:$4 sm:$0xff]  }
   0x7   :  { %201 = vmatprep.subr.bf16.mxu0 %v617_v0  ;;  %565 = vmatprep.subr.bf16.mxu1 %v617_v0  ;;  %v611_v18 = vld [vmem:[%s822_s0 + $0x50] ss:$8 sps:$4 sm:$0xff]   ;;  %v612_v20 = vld [vmem:[%s822_s0 + $0x64] ss:$8 sps:$4 sm:$0xff]   ;;  %v602_v21 = vld [vmem:[%s822_s0 + $0x20] ss:$8 sps:$4 sm:$0xff]  }
   0x8   :  { %v614_v22 = vld [vmem:[%s822_s0 + $0x60] ss:$8 sps:$4 sm:$0xff]   ;;  %v606_v23 = vld [vmem:[%s822_s0 + $0x34] ss:$8 sps:$4 sm:$0xff]   ;;  %v608_v24 = vld [vmem:[%s822_s0 + $0x30] ss:$8 sps:$4 sm:$0xff]  }
   0xa   :  { %202 = vmatpush1.bf16.msra.mxu0 %v586_v3  ;;  %575 = vmatpush1.bf16.msra.mxu1 %v586_v3 }
   0xb   :  { %203 = vmatprep.subr.bf16.mxu0 %v617_v0  ;;  %566 = vmatprep.subr.bf16.mxu1 %v617_v0 }
   0xe   :  { %204 = vmatpush1.bf16.msra.mxu0 %v587_v4  ;;  %576 = vmatpush1.bf16.msra.mxu1 %v587_v4 }
   0xf   :  { %205 = vmatprep.subr.bf16.mxu0 %v617_v0  ;;  %567 = vmatprep.subr.bf16.mxu1 %v617_v0 }
  0x12   :  { %206 = vmatpush1.bf16.msra.mxu0 %v588_v6  ;;  %577 = vmatpush1.bf16.msra.mxu1 %v588_v6 }
  0x13   :  { %207 = vmatprep.subr.bf16.mxu0 %v617_v0  ;;  %568 = vmatprep.subr.bf16.mxu1 %v617_v0 }
  0x16   :  { %208 = vmatpush1.bf16.msra.mxu0 %v589_v8  ;;  %578 = vmatpush1.bf16.msra.mxu1 %v589_v8 }
  0x17   :  { %209 = vmatprep.subr.bf16.mxu0 %v617_v0  ;;  %569 = vmatprep.subr.bf16.mxu1 %v617_v0 }
  0x1a   :  { %210 = vmatpush1.bf16.msra.mxu0 %v590_v9  ;;  %579 = vmatpush1.bf16.msra.mxu1 %v590_v9 }
  0x1b   :  { %211 = vmatprep.subr.bf16.mxu0 %v617_v0  ;;  %570 = vmatprep.subr.bf16.mxu1 %v617_v0 }
  0x1e   :  { %212 = vmatpush1.bf16.msra.mxu0 %v591_v10  ;;  %580 = vmatpush1.bf16.msra.mxu1 %v591_v10 }
  0x1f   :  { %213 = vmatprep.subr.bf16.mxu0 %v617_v0  ;;  %571 = vmatprep.subr.bf16.mxu1 %v617_v0 }
  0x22   :  { %214 = vmatpush1.bf16.msra.mxu0 %v592_v11  ;;  %581 = vmatpush1.bf16.msra.mxu1 %v592_v11 }
  0x23   :  { %215 = vmatprep.subr.bf16.mxu0 %v617_v0  ;;  %572 = vmatprep.subr.bf16.mxu1 %v617_v0 }
  0x26   :  { %216 = vmatpush1.bf16.msra.mxu0 %v593_v12  ;;  %582 = vmatpush1.bf16.msra.mxu1 %v593_v12 }
  0x29   :  { %230 = vmatmul.mubr.bf16.vlgmr.msra.gmra.mrb[0].mxu0 %v594_v13  ;;  %262 = vmatmul.mubr.bf16.vlgmr.msra.gmra.mrb[0].mxu1 %v603_v14 }
  0x2a   :  { %496 = vmatprep.mubr.msk.bf16.mxu0 %vm175_vm0, %v597_v15  ;;  %500 = vmatprep.mubr.msk.bf16.mxu1 %vm175_vm0, %v609_v16 }
  0x31   :  { %238 = vmatmul.mubr.bf16.gmra.mrb[4].mxu0 %v599_v17  ;;  %270 = vmatmul.mubr.bf16.gmra.mrb[4].mxu1 %v611_v18 }
  0x32   :  { %497 = vmatprep.mubr.msk.bf16.mxu0 %vm175_vm0, %v600_v19  ;;  %501 = vmatprep.mubr.msk.bf16.mxu1 %vm175_vm0, %v612_v20 }
  0x39   :  { %246 = vmatmul.mubr.bf16.gmra.mrb[8].mxu0 %v602_v21  ;;  %278 = vmatmul.mubr.bf16.gmra.mrb[8].mxu1 %v614_v22 }
  0x3a   :  { %498 = vmatprep.mubr.msk.bf16.mxu0 %vm175_vm0, %v606_v23 }
  0x41   :  { %254 = vmatmul.mubr.bf16.gmra.mrb[12].mxu0 %v608_v24 }
  0xfc   :  { %v722_v25 = vpop.f32.mrb[0].mxu0  ;;  %v724_v26 = vpop.f32.mrb[0].mxu1 }
  0xfd   :  { %v233_v27 = vpop.f32.mrb[1].mxu0  ;;  %v265_v28 = vpop.f32.mrb[1].mxu1  ;;  %v306_v31 = vmul.f32 %v722_v25, %v722_v25  ;;  %v314_v10 = vmul.f32 %v724_v26, %v724_v26 }
  0xfe   :  { %v726_v29 = vpop.f32.mrb[2].mxu0  ;;  %v728_v30 = vpop.f32.mrb[2].mxu1 }
  0xff   :  { %v286_v32 = vadd.f32 %v726_v29, %v722_v25  ;;  %v307_v33 = vmul.f32 %v726_v29, %v726_v29  ;;  %v236_v34 = vpop.f32.mrb[3].mxu0  ;;  %v268_v35 = vpop.f32.mrb[3].mxu1  ;;  %v315_v13 = vmul.f32 %v728_v30, %v728_v30 }
 0x101   :  { %v320_v36 = vadd.f32 %v307_v33, %v306_v31 }
 0x104   :  { %v736_v37 = vpop.f32.mrb[4].mxu0  ;;  %v738_v38 = vpop.f32.mrb[4].mxu1 }
 0x105   :  { %v287_v39 = vadd.f32 %v286_v32, %v736_v37  ;;  %v308_v40 = vmul.f32 %v736_v37, %v736_v37  ;;  %v241_v41 = vpop.f32.mrb[5].mxu0  ;;  %v273_v42 = vpop.f32.mrb[5].mxu1  ;;  %v316_v16 = vmul.f32 %v738_v38, %v738_v38 }
 0x106   :  { %v743_v43 = vpop.f32.mrb[6].mxu0  ;;  %v745_v44 = vpop.f32.mrb[6].mxu1 }
 0x107   :  { %v321_v45 = vadd.f32 %v320_v36, %v308_v40  ;;  %v288_v46 = vadd.f32 %v287_v39, %v743_v43  ;;  %v309_v47 = vmul.f32 %v743_v43, %v743_v43  ;;  %v244_v48 = vpop.f32.mrb[7].mxu0  ;;  %v276_v49 = vpop.f32.mrb[7].mxu1  ;;  %v317_v20 = vmul.f32 %v745_v44, %v745_v44 }
 0x109   :  { %v322_v50 = vadd.f32 %v321_v45, %v309_v47 }
 0x10c   :  { %v750_v51 = vpop.f32.mrb[8].mxu0  ;;  %v752_v52 = vpop.f32.mrb[8].mxu1 }
 0x10d   :  { %v289_v53 = vadd.f32 %v288_v46, %v750_v51  ;;  %v310_v54 = vmul.f32 %v750_v51, %v750_v51  ;;  %v249_v55 = vpop.f32.mrb[9].mxu0  ;;  %v281_v56 = vpop.f32.mrb[9].mxu1  ;;  %v318_v22 = vmul.f32 %v752_v52, %v752_v52 }
 0x10e   :  { %v757_v57 = vpop.f32.mrb[10].mxu0  ;;  %v282_v58 = vpop.f32.mrb[10].mxu1 }
 0x10f   :  { %v323_v59 = vadd.f32 %v322_v50, %v310_v54  ;;  %v290_v60 = vadd.f32 %v289_v53, %v757_v57  ;;  %v311_v61 = vmul.f32 %v757_v57, %v757_v57  ;;  %v252_v62 = vpop.f32.mrb[11].mxu0  ;;  %v284_v63 = vpop.f32.mrb[11].mxu1  ;;  %v319_v31 = vmul.f32 %v282_v58, %v282_v58 }
 0x111   :  { %v324_v0 = vadd.f32 %v323_v59, %v311_v61 }
 0x114   :  { %v762_v1 = vpop.f32.mrb[12].mxu0 }
 0x115   :  { %v291_v2 = vadd.f32 %v290_v60, %v762_v1  ;;  %v312_v3 = vmul.f32 %v762_v1, %v762_v1  ;;  %v257_v4 = vpop.f32.mrb[13].mxu0  ;;  %v343_v60 = vld [vmem:[%s823_s2] sm:$0x1] }
 0x116   :  { %v258_v5 = vpop.f32.mrb[14].mxu0 }
 0x117   :  { %v325_v6 = vadd.f32 %v324_v0, %v312_v3  ;;  %v292_v7 = vadd.f32 %v291_v2, %v258_v5  ;;  %v313_v8 = vmul.f32 %v258_v5, %v258_v5  ;;  %v260_v9 = vpop.f32.mrb[15].mxu0  ;;  %v347_v0 = vld [vmem:[%s824_s3] sm:$0x1] }
 0x119   :  { %v293_v11 = vadd.f32 %v292_v7, %v724_v26  ;;  %v326_v12 = vadd.f32 %v325_v6, %v313_v8 }
 0x11b   :  { %v327_v14 = vadd.f32 %v326_v12, %v314_v10  ;;  %v294_v15 = vadd.f32 %v293_v11, %v728_v30 }
 0x11d   :  { %v295_v17 = vadd.f32 %v294_v15, %v738_v38  ;;  %v328_v18 = vadd.f32 %v327_v14, %v315_v13 }
 0x11f   :  { %v296_v19 = vadd.f32 %v295_v17, %v745_v44  ;;  %v329_v21 = vadd.f32 %v328_v18, %v316_v16 }
 0x121   :  { %v330_v23 = vadd.f32 %v329_v21, %v317_v20  ;;  %v297_v24 = vadd.f32 %v296_v19, %v752_v52 }
 0x123   :  { %v331_v27 = vadd.f32 %v330_v23, %v318_v22  ;;  %v298_v28 = vadd.f32 %v297_v24, %v282_v58  ;;  %v351_v58 = vlaneseq }
 0x125   :  { %v299_v32 = vrot.slane %v298_v28, 4  ;;  %v332_v33 = vadd.f32 %v331_v27, %v319_v31  ;;  %v352_v59 = vshrl.u32 %v351_v58, 7 }
 0x127   :  { %v300_v34 = vadd.f32 %v299_v32, %v298_v28  ;;  %v333_v35 = vrot.slane %v332_v33, 4  ;;  %v353_v61 = vsub.s32 0, %v352_v59 }
 0x129   :  { %v301_v36 = vrot.slane %v300_v34, 2  ;;  %v334_v39 = vadd.f32 %v333_v35, %v332_v33 }
 0x12b   :  { %v302_v40 = vadd.f32 %v301_v36, %v300_v34  ;;  %v335_v41 = vrot.slane %v334_v39, 2 }
 0x12d   :  { %v303_v42 = vrot.slane %v302_v40, 1  ;;  %v336_v45 = vadd.f32 %v335_v41, %v334_v39 }
 0x12f   :  { %v304_v46 = vadd.f32 %v303_v42, %v302_v40  ;;  %v337_v47 = vrot.slane %v336_v45, 1 }
 0x131   :  { %v305_v48 = vmul.f32 0.010204081, %v304_v46  ;;  %v338_v49 = vadd.f32 %v337_v47, %v336_v45 }
 0x133   :  { %v339_v50 = vmul.f32 0.010204081, %v338_v49  ;;  %v340_v53 = vmul.f32 %v305_v48, %v305_v48 }
 0x135   :  { %v341_v54 = vsub.f32 %v339_v50, %v340_v53 }
 0x137   :  { %v342_v55 = vmax.f32 %v341_v54, 0.0 }
 0x139   :  { %v344_v56 = vadd.f32 1e-05, %v342_v55 }
 0x13b   :  { %615 = vrsqrt.f32 %v344_v56 }
 0x145   :  { %v616_v62 = vpop.eup %615 }
 0x146   :  { %v346_v63 = vmul.f32 %v616_v62, %v343_v60 }
 0x148   :  { %v348_v2 = vmul.f32 %v346_v63, %v305_v48  ;;  %v354_v3 = vrot.slane %v346_v63, %v353_v61 }
 0x14a   :  { %v349_v4 = vsub.f32 %v347_v0, %v348_v2  ;;  %v356_v6 = vmul.f32 %v354_v3, %v722_v25  ;;  %v357_v7 = vmul.f32 %v354_v3, %v726_v29  ;;  %v358_v8 = vmul.f32 %v354_v3, %v736_v37 }
 0x14b   :  { %v359_v9 = vmul.f32 %v354_v3, %v743_v43  ;;  %v360_v10 = vmul.f32 %v354_v3, %v750_v51  ;;  %v361_v11 = vmul.f32 %v354_v3, %v757_v57  ;;  %v362_v12 = vmul.f32 %v354_v3, %v762_v1 }
 0x14c   :  { %v363_v13 = vmul.f32 %v354_v3, %v258_v5  ;;  %v364_v14 = vmul.f32 %v354_v3, %v724_v26  ;;  %v365_v15 = vmul.f32 %v354_v3, %v728_v30  ;;  %v366_v16 = vmul.f32 %v354_v3, %v738_v38 }
 0x14d   :  { %v367_v25 = vmul.f32 %v354_v3, %v745_v44  ;;  %v368_v29 = vmul.f32 %v354_v3, %v752_v52  ;;  %v373_v37 = vrot.slane %v349_v4, %v353_v61 }
 0x14f   :  { %v375_v17 = vadd.f32 %v373_v37, %v356_v6  ;;  %v376_v43 = vadd.f32 %v373_v37, %v357_v7  ;;  %v377_v18 = vadd.f32 %v373_v37, %v358_v8  ;;  %v378_v51 = vadd.f32 %v373_v37, %v359_v9 }
 0x150   :  { %v379_v19 = vadd.f32 %v373_v37, %v360_v10  ;;  %v380_v57 = vadd.f32 %v373_v37, %v361_v11  ;;  %v381_v20 = vadd.f32 %v373_v37, %v362_v12  ;;  %v382_v1 = vadd.f32 %v373_v37, %v363_v13 }
 0x151   :  { %v383_v5 = vadd.f32 %v373_v37, %v364_v14  ;;  %v384_v21 = vadd.f32 %v373_v37, %v365_v15  ;;  %v385_v26 = vadd.f32 %v373_v37, %v366_v16  ;;  %v386_v22 = vadd.f32 %v373_v37, %v367_v25 }
 0x152   :  { %v387_v30 = vadd.f32 %v373_v37, %v368_v29  ;;  %v388_v23 = vmax.f32 %v375_v17, 0.0  ;;  %v389_v38 = vmax.f32 %v376_v43, 0.0  ;;  %v390_v24 = vmax.f32 %v377_v18, 0.0 }
 0x153   :  { %v391_v44 = vmax.f32 %v378_v51, 0.0  ;;  %v392_v27 = vmax.f32 %v379_v19, 0.0  ;;  %v393_v52 = vmax.f32 %v380_v57, 0.0  ;;  %v394_v28 = vmax.f32 %v381_v20, 0.0 }
 0x154   :  { %v395_v31 = vmax.f32 %v382_v1, 0.0  ;;  %v396_v32 = vmax.f32 %v383_v5, 0.0  ;;  %v397_v33 = vmax.f32 %v384_v21, 0.0  ;;  %v398_v34 = vmax.f32 %v385_v26, 0.0 }
 0x155   :  { %v399_v35 = vmax.f32 %v386_v22, 0.0  ;;  %v400_v36 = vmax.f32 %v387_v30, 0.0  ;;  %v531_v39 = vpack.c.bf16 %v389_v38, %v388_v23  ;;  %v536_v40 = vpack.c.bf16 %v391_v44, %v390_v24 }
 0x156   :  { %v541_v41 = vpack.c.bf16 %v393_v52, %v392_v27  ;;  %v546_v42 = vpack.c.bf16 %v395_v31, %v394_v28  ;;  %v551_v45 = vpack.c.bf16 %v397_v33, %v396_v32 }
 0x157   :  { %v527_v46 = vpack.c.bf16 %v400_v36, %v400_v36  ;;  %532 = vst [vmem:[%s825_s4] sm:$0xff] %v531_v39   ;;  %558 = vst [vmem:[%s825_s4 + $0x8] sm:$0xff] %v536_v40   ;;  %v556_v47 = vpack.c.bf16 %v399_v35, %v398_v34 }
 0x158   :  { %559 = vst [vmem:[%s825_s4 + $0x10] sm:$0xff] %v541_v41   ;;  %560 = vst [vmem:[%s825_s4 + $0x18] sm:$0xff] %v546_v42  }
 0x159   :  { %561 = vst [vmem:[%s825_s4 + $0x20] sm:$0xff] %v551_v45   ;;  %562 = vst [vmem:[%s825_s4 + $0x28] sm:$0xff] %v556_v47  }
 0x15a   :  { %466 = vst [vmem:[%s825_s4 + $0x30] sm:$0x1] %v527_v46 }

// kernel: stem_forward.13
= control target key start
LH: loop header
LB: loop body
LE: loop exit
PB: predicated region body
PF: predicated region fallthrough
CT: control target
= control target key end

     0   :  { %v1363_v34 = vmov 0.0   ;;  %vm1364_vm0 = vmmov 0   ;;  %vm523_vm1 = vcmask 523264   ;;  %vm980_vm2 = vcmask 781312   ;;  %s1786_s1 = inlined_call_operand.vmem [shape: bf16[576,128], index: 1, kind: input, shape index: {}]   ;;  %s1787_s0 = inlined_call_operand.vmem [shape: bf16[112,576], index: 0, kind: input, shape index: {}]   ;;  %s1788_s2 = inlined_call_operand.vmem [shape: f32[1,128], index: 2, kind: input, shape index: {}]   ;;  %s1789_s3 = inlined_call_operand.vmem [shape: f32[1,128], index: 3, kind: input, shape index: {}]   ;;  %s1790_s4 = inlined_call_operand.vmem [shape: bf16[98,96], index: 4, kind: output, shape index: {}]  }
   0x1   :  { %v1276_v0 = vld [vmem:[%s1786_s1 + $0x40] sm:$0xff]   ;;  %v1280_v4 = vld [vmem:[%s1786_s1 + $0x48] sm:$0xff]   ;;  %v1284_v8 = vld [vmem:[%s1786_s1 + $0x50] sm:$0xff]   ;;  %vm993_vm3 = vcmask 778240  }
   0x2   :  { %v1277_v1 = vld [vmem:[%s1786_s1 + $0xc0] sm:$0xff]   ;;  %1103 = vmatprep.subr.bf16.mxu0 %v1276_v0  ;;  %v1281_v5 = vld [vmem:[%s1786_s1 + $0xc8] sm:$0xff]   ;;  %v1285_v9 = vld [vmem:[%s1786_s1 + $0xd0] sm:$0xff]  }
   0x3   :  { %v1278_v2 = vld [vmem:[%s1786_s1] sm:$0xff]   ;;  %1161 = vmatprep.subr.bf16.mxu1 %v1277_v1  ;;  %v1282_v6 = vld [vmem:[%s1786_s1 + $0x8] sm:$0xff]   ;;  %v1286_v10 = vld [vmem:[%s1786_s1 + $0x10] sm:$0xff]  }
   0x4   :  { %v1279_v3 = vld [vmem:[%s1786_s1 + $0x80] sm:$0xff]   ;;  %1104 = vmatpush3.bf16.msra.mxu0 %v1278_v2  ;;  %v1283_v7 = vld [vmem:[%s1786_s1 + $0x88] sm:$0xff]   ;;  %v1287_v11 = vld [vmem:[%s1786_s1 + $0x90] sm:$0xff]  }
   0x5   :  { %1162 = vmatpush3.bf16.msra.mxu1 %v1279_v3  ;;  %1105 = vmatprep.subr.bf16.mxu0 %v1280_v4  ;;  %v1288_v12 = vld [vmem:[%s1786_s1 + $0x58] sm:$0xff]   ;;  %v1292_v16 = vld [vmem:[%s1786_s1 + $0x60] sm:$0xff]   ;;  %v1296_v20 = vld [vmem:[%s1786_s1 + $0x68] sm:$0xff]  }
   0x6   :  { %1163 = vmatprep.subr.bf16.mxu1 %v1281_v5  ;;  %v1289_v13 = vld [vmem:[%s1786_s1 + $0xd8] sm:$0xff]   ;;  %v1293_v17 = vld [vmem:[%s1786_s1 + $0xe0] sm:$0xff]   ;;  %v1297_v21 = vld [vmem:[%s1786_s1 + $0xe8] sm:$0xff]  }
   0x7   :  { %v1290_v14 = vld [vmem:[%s1786_s1 + $0x18] sm:$0xff]   ;;  %v1294_v18 = vld [vmem:[%s1786_s1 + $0x20] sm:$0xff]   ;;  %v1298_v22 = vld [vmem:[%s1786_s1 + $0x28] sm:$0xff]  }
   0x8   :  { %1106 = vmatpush3.bf16.msra.mxu0 %v1282_v6  ;;  %v1291_v15 = vld [vmem:[%s1786_s1 + $0x98] sm:$0xff]   ;;  %v1295_v19 = vld [vmem:[%s1786_s1 + $0xa0] sm:$0xff]   ;;  %v1299_v23 = vld [vmem:[%s1786_s1 + $0xa8] sm:$0xff]  }
   0x9   :  { %1164 = vmatpush3.bf16.msra.mxu1 %v1283_v7  ;;  %1107 = vmatprep.subr.bf16.mxu0 %v1284_v8  ;;  %v1300_v24 = vld [vmem:[%s1786_s1 + $0x70] sm:$0xff]   ;;  %v1304_v28 = vld [vmem:[%s1786_s1 + $0x78] sm:$0xff]   ;;  %v1313_v36 = vld [vmem:[%s1787_s0 + $0xc] ss:$20 sps:$4 sm:$0xff]  }
   0xa   :  { %1165 = vmatprep.subr.bf16.mxu1 %v1285_v9  ;;  %v1301_v25 = vld [vmem:[%s1786_s1 + $0xf0] sm:$0xff]   ;;  %v1305_v29 = vld [vmem:[%s1786_s1 + $0xf8] sm:$0xff]   ;;  %v1314_v37 = vld [vmem:[%s1786_s1 + $0x100] sm:$0xff]   ;;  %666 = vmatprep.mubr.bf16.mxu1 %v1313_v36 }
   0xb   :  { %v1302_v26 = vld [vmem:[%s1786_s1 + $0x30] sm:$0xff]   ;;  %v1306_v30 = vld [vmem:[%s1786_s1 + $0x38] sm:$0xff]   ;;  %v1315_v38 = vld [vmem:[%s1787_s0 + $0x2c] ss:$20 sps:$4 sm:$0xff]  }
   0xc   :  { %1108 = vmatpush3.bf16.msra.mxu0 %v1286_v10  ;;  %v1303_v27 = vld [vmem:[%s1786_s1 + $0xb0] sm:$0xff]   ;;  %v1307_v31 = vld [vmem:[%s1786_s1 + $0xb8] sm:$0xff]   ;;  %v1325_v43 = vld [vmem:[%s1786_s1 + $0x108] sm:$0xff]  }
   0xd   :  { %1166 = vmatpush3.bf16.msra.mxu1 %v1287_v11  ;;  %1109 = vmatprep.subr.bf16.mxu0 %v1288_v12  ;;  %v1308_v32 = vld [vmem:[%s1787_s0] ss:$20 sps:$4 sm:$0xff]   ;;  %v1310_v33 = vld [vmem:[%s1787_s0 + $0x4] ss:$20 sps:$4 sm:$0xff]   ;;  %v1311_v35 = vld [vmem:[%s1787_s0 + $0x8] ss:$20 sps:$4 sm:$0xff]  }
   0xe   :  { %1167 = vmatprep.subr.bf16.mxu1 %v1289_v13  ;;  %577 = vmatprep.mubr.bf16.mxu0 %v1310_v33  ;;  %v1317_v39 = vld [vmem:[%s1787_s0 + $0x34] ss:$20 sps:$4 sm:$0xff]   ;;  %v1320_v41 = vld [vmem:[%s1787_s0 + $0x30] ss:$20 sps:$4 sm:$0xff]   ;;  %v1327_v47 = vld [vmem:[%s1787_s0 + $0x58] ss:$20 sps:$4 sm:$0xff]  }
   0xf   :  { %v1319_v40 = vld [vmem:[%s1787_s0 + $0x28] ss:$20 sps:$4 sm:$0xff]   ;;  %v1334_v45 = vld [vmem:[%s1786_s1 + $0x110] sm:$0xff]   ;;  %v1330_v49 = vld [vmem:[%s1787_s0 + $0x84] ss:$20 sps:$4 sm:$0xff]  }
  0x10   :  { %1110 = vmatpush3.bf16.msra.mxu0 %v1290_v14  ;;  %v1321_v42 = vld [vmem:[%s1787_s0 + $0x54] ss:$20 sps:$4 sm:$0xff]   ;;  %v1323_v44 = vld [vmem:[%s1787_s0 + $0x5c] ss:$20 sps:$4 sm:$0xff]   ;;  %v1332_v51 = vld [vmem:[%s1787_s0 + $0x78] ss:$20 sps:$4 sm:$0xff]  }
  0x11   :  { %1168 = vmatpush3.bf16.msra.mxu1 %v1291_v15  ;;  %1111 = vmatprep.subr.bf16.mxu0 %v1292_v16  ;;  %v1326_v46 = vld [vmem:[%s1787_s0 + $0x50] ss:$20 sps:$4 sm:$0xff]   ;;  %v1347_v50 = vld [vmem:[%s1786_s1 + $0x118] sm:$0xff]   ;;  %v1333_v52 = vld [vmem:[%s1787_s0 + $0x80] ss:$20 sps:$4 sm:$0xff]  }
  0x12   :  { %1169 = vmatprep.subr.bf16.mxu1 %v1293_v17  ;;  %v1328_v48 = vld [vmem:[%s1787_s0 + $0x7c] ss:$20 sps:$4 sm:$0xff]   ;;  %v1335_v53 = vld [vmem:[%s1787_s0 + $0xa4] ss:$20 sps:$4 sm:$0xff]   ;;  %v1337_v54 = vld [vmem:[%s1787_s0 + $0xac] ss:$20 sps:$4 sm:$0xff]  }
  0x13   :  { %v1339_v55 = vld [vmem:[%s1787_s0 + $0xa0] ss:$20 sps:$4 sm:$0xff]   ;;  %v1340_v56 = vld [vmem:[%s1787_s0 + $0xa8] ss:$20 sps:$4 sm:$0xff]   ;;  %v1346_v60 = vld [vmem:[%s1787_s0 + $0xd0] ss:$20 sps:$4 sm:$0xff]  }
  0x14   :  { %1112 = vmatpush3.bf16.msra.mxu0 %v1294_v18  ;;  %v1341_v57 = vld [vmem:[%s1787_s0 + $0xcc] ss:$20 sps:$4 sm:$0xff]   ;;  %v1343_v58 = vld [vmem:[%s1787_s0 + $0xd4] ss:$20 sps:$4 sm:$0xff]   ;;  %v1350_v62 = vld [vmem:[%s1787_s0 + $0xfc] ss:$20 sps:$4 sm:$0xff]  }
  0x15   :  { %1170 = vmatpush3.bf16.msra.mxu1 %v1295_v19  ;;  %1113 = vmatprep.subr.bf16.mxu0 %v1296_v20  ;;  %v1345_v59 = vld [vmem:[%s1787_s0 + $0xc8] ss:$20 sps:$4 sm:$0xff]   ;;  %v1352_v63 = vld [vmem:[%s1787_s0 + $0xf0] ss:$20 sps:$4 sm:$0xff]   ;;  %v1353_v0 = vld [vmem:[%s1787_s0 + $0xf8] ss:$20 sps:$4 sm:$0xff]  }
  0x16   :  { %1171 = vmatprep.subr.bf16.mxu1 %v1297_v21  ;;  %v1348_v61 = vld [vmem:[%s1787_s0 + $0xf4] ss:$20 sps:$4 sm:$0xff]   ;;  %v1354_v1 = vld [vmem:[%s1787_s0 + $0x10] ss:$20 sps:$4 sm:$0xff]   ;;  %v1356_v3 = vld [vmem:[%s1787_s0 + $0x38] ss:$20 sps:$4 sm:$0xff]  }
  0x17   :  { %v1355_v2 = vld [vmem:[%s1787_s0 + $0xb0] ss:$20 sps:$4 sm:$0xff]   ;;  %v1357_v4 = vld [vmem:[%s1787_s0 + $0xd8] ss:$20 sps:$4 sm:$0xff]   ;;  %v1358_v5 = vld [vmem:[%s1787_s0 + $0x60] ss:$20 sps:$4 sm:$0xff]  }
  0x18   :  { %1114 = vmatpush3.bf16.msra.mxu0 %v1298_v22  ;;  %v1359_v6 = vld [vmem:[%s1787_s0 + $0x100] ss:$20 sps:$4 sm:$0xff]   ;;  %v1360_v7 = vld [vmem:[%s1787_s0 + $0x88] ss:$20 sps:$4 sm:$0xff]  }
  0x19   :  { %1172 = vmatpush3.bf16.msra.mxu1 %v1299_v23  ;;  %1115 = vmatprep.subr.bf16.mxu0 %v1300_v24 }
  0x1a   :  { %1173 = vmatprep.subr.bf16.mxu1 %v1301_v25 }
  0x1c   :  { %1116 = vmatpush3.bf16.msra.mxu0 %v1302_v26 }
  0x1d   :  { %1174 = vmatpush3.bf16.msra.mxu1 %v1303_v27  ;;  %1117 = vmatprep.subr.bf16.mxu0 %v1304_v28 }
  0x1e   :  { %1175 = vmatprep.subr.bf16.mxu1 %v1305_v29 }
  0x20   :  { %1118 = vmatpush3.bf16.msra.mxu0 %v1306_v30 }
  0x21   :  { %1176 = vmatpush3.bf16.msra.mxu1 %v1307_v31  ;;  %1230 = vmatprep.subr.bf16.mxu0 %v1363_v34 }
  0x22   :  { %1266 = vmatprep.subr.bf16.mxu1 %v1363_v34 }
  0x23   :  { %578 = vmatmul.mubr.bf16.vlgmr.msra.gmra.mrb[0].mxu0 %v1308_v32 }
  0x24   :  { %667 = vmatmul.mubr.bf16.vlgmr.msra.gmra.mrb[0].mxu1 %v1311_v35  ;;  %1231 = vmatpush3.bf16.msra.mxu0 %v1314_v37 }
  0x25   :  { %585 = vmatprep.mubr.bf16.mxu0 %v1315_v38  ;;  %1232 = vmatprep.subr.bf16.mxu0 %v1363_v34 }
  0x26   :  { %674 = vmatprep.mubr.bf16.mxu1 %v1317_v39  ;;  %1270 = vmatpush3.bf16.msra.mxu1 %v1314_v37 }
  0x27   :  { %1267 = vmatprep.subr.bf16.mxu1 %v1363_v34 }
  0x28   :  { %1233 = vmatpush3.bf16.msra.mxu0 %v1325_v43 }
  0x29   :  { %1234 = vmatprep.subr.bf16.mxu0 %v1363_v34 }
  0x2a   :  { %1271 = vmatpush3.bf16.msra.mxu1 %v1325_v43 }
  0x2b   :  { %586 = vmatmul.mubr.bf16.gmra.mrb[4].mxu0 %v1319_v40  ;;  %1268 = vmatprep.subr.bf16.mxu1 %v1363_v34 }
  0x2c   :  { %675 = vmatmul.mubr.bf16.gmra.mrb[4].mxu1 %v1320_v41  ;;  %593 = vmatprep.mubr.bf16.mxu0 %v1321_v42 }
  0x2d   :  { %682 = vmatprep.mubr.bf16.mxu1 %v1323_v44  ;;  %1235 = vmatpush3.bf16.msra.mxu0 %v1334_v45 }
  0x2e   :  { %1272 = vmatpush3.bf16.msra.mxu1 %v1334_v45  ;;  %1236 = vmatprep.subr.bf16.mxu0 %v1363_v34 }
  0x2f   :  { %1269 = vmatprep.subr.bf16.mxu1 %v1363_v34 }
  0x31   :  { %1237 = vmatpush3.bf16.msra.mxu0 %v1347_v50 }
  0x32   :  { %1273 = vmatpush3.bf16.msra.mxu1 %v1347_v50 }
  0x33   :  { %594 = vmatmul.mubr.bf16.gmra.mrb[8].mxu0 %v1326_v46 }
  0x34   :  { %683 = vmatmul.mubr.bf16.gmra.mrb[8].mxu1 %v1327_v47  ;;  %601 = vmatprep.mubr.bf16.mxu0 %v1328_v48 }
  0x35   :  { %690 = vmatprep.mubr.bf16.mxu1 %v1330_v49 }
  0x3b   :  { %602 = vmatmul.mubr.bf16.gmra.mrb[12].mxu0 %v1332_v51 }
  0x3c   :  { %691 = vmatmul.mubr.bf16.gmra.mrb[12].mxu1 %v1333_v52  ;;  %609 = vmatprep.mubr.bf16.mxu0 %v1335_v53 }
  0x3d   :  { %698 = vmatprep.mubr.bf16.mxu1 %v1337_v54 }
  0x43   :  { %610 = vmatmul.mubr.bf16.gmra.mrb[16].mxu0 %v1339_v55 }
  0x44   :  { %699 = vmatmul.mubr.bf16.gmra.mrb[16].mxu1 %v1340_v56  ;;  %617 = vmatprep.mubr.bf16.mxu0 %v1341_v57 }
  0x45   :  { %706 = vmatprep.mubr.bf16.mxu1 %v1343_v58 }
  0x4b   :  { %618 = vmatmul.mubr.bf16.gmra.mrb[20].mxu0 %v1345_v59 }
  0x4c   :  { %707 = vmatmul.mubr.bf16.gmra.mrb[20].mxu1 %v1346_v60  ;;  %625 = vmatprep.mubr.bf16.mxu0 %v1348_v61 }
  0x4d   :  { %714 = vmatprep.mubr.bf16.mxu1 %v1350_v62 }
  0x53   :  { %626 = vmatmul.mubr.bf16.gmra.mrb[24].mxu0 %v1352_v63 }
  0x54   :  { %715 = vmatmul.mubr.bf16.gmra.mrb[24].mxu1 %v1353_v0  ;;  %1238 = vmatprep.mubr.msk.bf16.mxu0 %vm1364_vm0, %v1363_v34 }
  0x55   :  { %1254 = vmatprep.mubr.msk.bf16.mxu1 %vm1364_vm0, %v1363_v34 }
  0x5b   :  { %1239 = vmatmul.mubr.msk.bf16.vlgmr.msra.gmra.mrb[28].mxu0 %vm523_vm1, %v1354_v1 }
  0x5c   :  { %1255 = vmatmul.mubr.msk.bf16.vlgmr.msra.gmra.mrb[28].mxu1 %vm523_vm1, %v1355_v2  ;;  %1242 = vmatprep.mubr.msk.bf16.mxu0 %vm1364_vm0, %v1363_v34 }
  0x5d   :  { %1258 = vmatprep.mubr.msk.bf16.mxu1 %vm1364_vm0, %v1363_v34 }
  0x63   :  { %1243 = vmatmul.mubr.msk.bf16.gmra.mrb[32].mxu0 %vm523_vm1, %v1356_v3 }
  0x64   :  { %1259 = vmatmul.mubr.msk.bf16.gmra.mrb[32].mxu1 %vm523_vm1, %v1357_v4  ;;  %1246 = vmatprep.mubr.msk.bf16.mxu0 %vm1364_vm0, %v1363_v34 }
  0x65   :  { %1262 = vmatprep.mubr.msk.bf16.mxu1 %vm1364_vm0, %v1363_v34 }
  0x6b   :  { %1247 = vmatmul.mubr.msk.bf16.gmra.mrb[36].mxu0 %vm523_vm1, %v1358_v5 }
  0x6c   :  { %1263 = vmatmul.mubr.msk.bf16.gmra.mrb[36].mxu1 %vm523_vm1, %v1359_v6  ;;  %1250 = vmatprep.mubr.msk.bf16.mxu0 %vm1364_vm0, %v1363_v34 }
  0x73   :  { %1251 = vmatmul.mubr.msk.bf16.gmra.mrb[40].mxu0 %vm523_vm1, %v1360_v7 }
  0xf6   :  { %v1119_v8 = vpop.f32.mrb[0].mxu0 }
  0xf7   :  { %v1177_v9 = vpop.f32.mrb[0].mxu1  ;;  %v1120_v10 = vpop.f32.mrb[1].mxu0 }
  0xf8   :  { %v1121_v11 = vadd.f32 %v1120_v10, %v1119_v8  ;;  %v1178_v12 = vpop.f32.mrb[1].mxu1  ;;  %v1122_v13 = vpop.f32.mrb[2].mxu0 }
  0xf9   :  { %v1179_v14 = vadd.f32 %v1178_v12, %v1177_v9  ;;  %v1180_v15 = vpop.f32.mrb[2].mxu1  ;;  %v1123_v16 = vpop.f32.mrb[3].mxu0 }
  0xfa   :  { %v1124_v17 = vadd.f32 %v1123_v16, %v1122_v13  ;;  %v1181_v18 = vpop.f32.mrb[3].mxu1 }
  0xfb   :  { %v1182_v19 = vadd.f32 %v1181_v18, %v1180_v15  ;;  %v1632_v20 = vadd.f32 %v1179_v14, %v1121_v11 }
  0xfd   :  { %v1634_v21 = vadd.f32 %v1182_v19, %v1124_v17 }
  0xfe   :  { %v1125_v22 = vpop.f32.mrb[4].mxu0 }
  0xff   :  { %v1183_v23 = vpop.f32.mrb[4].mxu1  ;;  %v1126_v24 = vpop.f32.mrb[5].mxu0 }
 0x100   :  { %v1127_v25 = vadd.f32 %v1126_v24, %v1125_v22  ;;  %v1184_v26 = vpop.f32.mrb[5].mxu1  ;;  %v1128_v27 = vpop.f32.mrb[6].mxu0 }
 0x101   :  { %v1185_v28 = vadd.f32 %v1184_v26, %v1183_v23  ;;  %v1186_v29 = vpop.f32.mrb[6].mxu1  ;;  %v1129_v30 = vpop.f32.mrb[7].mxu0 }
 0x102   :  { %v1130_v31 = vadd.f32 %v1129_v30, %v1128_v27  ;;  %v1187_v32 = vpop.f32.mrb[7].mxu1 }
 0x103   :  { %v1188_v33 = vadd.f32 %v1187_v32, %v1186_v29  ;;  %v1636_v34 = vadd.f32 %v1185_v28, %v1127_v25 }
 0x105   :  { %v1638_v35 = vadd.f32 %v1188_v33, %v1130_v31 }
 0x106   :  { %v1131_v36 = vpop.f32.mrb[8].mxu0 }
 0x107   :  { %v1189_v37 = vpop.f32.mrb[8].mxu1  ;;  %v1132_v38 = vpop.f32.mrb[9].mxu0 }
 0x108   :  { %v1133_v39 = vadd.f32 %v1132_v38, %v1131_v36  ;;  %v1190_v40 = vpop.f32.mrb[9].mxu1  ;;  %v1134_v41 = vpop.f32.mrb[10].mxu0 }
 0x109   :  { %v1191_v42 = vadd.f32 %v1190_v40, %v1189_v37  ;;  %v1192_v43 = vpop.f32.mrb[10].mxu1  ;;  %v1135_v44 = vpop.f32.mrb[11].mxu0 }
 0x10a   :  { %v1136_v45 = vadd.f32 %v1135_v44, %v1134_v41  ;;  %v1193_v46 = vpop.f32.mrb[11].mxu1 }
 0x10b   :  { %v1194_v47 = vadd.f32 %v1193_v46, %v1192_v43  ;;  %v1640_v48 = vadd.f32 %v1191_v42, %v1133_v39 }
 0x10d   :  { %v1642_v49 = vadd.f32 %v1194_v47, %v1136_v45 }
 0x10e   :  { %v1137_v50 = vpop.f32.mrb[12].mxu0 }
 0x10f   :  { %v1195_v51 = vpop.f32.mrb[12].mxu1  ;;  %v1138_v52 = vpop.f32.mrb[13].mxu0 }
 0x110   :  { %v1139_v53 = vadd.f32 %v1138_v52, %v1137_v50  ;;  %v1196_v54 = vpop.f32.mrb[13].mxu1  ;;  %v1140_v55 = vpop.f32.mrb[14].mxu0 }
 0x111   :  { %v1197_v56 = vadd.f32 %v1196_v54, %v1195_v51  ;;  %v1198_v57 = vpop.f32.mrb[14].mxu1  ;;  %v1141_v58 = vpop.f32.mrb[15].mxu0 }
 0x112   :  { %v1142_v59 = vadd.f32 %v1141_v58, %v1140_v55  ;;  %v1199_v60 = vpop.f32.mrb[15].mxu1 }
 0x113   :  { %v1200_v61 = vadd.f32 %v1199_v60, %v1198_v57  ;;  %v1644_v62 = vadd.f32 %v1197_v56, %v1139_v53 }
 0x115   :  { %v1646_v63 = vadd.f32 %v1200_v61, %v1142_v59 }
 0x116   :  { %v1143_v0 = vpop.f32.mrb[16].mxu0 }
 0x117   :  { %v1201_v1 = vpop.f32.mrb[16].mxu1  ;;  %v1144_v2 = vpop.f32.mrb[17].mxu0 }
 0x118   :  { %v1145_v3 = vadd.f32 %v1144_v2, %v1143_v0  ;;  %v1202_v4 = vpop.f32.mrb[17].mxu1  ;;  %v1146_v5 = vpop.f32.mrb[18].mxu0 }
 0x119   :  { %v1203_v6 = vadd.f32 %v1202_v4, %v1201_v1  ;;  %v1204_v7 = vpop.f32.mrb[18].mxu1  ;;  %v1147_v8 = vpop.f32.mrb[19].mxu0 }
 0x11a   :  { %v1148_v9 = vadd.f32 %v1147_v8, %v1146_v5  ;;  %v1205_v10 = vpop.f32.mrb[19].mxu1 }
 0x11b   :  { %v1206_v11 = vadd.f32 %v1205_v10, %v1204_v7  ;;  %v701_v12 = vadd.f32 %v1203_v6, %v1145_v3 }
 0x11d   :  { %v704_v13 = vadd.f32 %v1206_v11, %v1148_v9 }
 0x11e   :  { %v1149_v14 = vpop.f32.mrb[20].mxu0 }
 0x11f   :  { %v1207_v15 = vpop.f32.mrb[20].mxu1  ;;  %v1150_v16 = vpop.f32.mrb[21].mxu0 }
 0x120   :  { %v1151_v17 = vadd.f32 %v1150_v16, %v1149_v14  ;;  %v1208_v18 = vpop.f32.mrb[21].mxu1  ;;  %v1152_v19 = vpop.f32.mrb[22].mxu0 }
 0x121   :  { %v1209_v22 = vadd.f32 %v1208_v18, %v1207_v15  ;;  %v1210_v23 = vpop.f32.mrb[22].mxu1  ;;  %v1153_v24 = vpop.f32.mrb[23].mxu0 }
 0x122   :  { %v1154_v25 = vadd.f32 %v1153_v24, %v1152_v19  ;;  %v1211_v26 = vpop.f32.mrb[23].mxu1 }
 0x123   :  { %v1212_v27 = vadd.f32 %v1211_v26, %v1210_v23  ;;  %v709_v28 = vadd.f32 %v1209_v22, %v1151_v17 }
 0x125   :  { %v712_v29 = vadd.f32 %v1212_v27, %v1154_v25 }
 0x126   :  { %v1155_v30 = vpop.f32.mrb[24].mxu0 }
 0x127   :  { %v1213_v31 = vpop.f32.mrb[24].mxu1  ;;  %v1156_v32 = vpop.f32.mrb[25].mxu0 }
 0x128   :  { %v1157_v33 = vadd.f32 %v1156_v32, %v1155_v30  ;;  %v1214_v36 = vpop.f32.mrb[25].mxu1  ;;  %v1158_v37 = vpop.f32.mrb[26].mxu0 }
 0x129   :  { %v1215_v38 = vadd.f32 %v1214_v36, %v1213_v31  ;;  %v1216_v39 = vpop.f32.mrb[26].mxu1  ;;  %v1159_v40 = vpop.f32.mrb[27].mxu0 }
 0x12a   :  { %v1160_v41 = vadd.f32 %v1159_v40, %v1158_v37  ;;  %v1217_v42 = vpop.f32.mrb[27].mxu1 }
 0x12b   :  { %v1218_v43 = vadd.f32 %v1217_v42, %v1216_v39  ;;  %v717_v44 = vadd.f32 %v1215_v38, %v1157_v33 }
 0x12d   :  { %v720_v45 = vadd.f32 %v1218_v43, %v1160_v41 }
 0x12e   :  { %v757_v46 = vpop.f32.mrb[28].mxu0 }
 0x12f   :  { %v1649_v47 = vadd.f32 %v757_v46, %v1632_v20  ;;  %v789_v50 = vpop.f32.mrb[28].mxu1  ;;  %v1240_v51 = vpop.f32.mrb[29].mxu0 }
 0x130   :  { %v1651_v52 = vadd.f32 %v789_v50, %v701_v12  ;;  %v1256_v53 = vpop.f32.mrb[29].mxu1  ;;  %v760_v54 = vpop.f32.mrb[30].mxu0 }
 0x131   :  { %v1654_v55 = vadd.f32 %v760_v54, %v1634_v21  ;;  %v792_v56 = vpop.f32.mrb[30].mxu1  ;;  %v1241_v57 = vpop.f32.mrb[31].mxu0  ;;  %v832_v20 = vmul.f32 %v1649_v47, %v1649_v47 }
 0x132   :  { %v1656_v58 = vadd.f32 %v792_v56, %v704_v13  ;;  %v1257_v59 = vpop.f32.mrb[31].mxu1  ;;  %v840_v50 = vmul.f32 %v1651_v52, %v1651_v52 }
 0x133   :  { %v833_v60 = vmul.f32 %v1654_v55, %v1654_v55  ;;  %v812_v0 = vadd.f32 %v1654_v55, %v1649_v47 }
 0x134   :  { %v841_v53 = vmul.f32 %v1656_v58, %v1656_v58 }
 0x135   :  { %v846_v6 = vadd.f32 %v833_v60, %v832_v20 }
 0x136   :  { %v765_v61 = vpop.f32.mrb[32].mxu0 }
 0x137   :  { %v1665_v1 = vadd.f32 %v765_v61, %v1636_v34  ;;  %v797_v21 = vpop.f32.mrb[32].mxu1  ;;  %v1244_v2 = vpop.f32.mrb[33].mxu0 }
 0x138   :  { %v1667_v3 = vadd.f32 %v797_v21, %v709_v28  ;;  %v1260_v4 = vpop.f32.mrb[33].mxu1  ;;  %v768_v5 = vpop.f32.mrb[34].mxu0 }
 0x139   :  { %v813_v7 = vadd.f32 %v812_v0, %v1665_v1  ;;  %v834_v8 = vmul.f32 %v1665_v1, %v1665_v1  ;;  %v1673_v9 = vadd.f32 %v768_v5, %v1638_v35  ;;  %v800_v10 = vpop.f32.mrb[34].mxu1  ;;  %v1245_v11 = vpop.f32.mrb[35].mxu0 }
 0x13a   :  { %v1675_v12 = vadd.f32 %v800_v10, %v712_v29  ;;  %v1261_v34 = vpop.f32.mrb[35].mxu1  ;;  %v842_v57 = vmul.f32 %v1667_v3, %v1667_v3 }
 0x13b   :  { %v847_v13 = vadd.f32 %v846_v6, %v834_v8  ;;  %v814_v14 = vadd.f32 %v813_v7, %v1673_v9  ;;  %v835_v15 = vmul.f32 %v1673_v9, %v1673_v9 }
 0x13c   :  { %v843_v60 = vmul.f32 %v1675_v12, %v1675_v12 }
 0x13d   :  { %v848_v16 = vadd.f32 %v847_v13, %v835_v15 }
 0x13e   :  { %v773_v17 = vpop.f32.mrb[36].mxu0 }
 0x13f   :  { %v1681_v18 = vadd.f32 %v773_v17, %v1640_v48  ;;  %v805_v19 = vpop.f32.mrb[36].mxu1  ;;  %v1248_v22 = vpop.f32.mrb[37].mxu0 }
 0x140   :  { %v1683_v35 = vadd.f32 %v805_v19, %v717_v44  ;;  %v1264_v23 = vpop.f32.mrb[37].mxu1  ;;  %v776_v24 = vpop.f32.mrb[38].mxu0 }
 0x141   :  { %v815_v25 = vadd.f32 %v814_v14, %v1681_v18  ;;  %v836_v26 = vmul.f32 %v1681_v18, %v1681_v18  ;;  %v1689_v27 = vadd.f32 %v776_v24, %v1642_v49  ;;  %v808_v28 = vpop.f32.mrb[38].mxu1  ;;  %v1249_v29 = vpop.f32.mrb[39].mxu0 }
 0x142   :  { %v809_v30 = vadd.f32 %v808_v28, %v720_v45  ;;  %v1265_v31 = vpop.f32.mrb[39].mxu1  ;;  %v844_v0 = vmul.f32 %v1683_v35, %v1683_v35 }
 0x143   :  { %v849_v48 = vadd.f32 %v848_v16, %v836_v26  ;;  %v816_v32 = vadd.f32 %v815_v25, %v1689_v27  ;;  %v837_v33 = vmul.f32 %v1689_v27, %v1689_v27  ;;  %v877_v31 = vlaneseq }
 0x144   :  { %v845_v4 = vmul.f32 %v809_v30, %v809_v30 }
 0x145   :  { %v850_v36 = vadd.f32 %v849_v48, %v837_v33  ;;  %v878_v48 = vshrl.u32 %v877_v31, 7 }
 0x146   :  { %v781_v37 = vpop.f32.mrb[40].mxu0 }
 0x147   :  { %v1695_v38 = vadd.f32 %v781_v37, %v1644_v62  ;;  %v1252_v39 = vpop.f32.mrb[41].mxu0  ;;  %v879_v33 = vsub.s32 0, %v878_v48 }
 0x148   :  { %v784_v40 = vpop.f32.mrb[42].mxu0  ;;  %v873_v39 = vld [vmem:[%s1789_s3] sm:$0x1] }
 0x149   :  { %v817_v49 = vadd.f32 %v816_v32, %v1695_v38  ;;  %v838_v41 = vmul.f32 %v1695_v38, %v1695_v38  ;;  %v785_v42 = vadd.f32 %v784_v40, %v1646_v63  ;;  %v1253_v43 = vpop.f32.mrb[43].mxu0  ;;  %v869_v32 = vld [vmem:[%s1788_s2] sm:$0x1] }
 0x14b   :  { %v851_v44 = vadd.f32 %v850_v36, %v838_v41  ;;  %v818_v45 = vadd.f32 %v817_v49, %v785_v42  ;;  %v839_v46 = vmul.f32 %v785_v42, %v785_v42 }
 0x14d   :  { %v819_v51 = vadd.f32 %v818_v45, %v1651_v52  ;;  %v852_v62 = vadd.f32 %v851_v44, %v839_v46 }
 0x14f   :  { %v820_v54 = vadd.f32 %v819_v51, %v1656_v58  ;;  %v853_v56 = vadd.f32 %v852_v62, %v840_v50 }
 0x151   :  { %v821_v63 = vadd.f32 %v820_v54, %v1667_v3  ;;  %v854_v59 = vadd.f32 %v853_v56, %v841_v53 }
 0x153   :  { %v822_v61 = vadd.f32 %v821_v63, %v1675_v12  ;;  %v855_v20 = vadd.f32 %v854_v59, %v842_v57 }
 0x155   :  { %v823_v21 = vadd.f32 %v822_v61, %v1683_v35  ;;  %v856_v2 = vadd.f32 %v855_v20, %v843_v60 }
 0x157   :  { %v824_v5 = vadd.f32 %v823_v21, %v809_v30  ;;  %v857_v6 = vadd.f32 %v856_v2, %v844_v0 }
 0x159   :  { %v825_v7 = vrot.slane %v824_v5, 4  ;;  %v858_v8 = vadd.f32 %v857_v6, %v845_v4 }
 0x15b   :  { %v826_v10 = vadd.f32 %v825_v7, %v824_v5  ;;  %v859_v11 = vrot.slane %v858_v8, 4 }
 0x15d   :  { %v827_v34 = vrot.slane %v826_v10, 2  ;;  %v860_v13 = vadd.f32 %v859_v11, %v858_v8 }
 0x15f   :  { %v828_v14 = vadd.f32 %v827_v34, %v826_v10  ;;  %v861_v15 = vrot.slane %v860_v13, 2 }
 0x161   :  { %v829_v16 = vrot.slane %v828_v14, 1  ;;  %v862_v17 = vadd.f32 %v861_v15, %v860_v13 }
 0x163   :  { %v830_v19 = vadd.f32 %v829_v16, %v828_v14  ;;  %v863_v22 = vrot.slane %v862_v17, 1 }
 0x165   :  { %v831_v23 = vmul.f32 0.010204081, %v830_v19  ;;  %v864_v24 = vadd.f32 %v863_v22, %v862_v17 }
 0x167   :  { %v865_v25 = vmul.f32 0.010204081, %v864_v24  ;;  %v866_v26 = vmul.f32 %v831_v23, %v831_v23 }
 0x169   :  { %v867_v28 = vsub.f32 %v865_v25, %v866_v26 }
 0x16b   :  { %v868_v29 = vmax.f32 %v867_v28, 0.0 }
 0x16d   :  { %v870_v30 = vadd.f32 1e-05, %v868_v29 }
 0x16f   :  { %1361 = vrsqrt.f32 %v870_v30 }
 0x179   :  { %v1362_v36 = vpop.eup %1361 }
 0x17a   :  { %v872_v37 = vmul.f32 %v1362_v36, %v869_v32 }
 0x17c   :  { %v874_v40 = vmul.f32 %v872_v37, %v831_v23  ;;  %v880_v49 = vrot.slane %v872_v37, %v879_v33 }
 0x17e   :  { %v875_v41 = vsub.f32 %v873_v39, %v874_v40  ;;  %v882_v43 = vmul.f32 %v880_v49, %v1649_v47  ;;  %v884_v44 = vmul.f32 %v880_v49, %v1665_v1  ;;  %v885_v45 = vmul.f32 %v880_v49, %v1673_v9 }
 0x17f   :  { %v886_v46 = vmul.f32 %v880_v49, %v1681_v18  ;;  %v887_v50 = vmul.f32 %v880_v49, %v1689_v27  ;;  %v888_v51 = vmul.f32 %v880_v49, %v1695_v38  ;;  %v889_v62 = vmul.f32 %v880_v49, %v785_v42 }
 0x180   :  { %v890_v53 = vmul.f32 %v880_v49, %v1651_v52  ;;  %v891_v54 = vmul.f32 %v880_v49, %v1656_v58  ;;  %v892_v56 = vmul.f32 %v880_v49, %v1667_v3  ;;  %v883_v57 = vmul.f32 %v880_v49, %v1654_v55 }
 0x181   :  { %v893_v47 = vmul.f32 %v880_v49, %v1675_v12  ;;  %v894_v1 = vmul.f32 %v880_v49, %v1683_v35  ;;  %v899_v9 = vrot.slane %v875_v41, %v879_v33 }
 0x183   :  { %v901_v18 = vadd.f32 %v899_v9, %v882_v43  ;;  %v902_v63 = vadd.f32 %v899_v9, %v883_v57  ;;  %v903_v27 = vadd.f32 %v899_v9, %v884_v44  ;;  %v904_v59 = vadd.f32 %v899_v9, %v885_v45 }
 0x184   :  { %v905_v38 = vadd.f32 %v899_v9, %v886_v46  ;;  %v906_v42 = vadd.f32 %v899_v9, %v887_v50  ;;  %v907_v52 = vadd.f32 %v899_v9, %v888_v51  ;;  %v908_v60 = vadd.f32 %v899_v9, %v889_v62 }
 0x185   :  { %v909_v58 = vadd.f32 %v899_v9, %v890_v53  ;;  %v910_v61 = vadd.f32 %v899_v9, %v891_v54  ;;  %v911_v3 = vadd.f32 %v899_v9, %v892_v56  ;;  %v912_v20 = vadd.f32 %v899_v9, %v893_v47 }
 0x186   :  { %v913_v55 = vadd.f32 %v899_v9, %v894_v1  ;;  %v914_v0 = vmax.f32 %v901_v18, 0.0  ;;  %v915_v12 = vmax.f32 %v902_v63, 0.0  ;;  %v916_v21 = vmax.f32 %v903_v27, 0.0 }
 0x187   :  { %v917_v35 = vmax.f32 %v904_v59, 0.0  ;;  %v918_v2 = vmax.f32 %v905_v38, 0.0  ;;  %v919_v4 = vmax.f32 %v906_v42, 0.0  ;;  %v920_v5 = vmax.f32 %v907_v52, 0.0 }
 0x188   :  { %v921_v6 = vmax.f32 %v908_v60, 0.0  ;;  %v922_v7 = vmax.f32 %v909_v58, 0.0  ;;  %v923_v8 = vmax.f32 %v910_v61, 0.0  ;;  %v924_v10 = vmax.f32 %v911_v3, 0.0 }
 0x189   :  { %v925_v11 = vmax.f32 %v912_v20, 0.0  ;;  %v926_v34 = vmax.f32 %v913_v55, 0.0  ;;  %v1090_v13 = vpack.c.bf16 %v914_v0, %v914_v0  ;;  %v1091_v14 = vpack.c.bf16 %v915_v12, %v915_v12 }
 0x18a   :  { %v1092_v15 = vpack.c.bf16 %v916_v21, %v916_v21  ;;  %v1093_v16 = vpack.c.bf16 %v917_v35, %v917_v35  ;;  %v1094_v17 = vpack.c.bf16 %v918_v2, %v918_v2  ;;  %v1095_v19 = vpack.c.bf16 %v919_v4, %v919_v4 }
 0x18b   :  { %v1096_v22 = vpack.c.bf16 %v920_v5, %v920_v5  ;;  %v1097_v23 = vpack.c.bf16 %v921_v6, %v921_v6  ;;  %v1098_v24 = vpack.c.bf16 %v922_v7, %v922_v7  ;;  %v1099_v25 = vpack.c.bf16 %v923_v8, %v923_v8  ;;  %981 = vst.msk [vmem:[%s1790_s4] sm:$0xf] %vm980_vm2, %v1090_v13 }
 0x18c   :  { %982 = vst.msk [vmem:[%s1790_s4 + $0x4] sm:$0xf] %vm980_vm2, %v1091_v14  ;;  %v1100_v26 = vpack.c.bf16 %v924_v10, %v924_v10  ;;  %v1101_v28 = vpack.c.bf16 %v925_v11, %v925_v11  ;;  %v1102_v29 = vpack.c.bf16 %v926_v34, %v926_v34  ;;  %983 = vst.msk [vmem:[%s1790_s4 + $0x8] sm:$0xf] %vm980_vm2, %v1092_v15 }
 0x18d   :  { %984 = vst.msk [vmem:[%s1790_s4 + $0xc] sm:$0xf] %vm980_vm2, %v1093_v16  ;;  %985 = vst.msk [vmem:[%s1790_s4 + $0x10] sm:$0xf] %vm980_vm2, %v1094_v17 }
 0x18e   :  { %986 = vst.msk [vmem:[%s1790_s4 + $0x14] sm:$0xf] %vm980_vm2, %v1095_v19  ;;  %987 = vst.msk [vmem:[%s1790_s4 + $0x18] sm:$0xf] %vm980_vm2, %v1096_v22 }
 0x18f   :  { %988 = vst.msk [vmem:[%s1790_s4 + $0x1c] sm:$0xf] %vm980_vm2, %v1097_v23  ;;  %989 = vst.msk [vmem:[%s1790_s4 + $0x20] sm:$0xf] %vm980_vm2, %v1098_v24 }
 0x190   :  { %990 = vst.msk [vmem:[%s1790_s4 + $0x24] sm:$0xf] %vm980_vm2, %v1099_v25  ;;  %991 = vst.msk [vmem:[%s1790_s4 + $0x28] sm:$0xf] %vm980_vm2, %v1100_v26 }
 0x191   :  { %992 = vst.msk [vmem:[%s1790_s4 + $0x2c] sm:$0xf] %vm980_vm2, %v1101_v28 }
 0x192   :  { %994 = vst.msk [vmem:[%s1790_s4 + $0x30] sm:$0x1] %vm993_vm3, %v1102_v29 }

// kernel: stem_forward.15
= control target key start
LH: loop header
LB: loop body
LE: loop exit
PB: predicated region body
PF: predicated region fallthrough
CT: control target
= control target key end

     0   :  { %vm430_vm0 = vcmask 523264   ;;  %vm746_vm1 = vcmask 781312   ;;  %vm753_vm2 = vcmask 778240   ;;  %s1267_s1 = inlined_call_operand.vmem [shape: bf16[576,128], index: 1, kind: input, shape index: {}]   ;;  %s1268_s0 = inlined_call_operand.vmem [shape: bf16[64,576], index: 0, kind: input, shape index: {}]   ;;  %s1269_s2 = inlined_call_operand.vmem [shape: f32[1,128], index: 2, kind: input, shape index: {}]   ;;  %s1270_s3 = inlined_call_operand.vmem [shape: f32[1,128], index: 3, kind: input, shape index: {}]   ;;  %s1271_s4 = inlined_call_operand.vmem [shape: bf16[50,96], index: 4, kind: output, shape index: {}]  }
   0x1   :  { %v945_v0 = vld [vmem:[%s1267_s1 + $0x40] sm:$0xff]   ;;  %v949_v4 = vld [vmem:[%s1267_s1 + $0x48] sm:$0xff]   ;;  %v953_v8 = vld [vmem:[%s1267_s1 + $0x50] sm:$0xff]  }
   0x2   :  { %v946_v1 = vld [vmem:[%s1267_s1 + $0xc0] sm:$0xff]   ;;  %833 = vmatprep.subr.bf16.mxu0 %v945_v0  ;;  %v950_v5 = vld [vmem:[%s1267_s1 + $0xc8] sm:$0xff]   ;;  %v954_v9 = vld [vmem:[%s1267_s1 + $0xd0] sm:$0xff]  }
   0x3   :  { %v947_v2 = vld [vmem:[%s1267_s1] sm:$0xff]   ;;  %873 = vmatprep.subr.bf16.mxu1 %v946_v1  ;;  %v951_v6 = vld [vmem:[%s1267_s1 + $0x8] sm:$0xff]   ;;  %v955_v10 = vld [vmem:[%s1267_s1 + $0x10] sm:$0xff]  }
   0x4   :  { %v948_v3 = vld [vmem:[%s1267_s1 + $0x80] sm:$0xff]   ;;  %834 = vmatpush3.bf16.msra.mxu0 %v947_v2  ;;  %v952_v7 = vld [vmem:[%s1267_s1 + $0x88] sm:$0xff]   ;;  %v956_v11 = vld [vmem:[%s1267_s1 + $0x90] sm:$0xff]  }
   0x5   :  { %874 = vmatpush3.bf16.msra.mxu1 %v948_v3  ;;  %835 = vmatprep.subr.bf16.mxu0 %v949_v4  ;;  %v957_v12 = vld [vmem:[%s1267_s1 + $0x58] sm:$0xff]   ;;  %v961_v16 = vld [vmem:[%s1267_s1 + $0x60] sm:$0xff]   ;;  %v965_v20 = vld [vmem:[%s1267_s1 + $0x68] sm:$0xff]  }
   0x6   :  { %875 = vmatprep.subr.bf16.mxu1 %v950_v5  ;;  %v958_v13 = vld [vmem:[%s1267_s1 + $0xd8] sm:$0xff]   ;;  %v962_v17 = vld [vmem:[%s1267_s1 + $0xe0] sm:$0xff]   ;;  %v966_v21 = vld [vmem:[%s1267_s1 + $0xe8] sm:$0xff]  }
   0x7   :  { %v959_v14 = vld [vmem:[%s1267_s1 + $0x18] sm:$0xff]   ;;  %v963_v18 = vld [vmem:[%s1267_s1 + $0x20] sm:$0xff]   ;;  %v967_v22 = vld [vmem:[%s1267_s1 + $0x28] sm:$0xff]  }
   0x8   :  { %836 = vmatpush3.bf16.msra.mxu0 %v951_v6  ;;  %v960_v15 = vld [vmem:[%s1267_s1 + $0x98] sm:$0xff]   ;;  %v964_v19 = vld [vmem:[%s1267_s1 + $0xa0] sm:$0xff]   ;;  %v968_v23 = vld [vmem:[%s1267_s1 + $0xa8] sm:$0xff]  }
   0x9   :  { %876 = vmatpush3.bf16.msra.mxu1 %v952_v7  ;;  %837 = vmatprep.subr.bf16.mxu0 %v953_v8  ;;  %v969_v24 = vld [vmem:[%s1267_s1 + $0x70] sm:$0xff]   ;;  %v973_v28 = vld [vmem:[%s1267_s1 + $0x78] sm:$0xff]   ;;  %v982_v35 = vld [vmem:[%s1268_s0 + $0xc] ss:$20 sps:$4 sm:$0xff]  }
   0xa   :  { %877 = vmatprep.subr.bf16.mxu1 %v954_v9  ;;  %v970_v25 = vld [vmem:[%s1267_s1 + $0xf0] sm:$0xff]   ;;  %v974_v29 = vld [vmem:[%s1267_s1 + $0xf8] sm:$0xff]   ;;  %v983_v36 = vld [vmem:[%s1267_s1 + $0x100] sm:$0xff]   ;;  %540 = vmatprep.mubr.bf16.mxu1 %v982_v35 }
   0xb   :  { %v971_v26 = vld [vmem:[%s1267_s1 + $0x30] sm:$0xff]   ;;  %v975_v30 = vld [vmem:[%s1267_s1 + $0x38] sm:$0xff]   ;;  %v984_v37 = vld [vmem:[%s1268_s0 + $0x2c] ss:$20 sps:$4 sm:$0xff]  }
   0xc   :  { %838 = vmatpush3.bf16.msra.mxu0 %v955_v10  ;;  %v972_v27 = vld [vmem:[%s1267_s1 + $0xb0] sm:$0xff]   ;;  %v976_v31 = vld [vmem:[%s1267_s1 + $0xb8] sm:$0xff]   ;;  %v990_v39 = vld [vmem:[%s1267_s1 + $0x108] sm:$0xff]  }
   0xd   :  { %878 = vmatpush3.bf16.msra.mxu1 %v956_v11  ;;  %839 = vmatprep.subr.bf16.mxu0 %v957_v12  ;;  %v977_v32 = vld [vmem:[%s1268_s0] ss:$20 sps:$4 sm:$0xff]   ;;  %v979_v33 = vld [vmem:[%s1268_s0 + $0x4] ss:$20 sps:$4 sm:$0xff]   ;;  %v980_v34 = vld [vmem:[%s1268_s0 + $0x8] ss:$20 sps:$4 sm:$0xff]  }
   0xe   :  { %879 = vmatprep.subr.bf16.mxu1 %v958_v13  ;;  %475 = vmatprep.mubr.bf16.mxu0 %v979_v33  ;;  %v986_v38 = vld [vmem:[%s1268_s0 + $0x34] ss:$20 sps:$4 sm:$0xff]   ;;  %v989_v41 = vld [vmem:[%s1268_s0 + $0x30] ss:$20 sps:$4 sm:$0xff]   ;;  %v1004_v45 = vld [vmem:[%s1267_s1 + $0x118] sm:$0xff]  }
   0xf   :  { %v988_v40 = vld [vmem:[%s1268_s0 + $0x28] ss:$20 sps:$4 sm:$0xff]   ;;  %v997_v44 = vld [vmem:[%s1267_s1 + $0x110] sm:$0xff]   ;;  %v996_v47 = vld [vmem:[%s1268_s0 + $0x58] ss:$20 sps:$4 sm:$0xff]  }
  0x10   :  { %840 = vmatpush3.bf16.msra.mxu0 %v959_v14  ;;  %v991_v42 = vld [vmem:[%s1268_s0 + $0x54] ss:$20 sps:$4 sm:$0xff]   ;;  %v993_v43 = vld [vmem:[%s1268_s0 + $0x5c] ss:$20 sps:$4 sm:$0xff]   ;;  %v1000_v49 = vld [vmem:[%s1268_s0 + $0x84] ss:$20 sps:$4 sm:$0xff]  }
  0x11   :  { %880 = vmatpush3.bf16.msra.mxu1 %v960_v15  ;;  %841 = vmatprep.subr.bf16.mxu0 %v961_v16  ;;  %v995_v46 = vld [vmem:[%s1268_s0 + $0x50] ss:$20 sps:$4 sm:$0xff]   ;;  %v1002_v50 = vld [vmem:[%s1268_s0 + $0x78] ss:$20 sps:$4 sm:$0xff]   ;;  %v1003_v51 = vld [vmem:[%s1268_s0 + $0x80] ss:$20 sps:$4 sm:$0xff]  }
  0x12   :  { %881 = vmatprep.subr.bf16.mxu1 %v962_v17  ;;  %v998_v48 = vld [vmem:[%s1268_s0 + $0x7c] ss:$20 sps:$4 sm:$0xff]   ;;  %v1006_v53 = vld [vmem:[%s1268_s0 + $0x60] ss:$20 sps:$4 sm:$0xff]   ;;  %v1007_v54 = vld [vmem:[%s1268_s0 + $0x38] ss:$20 sps:$4 sm:$0xff]  }
  0x13   :  { %v1005_v52 = vld [vmem:[%s1268_s0 + $0x10] ss:$20 sps:$4 sm:$0xff]   ;;  %v1008_v55 = vld [vmem:[%s1268_s0 + $0x88] ss:$20 sps:$4 sm:$0xff]  }
  0x14   :  { %842 = vmatpush3.bf16.msra.mxu0 %v963_v18 }
  0x15   :  { %882 = vmatpush3.bf16.msra.mxu1 %v964_v19  ;;  %843 = vmatprep.subr.bf16.mxu0 %v965_v20 }
  0x16   :  { %883 = vmatprep.subr.bf16.mxu1 %v966_v21 }
  0x18   :  { %844 = vmatpush3.bf16.msra.mxu0 %v967_v22 }
  0x19   :  { %884 = vmatpush3.bf16.msra.mxu1 %v968_v23  ;;  %845 = vmatprep.subr.bf16.mxu0 %v969_v24 }
  0x1a   :  { %885 = vmatprep.subr.bf16.mxu1 %v970_v25 }
  0x1c   :  { %846 = vmatpush3.bf16.msra.mxu0 %v971_v26 }
  0x1d   :  { %886 = vmatpush3.bf16.msra.mxu1 %v972_v27  ;;  %847 = vmatprep.subr.bf16.mxu0 %v973_v28 }
  0x1e   :  { %887 = vmatprep.subr.bf16.mxu1 %v974_v29 }
  0x20   :  { %848 = vmatpush3.bf16.msra.mxu0 %v975_v30 }
  0x21   :  { %888 = vmatpush3.bf16.msra.mxu1 %v976_v31  ;;  %921 = vmatprep.subr.bf16.mxu0 %v983_v36 }
  0x22   :  { %937 = vmatprep.subr.bf16.mxu1 %v983_v36 }
  0x23   :  { %476 = vmatmul.mubr.bf16.vlgmr.msra.gmra.mrb[0].mxu0 %v977_v32 }
  0x24   :  { %541 = vmatmul.mubr.bf16.vlgmr.msra.gmra.mrb[0].mxu1 %v980_v34  ;;  %922 = vmatpush3.bf16.msra.mxu0 %v983_v36 }
  0x25   :  { %483 = vmatprep.mubr.bf16.mxu0 %v984_v37  ;;  %548 = vmatprep.mubr.bf16.mxu1 %v986_v38 }
  0x26   :  { %941 = vmatpush3.bf16.msra.mxu1 %v983_v36  ;;  %923 = vmatprep.subr.bf16.mxu0 %v990_v39 }
  0x27   :  { %938 = vmatprep.subr.bf16.mxu1 %v990_v39 }
  0x28   :  { %924 = vmatpush3.bf16.msra.mxu0 %v990_v39 }
  0x29   :  { %925 = vmatprep.subr.bf16.mxu0 %v997_v44 }
  0x2a   :  { %942 = vmatpush3.bf16.msra.mxu1 %v990_v39 }
  0x2b   :  { %484 = vmatmul.mubr.bf16.gmra.mrb[4].mxu0 %v988_v40  ;;  %939 = vmatprep.subr.bf16.mxu1 %v997_v44 }
  0x2c   :  { %549 = vmatmul.mubr.bf16.gmra.mrb[4].mxu1 %v989_v41  ;;  %491 = vmatprep.mubr.bf16.mxu0 %v991_v42 }
  0x2d   :  { %556 = vmatprep.mubr.bf16.mxu1 %v993_v43  ;;  %926 = vmatpush3.bf16.msra.mxu0 %v997_v44 }
  0x2e   :  { %927 = vmatprep.subr.bf16.mxu0 %v1004_v45  ;;  %943 = vmatpush3.bf16.msra.mxu1 %v997_v44 }
  0x2f   :  { %940 = vmatprep.subr.bf16.mxu1 %v1004_v45 }
  0x31   :  { %928 = vmatpush3.bf16.msra.mxu0 %v1004_v45 }
  0x32   :  { %944 = vmatpush3.bf16.msra.mxu1 %v1004_v45 }
  0x33   :  { %492 = vmatmul.mubr.bf16.gmra.mrb[8].mxu0 %v995_v46 }
  0x34   :  { %557 = vmatmul.mubr.bf16.gmra.mrb[8].mxu1 %v996_v47  ;;  %499 = vmatprep.mubr.bf16.mxu0 %v998_v48 }
  0x35   :  { %564 = vmatprep.mubr.bf16.mxu1 %v1000_v49 }
  0x3b   :  { %500 = vmatmul.mubr.bf16.gmra.mrb[12].mxu0 %v1002_v50 }
  0x3c   :  { %565 = vmatmul.mubr.bf16.gmra.mrb[12].mxu1 %v1003_v51  ;;  %929 = vmatprep.mubr.msk.bf16.mxu0 %vm430_vm0, %v1005_v52 }
  0x3d   :  { %933 = vmatprep.mubr.msk.bf16.mxu1 %vm430_vm0, %v1006_v53 }
  0x43   :  { %930 = vmatmul.mubr.msk.bf16.vlgmr.msra.gmra.mrb[16].mxu0 %vm430_vm0, %v1007_v54 }
  0x44   :  { %934 = vmatmul.mubr.msk.bf16.vlgmr.msra.gmra.mrb[16].mxu1 %vm430_vm0, %v1008_v55 }
  0xf6   :  { %v849_v56 = vpop.f32.mrb[0].mxu0 }
  0xf7   :  { %v889_v57 = vpop.f32.mrb[0].mxu1  ;;  %v850_v58 = vpop.f32.mrb[1].mxu0 }
  0xf8   :  { %v851_v59 = vadd.f32 %v850_v58, %v849_v56  ;;  %v890_v60 = vpop.f32.mrb[1].mxu1  ;;  %v852_v61 = vpop.f32.mrb[2].mxu0 }
  0xf9   :  { %v891_v62 = vadd.f32 %v890_v60, %v889_v57  ;;  %v892_v63 = vpop.f32.mrb[2].mxu1  ;;  %v853_v0 = vpop.f32.mrb[3].mxu0 }
  0xfa   :  { %v854_v1 = vadd.f32 %v853_v0, %v852_v61  ;;  %v893_v2 = vpop.f32.mrb[3].mxu1 }
  0xfb   :  { %v894_v3 = vadd.f32 %v893_v2, %v892_v63  ;;  %v543_v4 = vadd.f32 %v891_v62, %v851_v59 }
  0xfd   :  { %v546_v5 = vadd.f32 %v894_v3, %v854_v1 }
  0xfe   :  { %v855_v6 = vpop.f32.mrb[4].mxu0 }
  0xff   :  { %v895_v7 = vpop.f32.mrb[4].mxu1  ;;  %v856_v8 = vpop.f32.mrb[5].mxu0 }
 0x100   :  { %v857_v9 = vadd.f32 %v856_v8, %v855_v6  ;;  %v896_v10 = vpop.f32.mrb[5].mxu1  ;;  %v858_v11 = vpop.f32.mrb[6].mxu0 }
 0x101   :  { %v897_v12 = vadd.f32 %v896_v10, %v895_v7  ;;  %v898_v13 = vpop.f32.mrb[6].mxu1  ;;  %v859_v14 = vpop.f32.mrb[7].mxu0 }
 0x102   :  { %v860_v15 = vadd.f32 %v859_v14, %v858_v11  ;;  %v899_v16 = vpop.f32.mrb[7].mxu1 }
 0x103   :  { %v900_v17 = vadd.f32 %v899_v16, %v898_v13  ;;  %v551_v18 = vadd.f32 %v897_v12, %v857_v9 }
 0x105   :  { %v554_v19 = vadd.f32 %v900_v17, %v860_v15 }
 0x106   :  { %v861_v20 = vpop.f32.mrb[8].mxu0 }
 0x107   :  { %v901_v21 = vpop.f32.mrb[8].mxu1  ;;  %v862_v22 = vpop.f32.mrb[9].mxu0 }
 0x108   :  { %v863_v23 = vadd.f32 %v862_v22, %v861_v20  ;;  %v902_v24 = vpop.f32.mrb[9].mxu1  ;;  %v864_v25 = vpop.f32.mrb[10].mxu0 }
 0x109   :  { %v903_v26 = vadd.f32 %v902_v24, %v901_v21  ;;  %v904_v27 = vpop.f32.mrb[10].mxu1  ;;  %v865_v28 = vpop.f32.mrb[11].mxu0 }
 0x10a   :  { %v866_v29 = vadd.f32 %v865_v28, %v864_v25  ;;  %v905_v30 = vpop.f32.mrb[11].mxu1 }
 0x10b   :  { %v906_v31 = vadd.f32 %v905_v30, %v904_v27  ;;  %v559_v32 = vadd.f32 %v903_v26, %v863_v23 }
 0x10d   :  { %v562_v33 = vadd.f32 %v906_v31, %v866_v29 }
 0x10e   :  { %v867_v34 = vpop.f32.mrb[12].mxu0 }
 0x10f   :  { %v907_v35 = vpop.f32.mrb[12].mxu1  ;;  %v868_v36 = vpop.f32.mrb[13].mxu0 }
 0x110   :  { %v869_v37 = vadd.f32 %v868_v36, %v867_v34  ;;  %v908_v38 = vpop.f32.mrb[13].mxu1  ;;  %v870_v39 = vpop.f32.mrb[14].mxu0 }
 0x111   :  { %v909_v40 = vadd.f32 %v908_v38, %v907_v35  ;;  %v910_v41 = vpop.f32.mrb[14].mxu1  ;;  %v871_v42 = vpop.f32.mrb[15].mxu0 }
 0x112   :  { %v872_v43 = vadd.f32 %v871_v42, %v870_v39  ;;  %v911_v44 = vpop.f32.mrb[15].mxu1  ;;  %v677_v42 = vld [vmem:[%s1269_s2] sm:$0x1] }
 0x113   :  { %v912_v45 = vadd.f32 %v911_v44, %v910_v41  ;;  %v567_v46 = vadd.f32 %v909_v40, %v869_v37  ;;  %v685_v40 = vlaneseq }
 0x115   :  { %v570_v47 = vadd.f32 %v912_v45, %v872_v43  ;;  %v686_v41 = vshrl.u32 %v685_v40, 7 }
 0x116   :  { %v931_v48 = vpop.f32.mrb[16].mxu0 }
 0x117   :  { %v1204_v49 = vadd.f32 %v931_v48, %v551_v18  ;;  %v935_v50 = vpop.f32.mrb[16].mxu1  ;;  %v607_v51 = vpop.f32.mrb[17].mxu0  ;;  %v687_v43 = vsub.s32 0, %v686_v41 }
 0x118   :  { %v1206_v52 = vadd.f32 %v935_v50, %v567_v46  ;;  %v1208_v53 = vadd.f32 %v607_v51, %v543_v4  ;;  %v623_v54 = vpop.f32.mrb[17].mxu1  ;;  %v932_v55 = vpop.f32.mrb[18].mxu0  ;;  %v681_v46 = vld [vmem:[%s1270_s3] sm:$0x1] }
 0x119   :  { %v1210_v56 = vadd.f32 %v623_v54, %v559_v32  ;;  %v1212_v57 = vadd.f32 %v932_v55, %v554_v19  ;;  %v936_v58 = vpop.f32.mrb[18].mxu1  ;;  %v610_v59 = vpop.f32.mrb[19].mxu0  ;;  %v654_v3 = vmul.f32 %v1204_v49, %v1204_v49 }
 0x11a   :  { %v635_v60 = vadd.f32 %v936_v58, %v570_v47  ;;  %v611_v61 = vadd.f32 %v610_v59, %v546_v5  ;;  %v626_v62 = vpop.f32.mrb[19].mxu1  ;;  %v652_v0 = vmul.f32 %v1208_v53, %v1208_v53  ;;  %v658_v15 = vmul.f32 %v1206_v52, %v1206_v52 }
 0x11b   :  { %v627_v63 = vadd.f32 %v626_v62, %v562_v33  ;;  %v655_v7 = vmul.f32 %v1212_v57, %v1212_v57  ;;  %v656_v9 = vmul.f32 %v1210_v56, %v1210_v56 }
 0x11c   :  { %v638_v1 = vadd.f32 %v611_v61, %v1208_v53  ;;  %v653_v2 = vmul.f32 %v611_v61, %v611_v61  ;;  %v659_v18 = vmul.f32 %v635_v60, %v635_v60 }
 0x11d   :  { %v657_v13 = vmul.f32 %v627_v63, %v627_v63 }
 0x11e   :  { %v639_v4 = vadd.f32 %v638_v1, %v1204_v49  ;;  %v660_v6 = vadd.f32 %v653_v2, %v652_v0 }
 0x120   :  { %v661_v8 = vadd.f32 %v660_v6, %v654_v3  ;;  %v640_v5 = vadd.f32 %v639_v4, %v1212_v57 }
 0x122   :  { %v641_v10 = vadd.f32 %v640_v5, %v1210_v56  ;;  %v662_v11 = vadd.f32 %v661_v8, %v655_v7 }
 0x124   :  { %v642_v12 = vadd.f32 %v641_v10, %v627_v63  ;;  %v663_v14 = vadd.f32 %v662_v11, %v656_v9 }
 0x126   :  { %v643_v16 = vadd.f32 %v642_v12, %v1206_v52  ;;  %v664_v17 = vadd.f32 %v663_v14, %v657_v13 }
 0x128   :  { %v644_v19 = vadd.f32 %v643_v16, %v635_v60  ;;  %v665_v20 = vadd.f32 %v664_v17, %v658_v15 }
 0x12a   :  { %v645_v21 = vrot.slane %v644_v19, 4  ;;  %v666_v22 = vadd.f32 %v665_v20, %v659_v18 }
 0x12c   :  { %v646_v23 = vadd.f32 %v645_v21, %v644_v19  ;;  %v667_v24 = vrot.slane %v666_v22, 4 }
 0x12e   :  { %v647_v25 = vrot.slane %v646_v23, 2  ;;  %v668_v26 = vadd.f32 %v667_v24, %v666_v22 }
 0x130   :  { %v648_v27 = vadd.f32 %v647_v25, %v646_v23  ;;  %v669_v28 = vrot.slane %v668_v26, 2 }
 0x132   :  { %v649_v29 = vrot.slane %v648_v27, 1  ;;  %v670_v30 = vadd.f32 %v669_v28, %v668_v26 }
 0x134   :  { %v650_v31 = vadd.f32 %v649_v29, %v648_v27  ;;  %v671_v32 = vrot.slane %v670_v30, 1 }
 0x136   :  { %v651_v33 = vmul.f32 0.02, %v650_v31  ;;  %v672_v34 = vadd.f32 %v671_v32, %v670_v30 }
 0x138   :  { %v673_v35 = vmul.f32 0.02, %v672_v34  ;;  %v674_v36 = vmul.f32 %v651_v33, %v651_v33 }
 0x13a   :  { %v675_v37 = vsub.f32 %v673_v35, %v674_v36 }
 0x13c   :  { %v676_v38 = vmax.f32 %v675_v37, 0.0 }
 0x13e   :  { %v678_v39 = vadd.f32 1e-05, %v676_v38 }
 0x140   :  { %1009 = vrsqrt.f32 %v678_v39 }
 0x14a   :  { %v1010_v44 = vpop.eup %1009 }
 0x14b   :  { %v680_v45 = vmul.f32 %v1010_v44, %v677_v42 }
 0x14d   :  { %v682_v47 = vmul.f32 %v680_v45, %v651_v33  ;;  %v688_v48 = vrot.slane %v680_v45, %v687_v43 }
 0x14f   :  { %v683_v50 = vsub.f32 %v681_v46, %v682_v47  ;;  %v690_v51 = vmul.f32 %v688_v48, %v1208_v53  ;;  %v691_v54 = vmul.f32 %v688_v48, %v611_v61  ;;  %v692_v55 = vmul.f32 %v688_v48, %v1204_v49 }
 0x150   :  { %v693_v58 = vmul.f32 %v688_v48, %v1212_v57  ;;  %v694_v59 = vmul.f32 %v688_v48, %v1210_v56  ;;  %v695_v60 = vmul.f32 %v688_v48, %v627_v63  ;;  %v696_v62 = vmul.f32 %v688_v48, %v1206_v52 }
 0x151   :  { %v701_v0 = vrot.slane %v683_v50, %v687_v43 }
 0x153   :  { %v703_v1 = vadd.f32 %v701_v0, %v690_v51  ;;  %v704_v2 = vadd.f32 %v701_v0, %v691_v54  ;;  %v705_v3 = vadd.f32 %v701_v0, %v692_v55  ;;  %v706_v4 = vadd.f32 %v701_v0, %v693_v58 }
 0x154   :  { %v707_v6 = vadd.f32 %v701_v0, %v694_v59  ;;  %v708_v7 = vadd.f32 %v701_v0, %v695_v60  ;;  %v709_v8 = vadd.f32 %v701_v0, %v696_v62 }
 0x155   :  { %v710_v53 = vmax.f32 %v703_v1, 0.0  ;;  %v711_v61 = vmax.f32 %v704_v2, 0.0  ;;  %v712_v5 = vmax.f32 %v705_v3, 0.0  ;;  %v713_v49 = vmax.f32 %v706_v4, 0.0 }
 0x156   :  { %v714_v9 = vmax.f32 %v707_v6, 0.0  ;;  %v715_v57 = vmax.f32 %v708_v7, 0.0  ;;  %v716_v10 = vmax.f32 %v709_v8, 0.0 }
 0x157   :  { %v826_v56 = vpack.c.bf16 %v710_v53, %v710_v53  ;;  %v827_v63 = vpack.c.bf16 %v711_v61, %v711_v61  ;;  %v828_v52 = vpack.c.bf16 %v712_v5, %v712_v5  ;;  %v829_v11 = vpack.c.bf16 %v713_v49, %v713_v49 }
 0x158   :  { %v830_v12 = vpack.c.bf16 %v714_v9, %v714_v9  ;;  %v831_v13 = vpack.c.bf16 %v715_v57, %v715_v57  ;;  %v832_v14 = vpack.c.bf16 %v716_v10, %v716_v10 }
 0x159   :  { %747 = vst.msk [vmem:[%s1271_s4] sm:$0xf] %vm746_vm1, %v826_v56  ;;  %748 = vst.msk [vmem:[%s1271_s4 + $0x4] sm:$0xf] %vm746_vm1, %v827_v63 }
 0x15a   :  { %749 = vst.msk [vmem:[%s1271_s4 + $0x8] sm:$0xf] %vm746_vm1, %v828_v52  ;;  %750 = vst.msk [vmem:[%s1271_s4 + $0xc] sm:$0xf] %vm746_vm1, %v829_v11 }
 0x15b   :  { %751 = vst.msk [vmem:[%s1271_s4 + $0x10] sm:$0xf] %vm746_vm1, %v830_v12  ;;  %752 = vst.msk [vmem:[%s1271_s4 + $0x14] sm:$0xf] %vm746_vm1, %v831_v13 }
 0x15c   :  { %754 = vst.msk [vmem:[%s1271_s4 + $0x18] sm:$0x1] %vm753_vm2, %v832_v14 }

// kernel: stem_forward.16
= control target key start
LH: loop header
LB: loop body
LE: loop exit
PB: predicated region body
PF: predicated region fallthrough
CT: control target
= control target key end

     0   :  { %v1034_v0 = vmov 0   ;;  %vm403_vm0 = vcmask 523264   ;;  %vm771_vm1 = vcmask 519168   ;;  %vm784_vm2 = vcmask 516096   ;;  %s1433_s1 = inlined_call_operand.vmem [shape: bf16[448,128], index: 1, kind: input, shape index: {}]   ;;  %s1434_s0 = inlined_call_operand.vmem [shape: bf16[112,448], index: 0, kind: input, shape index: {}]   ;;  %s1435_s2 = inlined_call_operand.vmem [shape: f32[1,128], index: 2, kind: input, shape index: {}]   ;;  %s1436_s3 = inlined_call_operand.vmem [shape: f32[1,128], index: 3, kind: input, shape index: {}]   ;;  %s1437_s4 = inlined_call_operand.vmem [shape: bf16[98,64], index: 4, kind: output, shape index: {}]  }
   0x1   :  { %937 = vmatprep.subr.bf16.mxu1 %v1034_v0  ;;  %v962_v1 = vld [vmem:[%s1433_s1 + $0x40] sm:$0xff]   ;;  %v965_v4 = vld [vmem:[%s1433_s1 + $0x48] sm:$0xff]   ;;  %v968_v7 = vld [vmem:[%s1433_s1 + $0x50] sm:$0xff]  }
   0x2   :  { %v1067_v2 = vld [vmem:[%s1433_s1 + $0x80] sm:$0xff]   ;;  %879 = vmatprep.subr.bf16.mxu0 %v962_v1  ;;  %v1080_v5 = vld [vmem:[%s1433_s1 + $0x88] sm:$0xff]   ;;  %v1092_v8 = vld [vmem:[%s1433_s1 + $0x90] sm:$0xff]  }
   0x3   :  { %v964_v3 = vld [vmem:[%s1433_s1] sm:$0xff]   ;;  %949 = vmatpush1.bf16.msra.mxu1 %v1067_v2  ;;  %v967_v6 = vld [vmem:[%s1433_s1 + $0x8] sm:$0xff]   ;;  %v970_v9 = vld [vmem:[%s1433_s1 + $0x10] sm:$0xff]  }
   0x4   :  { %880 = vmatpush3.bf16.msra.mxu0 %v964_v3  ;;  %938 = vmatprep.subr.bf16.mxu1 %v1034_v0  ;;  %v971_v10 = vld [vmem:[%s1433_s1 + $0x58] sm:$0xff]   ;;  %v974_v13 = vld [vmem:[%s1433_s1 + $0x60] sm:$0xff]   ;;  %v977_v16 = vld [vmem:[%s1433_s1 + $0x68] sm:$0xff]  }
   0x5   :  { %881 = vmatprep.subr.bf16.mxu0 %v965_v4  ;;  %v1105_v11 = vld [vmem:[%s1433_s1 + $0x98] sm:$0xff]   ;;  %v1118_v14 = vld [vmem:[%s1433_s1 + $0xa0] sm:$0xff]   ;;  %v1131_v17 = vld [vmem:[%s1433_s1 + $0xa8] sm:$0xff]  }
   0x6   :  { %v973_v12 = vld [vmem:[%s1433_s1 + $0x18] sm:$0xff]   ;;  %v976_v15 = vld [vmem:[%s1433_s1 + $0x20] sm:$0xff]   ;;  %v979_v18 = vld [vmem:[%s1433_s1 + $0x28] sm:$0xff]  }
   0x7   :  { %950 = vmatpush1.bf16.msra.mxu1 %v1080_v5  ;;  %v980_v19 = vld [vmem:[%s1433_s1 + $0x70] sm:$0xff]   ;;  %v983_v22 = vld [vmem:[%s1433_s1 + $0x78] sm:$0xff]   ;;  %v989_v27 = vld [vmem:[%s1433_s1 + $0xc0] sm:$0xff]  }
   0x8   :  { %882 = vmatpush3.bf16.msra.mxu0 %v967_v6  ;;  %939 = vmatprep.subr.bf16.mxu1 %v1034_v0  ;;  %v1143_v20 = vld [vmem:[%s1433_s1 + $0xb0] sm:$0xff]   ;;  %v1160_v24 = vld [vmem:[%s1433_s1 + $0xb8] sm:$0xff]   ;;  %v990_v30 = vld [vmem:[%s1433_s1 + $0xc8] sm:$0xff]  }
   0x9   :  { %883 = vmatprep.subr.bf16.mxu0 %v968_v7  ;;  %v982_v21 = vld [vmem:[%s1433_s1 + $0x30] sm:$0xff]   ;;  %v985_v25 = vld [vmem:[%s1433_s1 + $0x38] sm:$0xff]  }
   0xa   :  { %v988_v23 = vld [vmem:[%s1434_s0 + $0x4] ss:$16 sps:$4 sm:$0xff]   ;;  %v986_v26 = vld [vmem:[%s1434_s0] ss:$16 sps:$4 sm:$0xff]   ;;  %v998_v28 = vld [vmem:[%s1434_s0 + $0x2c] ss:$16 sps:$4 sm:$0xff]  }
   0xb   :  { %951 = vmatpush1.bf16.msra.mxu1 %v1092_v8  ;;  %457 = vmatprep.mubr.bf16.mxu0 %v988_v23  ;;  %v991_v29 = vld [vmem:[%s1434_s0 + $0x24] ss:$16 sps:$4 sm:$0xff]   ;;  %v993_v31 = vld [vmem:[%s1434_s0 + $0x20] ss:$16 sps:$4 sm:$0xff]   ;;  %v995_v34 = vld [vmem:[%s1433_s1 + $0xd8] sm:$0xff]  }
   0xc   :  { %884 = vmatpush3.bf16.msra.mxu0 %v970_v9  ;;  %940 = vmatprep.subr.bf16.mxu1 %v1034_v0  ;;  %v994_v32 = vld [vmem:[%s1433_s1 + $0xd0] sm:$0xff]   ;;  %v996_v35 = vld [vmem:[%s1434_s0 + $0x28] ss:$16 sps:$4 sm:$0xff]   ;;  %v1002_v37 = vld [vmem:[%s1434_s0 + $0x4c] ss:$16 sps:$4 sm:$0xff]  }
   0xd   :  { %885 = vmatprep.subr.bf16.mxu0 %v971_v10  ;;  %847 = vmatprep.mubr.msk.bf16.mxu1 %vm403_vm0, %v998_v28  ;;  %v999_v33 = vld [vmem:[%s1434_s0 + $0x44] ss:$16 sps:$4 sm:$0xff]   ;;  %v1001_v36 = vld [vmem:[%s1434_s0 + $0x40] ss:$16 sps:$4 sm:$0xff]   ;;  %v1006_v39 = vld [vmem:[%s1434_s0 + $0x48] ss:$16 sps:$4 sm:$0xff]  }
   0xe   :  { %v1004_v38 = vld [vmem:[%s1434_s0 + $0x64] ss:$16 sps:$4 sm:$0xff]   ;;  %v1007_v40 = vld [vmem:[%s1434_s0 + $0x60] ss:$16 sps:$4 sm:$0xff]   ;;  %v1008_v41 = vld [vmem:[%s1434_s0 + $0x6c] ss:$16 sps:$4 sm:$0xff]  }
   0xf   :  { %952 = vmatpush1.bf16.msra.mxu1 %v1105_v11  ;;  %v1010_v42 = vld [vmem:[%s1434_s0 + $0x84] ss:$16 sps:$4 sm:$0xff]   ;;  %v1012_v43 = vld [vmem:[%s1434_s0 + $0x68] ss:$16 sps:$4 sm:$0xff]   ;;  %v1013_v44 = vld [vmem:[%s1434_s0 + $0x80] ss:$16 sps:$4 sm:$0xff]  }
  0x10   :  { %886 = vmatpush3.bf16.msra.mxu0 %v973_v12  ;;  %941 = vmatprep.subr.bf16.mxu1 %v1034_v0  ;;  %v1014_v45 = vld [vmem:[%s1434_s0 + $0x8c] ss:$16 sps:$4 sm:$0xff]   ;;  %v1016_v46 = vld [vmem:[%s1434_s0 + $0xa4] ss:$16 sps:$4 sm:$0xff]   ;;  %v1018_v47 = vld [vmem:[%s1434_s0 + $0x88] ss:$16 sps:$4 sm:$0xff]  }
  0x11   :  { %887 = vmatprep.subr.bf16.mxu0 %v974_v13  ;;  %v1019_v48 = vld [vmem:[%s1434_s0 + $0xa0] ss:$16 sps:$4 sm:$0xff]   ;;  %v1020_v49 = vld [vmem:[%s1434_s0 + $0xac] ss:$16 sps:$4 sm:$0xff]   ;;  %v1022_v50 = vld [vmem:[%s1434_s0 + $0xc4] ss:$16 sps:$4 sm:$0xff]  }
  0x12   :  { %v1024_v51 = vld [vmem:[%s1434_s0 + $0xa8] ss:$16 sps:$4 sm:$0xff]   ;;  %v1025_v52 = vld [vmem:[%s1434_s0 + $0xc0] ss:$16 sps:$4 sm:$0xff]   ;;  %v1026_v53 = vld [vmem:[%s1434_s0 + $0xcc] ss:$16 sps:$4 sm:$0xff]  }
  0x13   :  { %953 = vmatpush1.bf16.msra.mxu1 %v1118_v14  ;;  %v1030_v54 = vld [vmem:[%s1434_s0 + $0xc] ss:$16 sps:$4 sm:$0xff]   ;;  %v1031_v55 = vld [vmem:[%s1434_s0 + $0xc8] ss:$16 sps:$4 sm:$0xff]  }
  0x14   :  { %888 = vmatpush3.bf16.msra.mxu0 %v976_v15  ;;  %942 = vmatprep.subr.bf16.mxu1 %v1034_v0  ;;  %v1028_v56 = vld [vmem:[%s1434_s0 + $0x8] ss:$16 sps:$4 sm:$0xff]  }
  0x15   :  { %889 = vmatprep.subr.bf16.mxu0 %v977_v16 }
  0x17   :  { %954 = vmatpush1.bf16.msra.mxu1 %v1131_v17 }
  0x18   :  { %890 = vmatpush3.bf16.msra.mxu0 %v979_v18  ;;  %943 = vmatprep.subr.bf16.mxu1 %v1034_v0 }
  0x19   :  { %891 = vmatprep.subr.bf16.mxu0 %v980_v19 }
  0x1b   :  { %955 = vmatpush1.bf16.msra.mxu1 %v1143_v20 }
  0x1c   :  { %892 = vmatpush3.bf16.msra.mxu0 %v982_v21  ;;  %944 = vmatprep.subr.bf16.mxu1 %v1034_v0 }
  0x1d   :  { %893 = vmatprep.subr.bf16.mxu0 %v983_v22 }
  0x1f   :  { %956 = vmatpush1.bf16.msra.mxu1 %v1160_v24 }
  0x20   :  { %894 = vmatpush3.bf16.msra.mxu0 %v985_v25  ;;  %945 = vmatprep.subr.bf16.mxu1 %v1034_v0 }
  0x21   :  { %514 = vmatprep.subr.bf16.mxu0 %v1034_v0 }
  0x23   :  { %458 = vmatmul.mubr.bf16.vlgmr.msra.gmra.mrb[0].mxu0 %v986_v26  ;;  %957 = vmatpush1.bf16.msra.mxu1 %v989_v27 }
  0x24   :  { %515 = vmatpush1.bf16.msra.mxu0 %v1067_v2  ;;  %946 = vmatprep.subr.bf16.mxu1 %v1034_v0 }
  0x25   :  { %516 = vmatprep.subr.bf16.mxu0 %v1034_v0  ;;  %465 = vmatprep.mubr.bf16.mxu0 %v991_v29 }
  0x27   :  { %958 = vmatpush1.bf16.msra.mxu1 %v990_v30 }
  0x28   :  { %517 = vmatpush1.bf16.msra.mxu0 %v1080_v5  ;;  %947 = vmatprep.subr.bf16.mxu1 %v1034_v0 }
  0x29   :  { %518 = vmatprep.subr.bf16.mxu0 %v1034_v0 }
  0x2b   :  { %466 = vmatmul.mubr.bf16.gmra.mrb[4].mxu0 %v993_v31  ;;  %959 = vmatpush1.bf16.msra.mxu1 %v994_v32 }
  0x2c   :  { %519 = vmatpush1.bf16.msra.mxu0 %v1092_v8  ;;  %948 = vmatprep.subr.bf16.mxu1 %v1034_v0 }
  0x2d   :  { %520 = vmatprep.subr.bf16.mxu0 %v1034_v0  ;;  %473 = vmatprep.mubr.bf16.mxu0 %v999_v33 }
  0x2f   :  { %960 = vmatpush1.bf16.msra.mxu1 %v995_v34 }
  0x30   :  { %521 = vmatpush1.bf16.msra.mxu0 %v1105_v11 }
  0x31   :  { %522 = vmatprep.subr.bf16.mxu0 %v1034_v0 }
  0x32   :  { %555 = vmatmul.mubr.bf16.vlgmr.msra.gmra.mrb[0].mxu1 %v996_v35 }
  0x33   :  { %474 = vmatmul.mubr.bf16.gmra.mrb[8].mxu0 %v1001_v36  ;;  %848 = vmatprep.mubr.msk.bf16.mxu1 %vm403_vm0, %v1002_v37 }
  0x34   :  { %523 = vmatpush1.bf16.msra.mxu0 %v1118_v14  ;;  %481 = vmatprep.mubr.bf16.mxu0 %v1004_v38 }
  0x35   :  { %524 = vmatprep.subr.bf16.mxu0 %v1034_v0 }
  0x38   :  { %525 = vmatpush1.bf16.msra.mxu0 %v1131_v17 }
  0x39   :  { %526 = vmatprep.subr.bf16.mxu0 %v1034_v0 }
  0x3a   :  { %563 = vmatmul.mubr.bf16.gmra.mrb[4].mxu1 %v1006_v39 }
  0x3b   :  { %482 = vmatmul.mubr.bf16.gmra.mrb[12].mxu0 %v1007_v40  ;;  %849 = vmatprep.mubr.msk.bf16.mxu1 %vm403_vm0, %v1008_v41 }
  0x3c   :  { %527 = vmatpush1.bf16.msra.mxu0 %v1143_v20  ;;  %489 = vmatprep.mubr.bf16.mxu0 %v1010_v42 }
  0x3d   :  { %528 = vmatprep.subr.bf16.mxu0 %v1034_v0 }
  0x40   :  { %529 = vmatpush1.bf16.msra.mxu0 %v1160_v24 }
  0x41   :  { %530 = vmatprep.subr.bf16.mxu0 %v1034_v0 }
  0x42   :  { %571 = vmatmul.mubr.bf16.gmra.mrb[8].mxu1 %v1012_v43 }
  0x43   :  { %490 = vmatmul.mubr.bf16.gmra.mrb[16].mxu0 %v1013_v44  ;;  %850 = vmatprep.mubr.msk.bf16.mxu1 %vm403_vm0, %v1014_v45 }
  0x44   :  { %497 = vmatprep.mubr.bf16.mxu0 %v1016_v46  ;;  %531 = vmatpush1.bf16.msra.mxu0 %v989_v27 }
  0x45   :  { %532 = vmatprep.subr.bf16.mxu0 %v1034_v0 }
  0x48   :  { %533 = vmatpush1.bf16.msra.mxu0 %v990_v30 }
  0x49   :  { %534 = vmatprep.subr.bf16.mxu0 %v1034_v0 }
  0x4a   :  { %579 = vmatmul.mubr.bf16.gmra.mrb[12].mxu1 %v1018_v47 }
  0x4b   :  { %498 = vmatmul.mubr.bf16.gmra.mrb[20].mxu0 %v1019_v48  ;;  %851 = vmatprep.mubr.msk.bf16.mxu1 %vm403_vm0, %v1020_v49 }
  0x4c   :  { %505 = vmatprep.mubr.bf16.mxu0 %v1022_v50  ;;  %535 = vmatpush1.bf16.msra.mxu0 %v994_v32 }
  0x4d   :  { %536 = vmatprep.subr.bf16.mxu0 %v1034_v0 }
  0x50   :  { %537 = vmatpush1.bf16.msra.mxu0 %v995_v34 }
  0x52   :  { %587 = vmatmul.mubr.bf16.gmra.mrb[16].mxu1 %v1024_v51 }
  0x53   :  { %506 = vmatmul.mubr.bf16.gmra.mrb[24].mxu0 %v1025_v52  ;;  %852 = vmatprep.mubr.msk.bf16.mxu1 %vm403_vm0, %v1026_v53 }
  0x54   :  { %846 = vmatprep.mubr.msk.bf16.mxu0 %vm403_vm0, %v1030_v54 }
  0x5a   :  { %595 = vmatmul.mubr.bf16.gmra.mrb[20].mxu1 %v1031_v55 }
  0x5b   :  { %547 = vmatmul.mubr.bf16.vlgmr.msra.gmra.mrb[28].mxu0 %v1028_v56 }
  0xf6   :  { %v895_v57 = vpop.f32.mrb[0].mxu0 }
  0xf7   :  { %v896_v58 = vpop.f32.mrb[1].mxu0 }
  0xf8   :  { %v1291_v59 = vadd.f32 %v896_v58, %v895_v57  ;;  %v898_v60 = vpop.f32.mrb[2].mxu0 }
  0xf9   :  { %v899_v61 = vpop.f32.mrb[3].mxu0 }
  0xfa   :  { %v1293_v62 = vadd.f32 %v899_v61, %v898_v60 }
  0xfe   :  { %v901_v63 = vpop.f32.mrb[4].mxu0 }
  0xff   :  { %v902_v0 = vpop.f32.mrb[5].mxu0 }
 0x100   :  { %v903_v1 = vadd.f32 %v902_v0, %v901_v63  ;;  %v904_v2 = vpop.f32.mrb[6].mxu0 }
 0x101   :  { %v905_v3 = vpop.f32.mrb[7].mxu0 }
 0x102   :  { %v906_v4 = vadd.f32 %v905_v3, %v904_v2 }
 0x105   :  { %v556_v5 = vpop.f32.mrb[0].mxu1 }
 0x106   :  { %v1295_v6 = vadd.f32 %v903_v1, %v556_v5  ;;  %v907_v7 = vpop.f32.mrb[8].mxu0  ;;  %v558_v8 = vpop.f32.mrb[1].mxu1 }
 0x107   :  { %v908_v9 = vpop.f32.mrb[9].mxu0  ;;  %v559_v10 = vpop.f32.mrb[2].mxu1 }
 0x108   :  { %v909_v11 = vadd.f32 %v908_v9, %v907_v7  ;;  %v1297_v12 = vadd.f32 %v906_v4, %v559_v10  ;;  %v910_v13 = vpop.f32.mrb[10].mxu0  ;;  %v561_v14 = vpop.f32.mrb[3].mxu1 }
 0x109   :  { %v911_v15 = vpop.f32.mrb[11].mxu0 }
 0x10a   :  { %v912_v16 = vadd.f32 %v911_v15, %v910_v13 }
 0x10d   :  { %v564_v17 = vpop.f32.mrb[4].mxu1 }
 0x10e   :  { %v1299_v18 = vadd.f32 %v909_v11, %v564_v17  ;;  %v913_v19 = vpop.f32.mrb[12].mxu0  ;;  %v566_v20 = vpop.f32.mrb[5].mxu1 }
 0x10f   :  { %v914_v21 = vpop.f32.mrb[13].mxu0  ;;  %v567_v22 = vpop.f32.mrb[6].mxu1 }
 0x110   :  { %v915_v23 = vadd.f32 %v914_v21, %v913_v19  ;;  %v1301_v24 = vadd.f32 %v912_v16, %v567_v22  ;;  %v916_v25 = vpop.f32.mrb[14].mxu0  ;;  %v569_v26 = vpop.f32.mrb[7].mxu1 }
 0x111   :  { %v917_v27 = vpop.f32.mrb[15].mxu0  ;;  %v627_v26 = vmul.f32 %v1299_v18, %v1299_v18 }
 0x112   :  { %v918_v28 = vadd.f32 %v917_v27, %v916_v25 }
 0x115   :  { %v572_v29 = vpop.f32.mrb[8].mxu1 }
 0x116   :  { %v1303_v30 = vadd.f32 %v915_v23, %v572_v29  ;;  %v919_v31 = vpop.f32.mrb[16].mxu0  ;;  %v574_v32 = vpop.f32.mrb[9].mxu1  ;;  %v628_v29 = vmul.f32 %v1301_v24, %v1301_v24 }
 0x117   :  { %v920_v33 = vpop.f32.mrb[17].mxu0  ;;  %v575_v34 = vpop.f32.mrb[10].mxu1 }
 0x118   :  { %v921_v35 = vadd.f32 %v920_v33, %v919_v31  ;;  %v1305_v36 = vadd.f32 %v918_v28, %v575_v34  ;;  %v922_v37 = vpop.f32.mrb[18].mxu0  ;;  %v577_v38 = vpop.f32.mrb[11].mxu1  ;;  %v629_v33 = vmul.f32 %v1303_v30, %v1303_v30 }
 0x119   :  { %v923_v39 = vpop.f32.mrb[19].mxu0 }
 0x11a   :  { %v924_v40 = vadd.f32 %v923_v39, %v922_v37  ;;  %v630_v37 = vmul.f32 %v1305_v36, %v1305_v36 }
 0x11d   :  { %v580_v41 = vpop.f32.mrb[12].mxu1 }
 0x11e   :  { %v1307_v42 = vadd.f32 %v921_v35, %v580_v41  ;;  %v925_v43 = vpop.f32.mrb[20].mxu0  ;;  %v582_v44 = vpop.f32.mrb[13].mxu1 }
 0x11f   :  { %v926_v45 = vpop.f32.mrb[21].mxu0  ;;  %v583_v46 = vpop.f32.mrb[14].mxu1 }
 0x120   :  { %v927_v47 = vadd.f32 %v926_v45, %v925_v43  ;;  %v1309_v48 = vadd.f32 %v924_v40, %v583_v46  ;;  %v928_v49 = vpop.f32.mrb[22].mxu0  ;;  %v585_v50 = vpop.f32.mrb[15].mxu1  ;;  %v631_v40 = vmul.f32 %v1307_v42, %v1307_v42 }
 0x121   :  { %v929_v51 = vpop.f32.mrb[23].mxu0 }
 0x122   :  { %v930_v52 = vadd.f32 %v929_v51, %v928_v49  ;;  %v632_v44 = vmul.f32 %v1309_v48, %v1309_v48 }
 0x125   :  { %v588_v53 = vpop.f32.mrb[16].mxu1 }
 0x126   :  { %v1311_v54 = vadd.f32 %v927_v47, %v588_v53  ;;  %v931_v55 = vpop.f32.mrb[24].mxu0  ;;  %v590_v56 = vpop.f32.mrb[17].mxu1 }
 0x127   :  { %v932_v57 = vpop.f32.mrb[25].mxu0  ;;  %v591_v58 = vpop.f32.mrb[18].mxu1 }
 0x128   :  { %v933_v60 = vadd.f32 %v932_v57, %v931_v55  ;;  %v1313_v61 = vadd.f32 %v930_v52, %v591_v58  ;;  %v934_v63 = vpop.f32.mrb[26].mxu0  ;;  %v593_v0 = vpop.f32.mrb[19].mxu1  ;;  %v633_v47 = vmul.f32 %v1311_v54, %v1311_v54 }
 0x129   :  { %v935_v1 = vpop.f32.mrb[27].mxu0 }
 0x12a   :  { %v936_v2 = vadd.f32 %v935_v1, %v934_v63  ;;  %v634_v51 = vmul.f32 %v1313_v61, %v1313_v61 }
 0x12d   :  { %v596_v3 = vpop.f32.mrb[20].mxu1 }
 0x12e   :  { %v1315_v4 = vadd.f32 %v933_v60, %v596_v3  ;;  %v548_v5 = vpop.f32.mrb[28].mxu0  ;;  %v598_v7 = vpop.f32.mrb[21].mxu1 }
 0x12f   :  { %v1318_v8 = vadd.f32 %v1291_v59, %v548_v5  ;;  %v550_v9 = vpop.f32.mrb[29].mxu0  ;;  %v599_v10 = vpop.f32.mrb[22].mxu1  ;;  %v625_v59 = vmul.f32 %v1295_v6, %v1295_v6 }
 0x130   :  { %v600_v11 = vadd.f32 %v936_v2, %v599_v10  ;;  %v551_v13 = vpop.f32.mrb[30].mxu0  ;;  %v601_v14 = vpop.f32.mrb[23].mxu1  ;;  %v635_v55 = vmul.f32 %v1315_v4, %v1315_v4 }
 0x131   :  { %v1321_v15 = vadd.f32 %v1293_v62, %v551_v13  ;;  %v553_v16 = vpop.f32.mrb[31].mxu0  ;;  %v623_v17 = vmul.f32 %v1318_v8, %v1318_v8  ;;  %v626_v62 = vmul.f32 %v1297_v12, %v1297_v12 }
 0x132   :  { %v636_v58 = vmul.f32 %v600_v11, %v600_v11 }
 0x133   :  { %v603_v19 = vadd.f32 %v1321_v15, %v1318_v8  ;;  %v624_v20 = vmul.f32 %v1321_v15, %v1321_v15 }
 0x135   :  { %v604_v21 = vadd.f32 %v603_v19, %v1295_v6  ;;  %v637_v22 = vadd.f32 %v624_v20, %v623_v17 }
 0x137   :  { %v605_v23 = vadd.f32 %v604_v21, %v1297_v12  ;;  %v638_v25 = vadd.f32 %v637_v22, %v625_v59 }
 0x139   :  { %v606_v27 = vadd.f32 %v605_v23, %v1299_v18  ;;  %v639_v28 = vadd.f32 %v638_v25, %v626_v62  ;;  %v668_v23 = vlaneseq }
 0x13b   :  { %v607_v31 = vadd.f32 %v606_v27, %v1301_v24  ;;  %v640_v32 = vadd.f32 %v639_v28, %v627_v26  ;;  %v669_v25 = vshrl.u32 %v668_v23, 7  ;;  %v660_v26 = vld [vmem:[%s1435_s2] sm:$0x1] }
 0x13d   :  { %v608_v34 = vadd.f32 %v607_v31, %v1303_v30  ;;  %v641_v35 = vadd.f32 %v640_v32, %v628_v29  ;;  %v670_v27 = vsub.s32 0, %v669_v25  ;;  %v664_v31 = vld [vmem:[%s1436_s3] sm:$0x1] }
 0x13f   :  { %v609_v38 = vadd.f32 %v608_v34, %v1305_v36  ;;  %v642_v39 = vadd.f32 %v641_v35, %v629_v33 }
 0x141   :  { %v610_v41 = vadd.f32 %v609_v38, %v1307_v42  ;;  %v643_v43 = vadd.f32 %v642_v39, %v630_v37 }
 0x143   :  { %v611_v45 = vadd.f32 %v610_v41, %v1309_v48  ;;  %v644_v46 = vadd.f32 %v643_v43, %v631_v40 }
 0x145   :  { %v612_v49 = vadd.f32 %v611_v45, %v1311_v54  ;;  %v645_v50 = vadd.f32 %v644_v46, %v632_v44 }
 0x147   :  { %v613_v52 = vadd.f32 %v612_v49, %v1313_v61  ;;  %v646_v53 = vadd.f32 %v645_v50, %v633_v47 }
 0x149   :  { %v614_v56 = vadd.f32 %v613_v52, %v1315_v4  ;;  %v647_v57 = vadd.f32 %v646_v53, %v634_v51 }
 0x14b   :  { %v615_v60 = vadd.f32 %v614_v56, %v600_v11  ;;  %v648_v63 = vadd.f32 %v647_v57, %v635_v55 }
 0x14d   :  { %v616_v0 = vrot.slane %v615_v60, 4  ;;  %v649_v1 = vadd.f32 %v648_v63, %v636_v58 }
 0x14f   :  { %v617_v2 = vadd.f32 %v616_v0, %v615_v60  ;;  %v650_v3 = vrot.slane %v649_v1, 4 }
 0x151   :  { %v618_v5 = vrot.slane %v617_v2, 2  ;;  %v651_v7 = vadd.f32 %v650_v3, %v649_v1 }
 0x153   :  { %v619_v9 = vadd.f32 %v618_v5, %v617_v2  ;;  %v652_v10 = vrot.slane %v651_v7, 2 }
 0x155   :  { %v620_v13 = vrot.slane %v619_v9, 1  ;;  %v653_v14 = vadd.f32 %v652_v10, %v651_v7 }
 0x157   :  { %v621_v16 = vadd.f32 %v620_v13, %v619_v9  ;;  %v654_v17 = vrot.slane %v653_v14, 1 }
 0x159   :  { %v622_v19 = vmul.f32 0.010204081, %v621_v16  ;;  %v655_v20 = vadd.f32 %v654_v17, %v653_v14 }
 0x15b   :  { %v656_v59 = vmul.f32 0.010204081, %v655_v20  ;;  %v657_v21 = vmul.f32 %v622_v19, %v622_v19 }
 0x15d   :  { %v658_v22 = vsub.f32 %v656_v59, %v657_v21 }
 0x15f   :  { %v659_v62 = vmax.f32 %v658_v22, 0.0 }
 0x161   :  { %v661_v11 = vadd.f32 1e-05, %v659_v62 }
 0x163   :  { %1032 = vrsqrt.f32 %v661_v11 }
 0x16d   :  { %v1033_v28 = vpop.eup %1032 }
 0x16e   :  { %v663_v29 = vmul.f32 %v1033_v28, %v660_v26 }
 0x170   :  { %v665_v32 = vmul.f32 %v663_v29, %v622_v19  ;;  %v671_v33 = vrot.slane %v663_v29, %v670_v27 }
 0x172   :  { %v666_v34 = vsub.f32 %v664_v31, %v665_v32  ;;  %v674_v35 = vmul.f32 %v671_v33, %v1321_v15  ;;  %v675_v37 = vmul.f32 %v671_v33, %v1295_v6  ;;  %v676_v38 = vmul.f32 %v671_v33, %v1297_v12 }
 0x173   :  { %v677_v39 = vmul.f32 %v671_v33, %v1299_v18  ;;  %v678_v40 = vmul.f32 %v671_v33, %v1301_v24  ;;  %v679_v41 = vmul.f32 %v671_v33, %v1303_v30  ;;  %v680_v43 = vmul.f32 %v671_v33, %v1305_v36 }
 0x174   :  { %v681_v44 = vmul.f32 %v671_v33, %v1307_v42  ;;  %v682_v45 = vmul.f32 %v671_v33, %v1309_v48  ;;  %v683_v46 = vmul.f32 %v671_v33, %v1311_v54  ;;  %v673_v15 = vmul.f32 %v671_v33, %v1318_v8 }
 0x175   :  { %v684_v6 = vmul.f32 %v671_v33, %v1313_v61  ;;  %v685_v12 = vmul.f32 %v671_v33, %v1315_v4  ;;  %v690_v47 = vrot.slane %v666_v34, %v670_v27 }
 0x177   :  { %v692_v18 = vadd.f32 %v690_v47, %v673_v15  ;;  %v693_v24 = vadd.f32 %v690_v47, %v674_v35  ;;  %v694_v49 = vadd.f32 %v690_v47, %v675_v37  ;;  %v695_v30 = vadd.f32 %v690_v47, %v676_v38 }
 0x178   :  { %v696_v36 = vadd.f32 %v690_v47, %v677_v39  ;;  %v697_v50 = vadd.f32 %v690_v47, %v678_v40  ;;  %v698_v42 = vadd.f32 %v690_v47, %v679_v41  ;;  %v699_v51 = vadd.f32 %v690_v47, %v680_v43 }
 0x179   :  { %v700_v48 = vadd.f32 %v690_v47, %v681_v44  ;;  %v701_v52 = vadd.f32 %v690_v47, %v682_v45  ;;  %v702_v54 = vadd.f32 %v690_v47, %v683_v46  ;;  %v703_v53 = vadd.f32 %v690_v47, %v684_v6 }
 0x17a   :  { %v704_v8 = vadd.f32 %v690_v47, %v685_v12  ;;  %v705_v55 = vmax.f32 %v692_v18, 0.0  ;;  %v706_v61 = vmax.f32 %v693_v24, 0.0  ;;  %v707_v56 = vmax.f32 %v694_v49, 0.0 }
 0x17b   :  { %v708_v4 = vmax.f32 %v695_v30, 0.0  ;;  %v709_v57 = vmax.f32 %v696_v36, 0.0  ;;  %v710_v58 = vmax.f32 %v697_v50, 0.0  ;;  %v711_v60 = vmax.f32 %v698_v42, 0.0 }
 0x17c   :  { %v712_v63 = vmax.f32 %v699_v51, 0.0  ;;  %v713_v0 = vmax.f32 %v700_v48, 0.0  ;;  %v714_v1 = vmax.f32 %v701_v52, 0.0  ;;  %v715_v2 = vmax.f32 %v702_v54, 0.0 }
 0x17d   :  { %v716_v3 = vmax.f32 %v703_v53, 0.0  ;;  %v717_v5 = vmax.f32 %v704_v8, 0.0  ;;  %v866_v7 = vpack.c.bf16 %v705_v55, %v705_v55  ;;  %v867_v9 = vpack.c.bf16 %v706_v61, %v706_v61 }
 0x17e   :  { %v868_v10 = vpack.c.bf16 %v707_v56, %v707_v56  ;;  %v869_v13 = vpack.c.bf16 %v708_v4, %v708_v4  ;;  %v870_v14 = vpack.c.bf16 %v709_v57, %v709_v57  ;;  %v871_v16 = vpack.c.bf16 %v710_v58, %v710_v58 }
 0x17f   :  { %v872_v17 = vpack.c.bf16 %v711_v60, %v711_v60  ;;  %v873_v19 = vpack.c.bf16 %v712_v63, %v712_v63  ;;  %v874_v20 = vpack.c.bf16 %v713_v0, %v713_v0  ;;  %v875_v59 = vpack.c.bf16 %v714_v1, %v714_v1  ;;  %772 = vst.msk [vmem:[%s1437_s4] sm:$0xf] %vm771_vm1, %v866_v7 }
 0x180   :  { %773 = vst.msk [vmem:[%s1437_s4 + $0x4] sm:$0xf] %vm771_vm1, %v867_v9  ;;  %v876_v21 = vpack.c.bf16 %v715_v2, %v715_v2  ;;  %v877_v22 = vpack.c.bf16 %v716_v3, %v716_v3  ;;  %v878_v62 = vpack.c.bf16 %v717_v5, %v717_v5  ;;  %774 = vst.msk [vmem:[%s1437_s4 + $0x8] sm:$0xf] %vm771_vm1, %v868_v10 }
 0x181   :  { %775 = vst.msk [vmem:[%s1437_s4 + $0xc] sm:$0xf] %vm771_vm1, %v869_v13  ;;  %776 = vst.msk [vmem:[%s1437_s4 + $0x10] sm:$0xf] %vm771_vm1, %v870_v14 }
 0x182   :  { %777 = vst.msk [vmem:[%s1437_s4 + $0x14] sm:$0xf] %vm771_vm1, %v871_v16  ;;  %778 = vst.msk [vmem:[%s1437_s4 + $0x18] sm:$0xf] %vm771_vm1, %v872_v17 }
 0x183   :  { %779 = vst.msk [vmem:[%s1437_s4 + $0x1c] sm:$0xf] %vm771_vm1, %v873_v19  ;;  %780 = vst.msk [vmem:[%s1437_s4 + $0x20] sm:$0xf] %vm771_vm1, %v874_v20 }
 0x184   :  { %781 = vst.msk [vmem:[%s1437_s4 + $0x24] sm:$0xf] %vm771_vm1, %v875_v59  ;;  %782 = vst.msk [vmem:[%s1437_s4 + $0x28] sm:$0xf] %vm771_vm1, %v876_v21 }
 0x185   :  { %783 = vst.msk [vmem:[%s1437_s4 + $0x2c] sm:$0xf] %vm771_vm1, %v877_v22 }
 0x186   :  { %785 = vst.msk [vmem:[%s1437_s4 + $0x30] sm:$0x1] %vm784_vm2, %v878_v62 }

// kernel: stem_forward.19
= control target key start
LH: loop header
LB: loop body
LE: loop exit
PB: predicated region body
PF: predicated region fallthrough
CT: control target
= control target key end

     0   :  { %vm1397_vm0 = vcmask 523264   ;;  %vm1830_vm1 = vcmask 1043456   ;;  %vm1831_vm2 = vcmask 523268   ;;  %s3187_s1 = inlined_call_operand.vmem [shape: bf16[1728,192], index: 1, kind: input, shape index: {}]   ;;  %s3188_s0 = inlined_call_operand.vmem [shape: bf16[16,1728], index: 0, kind: input, shape index: {}]   ;;  %s3189_s2 = inlined_call_operand.vmem [shape: f32[1,192], index: 2, kind: input, shape index: {}]   ;;  %s3190_s3 = inlined_call_operand.vmem [shape: f32[1,192], index: 3, kind: input, shape index: {}]   ;;  %s3191_s4 = inlined_call_operand.vmem [shape: bf16[8,192], index: 4, kind: output, shape index: {}]  }
   0x1   :  { %v2096_v0 = vld [vmem:[%s3187_s1 + $0x4] ss:$8 sps:$4 sm:$0xff]   ;;  %v2100_v2 = vld [vmem:[%s3187_s1] ss:$8 sps:$4 sm:$0xff]   ;;  %v2102_v4 = vld [vmem:[%s3187_s1 + $0x14] ss:$8 sps:$4 sm:$0xff]  }
   0x2   :  { %v2098_v1 = vld [vmem:[%s3187_s1 + $0x304] ss:$8 sps:$4 sm:$0xff]   ;;  %1401 = vmatprep.subr.bf16.mxu1 %v2096_v0  ;;  %v2101_v3 = vld [vmem:[%s3187_s1 + $0x300] ss:$8 sps:$4 sm:$0xff]   ;;  %v2104_v5 = vld [vmem:[%s3187_s1 + $0x314] ss:$8 sps:$4 sm:$0xff]  }
   0x3   :  { %1530 = vmatprep.subr.bf16.mxu0 %v2098_v1  ;;  %1402 = vmatpush1.bf16.msra.mxu1 %v2100_v2  ;;  %v2106_v6 = vld [vmem:[%s3187_s1 + $0x10] ss:$8 sps:$4 sm:$0xff]   ;;  %v2108_v8 = vld [vmem:[%s3187_s1 + $0x24] ss:$8 sps:$4 sm:$0xff]   ;;  %v2112_v10 = vld [vmem:[%s3187_s1 + $0x20] ss:$8 sps:$4 sm:$0xff]  }
   0x4   :  { %1531 = vmatpush1.bf16.msra.mxu0 %v2101_v3  ;;  %1403 = vmatprep.subr.bf16.mxu1 %v2102_v4  ;;  %v2107_v7 = vld [vmem:[%s3187_s1 + $0x310] ss:$8 sps:$4 sm:$0xff]   ;;  %v2110_v9 = vld [vmem:[%s3187_s1 + $0x324] ss:$8 sps:$4 sm:$0xff]   ;;  %v2113_v11 = vld [vmem:[%s3187_s1 + $0x320] ss:$8 sps:$4 sm:$0xff]  }
   0x5   :  { %1532 = vmatprep.subr.bf16.mxu0 %v2104_v5  ;;  %v2114_v12 = vld [vmem:[%s3187_s1 + $0x34] ss:$8 sps:$4 sm:$0xff]   ;;  %v2118_v14 = vld [vmem:[%s3187_s1 + $0x30] ss:$8 sps:$4 sm:$0xff]   ;;  %v2120_v16 = vld [vmem:[%s3187_s1 + $0x44] ss:$8 sps:$4 sm:$0xff]  }
   0x6   :  { %v2116_v13 = vld [vmem:[%s3187_s1 + $0x334] ss:$8 sps:$4 sm:$0xff]   ;;  %v2119_v15 = vld [vmem:[%s3187_s1 + $0x330] ss:$8 sps:$4 sm:$0xff]   ;;  %v2122_v17 = vld [vmem:[%s3187_s1 + $0x344] ss:$8 sps:$4 sm:$0xff]  }
   0x7   :  { %1404 = vmatpush1.bf16.msra.mxu1 %v2106_v6  ;;  %v2124_v18 = vld [vmem:[%s3187_s1 + $0x40] ss:$8 sps:$4 sm:$0xff]   ;;  %v2126_v20 = vld [vmem:[%s3187_s1 + $0x54] ss:$8 sps:$4 sm:$0xff]   ;;  %v2130_v22 = vld [vmem:[%s3187_s1 + $0x50] ss:$8 sps:$4 sm:$0xff]  }
   0x8   :  { %1533 = vmatpush1.bf16.msra.mxu0 %v2107_v7  ;;  %1405 = vmatprep.subr.bf16.mxu1 %v2108_v8  ;;  %v2125_v19 = vld [vmem:[%s3187_s1 + $0x340] ss:$8 sps:$4 sm:$0xff]   ;;  %v2128_v21 = vld [vmem:[%s3187_s1 + $0x354] ss:$8 sps:$4 sm:$0xff]   ;;  %v2131_v23 = vld [vmem:[%s3187_s1 + $0x350] ss:$8 sps:$4 sm:$0xff]  }
   0x9   :  { %1534 = vmatprep.subr.bf16.mxu0 %v2110_v9  ;;  %v2132_v24 = vld [vmem:[%s3187_s1 + $0x64] ss:$8 sps:$4 sm:$0xff]   ;;  %v2136_v26 = vld [vmem:[%s3187_s1 + $0x60] ss:$8 sps:$4 sm:$0xff]   ;;  %v2138_v28 = vld [vmem:[%s3187_s1 + $0x74] ss:$8 sps:$4 sm:$0xff]  }
   0xa   :  { %v2134_v25 = vld [vmem:[%s3187_s1 + $0x364] ss:$8 sps:$4 sm:$0xff]   ;;  %v2137_v27 = vld [vmem:[%s3187_s1 + $0x360] ss:$8 sps:$4 sm:$0xff]   ;;  %v2140_v29 = vld [vmem:[%s3187_s1 + $0x374] ss:$8 sps:$4 sm:$0xff]  }
   0xb   :  { %1406 = vmatpush1.bf16.msra.mxu1 %v2112_v10  ;;  %v2142_v30 = vld [vmem:[%s3187_s1 + $0x70] ss:$8 sps:$4 sm:$0xff]   ;;  %v2144_v32 = vld [vmem:[%s3187_s1 + $0x84] ss:$8 sps:$4 sm:$0xff]   ;;  %v2148_v34 = vld [vmem:[%s3187_s1 + $0x80] ss:$8 sps:$4 sm:$0xff]  }
   0xc   :  { %1535 = vmatpush1.bf16.msra.mxu0 %v2113_v11  ;;  %1407 = vmatprep.subr.bf16.mxu1 %v2114_v12  ;;  %v2143_v31 = vld [vmem:[%s3187_s1 + $0x370] ss:$8 sps:$4 sm:$0xff]   ;;  %v2146_v33 = vld [vmem:[%s3187_s1 + $0x384] ss:$8 sps:$4 sm:$0xff]   ;;  %v2149_v35 = vld [vmem:[%s3187_s1 + $0x380] ss:$8 sps:$4 sm:$0xff]  }
   0xd   :  { %1536 = vmatprep.subr.bf16.mxu0 %v2116_v13  ;;  %v2150_v36 = vld [vmem:[%s3187_s1 + $0x94] ss:$8 sps:$4 sm:$0xff]   ;;  %v2154_v38 = vld [vmem:[%s3187_s1 + $0x90] ss:$8 sps:$4 sm:$0xff]   ;;  %v2156_v40 = vld [vmem:[%s3187_s1 + $0xa4] ss:$8 sps:$4 sm:$0xff]  }
   0xe   :  { %v2152_v37 = vld [vmem:[%s3187_s1 + $0x394] ss:$8 sps:$4 sm:$0xff]   ;;  %v2155_v39 = vld [vmem:[%s3187_s1 + $0x390] ss:$8 sps:$4 sm:$0xff]   ;;  %v2158_v41 = vld [vmem:[%s3187_s1 + $0x3a4] ss:$8 sps:$4 sm:$0xff]  }
   0xf   :  { %1408 = vmatpush1.bf16.msra.mxu1 %v2118_v14  ;;  %v2160_v42 = vld [vmem:[%s3187_s1 + $0xa0] ss:$8 sps:$4 sm:$0xff]   ;;  %v2162_v44 = vld [vmem:[%s3187_s1 + $0xb4] ss:$8 sps:$4 sm:$0xff]   ;;  %v2166_v46 = vld [vmem:[%s3187_s1 + $0xb0] ss:$8 sps:$4 sm:$0xff]  }
  0x10   :  { %1537 = vmatpush1.bf16.msra.mxu0 %v2119_v15  ;;  %1409 = vmatprep.subr.bf16.mxu1 %v2120_v16  ;;  %v2161_v43 = vld [vmem:[%s3187_s1 + $0x3a0] ss:$8 sps:$4 sm:$0xff]   ;;  %v2164_v45 = vld [vmem:[%s3187_s1 + $0x3b4] ss:$8 sps:$4 sm:$0xff]   ;;  %v2167_v47 = vld [vmem:[%s3187_s1 + $0x3b0] ss:$8 sps:$4 sm:$0xff]  }
  0x11   :  { %1538 = vmatprep.subr.bf16.mxu0 %v2122_v17  ;;  %v2194_v48 = vld [vmem:[%s3188_s0 + $0x4] ss:$56 sps:$4 sm:$0xff]   ;;  %v2172_v52 = vld [vmem:[%s3187_s1 + $0xc0] ss:$8 sps:$4 sm:$0xff]   ;;  %v2178_v56 = vld [vmem:[%s3187_s1 + $0xd0] ss:$8 sps:$4 sm:$0xff]  }
  0x12   :  { %v2168_v49 = vld [vmem:[%s3187_s1 + $0xc4] ss:$8 sps:$4 sm:$0xff]   ;;  %1433 = vmatprep.mubr.bf16.mxu1 %v2194_v48  ;;  %v2200_v51 = vld [vmem:[%s3188_s0 + $0x1c] ss:$56 sps:$4 sm:$0xff]   ;;  %v2173_v53 = vld [vmem:[%s3187_s1 + $0x3c0] ss:$8 sps:$4 sm:$0xff]  }
  0x13   :  { %1410 = vmatpush1.bf16.msra.mxu1 %v2124_v18  ;;  %v2170_v50 = vld [vmem:[%s3187_s1 + $0x3c4] ss:$8 sps:$4 sm:$0xff]   ;;  %v2174_v54 = vld [vmem:[%s3187_s1 + $0xd4] ss:$8 sps:$4 sm:$0xff]   ;;  %1562 = vmatprep.mubr.bf16.mxu0 %v2200_v51  ;;  %v2179_v57 = vld [vmem:[%s3187_s1 + $0x3d0] ss:$8 sps:$4 sm:$0xff]  }
  0x14   :  { %1539 = vmatpush1.bf16.msra.mxu0 %v2125_v19  ;;  %1411 = vmatprep.subr.bf16.mxu1 %v2126_v20  ;;  %v2176_v55 = vld [vmem:[%s3187_s1 + $0x3d4] ss:$8 sps:$4 sm:$0xff]   ;;  %v2180_v58 = vld [vmem:[%s3187_s1 + $0xe4] ss:$8 sps:$4 sm:$0xff]   ;;  %v2184_v60 = vld [vmem:[%s3187_s1 + $0xe0] ss:$8 sps:$4 sm:$0xff]  }
  0x15   :  { %1540 = vmatprep.subr.bf16.mxu0 %v2128_v21  ;;  %v2182_v59 = vld [vmem:[%s3187_s1 + $0x3e4] ss:$8 sps:$4 sm:$0xff]   ;;  %v2185_v61 = vld [vmem:[%s3187_s1 + $0x3e0] ss:$8 sps:$4 sm:$0xff]   ;;  %v2186_v62 = vld [vmem:[%s3187_s1 + $0xf4] ss:$8 sps:$4 sm:$0xff]  }
  0x16   :  { %v2188_v63 = vld [vmem:[%s3187_s1 + $0x3f4] ss:$8 sps:$4 sm:$0xff]   ;;  %v2190_v0 = vld [vmem:[%s3187_s1 + $0xf0] ss:$8 sps:$4 sm:$0xff]   ;;  %v2197_v2 = vld [vmem:[%s3187_s1 + $0x104] ss:$8 sps:$4 sm:$0xff]  }
  0x17   :  { %1412 = vmatpush1.bf16.msra.mxu1 %v2130_v22  ;;  %v2191_v1 = vld [vmem:[%s3187_s1 + $0x3f0] ss:$8 sps:$4 sm:$0xff]   ;;  %v2203_v3 = vld [vmem:[%s3187_s1 + $0x404] ss:$8 sps:$4 sm:$0xff]   ;;  %v2195_v5 = vld [vmem:[%s3187_s1 + $0x100] ss:$8 sps:$4 sm:$0xff]  }
  0x18   :  { %1541 = vmatpush1.bf16.msra.mxu0 %v2131_v23  ;;  %1413 = vmatprep.subr.bf16.mxu1 %v2132_v24  ;;  %v2192_v4 = vld [vmem:[%s3188_s0] ss:$56 sps:$4 sm:$0xff]   ;;  %v2206_v8 = vld [vmem:[%s3187_s1 + $0x114] ss:$8 sps:$4 sm:$0xff]   ;;  %v2212_v12 = vld [vmem:[%s3187_s1 + $0x124] ss:$8 sps:$4 sm:$0xff]  }
  0x19   :  { %1542 = vmatprep.subr.bf16.mxu0 %v2134_v25  ;;  %v2198_v6 = vld [vmem:[%s3188_s0 + $0x18] ss:$56 sps:$4 sm:$0xff]   ;;  %v2201_v7 = vld [vmem:[%s3187_s1 + $0x400] ss:$8 sps:$4 sm:$0xff]   ;;  %v2209_v9 = vld [vmem:[%s3187_s1 + $0x414] ss:$8 sps:$4 sm:$0xff]  }
  0x1a   :  { %v2204_v10 = vld [vmem:[%s3187_s1 + $0x110] ss:$8 sps:$4 sm:$0xff]   ;;  %v2215_v13 = vld [vmem:[%s3187_s1 + $0x424] ss:$8 sps:$4 sm:$0xff]   ;;  %v2210_v14 = vld [vmem:[%s3187_s1 + $0x120] ss:$8 sps:$4 sm:$0xff]  }
  0x1b   :  { %1414 = vmatpush1.bf16.msra.mxu1 %v2136_v26  ;;  %v2207_v11 = vld [vmem:[%s3187_s1 + $0x410] ss:$8 sps:$4 sm:$0xff]   ;;  %v2213_v15 = vld [vmem:[%s3187_s1 + $0x420] ss:$8 sps:$4 sm:$0xff]   ;;  %v2218_v16 = vld [vmem:[%s3187_s1 + $0x134] ss:$8 sps:$4 sm:$0xff]  }
  0x1c   :  { %1543 = vmatpush1.bf16.msra.mxu0 %v2137_v27  ;;  %1415 = vmatprep.subr.bf16.mxu1 %v2138_v28  ;;  %v2221_v17 = vld [vmem:[%s3187_s1 + $0x434] ss:$8 sps:$4 sm:$0xff]   ;;  %v2216_v18 = vld [vmem:[%s3187_s1 + $0x130] ss:$8 sps:$4 sm:$0xff]   ;;  %v2224_v20 = vld [vmem:[%s3187_s1 + $0x144] ss:$8 sps:$4 sm:$0xff]  }
  0x1d   :  { %1544 = vmatprep.subr.bf16.mxu0 %v2140_v29  ;;  %v2219_v19 = vld [vmem:[%s3187_s1 + $0x430] ss:$8 sps:$4 sm:$0xff]   ;;  %v2227_v21 = vld [vmem:[%s3187_s1 + $0x444] ss:$8 sps:$4 sm:$0xff]   ;;  %v2222_v22 = vld [vmem:[%s3187_s1 + $0x140] ss:$8 sps:$4 sm:$0xff]  }
  0x1e   :  { %v2225_v23 = vld [vmem:[%s3187_s1 + $0x440] ss:$8 sps:$4 sm:$0xff]   ;;  %v2230_v24 = vld [vmem:[%s3187_s1 + $0x154] ss:$8 sps:$4 sm:$0xff]   ;;  %v2228_v26 = vld [vmem:[%s3187_s1 + $0x150] ss:$8 sps:$4 sm:$0xff]  }
  0x1f   :  { %1416 = vmatpush1.bf16.msra.mxu1 %v2142_v30  ;;  %v2233_v25 = vld [vmem:[%s3187_s1 + $0x454] ss:$8 sps:$4 sm:$0xff]   ;;  %v2231_v27 = vld [vmem:[%s3187_s1 + $0x450] ss:$8 sps:$4 sm:$0xff]   ;;  %v2236_v28 = vld [vmem:[%s3187_s1 + $0x164] ss:$8 sps:$4 sm:$0xff]  }
  0x20   :  { %1545 = vmatpush1.bf16.msra.mxu0 %v2143_v31  ;;  %1417 = vmatprep.subr.bf16.mxu1 %v2144_v32  ;;  %v2239_v29 = vld [vmem:[%s3187_s1 + $0x464] ss:$8 sps:$4 sm:$0xff]   ;;  %v2234_v30 = vld [vmem:[%s3187_s1 + $0x160] ss:$8 sps:$4 sm:$0xff]   ;;  %v2242_v32 = vld [vmem:[%s3187_s1 + $0x174] ss:$8 sps:$4 sm:$0xff]  }
  0x21   :  { %1546 = vmatprep.subr.bf16.mxu0 %v2146_v33  ;;  %v2237_v31 = vld [vmem:[%s3187_s1 + $0x460] ss:$8 sps:$4 sm:$0xff]   ;;  %v2245_v33 = vld [vmem:[%s3187_s1 + $0x474] ss:$8 sps:$4 sm:$0xff]   ;;  %vm1832_vm3 = vmor %vm1831_vm2, %vm1830_vm1 }
  0x22   :  { %v2258_v48 = vld [vmem:[%s3187_s1 + $0x1a0] ss:$8 sps:$4 sm:$0xff]   ;;  %v2269_v51 = vld [vmem:[%s3187_s1 + $0x4b4] ss:$8 sps:$4 sm:$0xff]  }
  0x23   :  { %1418 = vmatpush1.bf16.msra.mxu1 %v2148_v34  ;;  %v2296_v34 = vld [vmem:[%s3188_s0 + $0xc] ss:$56 sps:$4 sm:$0xff]  }
  0x24   :  { %1547 = vmatpush1.bf16.msra.mxu0 %v2149_v35  ;;  %1419 = vmatprep.subr.bf16.mxu1 %v2150_v36  ;;  %v2240_v35 = vld [vmem:[%s3187_s1 + $0x170] ss:$8 sps:$4 sm:$0xff]  }
  0x25   :  { %1548 = vmatprep.subr.bf16.mxu0 %v2152_v37  ;;  %v2243_v36 = vld [vmem:[%s3187_s1 + $0x470] ss:$8 sps:$4 sm:$0xff]   ;;  %v2302_v37 = vld [vmem:[%s3188_s0 + $0x24] ss:$56 sps:$4 sm:$0xff]  }
  0x27   :  { %1420 = vmatpush1.bf16.msra.mxu1 %v2154_v38  ;;  %v2248_v38 = vld [vmem:[%s3187_s1 + $0x184] ss:$8 sps:$4 sm:$0xff]  }
  0x28   :  { %1549 = vmatpush1.bf16.msra.mxu0 %v2155_v39  ;;  %1421 = vmatprep.subr.bf16.mxu1 %v2156_v40  ;;  %v2251_v39 = vld [vmem:[%s3187_s1 + $0x484] ss:$8 sps:$4 sm:$0xff]   ;;  %v2246_v40 = vld [vmem:[%s3187_s1 + $0x180] ss:$8 sps:$4 sm:$0xff]  }
  0x29   :  { %1550 = vmatprep.subr.bf16.mxu0 %v2158_v41  ;;  %v2249_v41 = vld [vmem:[%s3187_s1 + $0x480] ss:$8 sps:$4 sm:$0xff]  }
  0x2b   :  { %1422 = vmatpush1.bf16.msra.mxu1 %v2160_v42  ;;  %v2254_v42 = vld [vmem:[%s3187_s1 + $0x194] ss:$8 sps:$4 sm:$0xff]  }
  0x2c   :  { %1551 = vmatpush1.bf16.msra.mxu0 %v2161_v43  ;;  %1423 = vmatprep.subr.bf16.mxu1 %v2162_v44  ;;  %v2257_v43 = vld [vmem:[%s3187_s1 + $0x494] ss:$8 sps:$4 sm:$0xff]   ;;  %v2252_v44 = vld [vmem:[%s3187_s1 + $0x190] ss:$8 sps:$4 sm:$0xff]  }
  0x2d   :  { %1552 = vmatprep.subr.bf16.mxu0 %v2164_v45  ;;  %v2255_v45 = vld [vmem:[%s3187_s1 + $0x490] ss:$8 sps:$4 sm:$0xff]  }
  0x2f   :  { %1424 = vmatpush1.bf16.msra.mxu1 %v2166_v46  ;;  %v2260_v46 = vld [vmem:[%s3187_s1 + $0x1a4] ss:$8 sps:$4 sm:$0xff]  }
  0x30   :  { %1553 = vmatpush1.bf16.msra.mxu0 %v2167_v47  ;;  %1425 = vmatprep.subr.bf16.mxu1 %v2168_v49  ;;  %v2263_v47 = vld [vmem:[%s3187_s1 + $0x4a4] ss:$8 sps:$4 sm:$0xff]   ;;  %v2261_v49 = vld [vmem:[%s3187_s1 + $0x4a0] ss:$8 sps:$4 sm:$0xff]  }
  0x31   :  { %1554 = vmatprep.subr.bf16.mxu0 %v2170_v50  ;;  %v2266_v50 = vld [vmem:[%s3187_s1 + $0x1b4] ss:$8 sps:$4 sm:$0xff]  }
  0x33   :  { %1426 = vmatpush1.bf16.msra.mxu1 %v2172_v52  ;;  %v2264_v52 = vld [vmem:[%s3187_s1 + $0x1b0] ss:$8 sps:$4 sm:$0xff]  }
  0x34   :  { %1555 = vmatpush1.bf16.msra.mxu0 %v2173_v53  ;;  %1427 = vmatprep.subr.bf16.mxu1 %v2174_v54  ;;  %v2267_v53 = vld [vmem:[%s3187_s1 + $0x4b0] ss:$8 sps:$4 sm:$0xff]   ;;  %v2272_v54 = vld [vmem:[%s3187_s1 + $0x1c4] ss:$8 sps:$4 sm:$0xff]  }
  0x35   :  { %1556 = vmatprep.subr.bf16.mxu0 %v2176_v55  ;;  %v2275_v55 = vld [vmem:[%s3187_s1 + $0x4c4] ss:$8 sps:$4 sm:$0xff]  }
  0x37   :  { %1428 = vmatpush1.bf16.msra.mxu1 %v2178_v56  ;;  %v2270_v56 = vld [vmem:[%s3187_s1 + $0x1c0] ss:$8 sps:$4 sm:$0xff]  }
  0x38   :  { %1557 = vmatpush1.bf16.msra.mxu0 %v2179_v57  ;;  %1429 = vmatprep.subr.bf16.mxu1 %v2180_v58  ;;  %v2273_v57 = vld [vmem:[%s3187_s1 + $0x4c0] ss:$8 sps:$4 sm:$0xff]   ;;  %v2278_v58 = vld [vmem:[%s3187_s1 + $0x1d4] ss:$8 sps:$4 sm:$0xff]  }
  0x39   :  { %1558 = vmatprep.subr.bf16.mxu0 %v2182_v59  ;;  %v2281_v59 = vld [vmem:[%s3187_s1 + $0x4d4] ss:$8 sps:$4 sm:$0xff]  }
  0x3b   :  { %1430 = vmatpush1.bf16.msra.mxu1 %v2184_v60  ;;  %v2276_v60 = vld [vmem:[%s3187_s1 + $0x1d0] ss:$8 sps:$4 sm:$0xff]  }
  0x3c   :  { %1559 = vmatpush1.bf16.msra.mxu0 %v2185_v61  ;;  %1431 = vmatprep.subr.bf16.mxu1 %v2186_v62  ;;  %v2279_v61 = vld [vmem:[%s3187_s1 + $0x4d0] ss:$8 sps:$4 sm:$0xff]   ;;  %v2284_v62 = vld [vmem:[%s3187_s1 + $0x1e4] ss:$8 sps:$4 sm:$0xff]  }
  0x3d   :  { %1560 = vmatprep.subr.bf16.mxu0 %v2188_v63  ;;  %v2287_v63 = vld [vmem:[%s3187_s1 + $0x4e4] ss:$8 sps:$4 sm:$0xff]  }
  0x3f   :  { %1432 = vmatpush1.bf16.msra.mxu1 %v2190_v0  ;;  %v2282_v0 = vld [vmem:[%s3187_s1 + $0x1e0] ss:$8 sps:$4 sm:$0xff]  }
  0x40   :  { %1561 = vmatpush1.bf16.msra.mxu0 %v2191_v1  ;;  %1444 = vmatprep.subr.bf16.mxu1 %v2197_v2  ;;  %v2285_v1 = vld [vmem:[%s3187_s1 + $0x4e0] ss:$8 sps:$4 sm:$0xff]   ;;  %v2290_v2 = vld [vmem:[%s3187_s1 + $0x1f4] ss:$8 sps:$4 sm:$0xff]  }
  0x41   :  { %1573 = vmatprep.subr.bf16.mxu0 %v2203_v3  ;;  %v2293_v3 = vld [vmem:[%s3187_s1 + $0x4f4] ss:$8 sps:$4 sm:$0xff]  }
  0x42   :  { %1434 = vmatmul.mubr.bf16.vlgmr.msra.gmra.mrb[0].mxu1 %v2192_v4  ;;  %v2288_v4 = vld [vmem:[%s3187_s1 + $0x1f0] ss:$8 sps:$4 sm:$0xff]  }
  0x43   :  { %1563 = vmatmul.mubr.bf16.vlgmr.msra.gmra.mrb[0].mxu0 %v2198_v6  ;;  %1445 = vmatpush1.bf16.msra.mxu1 %v2195_v5  ;;  %v2291_v5 = vld [vmem:[%s3187_s1 + $0x4f0] ss:$8 sps:$4 sm:$0xff]   ;;  %v2299_v6 = vld [vmem:[%s3187_s1 + $0x204] ss:$8 sps:$4 sm:$0xff]  }
  0x44   :  { %1574 = vmatpush1.bf16.msra.mxu0 %v2201_v7  ;;  %1446 = vmatprep.subr.bf16.mxu1 %v2206_v8  ;;  %v2305_v7 = vld [vmem:[%s3187_s1 + $0x504] ss:$8 sps:$4 sm:$0xff]   ;;  %v2294_v8 = vld [vmem:[%s3188_s0 + $0x8] ss:$56 sps:$4 sm:$0xff]  }
  0x45   :  { %1575 = vmatprep.subr.bf16.mxu0 %v2209_v9  ;;  %1476 = vmatprep.mubr.bf16.mxu1 %v2296_v34  ;;  %v2297_v9 = vld [vmem:[%s3187_s1 + $0x200] ss:$8 sps:$4 sm:$0xff]   ;;  %v2338_v34 = vld [vmem:[%s3187_s1 + $0x264] ss:$8 sps:$4 sm:$0xff]  }
  0x46   :  { %1605 = vmatprep.mubr.bf16.mxu0 %v2302_v37  ;;  %v2339_v37 = vld [vmem:[%s3187_s1 + $0x560] ss:$8 sps:$4 sm:$0xff]  }
  0x47   :  { %1447 = vmatpush1.bf16.msra.mxu1 %v2204_v10  ;;  %v2300_v10 = vld [vmem:[%s3188_s0 + $0x20] ss:$56 sps:$4 sm:$0xff]  }
  0x48   :  { %1576 = vmatpush1.bf16.msra.mxu0 %v2207_v11  ;;  %1448 = vmatprep.subr.bf16.mxu1 %v2212_v12  ;;  %v2303_v11 = vld [vmem:[%s3187_s1 + $0x500] ss:$8 sps:$4 sm:$0xff]   ;;  %v2308_v12 = vld [vmem:[%s3187_s1 + $0x214] ss:$8 sps:$4 sm:$0xff]  }
  0x49   :  { %1577 = vmatprep.subr.bf16.mxu0 %v2215_v13  ;;  %v2311_v13 = vld [vmem:[%s3187_s1 + $0x514] ss:$8 sps:$4 sm:$0xff]  }
  0x4b   :  { %1449 = vmatpush1.bf16.msra.mxu1 %v2210_v14  ;;  %v2306_v14 = vld [vmem:[%s3187_s1 + $0x210] ss:$8 sps:$4 sm:$0xff]  }
  0x4c   :  { %1578 = vmatpush1.bf16.msra.mxu0 %v2213_v15  ;;  %1450 = vmatprep.subr.bf16.mxu1 %v2218_v16  ;;  %v2309_v15 = vld [vmem:[%s3187_s1 + $0x510] ss:$8 sps:$4 sm:$0xff]   ;;  %v2314_v16 = vld [vmem:[%s3187_s1 + $0x224] ss:$8 sps:$4 sm:$0xff]  }
  0x4d   :  { %1579 = vmatprep.subr.bf16.mxu0 %v2221_v17  ;;  %v2317_v17 = vld [vmem:[%s3187_s1 + $0x524] ss:$8 sps:$4 sm:$0xff]  }
  0x4f   :  { %1451 = vmatpush1.bf16.msra.mxu1 %v2216_v18  ;;  %v2312_v18 = vld [vmem:[%s3187_s1 + $0x220] ss:$8 sps:$4 sm:$0xff]  }
  0x50   :  { %1580 = vmatpush1.bf16.msra.mxu0 %v2219_v19  ;;  %1452 = vmatprep.subr.bf16.mxu1 %v2224_v20  ;;  %v2398_v19 = vld [vmem:[%s3188_s0 + $0x14] ss:$56 sps:$4 sm:$0xff]   ;;  %v2315_v20 = vld [vmem:[%s3187_s1 + $0x520] ss:$8 sps:$4 sm:$0xff]  }
  0x51   :  { %1581 = vmatprep.subr.bf16.mxu0 %v2227_v21  ;;  %v2401_v21 = vld [vmem:[%s3188_s0 + $0x2c] ss:$56 sps:$4 sm:$0xff]  }
  0x53   :  { %1453 = vmatpush1.bf16.msra.mxu1 %v2222_v22  ;;  %v2320_v22 = vld [vmem:[%s3187_s1 + $0x234] ss:$8 sps:$4 sm:$0xff]  }
  0x54   :  { %1582 = vmatpush1.bf16.msra.mxu0 %v2225_v23  ;;  %1454 = vmatprep.subr.bf16.mxu1 %v2230_v24  ;;  %v2323_v23 = vld [vmem:[%s3187_s1 + $0x534] ss:$8 sps:$4 sm:$0xff]   ;;  %v2318_v24 = vld [vmem:[%s3187_s1 + $0x230] ss:$8 sps:$4 sm:$0xff]  }
  0x55   :  { %1583 = vmatprep.subr.bf16.mxu0 %v2233_v25  ;;  %v2321_v25 = vld [vmem:[%s3187_s1 + $0x530] ss:$8 sps:$4 sm:$0xff]  }
  0x57   :  { %1455 = vmatpush1.bf16.msra.mxu1 %v2228_v26  ;;  %v2326_v26 = vld [vmem:[%s3187_s1 + $0x244] ss:$8 sps:$4 sm:$0xff]  }
  0x58   :  { %1584 = vmatpush1.bf16.msra.mxu0 %v2231_v27  ;;  %1456 = vmatprep.subr.bf16.mxu1 %v2236_v28  ;;  %v2329_v27 = vld [vmem:[%s3187_s1 + $0x544] ss:$8 sps:$4 sm:$0xff]   ;;  %v2324_v28 = vld [vmem:[%s3187_s1 + $0x240] ss:$8 sps:$4 sm:$0xff]  }
  0x59   :  { %1585 = vmatprep.subr.bf16.mxu0 %v2239_v29  ;;  %v2327_v29 = vld [vmem:[%s3187_s1 + $0x540] ss:$8 sps:$4 sm:$0xff]  }
  0x5b   :  { %1457 = vmatpush1.bf16.msra.mxu1 %v2234_v30  ;;  %v2332_v30 = vld [vmem:[%s3187_s1 + $0x254] ss:$8 sps:$4 sm:$0xff]  }
  0x5c   :  { %1586 = vmatpush1.bf16.msra.mxu0 %v2237_v31  ;;  %1458 = vmatprep.subr.bf16.mxu1 %v2242_v32  ;;  %v2335_v31 = vld [vmem:[%s3187_s1 + $0x554] ss:$8 sps:$4 sm:$0xff]   ;;  %v2330_v32 = vld [vmem:[%s3187_s1 + $0x250] ss:$8 sps:$4 sm:$0xff]  }
  0x5d   :  { %1587 = vmatprep.subr.bf16.mxu0 %v2245_v33  ;;  %v2333_v33 = vld [vmem:[%s3187_s1 + $0x550] ss:$8 sps:$4 sm:$0xff]  }
  0x5f   :  { %1459 = vmatpush1.bf16.msra.mxu1 %v2240_v35  ;;  %v2341_v35 = vld [vmem:[%s3187_s1 + $0x564] ss:$8 sps:$4 sm:$0xff]  }
  0x60   :  { %1588 = vmatpush1.bf16.msra.mxu0 %v2243_v36  ;;  %1460 = vmatprep.subr.bf16.mxu1 %v2248_v38  ;;  %v2336_v36 = vld [vmem:[%s3187_s1 + $0x260] ss:$8 sps:$4 sm:$0xff]   ;;  %v2344_v38 = vld [vmem:[%s3187_s1 + $0x274] ss:$8 sps:$4 sm:$0xff]  }
  0x61   :  { %1589 = vmatprep.subr.bf16.mxu0 %v2251_v39  ;;  %v2347_v39 = vld [vmem:[%s3187_s1 + $0x574] ss:$8 sps:$4 sm:$0xff]  }
  0x63   :  { %1461 = vmatpush1.bf16.msra.mxu1 %v2246_v40  ;;  %v2342_v40 = vld [vmem:[%s3187_s1 + $0x270] ss:$8 sps:$4 sm:$0xff]  }
  0x64   :  { %1590 = vmatpush1.bf16.msra.mxu0 %v2249_v41  ;;  %1462 = vmatprep.subr.bf16.mxu1 %v2254_v42  ;;  %v2345_v41 = vld [vmem:[%s3187_s1 + $0x570] ss:$8 sps:$4 sm:$0xff]   ;;  %v2350_v42 = vld [vmem:[%s3187_s1 + $0x284] ss:$8 sps:$4 sm:$0xff]  }
  0x65   :  { %1591 = vmatprep.subr.bf16.mxu0 %v2257_v43  ;;  %v2353_v43 = vld [vmem:[%s3187_s1 + $0x584] ss:$8 sps:$4 sm:$0xff]  }
  0x67   :  { %1463 = vmatpush1.bf16.msra.mxu1 %v2252_v44  ;;  %v2348_v44 = vld [vmem:[%s3187_s1 + $0x280] ss:$8 sps:$4 sm:$0xff]  }
  0x68   :  { %1592 = vmatpush1.bf16.msra.mxu0 %v2255_v45  ;;  %1464 = vmatprep.subr.bf16.mxu1 %v2260_v46  ;;  %v2351_v45 = vld [vmem:[%s3187_s1 + $0x580] ss:$8 sps:$4 sm:$0xff]   ;;  %v2356_v46 = vld [vmem:[%s3187_s1 + $0x294] ss:$8 sps:$4 sm:$0xff]  }
  0x69   :  { %1593 = vmatprep.subr.bf16.mxu0 %v2263_v47  ;;  %v2359_v47 = vld [vmem:[%s3187_s1 + $0x594] ss:$8 sps:$4 sm:$0xff]  }
  0x6b   :  { %1465 = vmatpush1.bf16.msra.mxu1 %v2258_v48  ;;  %v2354_v48 = vld [vmem:[%s3187_s1 + $0x290] ss:$8 sps:$4 sm:$0xff]  }
  0x6c   :  { %1594 = vmatpush1.bf16.msra.mxu0 %v2261_v49  ;;  %1466 = vmatprep.subr.bf16.mxu1 %v2266_v50  ;;  %v2357_v49 = vld [vmem:[%s3187_s1 + $0x590] ss:$8 sps:$4 sm:$0xff]   ;;  %v2362_v50 = vld [vmem:[%s3187_s1 + $0x2a4] ss:$8 sps:$4 sm:$0xff]  }
  0x6d   :  { %1595 = vmatprep.subr.bf16.mxu0 %v2269_v51  ;;  %v2365_v51 = vld [vmem:[%s3187_s1 + $0x5a4] ss:$8 sps:$4 sm:$0xff]  }
  0x6f   :  { %1467 = vmatpush1.bf16.msra.mxu1 %v2264_v52  ;;  %v2360_v52 = vld [vmem:[%s3187_s1 + $0x2a0] ss:$8 sps:$4 sm:$0xff]  }
  0x70   :  { %1596 = vmatpush1.bf16.msra.mxu0 %v2267_v53  ;;  %1468 = vmatprep.subr.bf16.mxu1 %v2272_v54  ;;  %v2363_v53 = vld [vmem:[%s3187_s1 + $0x5a0] ss:$8 sps:$4 sm:$0xff]   ;;  %v2368_v54 = vld [vmem:[%s3187_s1 + $0x2b4] ss:$8 sps:$4 sm:$0xff]  }
  0x71   :  { %1597 = vmatprep.subr.bf16.mxu0 %v2275_v55  ;;  %v2371_v55 = vld [vmem:[%s3187_s1 + $0x5b4] ss:$8 sps:$4 sm:$0xff]  }
  0x73   :  { %1469 = vmatpush1.bf16.msra.mxu1 %v2270_v56  ;;  %v2366_v56 = vld [vmem:[%s3187_s1 + $0x2b0] ss:$8 sps:$4 sm:$0xff]  }
  0x74   :  { %1598 = vmatpush1.bf16.msra.mxu0 %v2273_v57  ;;  %1470 = vmatprep.subr.bf16.mxu1 %v2278_v58  ;;  %v2369_v57 = vld [vmem:[%s3187_s1 + $0x5b0] ss:$8 sps:$4 sm:$0xff]   ;;  %v2374_v58 = vld [vmem:[%s3187_s1 + $0x2c4] ss:$8 sps:$4 sm:$0xff]  }
  0x75   :  { %1599 = vmatprep.subr.bf16.mxu0 %v2281_v59  ;;  %v2377_v59 = vld [vmem:[%s3187_s1 + $0x5c4] ss:$8 sps:$4 sm:$0xff]  }
  0x77   :  { %1471 = vmatpush1.bf16.msra.mxu1 %v2276_v60  ;;  %v2372_v60 = vld [vmem:[%s3187_s1 + $0x2c0] ss:$8 sps:$4 sm:$0xff]  }
  0x78   :  { %1600 = vmatpush1.bf16.msra.mxu0 %v2279_v61  ;;  %1472 = vmatprep.subr.bf16.mxu1 %v2284_v62  ;;  %v2375_v61 = vld [vmem:[%s3187_s1 + $0x5c0] ss:$8 sps:$4 sm:$0xff]   ;;  %v2380_v62 = vld [vmem:[%s3187_s1 + $0x2d4] ss:$8 sps:$4 sm:$0xff]  }
  0x79   :  { %1601 = vmatprep.subr.bf16.mxu0 %v2287_v63  ;;  %v2383_v63 = vld [vmem:[%s3187_s1 + $0x5d4] ss:$8 sps:$4 sm:$0xff]  }
  0x7b   :  { %1473 = vmatpush1.bf16.msra.mxu1 %v2282_v0  ;;  %v2378_v0 = vld [vmem:[%s3187_s1 + $0x2d0] ss:$8 sps:$4 sm:$0xff]  }
  0x7c   :  { %1602 = vmatpush1.bf16.msra.mxu0 %v2285_v1  ;;  %1474 = vmatprep.subr.bf16.mxu1 %v2290_v2  ;;  %v2381_v1 = vld [vmem:[%s3187_s1 + $0x5d0] ss:$8 sps:$4 sm:$0xff]   ;;  %v2386_v2 = vld [vmem:[%s3187_s1 + $0x2e4] ss:$8 sps:$4 sm:$0xff]  }
  0x7d   :  { %1603 = vmatprep.subr.bf16.mxu0 %v2293_v3  ;;  %v2389_v3 = vld [vmem:[%s3187_s1 + $0x5e4] ss:$8 sps:$4 sm:$0xff]  }
  0x7f   :  { %1475 = vmatpush1.bf16.msra.mxu1 %v2288_v4  ;;  %v2384_v4 = vld [vmem:[%s3187_s1 + $0x2e0] ss:$8 sps:$4 sm:$0xff]  }
  0x80   :  { %1604 = vmatpush1.bf16.msra.mxu0 %v2291_v5  ;;  %1487 = vmatprep.subr.bf16.mxu1 %v2299_v6  ;;  %v2387_v5 = vld [vmem:[%s3187_s1 + $0x5e0] ss:$8 sps:$4 sm:$0xff]   ;;  %v2392_v6 = vld [vmem:[%s3187_s1 + $0x2f4] ss:$8 sps:$4 sm:$0xff]  }
  0x81   :  { %1616 = vmatprep.subr.bf16.mxu0 %v2305_v7  ;;  %v2395_v7 = vld [vmem:[%s3187_s1 + $0x5f4] ss:$8 sps:$4 sm:$0xff]  }
  0x82   :  { %1477 = vmatmul.mubr.bf16.vlgmr.msra.gmra.mrb[0].mxu1 %v2294_v8  ;;  %v2390_v8 = vld [vmem:[%s3187_s1 + $0x2f0] ss:$8 sps:$4 sm:$0xff]  }
  0x83   :  { %1606 = vmatmul.mubr.bf16.vlgmr.msra.gmra.mrb[0].mxu0 %v2300_v10  ;;  %1488 = vmatpush1.bf16.msra.mxu1 %v2297_v9  ;;  %v2393_v9 = vld [vmem:[%s3187_s1 + $0x5f0] ss:$8 sps:$4 sm:$0xff]   ;;  %v2404_v10 = vld [vmem:[%s3187_s1 + $0x604] ss:$8 sps:$4 sm:$0xff]  }
  0x84   :  { %1617 = vmatpush1.bf16.msra.mxu0 %v2303_v11  ;;  %1489 = vmatprep.subr.bf16.mxu1 %v2308_v12  ;;  %v2396_v11 = vld [vmem:[%s3188_s0 + $0x10] ss:$56 sps:$4 sm:$0xff]  }
  0x85   :  { %1618 = vmatprep.subr.bf16.mxu0 %v2311_v13  ;;  %1519 = vmatprep.mubr.bf16.mxu1 %v2398_v19  ;;  %v2399_v12 = vld [vmem:[%s3188_s0 + $0x28] ss:$56 sps:$4 sm:$0xff]   ;;  %v2413_v19 = vld [vmem:[%s3187_s1 + $0x634] ss:$8 sps:$4 sm:$0xff]  }
  0x86   :  { %1648 = vmatprep.mubr.bf16.mxu0 %v2401_v21  ;;  %v2402_v13 = vld [vmem:[%s3187_s1 + $0x600] ss:$8 sps:$4 sm:$0xff]   ;;  %v2416_v21 = vld [vmem:[%s3187_s1 + $0x644] ss:$8 sps:$4 sm:$0xff]  }
  0x87   :  { %1490 = vmatpush1.bf16.msra.mxu1 %v2306_v14  ;;  %v2438_v14 = vld [vmem:[%s3188_s0 + $0x34] ss:$56 sps:$4 sm:$0xff]  }
  0x88   :  { %1619 = vmatpush1.bf16.msra.mxu0 %v2309_v15  ;;  %1491 = vmatprep.subr.bf16.mxu1 %v2314_v16  ;;  %v2407_v15 = vld [vmem:[%s3187_s1 + $0x614] ss:$8 sps:$4 sm:$0xff]   ;;  %v2405_v16 = vld [vmem:[%s3187_s1 + $0x610] ss:$8 sps:$4 sm:$0xff]  }
  0x89   :  { %1620 = vmatprep.subr.bf16.mxu0 %v2317_v17  ;;  %v2410_v17 = vld [vmem:[%s3187_s1 + $0x624] ss:$8 sps:$4 sm:$0xff]  }
  0x8b   :  { %1492 = vmatpush1.bf16.msra.mxu1 %v2312_v18  ;;  %v2408_v18 = vld [vmem:[%s3187_s1 + $0x620] ss:$8 sps:$4 sm:$0xff]  }
  0x8c   :  { %1621 = vmatpush1.bf16.msra.mxu0 %v2315_v20  ;;  %1493 = vmatprep.subr.bf16.mxu1 %v2320_v22  ;;  %v2411_v20 = vld [vmem:[%s3187_s1 + $0x630] ss:$8 sps:$4 sm:$0xff]   ;;  %v2414_v22 = vld [vmem:[%s3187_s1 + $0x640] ss:$8 sps:$4 sm:$0xff]  }
  0x8d   :  { %1622 = vmatprep.subr.bf16.mxu0 %v2323_v23  ;;  %v2419_v23 = vld [vmem:[%s3187_s1 + $0x654] ss:$8 sps:$4 sm:$0xff]  }
  0x8f   :  { %1494 = vmatpush1.bf16.msra.mxu1 %v2318_v24  ;;  %v2417_v24 = vld [vmem:[%s3187_s1 + $0x650] ss:$8 sps:$4 sm:$0xff]  }
  0x90   :  { %1623 = vmatpush1.bf16.msra.mxu0 %v2321_v25  ;;  %1495 = vmatprep.subr.bf16.mxu1 %v2326_v26  ;;  %v2422_v25 = vld [vmem:[%s3187_s1 + $0x664] ss:$8 sps:$4 sm:$0xff]   ;;  %v2420_v26 = vld [vmem:[%s3187_s1 + $0x660] ss:$8 sps:$4 sm:$0xff]  }
  0x91   :  { %1624 = vmatprep.subr.bf16.mxu0 %v2329_v27  ;;  %v2425_v27 = vld [vmem:[%s3187_s1 + $0x674] ss:$8 sps:$4 sm:$0xff]  }
  0x93   :  { %1496 = vmatpush1.bf16.msra.mxu1 %v2324_v28  ;;  %v2423_v28 = vld [vmem:[%s3187_s1 + $0x670] ss:$8 sps:$4 sm:$0xff]  }
  0x94   :  { %1625 = vmatpush1.bf16.msra.mxu0 %v2327_v29  ;;  %1497 = vmatprep.subr.bf16.mxu1 %v2332_v30  ;;  %v2428_v29 = vld [vmem:[%s3187_s1 + $0x684] ss:$8 sps:$4 sm:$0xff]   ;;  %v2426_v30 = vld [vmem:[%s3187_s1 + $0x680] ss:$8 sps:$4 sm:$0xff]  }
  0x95   :  { %1626 = vmatprep.subr.bf16.mxu0 %v2335_v31  ;;  %v2431_v31 = vld [vmem:[%s3187_s1 + $0x694] ss:$8 sps:$4 sm:$0xff]  }
  0x97   :  { %1498 = vmatpush1.bf16.msra.mxu1 %v2330_v32  ;;  %v2429_v32 = vld [vmem:[%s3187_s1 + $0x690] ss:$8 sps:$4 sm:$0xff]  }
  0x98   :  { %1627 = vmatpush1.bf16.msra.mxu0 %v2333_v33  ;;  %1499 = vmatprep.subr.bf16.mxu1 %v2338_v34  ;;  %v2434_v33 = vld [vmem:[%s3187_s1 + $0x6a4] ss:$8 sps:$4 sm:$0xff]   ;;  %v2432_v34 = vld [vmem:[%s3187_s1 + $0x6a0] ss:$8 sps:$4 sm:$0xff]  }
  0x99   :  { %1628 = vmatprep.subr.bf16.mxu0 %v2341_v35  ;;  %v2437_v35 = vld [vmem:[%s3187_s1 + $0x6b4] ss:$8 sps:$4 sm:$0xff]  }
  0x9b   :  { %1500 = vmatpush1.bf16.msra.mxu1 %v2336_v36  ;;  %v2435_v36 = vld [vmem:[%s3187_s1 + $0x6b0] ss:$8 sps:$4 sm:$0xff]  }
  0x9c   :  { %1629 = vmatpush1.bf16.msra.mxu0 %v2339_v37  ;;  %1501 = vmatprep.subr.bf16.mxu1 %v2344_v38  ;;  %v2440_v37 = vld [vmem:[%s3188_s0 + $0x30] ss:$56 sps:$4 sm:$0xff]  }
  0x9d   :  { %1630 = vmatprep.subr.bf16.mxu0 %v2347_v39 }
  0x9f   :  { %1502 = vmatpush1.bf16.msra.mxu1 %v2342_v40 }
  0xa0   :  { %1631 = vmatpush1.bf16.msra.mxu0 %v2345_v41  ;;  %1503 = vmatprep.subr.bf16.mxu1 %v2350_v42 }
  0xa1   :  { %1632 = vmatprep.subr.bf16.mxu0 %v2353_v43 }
  0xa3   :  { %1504 = vmatpush1.bf16.msra.mxu1 %v2348_v44 }
  0xa4   :  { %1633 = vmatpush1.bf16.msra.mxu0 %v2351_v45  ;;  %1505 = vmatprep.subr.bf16.mxu1 %v2356_v46 }
  0xa5   :  { %1634 = vmatprep.subr.bf16.mxu0 %v2359_v47 }
  0xa7   :  { %1506 = vmatpush1.bf16.msra.mxu1 %v2354_v48 }
  0xa8   :  { %1635 = vmatpush1.bf16.msra.mxu0 %v2357_v49  ;;  %1507 = vmatprep.subr.bf16.mxu1 %v2362_v50 }
  0xa9   :  { %1636 = vmatprep.subr.bf16.mxu0 %v2365_v51 }
  0xab   :  { %1508 = vmatpush1.bf16.msra.mxu1 %v2360_v52 }
  0xac   :  { %1637 = vmatpush1.bf16.msra.mxu0 %v2363_v53  ;;  %1509 = vmatprep.subr.bf16.mxu1 %v2368_v54 }
  0xad   :  { %1638 = vmatprep.subr.bf16.mxu0 %v2371_v55 }
  0xaf   :  { %1510 = vmatpush1.bf16.msra.mxu1 %v2366_v56 }
  0xb0   :  { %1639 = vmatpush1.bf16.msra.mxu0 %v2369_v57  ;;  %1511 = vmatprep.subr.bf16.mxu1 %v2374_v58 }
  0xb1   :  { %1640 = vmatprep.subr.bf16.mxu0 %v2377_v59 }
  0xb3   :  { %1512 = vmatpush1.bf16.msra.mxu1 %v2372_v60 }
  0xb4   :  { %1641 = vmatpush1.bf16.msra.mxu0 %v2375_v61  ;;  %1513 = vmatprep.subr.bf16.mxu1 %v2380_v62 }
  0xb5   :  { %1642 = vmatprep.subr.bf16.mxu0 %v2383_v63 }
  0xb7   :  { %1514 = vmatpush1.bf16.msra.mxu1 %v2378_v0 }
  0xb8   :  { %1643 = vmatpush1.bf16.msra.mxu0 %v2381_v1  ;;  %1515 = vmatprep.subr.bf16.mxu1 %v2386_v2 }
  0xb9   :  { %1644 = vmatprep.subr.bf16.mxu0 %v2389_v3 }
  0xbb   :  { %1516 = vmatpush1.bf16.msra.mxu1 %v2384_v4 }
  0xbc   :  { %1645 = vmatpush1.bf16.msra.mxu0 %v2387_v5  ;;  %1517 = vmatprep.subr.bf16.mxu1 %v2392_v6 }
  0xbd   :  { %1646 = vmatprep.subr.bf16.mxu0 %v2395_v7 }
  0xbf   :  { %1518 = vmatpush1.bf16.msra.mxu1 %v2390_v8 }
  0xc0   :  { %1647 = vmatpush1.bf16.msra.mxu0 %v2393_v9 }
  0xc1   :  { %1659 = vmatprep.subr.bf16.mxu0 %v2404_v10 }
  0xc2   :  { %1520 = vmatmul.mubr.bf16.vlgmr.msra.gmra.mrb[0].mxu1 %v2396_v11 }
  0xc3   :  { %1649 = vmatmul.mubr.bf16.vlgmr.msra.gmra.mrb[0].mxu0 %v2399_v12 }
  0xc4   :  { %1660 = vmatpush1.bf16.msra.mxu0 %v2402_v13  ;;  %2068 = vmatprep.mubr.msk.bf16.mxu0 %vm1397_vm0, %v2438_v14 }
  0xc5   :  { %1661 = vmatprep.subr.bf16.mxu0 %v2407_v15 }
  0xc8   :  { %1662 = vmatpush1.bf16.msra.mxu0 %v2405_v16 }
  0xc9   :  { %1663 = vmatprep.subr.bf16.mxu0 %v2410_v17 }
  0xcc   :  { %1664 = vmatpush1.bf16.msra.mxu0 %v2408_v18 }
  0xcd   :  { %1665 = vmatprep.subr.bf16.mxu0 %v2413_v19 }
  0xd0   :  { %1666 = vmatpush1.bf16.msra.mxu0 %v2411_v20 }
  0xd1   :  { %1667 = vmatprep.subr.bf16.mxu0 %v2416_v21 }
  0xd4   :  { %1668 = vmatpush1.bf16.msra.mxu0 %v2414_v22 }
  0xd5   :  { %1669 = vmatprep.subr.bf16.mxu0 %v2419_v23 }
  0xd8   :  { %1670 = vmatpush1.bf16.msra.mxu0 %v2417_v24 }
  0xd9   :  { %1671 = vmatprep.subr.bf16.mxu0 %v2422_v25 }
  0xdc   :  { %1672 = vmatpush1.bf16.msra.mxu0 %v2420_v26 }
  0xdd   :  { %1673 = vmatprep.subr.bf16.mxu0 %v2425_v27 }
  0xe0   :  { %1674 = vmatpush1.bf16.msra.mxu0 %v2423_v28 }
  0xe1   :  { %1675 = vmatprep.subr.bf16.mxu0 %v2428_v29 }
  0xe4   :  { %1676 = vmatpush1.bf16.msra.mxu0 %v2426_v30 }
  0xe5   :  { %1677 = vmatprep.subr.bf16.mxu0 %v2431_v31 }
  0xe8   :  { %1678 = vmatpush1.bf16.msra.mxu0 %v2429_v32 }
  0xe9   :  { %1679 = vmatprep.subr.bf16.mxu0 %v2434_v33 }
  0xec   :  { %1680 = vmatpush1.bf16.msra.mxu0 %v2432_v34  ;;  %v2445_v34 = vmov 1966171168  }
  0xed   :  { %1681 = vmatprep.subr.bf16.mxu0 %v2437_v35  ;;  %v1757_v35 = vunpack.c.l.s4 %v2445_v34 }
  0xf0   :  { %1682 = vmatpush1.bf16.msra.mxu0 %v2435_v36  ;;  %v1759_v36 = vlaneseq }
  0xf3   :  { %1692 = vmatmul.mubr.bf16.vlgmr.msra.gmra.mrb[0].mxu0 %v2440_v37  ;;  %v1758_v37 = vunpack.c.0.s8 %v1757_v35 }
 0x195   :  { %v1521_v38 = vpop.f32.mrb[0].mxu1 }
 0x196   :  { %v1523_v39 = vpop.f32.mrb[1].mxu1 }
 0x197   :  { %v1525_v40 = vpop.f32.mrb[2].mxu1 }
 0x198   :  { %v1527_v41 = vpop.f32.mrb[3].mxu1 }
 0x1c6   :  { %v1693_v42 = vpop.f32.mrb[0].mxu0 }
 0x1c7   :  { %v3162_v43 = vadd.f32 %v1693_v42, %v1521_v38  ;;  %v1695_v44 = vpop.f32.mrb[1].mxu0  ;;  %v1760_v38 = vshrl.u32 %v1759_v36, 7 }
 0x1c8   :  { %v3164_v45 = vadd.f32 %v1695_v44, %v1523_v39  ;;  %v1697_v46 = vpop.f32.mrb[2].mxu0 }
 0x1c9   :  { %v2073_v47 = vadd.f32 %v1697_v46, %v1525_v40  ;;  %v1699_v48 = vpop.f32.mrb[3].mxu0  ;;  %v1720_v51 = vmul.f32 %v3162_v43, %v3162_v43  ;;  %v1761_v40 = vsub.s32 %v1758_v37, %v1760_v38  ;;  %v1748_v46 = vld [vmem:[%s3189_s2] sm:$0x3] }
 0x1ca   :  { %v1721_v49 = vmul.f32 %v3164_v45, %v3164_v45  ;;  %v2074_v50 = vadd.f32 %v1699_v48, %v1527_v41  ;;  %v1709_v54 = vsel %vm1397_vm0, %v3164_v45, 0.0  ;;  %v1776_v48 = vsub.s32 0, %v1760_v38 }
 0x1cb   :  { %v1702_v52 = vadd.f32 %v2073_v47, %v3162_v43  ;;  %v1722_v53 = vmul.f32 %v2073_v47, %v2073_v47 }
 0x1cc   :  { %v1710_v55 = vsel %vm1397_vm0, %v2074_v50, 0.0  ;;  %v1723_v56 = vmul.f32 %v2074_v50, %v2074_v50  ;;  %v1731_v60 = vsel %vm1397_vm0, %v1721_v49, 0.0  ;;  %v1780_v49 = vsub.s32 1, %v1760_v38 }
 0x1cd   :  { %v1703_v57 = vrot.slane %v1702_v52, 4  ;;  %v1724_v58 = vadd.f32 %v1722_v53, %v1720_v51  ;;  %v1711_v59 = vadd.f32 %v1710_v55, %v1709_v54 }
 0x1ce   :  { %v1732_v61 = vsel %vm1397_vm0, %v1723_v56, 0.0 }
 0x1cf   :  { %v1704_v62 = vadd.f32 %v1703_v57, %v1702_v52  ;;  %v1725_v63 = vrot.slane %v1724_v58, 4  ;;  %v1712_v0 = vrot.slane %v1711_v59, 4  ;;  %v1733_v1 = vadd.f32 %v1732_v61, %v1731_v60 }
 0x1d1   :  { %v1705_v2 = vrot.slane %v1704_v62, 2  ;;  %v1726_v3 = vadd.f32 %v1725_v63, %v1724_v58  ;;  %v1713_v4 = vadd.f32 %v1712_v0, %v1711_v59  ;;  %v1734_v5 = vrot.slane %v1733_v1, 4  ;;  %v1772_v59 = vld [vmem:[%s3190_s3] sm:$0x3] }
 0x1d3   :  { %v1706_v6 = vadd.f32 %v1705_v2, %v1704_v62  ;;  %v1727_v7 = vrot.slane %v1726_v3, 2  ;;  %v1714_v8 = vrot.slane %v1713_v4, 2  ;;  %v1735_v9 = vadd.f32 %v1734_v5, %v1733_v1 }
 0x1d5   :  { %v1707_v10 = vrot.slane %v1706_v6, 1  ;;  %v1728_v11 = vadd.f32 %v1727_v7, %v1726_v3  ;;  %v1715_v12 = vadd.f32 %v1714_v8, %v1713_v4  ;;  %v1736_v13 = vrot.slane %v1735_v9, 2 }
 0x1d7   :  { %v1708_v14 = vadd.f32 %v1707_v10, %v1706_v6  ;;  %v1729_v15 = vrot.slane %v1728_v11, 1  ;;  %v1716_v16 = vrot.slane %v1715_v12, 1  ;;  %v1737_v17 = vadd.f32 %v1736_v13, %v1735_v9 }
 0x1d9   :  { %v1718_v18 = vmul.f32 0.125, %v1708_v14  ;;  %v1730_v19 = vadd.f32 %v1729_v15, %v1728_v11  ;;  %v1717_v20 = vadd.f32 %v1716_v16, %v1715_v12  ;;  %v1738_v21 = vrot.slane %v1737_v17, 1 }
 0x1db   :  { %v1740_v22 = vmul.f32 0.125, %v1730_v19  ;;  %v1742_v23 = vmul.f32 %v1718_v18, %v1718_v18  ;;  %v1719_v24 = vmul.f32 0.125, %v1717_v20  ;;  %v1739_v25 = vadd.f32 %v1738_v21, %v1737_v17 }
 0x1dd   :  { %v1744_v26 = vsub.f32 %v1740_v22, %v1742_v23  ;;  %v1741_v27 = vmul.f32 0.125, %v1739_v25  ;;  %v1743_v28 = vmul.f32 %v1719_v24, %v1719_v24 }
 0x1df   :  { %v1746_v29 = vmax.f32 %v1744_v26, 0.0  ;;  %v1745_v30 = vsub.f32 %v1741_v27, %v1743_v28 }
 0x1e1   :  { %v1749_v31 = vadd.f32 1e-05, %v1746_v29  ;;  %v1747_v32 = vmax.f32 %v1745_v30, 0.0 }
 0x1e3   :  { %v1750_v33 = vadd.f32 1e-05, %v1747_v32  ;;  %2441 = vrsqrt.f32 %v1749_v31 }
 0x1e5   :  { %2443 = vrsqrt.f32 %v1750_v33 }
 0x1ed   :  { %v2442_v39 = vpop.eup %2441 }
 0x1ef   :  { %v2444_v41 = vpop.eup %2443 }
 0x1f0   :  { %v1755_v42 = vcombine.low %v2442_v39, %v2444_v41 }
 0x1f2   :  { %v1762_v44 = vrot.slane %v1755_v42, %v1761_v40 }
 0x1f4   :  { %v1769_v47 = vrot.slane %v1762_v44, %v1761_v40 }
 0x1f6   :  { %v1771_v50 = vmul.f32 %v1769_v47, %v1748_v46 }
 0x1f8   :  { %v1777_v51 = vrot.slane %v1771_v50, %v1776_v48  ;;  %v1781_v52 = vrot.slane %v1771_v50, %v1780_v49 }
 0x1fa   :  { %v1784_v53 = vmul.f32 %v1777_v51, %v1718_v18  ;;  %v1785_v54 = vmul.f32 %v1781_v52, %v1719_v24  ;;  %v1805_v55 = vmul.f32 %v3162_v43, %v1777_v51  ;;  %v1806_v56 = vmul.f32 %v3164_v45, %v1781_v52 }
 0x1fc   :  { %v1788_v57 = vcombine.low %v1784_v53, %v1785_v54 }
 0x1fe   :  { %v1795_v58 = vrot.slane %v1788_v57, %v1761_v40 }
 0x200   :  { %v1802_v60 = vrot.slane %v1795_v58, %v1761_v40 }
 0x202   :  { %v1804_v61 = vsub.f32 %v1772_v59, %v1802_v60 }
 0x204   :  { %v1811_v62 = vrot.slane %v1804_v61, %v1776_v48  ;;  %v1815_v63 = vrot.slane %v1804_v61, %v1780_v49 }
 0x206   :  { %v1818_v0 = vadd.f32 %v1811_v62, %v1805_v55  ;;  %v1819_v1 = vadd.f32 %v1815_v63, %v1806_v56 }
 0x208   :  { %v1820_v2 = vmax.f32 %v1818_v0, 0.0  ;;  %v1821_v3 = vmax.f32 %v1819_v1, 0.0 }
 0x20a   :  { %v2070_v43 = vpack.c.bf16 %v1821_v3, %v1820_v2 }
 0x20c   :  { %1833 = vst.msk [vmem:[%s3191_s4] sm:$0xff] %vm1832_vm3, %v2070_v43 }

</bundles_post_ra>
